<compile_context>
chip_gen: v5e
topology: v5e:2x2
jax: 0.10.0
libtpu: 0.0.40
codegen_flags: <defaults>
</compile_context>

<pallas_src>
import jax
import jax.numpy as jnp
from jax.experimental import pallas as pl
from jax.experimental.pallas import tpu as pltpu

# ---- config (module defaults shrunk; meta_cond=False, use_proto=False) -------
BATCH = 256            # total rows pushed through the kernel
TB = 256               # batch tile per grid step; BATCH -> grid=(1,) (v5e/v6e).
                       # On v7x use TB = BATCH // 2 to split across the two TCs.
IN_DIMS = 128          # in_dims
ENC_HID = 512          # encoder hidden width (hardcoded 512 in the module)
HID1 = 32              # hid1_dims (latent)
IN_DEC = 128           # in_dec (decoder width / output width)
HEAD_N = 128           # fused + lane-padded mu|logvar head width (>= 2*HID1)
OUT_W = IN_DEC + HEAD_N  # merged output slab width (y | mu|logvar|pad)
NEG_SLOPE = 0.1

assert BATCH % TB == 0 and 2 * HID1 <= HEAD_N

# static offsets into the concatenated bias slab (all lane-aligned)
EB1_OFF = 0
EB2_OFF = EB1_OFF + ENC_HID
MVB_OFF = EB2_OFF + ENC_HID
DB1_OFF = MVB_OFF + HEAD_N
DB2_OFF = DB1_OFF + IN_DEC
BIAS_W = DB2_OFF + IN_DEC          # 1408


def _leaky_relu(v):
    return jnp.where(v >= 0, v, NEG_SLOPE * v)


def vaegt_kernel(x_ref, eps_ref, b_ref,
                 ew1_ref, ew2_ref, mvw_ref, dw1_ref, dw2_ref,
                 out_ref):
    x_bf = x_ref[...]                                   # (TB, IN_DIMS) bf16 (pre-cast)

    # bias slices (static, lane-aligned offsets into the (1, 1408) slab)
    eb1 = b_ref[:, EB1_OFF:EB1_OFF + ENC_HID]
    eb2 = b_ref[:, EB2_OFF:EB2_OFF + ENC_HID]
    mvb = b_ref[:, MVB_OFF:MVB_OFF + HEAD_N]
    db1 = b_ref[:, DB1_OFF:DB1_OFF + IN_DEC]
    db2 = b_ref[:, DB2_OFF:DB2_OFF + IN_DEC]

    # encoder: Linear -> LeakyReLU -> Linear -> LeakyReLU (bf16 weights, f32 accum)
    h = _leaky_relu(
        jnp.dot(x_bf, ew1_ref[...], preferred_element_type=jnp.float32) + eb1)
    h = _leaky_relu(
        jnp.dot(h.astype(jnp.bfloat16), ew2_ref[...],
                preferred_element_type=jnp.float32) + eb2)

    # fused heads: single (512, 128) matmul; cols [0:32)=mu, [32:64)=logvar, rest 0
    head = (jnp.dot(h.astype(jnp.bfloat16), mvw_ref[...],
                    preferred_element_type=jnp.float32) + mvb)
    mu = head[:, :HID1]
    logvar = head[:, HID1:2 * HID1]

    # reparameterize: hx = mu + exp(0.5 * logvar) * eps
    hx = mu + jnp.exp(0.5 * logvar) * eps_ref[...]

    # decoder layer1 on concat([hx, x]) as ONE K=256 matmul:
    #   LHS lanes 0:32 = hx, 32:128 = 0, 128:256 = x_bf
    #   dw1 rows  0:32 = Wd1[:hid1], 32:128 = 0, 128:256 = Wd1[hid1:]  (exact)
    rows = x_bf.shape[0]
    hx_pad = jnp.concatenate(
        [hx.astype(jnp.bfloat16),
         jnp.zeros((rows, IN_DIMS - HID1), jnp.bfloat16)], axis=1)     # (TB, 128)
    lhs = jnp.concatenate([hx_pad, x_bf], axis=1)                       # (TB, 256)
    d = _leaky_relu(
        jnp.dot(lhs, dw1_ref[...], preferred_element_type=jnp.float32) + db1)

    # decoder layer2 + sigmoid
    d = (jnp.dot(d.astype(jnp.bfloat16), dw2_ref[...],
                 preferred_element_type=jnp.float32) + db2)

    # one lane-dense output slab: [ y (128 lanes) | head (128 lanes) ]
    out_ref[...] = jnp.concatenate([jax.nn.sigmoid(d), head], axis=1)


def _resident(shape):
    # Weights/biases: constant block index across the grid -> DMA'd once, stay
    # resident in VMEM for all batch tiles.
    return pl.BlockSpec(shape, lambda i: tuple(0 for _ in shape))


@jax.jit
def vaegt_forward(x, eps, params):
    (ew1, ew2, mvw, dw1, dw2, bias) = params

    # x is only ever consumed as bf16; cast once outside the kernel so the
    # streamed input DMA is half-width.
    x_bf = x.astype(jnp.bfloat16)

    flops = 2 * BATCH * (IN_DIMS * ENC_HID + ENC_HID * ENC_HID
                         + ENC_HID * HEAD_N
                         + (2 * IN_DIMS) * IN_DEC          # fused decoder layer1
                         + IN_DEC * IN_DEC)
    transcendentals = BATCH * (HID1 + IN_DEC)              # exp in reparam + sigmoid
    param_bytes = sum(int(p.size) * p.dtype.itemsize for p in params)
    bytes_accessed = (param_bytes
                      + x_bf.size * 2                       # bf16 x
                      + eps.size * 4
                      + BATCH * OUT_W * 4)                  # merged output slab

    out = pl.pallas_call(
        vaegt_kernel,
        out_shape=jax.ShapeDtypeStruct((BATCH, OUT_W), jnp.float32),
        grid=(BATCH // TB,),
        in_specs=[
            pl.BlockSpec((TB, IN_DIMS), lambda i: (i, 0)),   # x (bf16): streamed
            pl.BlockSpec((TB, HID1), lambda i: (i, 0)),      # eps (f32): streamed
            _resident(bias.shape),                           # fused bias slab
            _resident(ew1.shape), _resident(ew2.shape),
            _resident(mvw.shape), _resident(dw1.shape), _resident(dw2.shape),
        ],
        out_specs=pl.BlockSpec((TB, OUT_W), lambda i: (i, 0)),
        compiler_params=pltpu.CompilerParams(
            dimension_semantics=("parallel",)),
        cost_estimate=pl.CostEstimate(flops=flops,
                                      transcendentals=transcendentals,
                                      bytes_accessed=bytes_accessed),
    )(x_bf, eps, bias, ew1, ew2, mvw, dw1, dw2)

    y = out[:, :IN_DEC]
    mu = out[:, IN_DEC:IN_DEC + HID1]
    logvar = out[:, IN_DEC + HID1:IN_DEC + 2 * HID1]
    return y, mu, logvar


def init_params(key):
    """Matches _init_weights: weights ~ N(0, 0.01), biases zero.
    Weights stored (in_features, out_features) in bfloat16; biases f32,
    concatenated into one (1, 1408) slab (eb1|eb2|mvb|db1|db2)."""
    ks = jax.random.split(key, 7)

    def w(k, shape):
        return (0.01 * jax.random.normal(k, shape)).astype(jnp.bfloat16)

    ew1 = w(ks[0], (IN_DIMS, ENC_HID))
    ew2 = w(ks[1], (ENC_HID, ENC_HID))

    # fused heads fc_mu | fc_var, zero-padded to HEAD_N lanes
    mw = w(ks[2], (ENC_HID, HID1))
    vw = w(ks[3], (ENC_HID, HID1))
    mvw = jnp.zeros((ENC_HID, HEAD_N), jnp.bfloat16).at[:, :2 * HID1].set(
        jnp.concatenate([mw, vw], axis=1))

    # decoder layer1 weight (hid1+in_dims, in_dec) embedded in a (256, 128)
    # matrix: rows 0:32 = hx part, rows 32:128 = 0, rows 128:256 = x part.
    dw1a = w(ks[4], (HID1, IN_DEC))
    dw1b = w(ks[5], (IN_DIMS, IN_DEC))
    dw1 = (jnp.zeros((2 * IN_DIMS, IN_DEC), jnp.bfloat16)
           .at[:HID1, :].set(dw1a)
           .at[IN_DIMS:, :].set(dw1b))

    dw2 = w(ks[6], (IN_DEC, IN_DEC))

    bias = jnp.zeros((1, BIAS_W), jnp.float32)   # all Linear biases init to zero
    return (ew1, ew2, mvw, dw1, dw2, bias)


def reference_forward(x, eps, params):
    """Pure-JAX reference with identical numerics (bf16 weights, f32 accumulation)."""
    (ew1, ew2, mvw, dw1, dw2, bias) = params
    eb1 = bias[:, EB1_OFF:EB1_OFF + ENC_HID]
    eb2 = bias[:, EB2_OFF:EB2_OFF + ENC_HID]
    mvb = bias[:, MVB_OFF:MVB_OFF + HEAD_N]
    db1 = bias[:, DB1_OFF:DB1_OFF + IN_DEC]
    db2 = bias[:, DB2_OFF:DB2_OFF + IN_DEC]

    leaky = lambda v: jnp.where(v >= 0, v, NEG_SLOPE * v)
    dot = lambda a, b: jnp.dot(a.astype(jnp.bfloat16), b,
                               preferred_element_type=jnp.float32)
    x_bf = x.astype(jnp.bfloat16)
    h = leaky(dot(x_bf, ew1) + eb1)
    h = leaky(dot(h, ew2) + eb2)
    head = dot(h, mvw) + mvb
    mu = head[:, :HID1]
    logvar = head[:, HID1:2 * HID1]
    hx = mu + jnp.exp(0.5 * logvar) * eps
    d = leaky(dot(hx, dw1[:HID1]) + dot(x_bf, dw1[IN_DIMS:]) + db1)
    y = jax.nn.sigmoid(dot(d, dw2) + db2)
    return y, mu, logvar


if __name__ == "__main__":
    key = jax.random.PRNGKey(0)
    k_x, k_eps, k_p = jax.random.split(key, 3)

    x = jax.random.normal(k_x, (BATCH, IN_DIMS), dtype=jnp.float32)
    # z (prototype conditioner input) is unused when meta_cond=False, use_proto=False;
    # eps is the reparameterization noise (torch.randn in _reparameterize).
    eps = jax.random.normal(k_eps, (BATCH, HID1), dtype=jnp.float32)
    params = init_params(k_p)

    y, mu, logvar = vaegt_forward(x, eps, params)
    jax.block_until_ready((y, mu, logvar))

    y_ref, mu_ref, lv_ref = reference_forward(x, eps, params)
    assert jnp.allclose(y, y_ref, atol=1e-4, rtol=1e-3)
    assert jnp.allclose(mu, mu_ref, atol=1e-4, rtol=1e-3)
    assert jnp.allclose(logvar, lv_ref, atol=1e-4, rtol=1e-3)

    print("KERNEL_OK")
</pallas_src>

<mosaic_0001>
module attributes {stable_mosaic.version = 11 : i64} {
  func.func @vaegt_kernel(%arg0: i32, %arg1: memref<256x128xbf16, #tpu.memory_space<vmem>>, %arg2: memref<256x32xf32, #tpu.memory_space<vmem>>, %arg3: memref<1x1408xf32, #tpu.memory_space<vmem>>, %arg4: memref<128x512xbf16, #tpu.memory_space<vmem>>, %arg5: memref<512x512xbf16, #tpu.memory_space<vmem>>, %arg6: memref<512x128xbf16, #tpu.memory_space<vmem>>, %arg7: memref<256x128xbf16, #tpu.memory_space<vmem>>, %arg8: memref<128x128xbf16, #tpu.memory_space<vmem>>, %arg9: memref<256x256xf32, #tpu.memory_space<vmem>>) attributes {dimension_semantics = [#tpu.dimension_semantics<parallel>], iteration_bounds = array<i64: 1>, scalar_prefetch = 0 : i64, scratch_operands = 0 : i64, tpu.core_type = #tpu.core_type<tc>, window_params = [{transform_indices = @transform_0, window_bounds = array<i64: 256, 128>}, {transform_indices = @transform_1, window_bounds = array<i64: 256, 32>}, {pipeline_mode = #tpu.pipeline_mode<synchronous>, transform_indices = @transform_2, window_bounds = array<i64: 1, 1408>}, {pipeline_mode = #tpu.pipeline_mode<synchronous>, transform_indices = @transform_3, window_bounds = array<i64: 128, 512>}, {pipeline_mode = #tpu.pipeline_mode<synchronous>, transform_indices = @transform_4, window_bounds = array<i64: 512, 512>}, {pipeline_mode = #tpu.pipeline_mode<synchronous>, transform_indices = @transform_5, window_bounds = array<i64: 512, 128>}, {pipeline_mode = #tpu.pipeline_mode<synchronous>, transform_indices = @transform_6, window_bounds = array<i64: 256, 128>}, {pipeline_mode = #tpu.pipeline_mode<synchronous>, transform_indices = @transform_7, window_bounds = array<i64: 128, 128>}, {transform_indices = @transform_8, window_bounds = array<i64: 256, 256>}]} {
    %c0 = arith.constant 0 : index
    %c0_0 = arith.constant 0 : index
    %0 = vector.load %arg1[%c0, %c0_0] : memref<256x128xbf16, #tpu.memory_space<vmem>>, vector<256x128xbf16>
    %c0_1 = arith.constant 0 : index
    %c0_2 = arith.constant 0 : index
    %1 = vector.load %arg3[%c0_1, %c0_2] : memref<1x1408xf32, #tpu.memory_space<vmem>>, vector<1x512xf32>
    %c0_3 = arith.constant 0 : index
    %c512 = arith.constant 512 : index
    %2 = vector.load %arg3[%c0_3, %c512] : memref<1x1408xf32, #tpu.memory_space<vmem>>, vector<1x512xf32>
    %c0_4 = arith.constant 0 : index
    %c1024 = arith.constant 1024 : index
    %3 = vector.load %arg3[%c0_4, %c1024] : memref<1x1408xf32, #tpu.memory_space<vmem>>, vector<1x128xf32>
    %c0_5 = arith.constant 0 : index
    %c1152 = arith.constant 1152 : index
    %4 = vector.load %arg3[%c0_5, %c1152] : memref<1x1408xf32, #tpu.memory_space<vmem>>, vector<1x128xf32>
    %c0_6 = arith.constant 0 : index
    %c1280 = arith.constant 1280 : index
    %5 = vector.load %arg3[%c0_6, %c1280] : memref<1x1408xf32, #tpu.memory_space<vmem>>, vector<1x128xf32>
    %c0_7 = arith.constant 0 : index
    %c0_8 = arith.constant 0 : index
    %6 = vector.load %arg4[%c0_7, %c0_8] : memref<128x512xbf16, #tpu.memory_space<vmem>>, vector<128x512xbf16>
    %cst = arith.constant dense<0.000000e+00> : vector<256x512xf32>
    %7 = tpu.matmul %0, %6, %cst {dimension_numbers = #tpu.dot_dimension_numbers<[1], [0], [0], [1], [0, 0, 1, 1], [], []>} : vector<256x128xbf16>, vector<128x512xbf16>, vector<256x512xf32> -> vector<256x512xf32>
    %8 = vector.broadcast %1 : vector<1x512xf32> to vector<256x512xf32>
    %9 = arith.addf %7, %8 : vector<256x512xf32>
    %cst_9 = arith.constant 0.000000e+00 : f32
    %10 = vector.broadcast %cst_9 : f32 to vector<256x512xf32>
    %11 = arith.cmpf oge, %9, %10 : vector<256x512xf32>
    %cst_10 = arith.constant 1.000000e-01 : f32
    %12 = vector.broadcast %cst_10 : f32 to vector<256x512xf32>
    %13 = arith.mulf %12, %9 : vector<256x512xf32>
    %14 = arith.select %11, %9, %13 : vector<256x512xi1>, vector<256x512xf32>
    %15 = arith.truncf %14 : vector<256x512xf32> to vector<256x512xbf16>
    %c0_11 = arith.constant 0 : index
    %c0_12 = arith.constant 0 : index
    %16 = vector.load %arg5[%c0_11, %c0_12] : memref<512x512xbf16, #tpu.memory_space<vmem>>, vector<512x512xbf16>
    %cst_13 = arith.constant dense<0.000000e+00> : vector<256x512xf32>
    %17 = tpu.matmul %15, %16, %cst_13 {dimension_numbers = #tpu.dot_dimension_numbers<[1], [0], [0], [1], [0, 0, 1, 1], [], []>} : vector<256x512xbf16>, vector<512x512xbf16>, vector<256x512xf32> -> vector<256x512xf32>
    %18 = vector.broadcast %2 : vector<1x512xf32> to vector<256x512xf32>
    %19 = arith.addf %17, %18 : vector<256x512xf32>
    %cst_14 = arith.constant 0.000000e+00 : f32
    %20 = vector.broadcast %cst_14 : f32 to vector<256x512xf32>
    %21 = arith.cmpf oge, %19, %20 : vector<256x512xf32>
    %cst_15 = arith.constant 1.000000e-01 : f32
    %22 = vector.broadcast %cst_15 : f32 to vector<256x512xf32>
    %23 = arith.mulf %22, %19 : vector<256x512xf32>
    %24 = arith.select %21, %19, %23 : vector<256x512xi1>, vector<256x512xf32>
    %25 = arith.truncf %24 : vector<256x512xf32> to vector<256x512xbf16>
    %c0_16 = arith.constant 0 : index
    %c0_17 = arith.constant 0 : index
    %26 = vector.load %arg6[%c0_16, %c0_17] : memref<512x128xbf16, #tpu.memory_space<vmem>>, vector<512x128xbf16>
    %cst_18 = arith.constant dense<0.000000e+00> : vector<256x128xf32>
    %27 = tpu.matmul %25, %26, %cst_18 {dimension_numbers = #tpu.dot_dimension_numbers<[1], [0], [0], [1], [0, 0, 1, 1], [], []>} : vector<256x512xbf16>, vector<512x128xbf16>, vector<256x128xf32> -> vector<256x128xf32>
    %28 = vector.broadcast %3 : vector<1x128xf32> to vector<256x128xf32>
    %29 = arith.addf %27, %28 : vector<256x128xf32>
    %30 = vector.extract_strided_slice %29 {offsets = [0, 0], sizes = [256, 32], strides = [1, 1]} : vector<256x128xf32> to vector<256x32xf32>
    %31 = vector.extract_strided_slice %29 {offsets = [0, 32], sizes = [256, 32], strides = [1, 1]} : vector<256x128xf32> to vector<256x32xf32>
    %cst_19 = arith.constant 5.000000e-01 : f32
    %32 = vector.broadcast %cst_19 : f32 to vector<256x32xf32>
    %33 = arith.mulf %32, %31 : vector<256x32xf32>
    %34 = math.exp %33 : vector<256x32xf32>
    %c0_20 = arith.constant 0 : index
    %c0_21 = arith.constant 0 : index
    %35 = vector.load %arg2[%c0_20, %c0_21] : memref<256x32xf32, #tpu.memory_space<vmem>>, vector<256x32xf32>
    %36 = arith.mulf %34, %35 : vector<256x32xf32>
    %37 = arith.addf %30, %36 : vector<256x32xf32>
    %38 = arith.truncf %37 : vector<256x32xf32> to vector<256x32xbf16>
    %cst_22 = arith.constant 0.000000e+00 : bf16
    %39 = vector.broadcast %cst_22 : bf16 to vector<256x96xbf16>
    %40 = tpu.concatenate %38, %39 in 1 : vector<256x32xbf16>, vector<256x96xbf16> -> vector<256x128xbf16>
    %41 = tpu.concatenate %40, %0 in 1 : vector<256x128xbf16>, vector<256x128xbf16> -> vector<256x256xbf16>
    %c0_23 = arith.constant 0 : index
    %c0_24 = arith.constant 0 : index
    %42 = vector.load %arg7[%c0_23, %c0_24] : memref<256x128xbf16, #tpu.memory_space<vmem>>, vector<256x128xbf16>
    %cst_25 = arith.constant dense<0.000000e+00> : vector<256x128xf32>
    %43 = tpu.matmul %41, %42, %cst_25 {dimension_numbers = #tpu.dot_dimension_numbers<[1], [0], [0], [1], [0, 0, 1, 1], [], []>} : vector<256x256xbf16>, vector<256x128xbf16>, vector<256x128xf32> -> vector<256x128xf32>
    %44 = vector.broadcast %4 : vector<1x128xf32> to vector<256x128xf32>
    %45 = arith.addf %43, %44 : vector<256x128xf32>
    %cst_26 = arith.constant 0.000000e+00 : f32
    %46 = vector.broadcast %cst_26 : f32 to vector<256x128xf32>
    %47 = arith.cmpf oge, %45, %46 : vector<256x128xf32>
    %cst_27 = arith.constant 1.000000e-01 : f32
    %48 = vector.broadcast %cst_27 : f32 to vector<256x128xf32>
    %49 = arith.mulf %48, %45 : vector<256x128xf32>
    %50 = arith.select %47, %45, %49 : vector<256x128xi1>, vector<256x128xf32>
    %51 = arith.truncf %50 : vector<256x128xf32> to vector<256x128xbf16>
    %c0_28 = arith.constant 0 : index
    %c0_29 = arith.constant 0 : index
    %52 = vector.load %arg8[%c0_28, %c0_29] : memref<128x128xbf16, #tpu.memory_space<vmem>>, vector<128x128xbf16>
    %cst_30 = arith.constant dense<0.000000e+00> : vector<256x128xf32>
    %53 = tpu.matmul %51, %52, %cst_30 {dimension_numbers = #tpu.dot_dimension_numbers<[1], [0], [0], [1], [0, 0, 1, 1], [], []>} : vector<256x128xbf16>, vector<128x128xbf16>, vector<256x128xf32> -> vector<256x128xf32>
    %54 = vector.broadcast %5 : vector<1x128xf32> to vector<256x128xf32>
    %55 = arith.addf %53, %54 : vector<256x128xf32>
    %56 = arith.negf %55 : vector<256x128xf32>
    %57 = math.exp %56 : vector<256x128xf32>
    %cst_31 = arith.constant 1.000000e+00 : f32
    %58 = vector.broadcast %cst_31 : f32 to vector<256x128xf32>
    %59 = arith.addf %58, %57 : vector<256x128xf32>
    %60 = arith.divf %58, %59 : vector<256x128xf32>
    %61 = tpu.concatenate %60, %29 in 1 : vector<256x128xf32>, vector<256x128xf32> -> vector<256x256xf32>
    %c0_32 = arith.constant 0 : index
    %c0_33 = arith.constant 0 : index
    %62 = vector.load %arg9[%c0_32, %c0_33] : memref<256x256xf32, #tpu.memory_space<vmem>>, vector<256x256xf32>
    tpu.vector_store %arg9[%c0_32, %c0_33], %61 {strides = array<i32>} : memref<256x256xf32, #tpu.memory_space<vmem>>, vector<256x256xf32>,
    return
  }
  func.func @transform_0(%arg0: i32) -> (i32, i32) {
    %c0_i32 = arith.constant 0 : i32
    %c0_i32_0 = arith.constant 0 : i32
    return %arg0, %c0_i32 : i32, i32
  }
  func.func @transform_1(%arg0: i32) -> (i32, i32) {
    %c0_i32 = arith.constant 0 : i32
    %c0_i32_0 = arith.constant 0 : i32
    return %arg0, %c0_i32 : i32, i32
  }
  func.func @transform_2(%arg0: i32) -> (i32, i32) {
    %c0_i32 = arith.constant 0 : i32
    %c0_i32_0 = arith.constant 0 : i32
    %c0_i32_1 = arith.constant 0 : i32
    return %c0_i32, %c0_i32_0 : i32, i32
  }
  func.func @transform_3(%arg0: i32) -> (i32, i32) {
    %c0_i32 = arith.constant 0 : i32
    %c0_i32_0 = arith.constant 0 : i32
    %c0_i32_1 = arith.constant 0 : i32
    return %c0_i32, %c0_i32_0 : i32, i32
  }
  func.func @transform_4(%arg0: i32) -> (i32, i32) {
    %c0_i32 = arith.constant 0 : i32
    %c0_i32_0 = arith.constant 0 : i32
    %c0_i32_1 = arith.constant 0 : i32
    return %c0_i32, %c0_i32_0 : i32, i32
  }
  func.func @transform_5(%arg0: i32) -> (i32, i32) {
    %c0_i32 = arith.constant 0 : i32
    %c0_i32_0 = arith.constant 0 : i32
    %c0_i32_1 = arith.constant 0 : i32
    return %c0_i32, %c0_i32_0 : i32, i32
  }
  func.func @transform_6(%arg0: i32) -> (i32, i32) {
    %c0_i32 = arith.constant 0 : i32
    %c0_i32_0 = arith.constant 0 : i32
    %c0_i32_1 = arith.constant 0 : i32
    return %c0_i32, %c0_i32_0 : i32, i32
  }
  func.func @transform_7(%arg0: i32) -> (i32, i32) {
    %c0_i32 = arith.constant 0 : i32
    %c0_i32_0 = arith.constant 0 : i32
    %c0_i32_1 = arith.constant 0 : i32
    return %c0_i32, %c0_i32_0 : i32, i32
  }
  func.func @transform_8(%arg0: i32) -> (i32, i32) {
    %c0_i32 = arith.constant 0 : i32
    %c0_i32_0 = arith.constant 0 : i32
    return %arg0, %c0_i32 : i32, i32
  }
}

</mosaic_0001>

<bundles_post_ra>
// kernel: vaegt_forward.1
= control target key start
LH: loop header
LB: loop body
LE: loop exit
PB: predicated region body
PF: predicated region fallthrough
CT: control target
= control target key end

     0   :  { %13 = vsyncpa [#allocation3], 0  ;;  %s11135_s0 = inlined_call_operand.vmem [shape: bf16[256,128], index: 0, kind: input, shape index: {}]   ;;  %s11136_s1 = inlined_call_operand.vmem [shape: f32[256,32], index: 1, kind: input, shape index: {}]   ;;  %s11137_s2 = inlined_call_operand.hbm [shape: f32[1,1408], index: 2, kind: input, shape index: {}]   ;;  %s11138_s3 = inlined_call_operand.vmem [shape: bf16[128,512], index: 3, kind: input, shape index: {}]   ;;  %s11139_s4 = inlined_call_operand.hbm [shape: bf16[512,512], index: 4, kind: input, shape index: {}]   ;;  %s11140_s5 = inlined_call_operand.vmem [shape: bf16[512,128], index: 5, kind: input, shape index: {}]   ;;  %s11141_s6 = inlined_call_operand.vmem [shape: bf16[256,128], index: 6, kind: input, shape index: {}]   ;;  %s11142_s7 = inlined_call_operand.vmem [shape: bf16[128,128], index: 7, kind: input, shape index: {}]   ;;  %s11143_s8 = inlined_call_operand.vmem [shape: f32[256,256], index: 8, kind: output, shape index: {}]  }
   0x1   :  { %s24_s29 = sshll.u32 %s11137_s2, 4  ;;  %s25_s29 = int_to_ptr.hbm [resolvable:$true] %s24_s29 }
   0x2   :  { %14 = vsyncpa [#allocation5], 0  ;;  %s7856_s30 = smov [#allocation2]   ;;  %s36_s12 = sshll.u32 %s11139_s4, 4  ;;  %s37_s12 = int_to_ptr.hbm [resolvable:$true] %s36_s12 }
   0x3   :  { %s26_s9 = sshll.u32 %s7856_s30, 4  ;;  %s7857_s13 = smov [#allocation4]   ;;  %s27_s9 = int_to_ptr.vmem [resolvable:$true] %s26_s9 }
   0x4   :  { %29 = dma.hbm_to_vmem [thread:$0]  %s25_s29, 176, %s27_s9, [#allocation3]  }
   0x5   :  { %s38_s14 = sshll.u32 %s7857_s13, 4  ;;  %s7858_s15 = smov 256   ;;  %s39_s14 = int_to_ptr.vmem [resolvable:$true] %s38_s14 }
   0x6   :  { %s7859_s16 = smov 16  }
   0x7   :  { %44 = dma.hbm_to_vmem [thread:$0]  %s37_s12, 16384, %s39_s14, [#allocation5], %s7858_s15, %s7858_s15, %s7859_s16  }
   0x8   :  { %7852 = dma.done.wait [#allocation3], 176  }
   0x9   :  { %7853 = vsyncadd [#allocation3], 4294967120 }
   0xa   :  { %7854 = dma.done.wait [#allocation5], 16384  }
   0xb   :  { %7855 = vsyncadd [#allocation5], 4294950912  ;;  %v6505_v0 = vld [vmem:[%s11138_s3 + $0xe0] sm:$0xf]  ;;  %v7349_v1 = vld [vmem:[%s11138_s3 + $0xec] sm:$0xf0] }
   0xc   :  { %v7347_v2 = vld [vmem:[%s11138_s3 + $0xe4] sm:$0xf]  ;;  %v6506_v3 = vor.u32 %v7349_v1, %v6505_v0  ;;  %v6507_v4 = vld [vmem:[%s11138_s3 + $0xf0] sm:$0xf0]  ;;  %v6513_v5 = vld [vmem:[%s11138_s3 + $0xe8] sm:$0xf] }
   0xd   :  { %v7350_v6 = vld [vmem:[%s11138_s3 + $0xf4] sm:$0xf0]  ;;  %v7931_v7 = vor.u32 %v7347_v2, %v6507_v4  ;;  %v6489_v9 = vld [vmem:[%s11138_s3 + $0xc0] sm:$0xf]  ;;  %v7345_v10 = vld [vmem:[%s11138_s3 + $0xcc] sm:$0xf0] }
   0xe   :  { %v7933_v8 = vor.u32 %v7350_v6, %v6513_v5  ;;  %v7343_v11 = vld [vmem:[%s11138_s3 + $0xc4] sm:$0xf]  ;;  %394 = vmatpush.bf16.msra.mxu0 %v6506_v3  ;;  %7535 = vmatpush.bf16.msra.mxu3 %v6506_v3  ;;  %v6490_v12 = vor.u32 %v7345_v10, %v6489_v9  ;;  %v6491_v13 = vld [vmem:[%s11138_s3 + $0xd0] sm:$0xf0]  ;;  %v6497_v14 = vld [vmem:[%s11138_s3 + $0xc8] sm:$0xf] }
   0xf   :  { %v7346_v15 = vld [vmem:[%s11138_s3 + $0xd4] sm:$0xf0]  ;;  %483 = vmatpush.bf16.msra.mxu1 %v7931_v7  ;;  %v7955_v16 = vor.u32 %v7343_v11, %v6491_v13  ;;  %v6473_v18 = vld [vmem:[%s11138_s3 + $0xa0] sm:$0xf]  ;;  %v7341_v19 = vld [vmem:[%s11138_s3 + $0xac] sm:$0xf0] }
  0x10   :  { %572 = vmatpush.bf16.msra.mxu2 %v7933_v8  ;;  %v7957_v17 = vor.u32 %v7346_v15, %v6497_v14  ;;  %v7339_v20 = vld [vmem:[%s11138_s3 + $0xa4] sm:$0xf]  ;;  %v6475_v21 = vld [vmem:[%s11138_s3 + $0xb0] sm:$0xf0]  ;;  %v6481_v22 = vld [vmem:[%s11138_s3 + $0xa8] sm:$0xf]  ;;  %v6474_v24 = vor.u32 %v7341_v19, %v6473_v18 }
  0x11   :  { %v7342_v23 = vld [vmem:[%s11138_s3 + $0xb4] sm:$0xf0]  ;;  %v7979_v25 = vor.u32 %v7339_v20, %v6475_v21  ;;  %v6457_v27 = vld [vmem:[%s11138_s3 + $0x80] sm:$0xf]  ;;  %v7337_v28 = vld [vmem:[%s11138_s3 + $0x8c] sm:$0xf0] }
  0x12   :  { %395 = vmatpush.bf16.msra.mxu0 %v6490_v12  ;;  %7536 = vmatpush.bf16.msra.mxu3 %v6490_v12  ;;  %v7981_v26 = vor.u32 %v7342_v23, %v6481_v22  ;;  %v7335_v29 = vld [vmem:[%s11138_s3 + $0x84] sm:$0xf]  ;;  %v6459_v30 = vld [vmem:[%s11138_s3 + $0x90] sm:$0xf0]  ;;  %v6465_v31 = vld [vmem:[%s11138_s3 + $0x88] sm:$0xf]  ;;  %v6458_v33 = vor.u32 %v7337_v28, %v6457_v27 }
  0x13   :  { %484 = vmatpush.bf16.msra.mxu1 %v7955_v16  ;;  %v7338_v32 = vld [vmem:[%s11138_s3 + $0x94] sm:$0xf0]  ;;  %v8003_v34 = vor.u32 %v7335_v29, %v6459_v30  ;;  %v6441_v36 = vld [vmem:[%s11138_s3 + $0x60] sm:$0xf]  ;;  %v7333_v37 = vld [vmem:[%s11138_s3 + $0x6c] sm:$0xf0] }
  0x14   :  { %573 = vmatpush.bf16.msra.mxu2 %v7957_v17  ;;  %v8005_v35 = vor.u32 %v7338_v32, %v6465_v31  ;;  %v7331_v38 = vld [vmem:[%s11138_s3 + $0x64] sm:$0xf]  ;;  %v6443_v39 = vld [vmem:[%s11138_s3 + $0x70] sm:$0xf0]  ;;  %v6449_v40 = vld [vmem:[%s11138_s3 + $0x68] sm:$0xf]  ;;  %v6442_v42 = vor.u32 %v7333_v37, %v6441_v36 }
  0x15   :  { %v7334_v41 = vld [vmem:[%s11138_s3 + $0x74] sm:$0xf0]  ;;  %v6425_v43 = vld [vmem:[%s11138_s3 + $0x40] sm:$0xf]  ;;  %v7329_v44 = vld [vmem:[%s11138_s3 + $0x4c] sm:$0xf0]  ;;  %v6446_v45 = vor.u32 %v7331_v38, %v6443_v39 }
  0x16   :  { %396 = vmatpush.bf16.msra.mxu0 %v6474_v24  ;;  %7537 = vmatpush.bf16.msra.mxu3 %v6474_v24  ;;  %v8033_v46 = vor.u32 %v7334_v41, %v6449_v40  ;;  %v7327_v47 = vld [vmem:[%s11138_s3 + $0x44] sm:$0xf]  ;;  %v6427_v48 = vld [vmem:[%s11138_s3 + $0x50] sm:$0xf0]  ;;  %v6433_v49 = vld [vmem:[%s11138_s3 + $0x48] sm:$0xf]  ;;  %v6426_v51 = vor.u32 %v7329_v44, %v6425_v43 }
  0x17   :  { %485 = vmatpush.bf16.msra.mxu1 %v7979_v25  ;;  %v7330_v50 = vld [vmem:[%s11138_s3 + $0x54] sm:$0xf0]  ;;  %v6430_v52 = vor.u32 %v7327_v47, %v6427_v48  ;;  %v6409_v54 = vld [vmem:[%s11138_s3 + $0x20] sm:$0xf]  ;;  %v7325_v55 = vld [vmem:[%s11138_s3 + $0x2c] sm:$0xf0] }
  0x18   :  { %574 = vmatpush.bf16.msra.mxu2 %v7981_v26  ;;  %v8048_v53 = vor.u32 %v7330_v50, %v6433_v49  ;;  %v7323_v56 = vld [vmem:[%s11138_s3 + $0x24] sm:$0xf]  ;;  %v6411_v57 = vld [vmem:[%s11138_s3 + $0x30] sm:$0xf0]  ;;  %v6417_v58 = vld [vmem:[%s11138_s3 + $0x28] sm:$0xf]  ;;  %v6410_v60 = vor.u32 %v7325_v55, %v6409_v54 }
  0x19   :  { %v7326_v59 = vld [vmem:[%s11138_s3 + $0x34] sm:$0xf0]  ;;  %v6414_v61 = vor.u32 %v7323_v56, %v6411_v57  ;;  %v6393_v63 = vld [vmem:[%s11138_s3] sm:$0xf]  ;;  %v7321_v0 = vld [vmem:[%s11138_s3 + $0xc] sm:$0xf0] }
  0x1a   :  { %397 = vmatpush.bf16.msra.mxu0 %v6458_v33  ;;  %7538 = vmatpush.bf16.msra.mxu3 %v6458_v33  ;;  %v6418_v62 = vor.u32 %v7326_v59, %v6417_v58  ;;  %v7319_v1 = vld [vmem:[%s11138_s3 + $0x4] sm:$0xf]  ;;  %v6395_v2 = vld [vmem:[%s11138_s3 + $0x10] sm:$0xf0]  ;;  %v6401_v3 = vld [vmem:[%s11138_s3 + $0x8] sm:$0xf]  ;;  %v6394_v5 = vor.u32 %v7321_v0, %v6393_v63 }
  0x1b   :  { %486 = vmatpush.bf16.msra.mxu1 %v8003_v34  ;;  %v7322_v4 = vld [vmem:[%s11138_s3 + $0x14] sm:$0xf0]  ;;  %v6398_v6 = vor.u32 %v7319_v1, %v6395_v2  ;;  %v8090_v10 = vld [vmem:[%s11135_s0] sm:$0xff]  ;;  %v8108_v12 = vld [vmem:[%s11135_s0 + $0x8] sm:$0xff]  ;;  %s7860_s19 = smov 32   ;;  %s7861_s12 = smov 96  }
  0x1c   :  { %575 = vmatpush.bf16.msra.mxu2 %v8005_v35  ;;  %v6402_v9 = vor.u32 %v7322_v4, %v6401_v3  ;;  %v8095_v11 = vld [vmem:[%s11135_s0 + $0x60] sm:$0xff]  ;;  %v8122_v13 = vld [vmem:[%s11135_s0 + $0x10] sm:$0xff]  ;;  %v8140_v15 = vld [vmem:[%s11135_s0 + $0x18] sm:$0xff] }
  0x1d   :  { %v8127_v14 = vld [vmem:[%s11135_s0 + $0x70] sm:$0xff]  ;;  %v7348_v19 = vld [vmem:[%s11138_s3 + $0xec] sm:$0xf]  ;;  %v6515_v20 = vld [vmem:[%s11138_s3 + $0xf8] sm:$0xf0] }
  0x1e   :  { %398 = vmatpush.bf16.msra.mxu0 %v6442_v42  ;;  %7539 = vmatpush.bf16.msra.mxu3 %v6442_v42  ;;  %v7309_v18 = vld [vmem:[%s11135_s0 + $0x30] sm:$0xff]  ;;  %v6518_v21 = vor.u32 %v7348_v19, %v6515_v20  ;;  %v7310_v22 = vld [vmem:[%s11135_s0 + $0x38] sm:$0xff]  ;;  %v7344_v23 = vld [vmem:[%s11138_s3 + $0xcc] sm:$0xf] }
  0x1f   :  { %487 = vmatpush.bf16.msra.mxu1 %v6446_v45  ;;  %v6499_v24 = vld [vmem:[%s11138_s3 + $0xd8] sm:$0xf0]  ;;  %v7311_v29 = vld [vmem:[%s11135_s0 + $0x40] sm:$0xff]  ;;  %v7336_v30 = vld [vmem:[%s11138_s3 + $0x8c] sm:$0xf] }
  0x20   :  { %576 = vmatpush.bf16.msra.mxu2 %v8033_v46  ;;  %v6483_v27 = vld [vmem:[%s11138_s3 + $0xb8] sm:$0xf0]  ;;  %v6633_v36 = vld [vmem:[#allocation4 + $0xe0] sm:$0xf] }
  0x21   :  { %v6467_v31 = vld [vmem:[%s11138_s3 + $0x98] sm:$0xf0]  ;;  %v6761_v39 = vld [vmem:[#allocation4 + $0x1e0] sm:$0xf] }
  0x22   :  { %399 = vmatpush.bf16.msra.mxu0 %v6426_v51  ;;  %7540 = vmatpush.bf16.msra.mxu3 %v6426_v51  ;;  %v6470_v33 = vor.u32 %v7336_v30, %v6467_v31  ;;  %v7381_v37 = vld [vmem:[#allocation4 + $0xec] sm:$0xf0]  ;;  %v6889_v43 = vld [vmem:[#allocation4 + $0x2e0] sm:$0xf] }
  0x23   :  { %488 = vmatpush.bf16.msra.mxu1 %v6430_v52  ;;  %v6634_v38 = vor.u32 %v7381_v37, %v6633_v36  ;;  %v7413_v41 = vld [vmem:[#allocation4 + $0x1ec] sm:$0xf0]  ;;  %v6617_v49 = vld [vmem:[#allocation4 + $0xc0] sm:$0xf] }
  0x24   :  { %577 = vmatpush.bf16.msra.mxu2 %v8048_v53  ;;  %v6762_v42 = vor.u32 %v7413_v41, %v6761_v39  ;;  %v7445_v44 = vld [vmem:[#allocation4 + $0x2ec] sm:$0xf0]  ;;  %v6873_v59 = vld [vmem:[#allocation4 + $0x2c0] sm:$0xf] }
  0x25   :  { %v6451_v47 = vld [vmem:[%s11138_s3 + $0x78] sm:$0xf0]  ;;  %v6890_v48 = vor.u32 %v7445_v44, %v6889_v43  ;;  %v6601_v63 = vld [vmem:[#allocation4 + $0xa0] sm:$0xf] }
  0x26   :  { %400 = vmatpush.bf16.msra.mxu0 %v6410_v60  ;;  %7541 = vmatpush.bf16.msra.mxu3 %v6410_v60  ;;  %v7409_v54 = vld [vmem:[#allocation4 + $0x1cc] sm:$0xf0]  ;;  %v6729_v3 = vld [vmem:[#allocation4 + $0x1a0] sm:$0xf] }
  0x27   :  { %489 = vmatpush.bf16.msra.mxu1 %v6414_v61  ;;  %v7441_v60 = vld [vmem:[#allocation4 + $0x2cc] sm:$0xf0]  ;;  %v7312_v4 = vld [vmem:[%s11135_s0 + $0x48] sm:$0xff] }
  0x28   :  { %578 = vmatpush.bf16.msra.mxu2 %v6418_v62  ;;  %v7373_v0 = vld [vmem:[#allocation4 + $0xac] sm:$0xf0]  ;;  %v6585_v19 = vld [vmem:[#allocation4 + $0x80] sm:$0xf] }
  0x29   :  { %v6602_v2 = vor.u32 %v7373_v0, %v6601_v63  ;;  %v7369_v20 = vld [vmem:[#allocation4 + $0x8c] sm:$0xf0]  ;;  %v6841_v30 = vld [vmem:[#allocation4 + $0x280] sm:$0xf] }
  0x2a   :  { %401 = vmatpush.bf16.msra.mxu0 %v6394_v5  ;;  %7542 = vmatpush.bf16.msra.mxu3 %v6394_v5  ;;  %v7405_v5 = vld [vmem:[#allocation4 + $0x1ac] sm:$0xf0]  ;;  %v6569_v39 = vld [vmem:[#allocation4 + $0x60] sm:$0xf] }
  0x2b   :  { %490 = vmatpush.bf16.msra.mxu1 %v6398_v6  ;;  %v7433_v31 = vld [vmem:[#allocation4 + $0x28c] sm:$0xf0] }
  0x2c   :  { %579 = vmatpush.bf16.msra.mxu2 %v6402_v9  ;;  %v7365_v43 = vld [vmem:[#allocation4 + $0x6c] sm:$0xf0] }
  0x2d   :  { %402 = vmatmul.bf16.vlgmr.msra.gmra.mxu0 %v8090_v10  ;;  %462 = vmatmul.bf16.vlgmr.msra.gmra.mxu3 %v8095_v11 }
  0x2e   :  { %7543 = vmatpush.bf16.msrb.mxu3 %v7931_v7  ;;  %491 = vmatmul.bf16.vlgmr.msra.gmra.mxu1 %v8090_v10  ;;  %v8113_v7 = vld [vmem:[%s11135_s0 + $0x68] sm:$0xff] }
  0x2f   :  { %580 = vmatmul.bf16.vlgmr.msra.gmra.mxu2 %v8090_v10  ;;  %1975 = vmatpush.bf16.msrb.mxu0 %v6634_v38  ;;  %v6842_v38 = vor.u32 %v7433_v31, %v6841_v30  ;;  %v6521_v31 = vld [vmem:[#allocation4] sm:$0xf] }
  0x30   :  { %2064 = vmatpush.bf16.msrb.mxu1 %v6762_v42  ;;  %2153 = vmatpush.bf16.msrb.mxu2 %v6890_v48  ;;  %v6825_v48 = vld [vmem:[#allocation4 + $0x260] sm:$0xf] }
  0x32   :  { %7544 = vmatpush.bf16.msrb.mxu3 %v7955_v16  ;;  %v8156_v16 = vld [vmem:[%s11135_s0 + $0x20] sm:$0xff] }
  0x36   :  { %7545 = vmatpush.bf16.msrb.mxu3 %v7979_v25  ;;  %v6502_v25 = vor.u32 %v7344_v23, %v6499_v24  ;;  %v7328_v24 = vld [vmem:[%s11138_s3 + $0x4c] sm:$0xf] }
  0x3a   :  { %7546 = vmatpush.bf16.msrb.mxu3 %v8003_v34  ;;  %v8203_v34 = vld [vmem:[#allocation2] sm:$0xf] }
  0x3b   :  { %v8209_v40 = vperm.slane %v8203_v34, 0 }
  0x3d   :  { %407 = vmatmul.bf16.gmra.mxu0 %v8108_v12  ;;  %467 = vmatmul.bf16.gmra.mxu3 %v8113_v7 }
  0x3e   :  { %7547 = vmatpush.bf16.msrb.mxu3 %v6446_v45  ;;  %496 = vmatmul.bf16.gmra.mxu1 %v8108_v12 }
  0x3f   :  { %585 = vmatmul.bf16.gmra.mxu2 %v8108_v12 }
  0x42   :  { %7548 = vmatpush.bf16.msrb.mxu3 %v6430_v52  ;;  %v7377_v52 = vld [vmem:[#allocation4 + $0xcc] sm:$0xf0] }
  0x43   :  { %v6618_v57 = vor.u32 %v7377_v52, %v6617_v49  ;;  %v7429_v49 = vld [vmem:[#allocation4 + $0x26c] sm:$0xf0]  ;;  %v7324_v52 = vld [vmem:[%s11138_s3 + $0x2c] sm:$0xf] }
  0x45   :  { %1976 = vmatpush.bf16.msrb.mxu0 %v6618_v57 }
  0x46   :  { %7549 = vmatpush.bf16.msrb.mxu3 %v6414_v61 }
  0x49   :  { %1977 = vmatpush.bf16.msrb.mxu0 %v6602_v2  ;;  %v6809_v2 = vld [vmem:[#allocation4 + $0x240] sm:$0xf] }
  0x4a   :  { %7550 = vmatpush.bf16.msrb.mxu3 %v6398_v6  ;;  %v6857_v6 = vld [vmem:[#allocation4 + $0x2a0] sm:$0xf] }
  0x4d   :  { %412 = vmatmul.bf16.gmra.mxu0 %v8122_v13  ;;  %472 = vmatmul.bf16.gmra.mxu3 %v8127_v14 }
  0x4e   :  { %7551 = vmatpush.bf16.msra.mxu3 %v7933_v8  ;;  %501 = vmatmul.bf16.gmra.mxu1 %v8122_v13  ;;  %v8145_v8 = vld [vmem:[%s11135_s0 + $0x78] sm:$0xff] }
  0x4f   :  { %590 = vmatmul.bf16.gmra.mxu2 %v8122_v13 }
  0x52   :  { %7552 = vmatpush.bf16.msra.mxu3 %v7957_v17  ;;  %v7308_v17 = vld [vmem:[%s11135_s0 + $0x28] sm:$0xff] }
  0x56   :  { %7553 = vmatpush.bf16.msra.mxu3 %v7981_v26  ;;  %v7340_v26 = vld [vmem:[%s11138_s3 + $0xac] sm:$0xf] }
  0x57   :  { %v6486_v28 = vor.u32 %v7340_v26, %v6483_v27  ;;  %v6586_v26 = vor.u32 %v7369_v20, %v6585_v19  ;;  %v7401_v27 = vld [vmem:[#allocation4 + $0x18c] sm:$0xf0]  ;;  %v6665_v19 = vld [vmem:[#allocation4 + $0x120] sm:$0xf]  ;;  %v7313_v20 = vld [vmem:[%s11135_s0 + $0x50] sm:$0xff] }
  0x59   :  { %1978 = vmatpush.bf16.msrb.mxu0 %v6586_v26  ;;  %v7320_v26 = vld [vmem:[%s11138_s3 + $0xc] sm:$0xf] }
  0x5a   :  { %7554 = vmatpush.bf16.msra.mxu3 %v8005_v35 }
  0x5d   :  { %417 = vmatmul.bf16.gmra.mxu0 %v8140_v15  ;;  %477 = vmatmul.bf16.gmra.mxu3 %v8145_v8 }
  0x5e   :  { %7555 = vmatpush.bf16.msra.mxu3 %v8033_v46  ;;  %506 = vmatmul.bf16.gmra.mxu1 %v8140_v15  ;;  %v7332_v46 = vld [vmem:[%s11138_s3 + $0x6c] sm:$0xf] }
  0x5f   :  { %595 = vmatmul.bf16.gmra.mxu2 %v8140_v15  ;;  %v6454_v51 = vor.u32 %v7332_v46, %v6451_v47  ;;  %v6570_v46 = vor.u32 %v7365_v43, %v6569_v39  ;;  %v7397_v47 = vld [vmem:[#allocation4 + $0x16c] sm:$0xf0] }
  0x60   :  { %v7353_v39 = vld [vmem:[#allocation4 + $0xc] sm:$0xf0] }
  0x61   :  { %1979 = vmatpush.bf16.msrb.mxu0 %v6570_v46  ;;  %v7417_v46 = vld [vmem:[#allocation4 + $0x20c] sm:$0xf0] }
  0x62   :  { %7556 = vmatpush.bf16.msra.mxu3 %v8048_v53  ;;  %v6745_v53 = vld [vmem:[#allocation4 + $0x1c0] sm:$0xf] }
  0x63   :  { %v6746_v58 = vor.u32 %v7409_v54, %v6745_v53  ;;  %v6826_v54 = vor.u32 %v7429_v49, %v6825_v48  ;;  %v6522_v49 = vor.u32 %v7353_v39, %v6521_v31 }
  0x65   :  { %2065 = vmatpush.bf16.msrb.mxu1 %v6746_v58 }
  0x66   :  { %7557 = vmatpush.bf16.msra.mxu3 %v6418_v62  ;;  %v6874_v62 = vor.u32 %v7441_v60, %v6873_v59  ;;  %v7361_v59 = vld [vmem:[#allocation4 + $0x4c] sm:$0xf0]  ;;  %v6681_v60 = vld [vmem:[#allocation4 + $0x140] sm:$0xf] }
  0x68   :  { %2154 = vmatpush.bf16.msrb.mxu2 %v6874_v62  ;;  %v7393_v62 = vld [vmem:[#allocation4 + $0x14c] sm:$0xf0] }
  0x6a   :  { %7558 = vmatpush.bf16.msra.mxu3 %v6402_v9  ;;  %v7437_v9 = vld [vmem:[#allocation4 + $0x2ac] sm:$0xf0] }
  0x6d   :  { %422 = vmatmul.bf16.gmra.mxu0 %v8156_v16  ;;  %551 = vmatmul.bf16.vlgmr.msrb.gmra.mxu3 %v8095_v11 }
  0x6e   :  { %511 = vmatmul.bf16.gmra.mxu1 %v8156_v16  ;;  %661 = vmatpush.bf16.msrb.mxu3 %v6518_v21  ;;  %v6713_v21 = vld [vmem:[#allocation4 + $0x180] sm:$0xf] }
  0x6f   :  { %600 = vmatmul.bf16.gmra.mxu2 %v8156_v16  ;;  %v6714_v37 = vor.u32 %v7401_v27, %v6713_v21  ;;  %v7389_v21 = vld [vmem:[#allocation4 + $0x12c] sm:$0xf0] }
  0x70   :  { %v6403_v27 = vld [vmem:[%s11138_s3 + $0x18] sm:$0xf0] }
  0x72   :  { %662 = vmatpush.bf16.msrb.mxu3 %v6502_v25  ;;  %v6435_v25 = vld [vmem:[%s11138_s3 + $0x58] sm:$0xf0] }
  0x76   :  { %663 = vmatpush.bf16.msrb.mxu3 %v6486_v28 }
  0x7a   :  { %664 = vmatpush.bf16.msrb.mxu3 %v6470_v33 }
  0x7d   :  { %427 = vmatmul.bf16.gmra.mxu0 %v7308_v17  ;;  %556 = vmatmul.bf16.gmra.mxu3 %v8113_v7 }
  0x7e   :  { %516 = vmatmul.bf16.gmra.mxu1 %v7308_v17  ;;  %665 = vmatpush.bf16.msrb.mxu3 %v6454_v51 }
  0x7f   :  { %605 = vmatmul.bf16.gmra.mxu2 %v7308_v17  ;;  %v6730_v17 = vor.u32 %v7405_v5, %v6729_v3  ;;  %v7425_v3 = vld [vmem:[#allocation4 + $0x24c] sm:$0xf0]  ;;  %v6682_v5 = vor.u32 %v7393_v62, %v6681_v60 }
  0x81   :  { %2066 = vmatpush.bf16.msrb.mxu1 %v6730_v17 }
  0x85   :  { %2067 = vmatpush.bf16.msrb.mxu1 %v6714_v37 }
  0x8d   :  { %432 = vmatmul.bf16.gmra.mxu0 %v7309_v18  ;;  %561 = vmatmul.bf16.gmra.mxu3 %v8127_v14 }
  0x8e   :  { %521 = vmatmul.bf16.gmra.mxu1 %v7309_v18 }
  0x8f   :  { %610 = vmatmul.bf16.gmra.mxu2 %v7309_v18  ;;  %v6858_v18 = vor.u32 %v7437_v9, %v6857_v6  ;;  %v6810_v6 = vor.u32 %v7425_v3, %v6809_v2  ;;  %v6537_v9 = vld [vmem:[#allocation4 + $0x20] sm:$0xf]  ;;  %v8283_v3 = vperm.slane %v8203_v34, 1 }
  0x91   :  { %2155 = vmatpush.bf16.msrb.mxu2 %v6858_v18 }
  0x95   :  { %2156 = vmatpush.bf16.msrb.mxu2 %v6842_v38  ;;  %v6406_v38 = vor.u32 %v7320_v26, %v6403_v27 }
  0x99   :  { %2157 = vmatpush.bf16.msrb.mxu2 %v6826_v54 }
  0x9d   :  { %437 = vmatmul.bf16.gmra.mxu0 %v7310_v22  ;;  %566 = vmatmul.bf16.gmra.mxu3 %v8145_v8 }
  0x9e   :  { %526 = vmatmul.bf16.gmra.mxu1 %v7310_v22  ;;  %2158 = vmatpush.bf16.msrb.mxu2 %v6810_v6 }
  0x9f   :  { %615 = vmatmul.bf16.gmra.mxu2 %v7310_v22 }
  0xaa   :  { %v8201_v32 = vpop.f32.mrf.mxu0 }
  0xab   :  { %v8205_v35 = vpop.f32.mrf.mxu1 }
  0xad   :  { %442 = vmatmul.bf16.gmra.mxu0 %v7311_v29  ;;  %640 = vmatmul.bf16.vlgmr.msra.gmra.mxu3 %v8095_v11 }
  0xae   :  { %531 = vmatmul.bf16.gmra.mxu1 %v7311_v29 }
  0xaf   :  { %620 = vmatmul.bf16.gmra.mxu2 %v7311_v29  ;;  %v6438_v29 = vor.u32 %v7328_v24, %v6435_v25  ;;  %v7421_v24 = vld [vmem:[#allocation4 + $0x22c] sm:$0xf0] }
  0xb0   :  { %v463_v45 = vpop.f32.mrf.mxu3 }
  0xb1   :  { %v464_v55 = vadd.f32 %v463_v45, %v8209_v40  ;;  %666 = vmatpush.bf16.msrb.mxu3 %v6438_v29  ;;  %v6697_v45 = vld [vmem:[#allocation4 + $0x160] sm:$0xf]  ;;  %v6666_v29 = vor.u32 %v7389_v21, %v6665_v19  ;;  %v404_v21 = vadd.f32 %v8201_v32, %v8209_v40 }
  0xb2   :  { %v8217_v50 = vpop.f32.mrf.mxu2  ;;  %v8220_v56 = vpop.f32.mrf.mxu0  ;;  %v6698_v53 = vor.u32 %v7397_v47, %v6697_v45  ;;  %v6777_v45 = vld [vmem:[#allocation4 + $0x200] sm:$0xf] }
  0xb3   :  { %v8222_v61 = vpop.f32.mrf.mxu1  ;;  %v974_v1 = vmul.f32 0.1, %v464_v55  ;;  %vm846_vm0 = vcmp.ge.f32.partialorder %v464_v55, 0.0  ;;  %v406_v26 = vadd.f32 %v8220_v56, %v8209_v40  ;;  %vm750_vm6 = vcmp.ge.f32.partialorder %v404_v21, 0.0 }
  0xb4   :  { %2068 = vmatpush.bf16.msrb.mxu1 %v6698_v53  ;;  %v495_v32 = vadd.f32 %v8222_v61, %v8283_v3 }
  0xb5   :  { %v1102_v41 = vsel %vm846_vm0, %v464_v55, %v974_v1  ;;  %v6553_v55 = vld [vmem:[#allocation4 + $0x40] sm:$0xf]  ;;  %vm754_vm7 = vcmp.ge.f32.partialorder %v406_v26, 0.0 }
  0xb6   :  { %v6554_v1 = vor.u32 %v7361_v59, %v6553_v55  ;;  %v7477_v59 = vld [vmem:[#allocation4 + $0x3ec] sm:$0xf0]  ;;  %v883_v56 = vmul.f32 0.1, %v495_v32  ;;  %vm755_vm10 = vcmp.ge.f32.partialorder %v495_v32, 0.0 }
  0xb8   :  { %v465_v11 = vpop.f32.mrf.mxu3  ;;  %1980 = vmatpush.bf16.msrb.mxu0 %v6554_v1  ;;  %2069 = vmatpush.bf16.msrb.mxu1 %v6682_v5 }
  0xb9   :  { %v466_v22 = vadd.f32 %v465_v11, %v8209_v40  ;;  %v7357_v11 = vld [vmem:[#allocation4 + $0x2c] sm:$0xf0] }
  0xba   :  { %v8228_v23 = vpop.f32.mrf.mxu2  ;;  %v8236_v28 = vpop.f32.mrf.mxu0  ;;  %v6538_v18 = vor.u32 %v7357_v11, %v6537_v9  ;;  %v7314_v11 = vld [vmem:[%s11135_s0 + $0x58] sm:$0xff] }
  0xbb   :  { %vm850_vm1 = vcmp.ge.f32.partialorder %v466_v22, 0.0  ;;  %v978_v33 = vmul.f32 0.1, %v466_v22  ;;  %v8238_v36 = vpop.f32.mrf.mxu1 }
  0xbc   :  { %1981 = vmatpush.bf16.msrb.mxu0 %v6538_v18  ;;  %2070 = vmatpush.bf16.msrb.mxu1 %v6666_v29 }
  0xbd   :  { %v1106_v42 = vsel %vm850_vm1, %v466_v22, %v978_v33  ;;  %447 = vmatmul.bf16.gmra.mxu0 %v7312_v4  ;;  %645 = vmatmul.bf16.gmra.mxu3 %v8113_v7  ;;  %v6419_v7 = vld [vmem:[%s11138_s3 + $0x38] sm:$0xf0]  ;;  %v6793_v22 = vld [vmem:[#allocation4 + $0x220] sm:$0xf] }
  0xbe   :  { %v8241_v44 = vpack.c.bf16 %v1106_v42, %v1102_v41  ;;  %536 = vmatmul.bf16.gmra.mxu1 %v7312_v4  ;;  %v6422_v58 = vor.u32 %v7324_v52, %v6419_v7  ;;  %v6794_v30 = vor.u32 %v7421_v24, %v6793_v22  ;;  %v6649_v41 = vld [vmem:[#allocation4 + $0x100] sm:$0xf]  ;;  %v7385_v42 = vld [vmem:[#allocation4 + $0x10c] sm:$0xf0]  ;;  %v6778_v52 = vor.u32 %v7417_v46, %v6777_v45 }
  0xbf   :  { %625 = vmatmul.bf16.gmra.mxu2 %v7312_v4  ;;  %v493_v22 = vadd.f32 %v8205_v35, %v8283_v3 }
  0xc0   :  { %11290 = vst [vmem:[#allocation8_spill] sm:$0xff] %v8241_v44  ;;  %v468_v51 = vpop.f32.mrf.mxu3  ;;  %667 = vmatpush.bf16.msrb.mxu3 %v6422_v58  ;;  %2159 = vmatpush.bf16.msrb.mxu2 %v6794_v30  ;;  %v7017_v58 = vld [vmem:[#allocation4 + $0x3e0] sm:$0xf]  ;;  %v878_v30 = vmul.f32 0.1, %v404_v21 }
  0xc1   :  { %v469_v63 = vadd.f32 %v468_v51, %v8209_v40  ;;  %v6650_v51 = vor.u32 %v7385_v42, %v6649_v41  ;;  %1982 = vmatpush.bf16.msrb.mxu0 %v6522_v49  ;;  %v7018_v62 = vor.u32 %v7477_v59, %v7017_v58  ;;  %vm751_vm8 = vcmp.ge.f32.partialorder %v493_v22, 0.0 }
  0xc2   :  { %v8249_v57 = vpop.f32.mrf.mxu2  ;;  %v8252_v0 = vpop.f32.mrf.mxu0 }
  0xc3   :  { %v8254_v4 = vpop.f32.mrf.mxu1  ;;  %v982_v17 = vmul.f32 0.1, %v469_v63  ;;  %vm854_vm2 = vcmp.ge.f32.partialorder %v469_v63, 0.0  ;;  %2071 = vmatpush.bf16.msrb.mxu1 %v6650_v51 }
  0xc4   :  { %668 = vmatpush.bf16.msrb.mxu3 %v6406_v38  ;;  %2160 = vmatpush.bf16.msrb.mxu2 %v6778_v52 }
  0xc5   :  { %v1110_v7 = vsel %vm854_vm2, %v469_v63, %v982_v17  ;;  %v8292_v17 = vperm.slane %v8203_v34, 2 }
  0xc7   :  { %v582_v34 = vadd.f32 %v8217_v50, %v8292_v17  ;;  %v584_v35 = vadd.f32 %v8228_v23, %v8292_v17  ;;  %v882_v50 = vmul.f32 0.1, %v406_v26  ;;  %v1006_v23 = vsel %vm750_vm6, %v404_v21, %v878_v30 }
  0xc8   :  { %v470_v25 = vpop.f32.mrf.mxu3  ;;  %2242 = vmatpush.bf16.msra.mxu3 %v7018_v62  ;;  %v587_v21 = vadd.f32 %v8249_v57, %v8292_v17 }
  0xc9   :  { %v471_v33 = vadd.f32 %v470_v25, %v8209_v40  ;;  %v884_v39 = vmul.f32 0.1, %v584_v35  ;;  %vm752_vm9 = vcmp.ge.f32.partialorder %v582_v34, 0.0  ;;  %vm756_vm11 = vcmp.ge.f32.partialorder %v584_v35, 0.0 }
  0xca   :  { %v8266_v37 = vpop.f32.mrf.mxu2  ;;  %v8268_v43 = vpop.f32.mrf.mxu0  ;;  %v1010_v42 = vsel %vm754_vm7, %v406_v26, %v882_v50  ;;  %vm760_vm1 = vcmp.ge.f32.partialorder %v587_v21, 0.0 }
  0xcb   :  { %vm858_vm3 = vcmp.ge.f32.partialorder %v471_v33, 0.0  ;;  %v986_v47 = vmul.f32 0.1, %v471_v33  ;;  %v8270_v48 = vpop.f32.mrf.mxu1  ;;  %v1012_v49 = vsel %vm756_vm11, %v584_v35, %v884_v39  ;;  %v8320_v52 = vpack.c.bf16 %v1010_v42, %v1006_v23 }
  0xcc   :  { %v888_v35 = vmul.f32 0.1, %v587_v21 }
  0xcd   :  { %v1114_v53 = vsel %vm858_vm3, %v471_v33, %v986_v47  ;;  %452 = vmatmul.bf16.gmra.mxu0 %v7313_v20  ;;  %650 = vmatmul.bf16.gmra.mxu3 %v8127_v14  ;;  %v880_v33 = vmul.f32 0.1, %v582_v34  ;;  %v1011_v47 = vsel %vm755_vm10, %v495_v32, %v883_v56 }
  0xce   :  { %v8273_v54 = vpack.c.bf16 %v1114_v53, %v1110_v7  ;;  %541 = vmatmul.bf16.gmra.mxu1 %v7313_v20 }
  0xcf   :  { %630 = vmatmul.bf16.gmra.mxu2 %v7313_v20  ;;  %v1008_v46 = vsel %vm752_vm9, %v582_v34, %v880_v33  ;;  %v7473_v34 = vld [vmem:[#allocation4 + $0x3cc] sm:$0xf0] }
  0xd0   :  { %v473_v55 = vpop.f32.mrf.mxu3  ;;  %v8327_v59 = vpack.c.bf16 %v1012_v49, %v1008_v46 }
  0xd1   :  { %v474_v14 = vadd.f32 %v473_v55, %v8209_v40 }
  0xd2   :  { %v8275_v60 = vpop.f32.mrf.mxu2  ;;  %v8277_v1 = vpop.f32.mrf.mxu0  ;;  %11292 = vst [vmem:[#allocation10_spill] sm:$0xff] %v8327_v59 }
  0xd3   :  { %v8279_v63 = vpop.f32.mrf.mxu1  ;;  %v990_v5 = vmul.f32 0.1, %v474_v14  ;;  %vm862_vm4 = vcmp.ge.f32.partialorder %v474_v14, 0.0 }
  0xd5   :  { %v1118_v24 = vsel %vm862_vm4, %v474_v14, %v990_v5  ;;  %v409_v5 = vadd.f32 %v8236_v28, %v8209_v40  ;;  %v500_v28 = vadd.f32 %v8254_v4, %v8283_v3 }
  0xd7   :  { %v886_v26 = vmul.f32 0.1, %v409_v5  ;;  %vm758_vm14 = vcmp.ge.f32.partialorder %v409_v5, 0.0  ;;  %vm763_vm2 = vcmp.ge.f32.partialorder %v500_v28, 0.0 }
  0xd8   :  { %v475_v2 = vpop.f32.mrf.mxu3 }
  0xd9   :  { %v476_v6 = vadd.f32 %v475_v2, %v8209_v40  ;;  %v1014_v50 = vsel %vm758_vm14, %v409_v5, %v886_v26 }
  0xda   :  { %v8286_v9 = vpop.f32.mrf.mxu2  ;;  %v8294_v18 = vpop.f32.mrf.mxu0 }
  0xdb   :  { %vm866_vm5 = vcmp.ge.f32.partialorder %v476_v6, 0.0  ;;  %v994_v19 = vmul.f32 0.1, %v476_v6  ;;  %v8296_v20 = vpop.f32.mrf.mxu1 }
  0xdd   :  { %v1122_v25 = vsel %vm866_vm5, %v476_v6, %v994_v19  ;;  %457 = vmatmul.bf16.gmra.mxu0 %v7314_v11  ;;  %655 = vmatmul.bf16.gmra.mxu3 %v8145_v8  ;;  %v879_v8 = vmul.f32 0.1, %v493_v22  ;;  %v498_v6 = vadd.f32 %v8238_v36, %v8283_v3 }
  0xde   :  { %v8307_v27 = vpack.c.bf16 %v1122_v25, %v1118_v24  ;;  %546 = vmatmul.bf16.gmra.mxu1 %v7314_v11  ;;  %v7001_v25 = vld [vmem:[#allocation4 + $0x3c0] sm:$0xf] }
  0xdf   :  { %635 = vmatmul.bf16.gmra.mxu2 %v7314_v11  ;;  %v1007_v45 = vsel %vm751_vm8, %v493_v22, %v879_v8  ;;  %v411_v22 = vadd.f32 %v8252_v0, %v8209_v40  ;;  %v7002_v32 = vor.u32 %v7473_v34, %v7001_v25  ;;  %v887_v0 = vmul.f32 0.1, %v498_v6 }
  0xe0   :  { %v478_v29 = vpop.f32.mrf.mxu3  ;;  %v8325_v58 = vpack.c.bf16 %v1011_v47, %v1007_v45  ;;  %v891_v8 = vmul.f32 0.1, %v500_v28  ;;  %vm759_vm0 = vcmp.ge.f32.partialorder %v498_v6, 0.0 }
  0xe1   :  { %v479_v61 = vadd.f32 %v478_v29, %v8209_v40  ;;  %v890_v29 = vmul.f32 0.1, %v411_v22  ;;  %vm762_vm15 = vcmp.ge.f32.partialorder %v411_v22, 0.0  ;;  %2243 = vmatpush.bf16.msra.mxu3 %v7002_v32  ;;  %v1015_v39 = vsel %vm759_vm0, %v498_v6, %v887_v0 }
  0xe2   :  { %v8313_v31 = vpop.f32.mrf.mxu2  ;;  %v8315_v38 = vpop.f32.mrf.mxu0  ;;  %11291 = vst [vmem:[#allocation9_spill] sm:$0xff] %v8325_v58  ;;  %v1019_v23 = vsel %vm763_vm2, %v500_v28, %v891_v8  ;;  %v592_v28 = vadd.f32 %v8275_v60, %v8292_v17 }
  0xe3   :  { %v8317_v41 = vpop.f32.mrf.mxu1  ;;  %v998_v7 = vmul.f32 0.1, %v479_v61  ;;  %vm870_vm12 = vcmp.ge.f32.partialorder %v479_v61, 0.0  ;;  %v1018_v56 = vsel %vm762_vm15, %v411_v22, %v890_v29 }
  0xe4   :  { %v8358_v46 = vpack.c.bf16 %v1018_v56, %v1014_v50  ;;  %v896_v26 = vmul.f32 0.1, %v592_v28  ;;  %vm768_vm9 = vcmp.ge.f32.partialorder %v592_v28, 0.0 }
  0xe5   :  { %v1126_v11 = vsel %vm870_vm12, %v479_v61, %v998_v7  ;;  %v1016_v61 = vsel %vm760_vm1, %v587_v21, %v888_v35  ;;  %v8363_v7 = vpack.c.bf16 %v1019_v23, %v1015_v39 }
  0xe6   :  { %11293 = vst [vmem:[#allocation11_spill] sm:$0xff] %v8358_v46 }
  0xe7   :  { %11294 = vst [vmem:[#allocation12_spill] sm:$0xff] %v8363_v7 }
  0xe8   :  { %v480_v51 = vpop.f32.mrf.mxu3 }
  0xe9   :  { %v481_v53 = vadd.f32 %v480_v51, %v8209_v40 }
  0xea   :  { %v8323_v55 = vpop.f32.mrf.mxu2  ;;  %v8329_v62 = vpop.f32.mrf.mxu0 }
  0xeb   :  { %vm874_vm13 = vcmp.ge.f32.partialorder %v481_v53, 0.0  ;;  %v1002_v14 = vmul.f32 0.1, %v481_v53  ;;  %v8331_v2 = vpop.f32.mrf.mxu1 }
  0xed   :  { %v1130_v19 = vsel %vm874_vm13, %v481_v53, %v1002_v14  ;;  %669 = vmatmul.bf16.vlgmr.msrb.gmra.mxu3 %v8090_v10  ;;  %1983 = vmatmul.bf16.vlgmr.msrb.gmra.mxu0 %v8320_v52  ;;  %v589_v10 = vadd.f32 %v8266_v37, %v8292_v17 }
  0xee   :  { %v8343_v24 = vpack.c.bf16 %v1130_v19, %v1126_v11  ;;  %2072 = vmatmul.bf16.vlgmr.msrb.gmra.mxu1 %v8325_v58  ;;  %v414_v11 = vadd.f32 %v8268_v43, %v8209_v40  ;;  %v503_v19 = vadd.f32 %v8270_v48, %v8283_v3  ;;  %v505_v43 = vadd.f32 %v8279_v63, %v8283_v3 }
  0xef   :  { %2161 = vmatmul.bf16.vlgmr.msrb.gmra.mxu2 %v8327_v59  ;;  %v892_v33 = vmul.f32 0.1, %v589_v10  ;;  %vm764_vm3 = vcmp.ge.f32.partialorder %v589_v10, 0.0 }
  0xf0   :  { %v552_v36 = vpop.f32.mrf.mxu3  ;;  %v894_v25 = vmul.f32 0.1, %v414_v11  ;;  %v895_v60 = vmul.f32 0.1, %v503_v19  ;;  %vm766_vm6 = vcmp.ge.f32.partialorder %v414_v11, 0.0  ;;  %vm767_vm8 = vcmp.ge.f32.partialorder %v503_v19, 0.0 }
  0xf1   :  { %v553_v37 = vadd.f32 %v552_v36, %v8283_v3  ;;  %v1020_v42 = vsel %vm764_vm3, %v589_v10, %v892_v33  ;;  %v416_v10 = vadd.f32 %v8277_v1, %v8209_v40  ;;  %v899_v0 = vmul.f32 0.1, %v505_v43 }
  0xf2   :  { %v8351_v57 = vpop.f32.mrf.mxu2  ;;  %v8353_v30 = vpop.f32.mrf.mxu0  ;;  %v8365_v53 = vpack.c.bf16 %v1020_v42, %v1016_v61  ;;  %vm771_vm10 = vcmp.ge.f32.partialorder %v505_v43, 0.0  ;;  %v1023_v33 = vsel %vm767_vm8, %v503_v19, %v895_v60  ;;  %v7469_v60 = vld [vmem:[#allocation4 + $0x3ac] sm:$0xf0] }
  0xf3   :  { %v8355_v4 = vpop.f32.mrf.mxu1  ;;  %v975_v47 = vmul.f32 0.1, %v553_v37  ;;  %vm847_vm4 = vcmp.ge.f32.partialorder %v553_v37, 0.0  ;;  %v898_v32 = vmul.f32 0.1, %v416_v10  ;;  %vm770_vm7 = vcmp.ge.f32.partialorder %v416_v10, 0.0 }
  0xf4   :  { %11295 = vst [vmem:[#allocation13_spill] sm:$0xff] %v8365_v53  ;;  %v1027_v50 = vsel %vm771_vm10, %v505_v43, %v899_v0  ;;  %v597_v43 = vadd.f32 %v8313_v31, %v8292_v17 }
  0xf5   :  { %v1103_v21 = vsel %vm847_vm4, %v553_v37, %v975_v47  ;;  %v1026_v8 = vsel %vm770_vm7, %v416_v10, %v898_v32  ;;  %v1024_v37 = vsel %vm768_vm9, %v592_v28, %v896_v26  ;;  %v8401_v47 = vpack.c.bf16 %v1027_v50, %v1023_v33 }
  0xf6   :  { %v904_v0 = vmul.f32 0.1, %v597_v43  ;;  %vm776_vm1 = vcmp.ge.f32.partialorder %v597_v43, 0.0 }
  0xf7   :  { %11298 = vst [vmem:[#allocation16_spill] sm:$0xff] %v8401_v47 }
  0xf8   :  { %v554_v45 = vpop.f32.mrf.mxu3 }
  0xf9   :  { %v555_v49 = vadd.f32 %v554_v45, %v8283_v3 }
  0xfa   :  { %v8361_v51 = vpop.f32.mrf.mxu2  ;;  %v8367_v14 = vpop.f32.mrf.mxu0 }
  0xfb   :  { %vm851_vm5 = vcmp.ge.f32.partialorder %v555_v49, 0.0  ;;  %v979_v5 = vmul.f32 0.1, %v555_v49  ;;  %v8369_v6 = vpop.f32.mrf.mxu1 }
  0xfd   :  { %v1107_v22 = vsel %vm851_vm5, %v555_v49, %v979_v5  ;;  %674 = vmatmul.bf16.gmra.mxu3 %v8108_v12  ;;  %1988 = vmatmul.bf16.gmra.mxu0 %v8358_v46  ;;  %v594_v12 = vadd.f32 %v8286_v9, %v8292_v17  ;;  %v1022_v9 = vsel %vm766_vm6, %v414_v11, %v894_v25  ;;  %v6985_v25 = vld [vmem:[#allocation4 + $0x3a0] sm:$0xf] }
  0xfe   :  { %v8381_v36 = vpack.c.bf16 %v1107_v22, %v1103_v21  ;;  %2077 = vmatmul.bf16.gmra.mxu1 %v8363_v7  ;;  %v8396_v61 = vpack.c.bf16 %v1026_v8, %v1022_v9  ;;  %v419_v21 = vadd.f32 %v8294_v18, %v8209_v40  ;;  %v508_v22 = vadd.f32 %v8296_v20, %v8283_v3 }
  0xff   :  { %2166 = vmatmul.bf16.gmra.mxu2 %v8365_v53  ;;  %v900_v35 = vmul.f32 0.1, %v594_v12  ;;  %vm772_vm11 = vcmp.ge.f32.partialorder %v594_v12, 0.0  ;;  %v510_v18 = vadd.f32 %v8317_v41, %v8283_v3  ;;  %v6986_v32 = vor.u32 %v7469_v60, %v6985_v25 }
 0x100   :  { %11296 = vst [vmem:[#allocation14_spill] sm:$0xff] %v8381_v36  ;;  %v557_v48 = vpop.f32.mrf.mxu3  ;;  %v902_v26 = vmul.f32 0.1, %v419_v21  ;;  %vm774_vm14 = vcmp.ge.f32.partialorder %v419_v21, 0.0  ;;  %vm775_vm0 = vcmp.ge.f32.partialorder %v508_v22, 0.0 }
 0x101   :  { %v558_v63 = vadd.f32 %v557_v48, %v8283_v3  ;;  %v1028_v56 = vsel %vm772_vm11, %v594_v12, %v900_v35  ;;  %11297 = vst [vmem:[#allocation15_spill] sm:$0xff] %v8396_v61  ;;  %v421_v12 = vadd.f32 %v8315_v38, %v8209_v40  ;;  %v903_v38 = vmul.f32 0.1, %v508_v22  ;;  %2244 = vmatpush.bf16.msra.mxu3 %v6986_v32 }
 0x102   :  { %v8389_v34 = vpop.f32.mrf.mxu2  ;;  %v8391_v1 = vpop.f32.mrf.mxu0  ;;  %v8403_v49 = vpack.c.bf16 %v1028_v56, %v1024_v37  ;;  %v907_v9 = vmul.f32 0.1, %v510_v18  ;;  %vm779_vm2 = vcmp.ge.f32.partialorder %v510_v18, 0.0  ;;  %v1030_v33 = vsel %vm774_vm14, %v419_v21, %v902_v26 }
 0x103   :  { %v8393_v29 = vpop.f32.mrf.mxu1  ;;  %v983_v23 = vmul.f32 0.1, %v558_v63  ;;  %vm855_vm12 = vcmp.ge.f32.partialorder %v558_v63, 0.0  ;;  %v906_v35 = vmul.f32 0.1, %v421_v12  ;;  %vm778_vm15 = vcmp.ge.f32.partialorder %v421_v12, 0.0 }
 0x104   :  { %11299 = vst [vmem:[#allocation17_spill] sm:$0xff] %v8403_v49  ;;  %v1031_v50 = vsel %vm775_vm0, %v508_v22, %v903_v38  ;;  %v1032_v56 = vsel %vm776_vm1, %v597_v43, %v904_v0  ;;  %v424_v43 = vadd.f32 %v8329_v62, %v8209_v40  ;;  %v602_v26 = vadd.f32 %v8351_v57, %v8292_v17 }
 0x105   :  { %v1111_v28 = vsel %vm855_vm12, %v558_v63, %v983_v23  ;;  %v1034_v37 = vsel %vm778_vm15, %v421_v12, %v906_v35  ;;  %v513_v12 = vadd.f32 %v8331_v2, %v8283_v3  ;;  %v426_v38 = vadd.f32 %v8353_v30, %v8209_v40 }
 0x106   :  { %v515_v62 = vadd.f32 %v8355_v4, %v8283_v3  ;;  %v910_v35 = vmul.f32 0.1, %v424_v43  ;;  %vm782_vm6 = vcmp.ge.f32.partialorder %v424_v43, 0.0  ;;  %vm784_vm9 = vcmp.ge.f32.partialorder %v602_v26, 0.0 }
 0x107   :  { %v911_v57 = vmul.f32 0.1, %v513_v12  ;;  %vm786_vm7 = vcmp.ge.f32.partialorder %v426_v38, 0.0  ;;  %vm783_vm8 = vcmp.ge.f32.partialorder %v513_v12, 0.0 }
 0x108   :  { %v559_v39 = vpop.f32.mrf.mxu3  ;;  %vm787_vm10 = vcmp.ge.f32.partialorder %v515_v62, 0.0 }
 0x109   :  { %v560_v42 = vadd.f32 %v559_v39, %v8283_v3  ;;  %v1035_v39 = vsel %vm779_vm2, %v510_v18, %v907_v9 }
 0x10a   :  { %v8399_v45 = vpop.f32.mrf.mxu2  ;;  %v8405_v5 = vpop.f32.mrf.mxu0  ;;  %v8439_v60 = vpack.c.bf16 %v1035_v39, %v1031_v50  ;;  %v1039_v39 = vsel %vm783_vm8, %v513_v12, %v911_v57  ;;  %v431_v57 = vadd.f32 %v8391_v1, %v8209_v40 }
 0x10b   :  { %vm859_vm13 = vcmp.ge.f32.partialorder %v560_v42, 0.0  ;;  %v987_v11 = vmul.f32 0.1, %v560_v42  ;;  %v8407_v19 = vpop.f32.mrf.mxu1 }
 0x10c   :  { %11301 = vst [vmem:[#allocation19_spill] sm:$0xff] %v8439_v60  ;;  %vm794_vm15 = vcmp.ge.f32.partialorder %v431_v57, 0.0 }
 0x10d   :  { %v1115_v10 = vsel %vm859_vm13, %v560_v42, %v987_v11  ;;  %679 = vmatmul.bf16.gmra.mxu3 %v8122_v13  ;;  %1993 = vmatmul.bf16.gmra.mxu0 %v8396_v61  ;;  %v599_v13 = vadd.f32 %v8323_v55, %v8292_v17  ;;  %v8434_v11 = vpack.c.bf16 %v1034_v37, %v1030_v33  ;;  %v915_v33 = vmul.f32 0.1, %v515_v62 }
 0x10e   :  { %v8419_v48 = vpack.c.bf16 %v1115_v10, %v1111_v28  ;;  %2082 = vmatmul.bf16.gmra.mxu1 %v8401_v47 }
 0x10f   :  { %2171 = vmatmul.bf16.gmra.mxu2 %v8403_v49  ;;  %v908_v8 = vmul.f32 0.1, %v599_v13  ;;  %vm780_vm3 = vcmp.ge.f32.partialorder %v599_v13, 0.0  ;;  %11300 = vst [vmem:[#allocation18_spill] sm:$0xff] %v8434_v11 }
 0x110   :  { %v562_v20 = vpop.f32.mrf.mxu3 }
 0x111   :  { %v563_v55 = vadd.f32 %v562_v20, %v8283_v3  ;;  %v1036_v23 = vsel %vm780_vm3, %v599_v13, %v908_v8  ;;  %v912_v8 = vmul.f32 0.1, %v602_v26 }
 0x112   :  { %v8427_v31 = vpop.f32.mrf.mxu2  ;;  %v8429_v63 = vpop.f32.mrf.mxu0  ;;  %v8441_v32 = vpack.c.bf16 %v1036_v23, %v1032_v56 }
 0x113   :  { %v8431_v41 = vpop.f32.mrf.mxu1  ;;  %v991_v28 = vmul.f32 0.1, %v563_v55  ;;  %vm863_vm4 = vcmp.ge.f32.partialorder %v563_v55, 0.0  ;;  %v1040_v23 = vsel %vm784_vm9, %v602_v26, %v912_v8  ;;  %v429_v26 = vadd.f32 %v8367_v14, %v8209_v40 }
 0x114   :  { %11302 = vst [vmem:[#allocation20_spill] sm:$0xff] %v8441_v32  ;;  %v520_v14 = vadd.f32 %v8393_v29, %v8283_v3 }
 0x115   :  { %v1119_v18 = vsel %vm863_vm4, %v563_v55, %v991_v28  ;;  %v914_v55 = vmul.f32 0.1, %v426_v38  ;;  %vm790_vm14 = vcmp.ge.f32.partialorder %v429_v26, 0.0 }
 0x116   :  { %vm795_vm2 = vcmp.ge.f32.partialorder %v520_v14, 0.0 }
 0x117   :  { %v1042_v56 = vsel %vm786_vm7, %v426_v38, %v914_v55  ;;  %v518_v38 = vadd.f32 %v8369_v6, %v8283_v3  ;;  %v6969_v55 = vld [vmem:[#allocation4 + $0x380] sm:$0xf] }
 0x118   :  { %v564_v42 = vpop.f32.mrf.mxu3 }
 0x119   :  { %v565_v10 = vadd.f32 %v564_v42, %v8283_v3  ;;  %v1043_v42 = vsel %vm787_vm10, %v515_v62, %v915_v33  ;;  %v7465_v33 = vld [vmem:[#allocation4 + $0x38c] sm:$0xf0]  ;;  %v919_v1 = vmul.f32 0.1, %v518_v38  ;;  %vm791_vm0 = vcmp.ge.f32.partialorder %v518_v38, 0.0 }
 0x11a   :  { %v8437_v25 = vpop.f32.mrf.mxu2  ;;  %v8443_v20 = vpop.f32.mrf.mxu0 }
 0x11b   :  { %vm867_vm5 = vcmp.ge.f32.partialorder %v565_v10, 0.0  ;;  %v995_v21 = vmul.f32 0.1, %v565_v10  ;;  %v8445_v22 = vpop.f32.mrf.mxu1 }
 0x11d   :  { %v1123_v13 = vsel %vm867_vm5, %v565_v10, %v995_v21  ;;  %684 = vmatmul.bf16.gmra.mxu3 %v8140_v15  ;;  %1998 = vmatmul.bf16.gmra.mxu0 %v8434_v11  ;;  %v604_v15 = vadd.f32 %v8361_v51, %v8292_v17  ;;  %v1038_v51 = vsel %vm782_vm6, %v424_v43, %v910_v35 }
 0x11e   :  { %v8457_v0 = vpack.c.bf16 %v1123_v13, %v1119_v18  ;;  %2087 = vmatmul.bf16.gmra.mxu1 %v8439_v60  ;;  %v8472_v21 = vpack.c.bf16 %v1042_v56, %v1038_v51  ;;  %v8477_v60 = vpack.c.bf16 %v1043_v42, %v1039_v39  ;;  %v607_v35 = vadd.f32 %v8389_v34, %v8292_v17 }
 0x11f   :  { %2176 = vmatmul.bf16.gmra.mxu2 %v8441_v32  ;;  %v916_v37 = vmul.f32 0.1, %v604_v15  ;;  %vm788_vm11 = vcmp.ge.f32.partialorder %v604_v15, 0.0  ;;  %v922_v56 = vmul.f32 0.1, %v431_v57 }
 0x120   :  { %v567_v2 = vpop.f32.mrf.mxu3  ;;  %11303 = vst [vmem:[#allocation21_spill] sm:$0xff] %v8472_v21  ;;  %v920_v51 = vmul.f32 0.1, %v607_v35  ;;  %vm792_vm1 = vcmp.ge.f32.partialorder %v607_v35, 0.0 }
 0x121   :  { %v568_v4 = vadd.f32 %v567_v2, %v8283_v3  ;;  %v1044_v28 = vsel %vm788_vm11, %v604_v15, %v916_v37  ;;  %11304 = vst [vmem:[#allocation22_spill] sm:$0xff] %v8477_v60  ;;  %v918_v37 = vmul.f32 0.1, %v429_v26 }
 0x122   :  { %v8465_v9 = vpop.f32.mrf.mxu2  ;;  %v8467_v30 = vpop.f32.mrf.mxu0  ;;  %v8479_v11 = vpack.c.bf16 %v1044_v28, %v1040_v23  ;;  %v923_v23 = vmul.f32 0.1, %v520_v14 }
 0x123   :  { %v8469_v50 = vpop.f32.mrf.mxu1  ;;  %v999_v18 = vmul.f32 0.1, %v568_v4  ;;  %vm871_vm12 = vcmp.ge.f32.partialorder %v568_v4, 0.0  ;;  %v1046_v28 = vsel %vm790_vm14, %v429_v26, %v918_v37  ;;  %v7760_v37 = vld [vmem:[%s11135_s0 + $0x28] sm:$0xff] }
 0x124   :  { %11305 = vst [vmem:[#allocation23_spill] sm:$0xff] %v8479_v11 }
 0x125   :  { %v1127_v62 = vsel %vm871_vm12, %v568_v4, %v999_v18  ;;  %v6970_v4 = vor.u32 %v7465_v33, %v6969_v55  ;;  %v1047_v18 = vsel %vm791_vm0, %v518_v38, %v919_v1  ;;  %v612_v1 = vadd.f32 %v8427_v31, %v8292_v17 }
 0x127   :  { %2245 = vmatpush.bf16.msra.mxu3 %v6970_v4  ;;  %vm800_vm9 = vcmp.ge.f32.partialorder %v612_v1, 0.0 }
 0x128   :  { %v569_v10 = vpop.f32.mrf.mxu3 }
 0x129   :  { %v570_v13 = vadd.f32 %v569_v10, %v8283_v3  ;;  %v1050_v10 = vsel %vm794_vm15, %v431_v57, %v922_v56  ;;  %v523_v57 = vadd.f32 %v8407_v19, %v8283_v3  ;;  %v614_v19 = vadd.f32 %v8437_v25, %v8292_v17 }
 0x12a   :  { %v8475_v32 = vpop.f32.mrf.mxu2  ;;  %v8481_v2 = vpop.f32.mrf.mxu0  ;;  %v8510_v55 = vpack.c.bf16 %v1050_v10, %v1046_v28  ;;  %v928_v28 = vmul.f32 0.1, %v612_v1 }
 0x12b   :  { %vm875_vm13 = vcmp.ge.f32.partialorder %v570_v13, 0.0  ;;  %v1003_v43 = vmul.f32 0.1, %v570_v13  ;;  %v8483_v12 = vpop.f32.mrf.mxu1  ;;  %v927_v31 = vmul.f32 0.1, %v523_v57  ;;  %vm799_vm8 = vcmp.ge.f32.partialorder %v523_v57, 0.0 }
 0x12c   :  { %11306 = vst [vmem:[#allocation24_spill] sm:$0xff] %v8510_v55  ;;  %vm804_vm11 = vcmp.ge.f32.partialorder %v614_v19, 0.0 }
 0x12d   :  { %v1131_v15 = vsel %vm875_vm13, %v570_v13, %v1003_v43  ;;  %689 = vmatmul.bf16.gmra.mxu3 %v8156_v16  ;;  %2003 = vmatmul.bf16.gmra.mxu0 %v8472_v21  ;;  %v609_v16 = vadd.f32 %v8399_v45, %v8292_v17  ;;  %v1048_v13 = vsel %vm792_vm1, %v607_v35, %v920_v51 }
 0x12e   :  { %v8495_v8 = vpack.c.bf16 %v1131_v15, %v1127_v62  ;;  %2092 = vmatmul.bf16.gmra.mxu1 %v8477_v60  ;;  %v1051_v43 = vsel %vm795_vm2, %v520_v14, %v923_v23  ;;  %v434_v35 = vadd.f32 %v8405_v5, %v8209_v40  ;;  %v436_v51 = vadd.f32 %v8429_v63, %v8209_v40 }
 0x12f   :  { %2181 = vmatmul.bf16.gmra.mxu2 %v8479_v11  ;;  %v924_v42 = vmul.f32 0.1, %v609_v16  ;;  %vm796_vm3 = vcmp.ge.f32.partialorder %v609_v16, 0.0  ;;  %v8515_v60 = vpack.c.bf16 %v1051_v43, %v1047_v18  ;;  %v525_v5 = vadd.f32 %v8431_v41, %v8283_v3 }
 0x130   :  { %v641_v6 = vpop.f32.mrf.mxu3  ;;  %v930_v10 = vmul.f32 0.1, %v436_v51  ;;  %vm798_vm6 = vcmp.ge.f32.partialorder %v434_v35, 0.0  ;;  %vm802_vm7 = vcmp.ge.f32.partialorder %v436_v51, 0.0 }
 0x131   :  { %v642_v45 = vadd.f32 %v641_v6, %v8292_v17  ;;  %v1052_v62 = vsel %vm796_vm3, %v609_v16, %v924_v42  ;;  %11307 = vst [vmem:[#allocation25_spill] sm:$0xff] %v8515_v60  ;;  %v926_v42 = vmul.f32 0.1, %v434_v35  ;;  %v931_v18 = vmul.f32 0.1, %v525_v5 }
 0x132   :  { %v8503_v34 = vpop.f32.mrf.mxu2  ;;  %v8505_v39 = vpop.f32.mrf.mxu0  ;;  %v8517_v21 = vpack.c.bf16 %v1052_v62, %v1048_v13  ;;  %v932_v13 = vmul.f32 0.1, %v614_v19  ;;  %vm803_vm10 = vcmp.ge.f32.partialorder %v525_v5, 0.0  ;;  %v1058_v62 = vsel %vm802_vm7, %v436_v51, %v930_v10 }
 0x133   :  { %v8507_v29 = vpop.f32.mrf.mxu1  ;;  %v976_v33 = vmul.f32 0.1, %v642_v45  ;;  %vm848_vm4 = vcmp.ge.f32.partialorder %v642_v45, 0.0  ;;  %v1054_v25 = vsel %vm798_vm6, %v434_v35, %v926_v42  ;;  %v528_v51 = vadd.f32 %v8445_v22, %v8283_v3  ;;  %v7761_v42 = vld [vmem:[%s11135_s0 + $0x30] sm:$0xff]  ;;  %v6953_v22 = vld [vmem:[#allocation4 + $0x360] sm:$0xf] }
 0x134   :  { %11308 = vst [vmem:[#allocation26_spill] sm:$0xff] %v8517_v21 }
 0x135   :  { %v1104_v14 = vsel %vm848_vm4, %v642_v45, %v976_v33  ;;  %v1056_v33 = vsel %vm800_vm9, %v612_v1, %v928_v28  ;;  %v439_v1 = vadd.f32 %v8443_v20, %v8209_v40  ;;  %v441_v28 = vadd.f32 %v8467_v30, %v8209_v40 }
 0x136   :  { %v619_v20 = vadd.f32 %v8475_v32, %v8292_v17  ;;  %v935_v30 = vmul.f32 0.1, %v528_v51  ;;  %vm807_vm0 = vcmp.ge.f32.partialorder %v528_v51, 0.0 }
 0x137   :  { %vm806_vm14 = vcmp.ge.f32.partialorder %v439_v1, 0.0  ;;  %vm810_vm15 = vcmp.ge.f32.partialorder %v441_v28, 0.0 }
 0x138   :  { %v643_v15 = vpop.f32.mrf.mxu3  ;;  %vm812_vm3 = vcmp.ge.f32.partialorder %v619_v20, 0.0 }
 0x139   :  { %v644_v4 = vadd.f32 %v643_v15, %v8292_v17  ;;  %v1055_v15 = vsel %vm799_vm8, %v523_v57, %v927_v31  ;;  %v617_v31 = vadd.f32 %v8465_v9, %v8292_v17  ;;  %v934_v9 = vmul.f32 0.1, %v439_v1 }
 0x13a   :  { %v8512_v11 = vpop.f32.mrf.mxu2  ;;  %v8519_v6 = vpop.f32.mrf.mxu0 }
 0x13b   :  { %vm852_vm5 = vcmp.ge.f32.partialorder %v644_v4, 0.0  ;;  %v980_v26 = vmul.f32 0.1, %v644_v4  ;;  %v8521_v38 = vpop.f32.mrf.mxu1  ;;  %vm808_vm1 = vcmp.ge.f32.partialorder %v617_v31, 0.0 }
 0x13d   :  { %v1108_v16 = vsel %vm852_vm5, %v644_v4, %v980_v26  ;;  %694 = vmatmul.bf16.gmra.mxu3 %v7760_v37  ;;  %2008 = vmatmul.bf16.gmra.mxu0 %v8510_v55  ;;  %v1059_v4 = vsel %vm803_vm10, %v525_v5, %v931_v18  ;;  %v1060_v26 = vsel %vm804_vm11, %v614_v19, %v932_v13  ;;  %v7461_v18 = vld [vmem:[#allocation4 + $0x36c] sm:$0xf0] }
 0x13e   :  { %v8535_v56 = vpack.c.bf16 %v1108_v16, %v1104_v14  ;;  %2097 = vmatmul.bf16.gmra.mxu1 %v8515_v60  ;;  %v8550_v16 = vpack.c.bf16 %v1058_v62, %v1054_v25  ;;  %v8555_v55 = vpack.c.bf16 %v1059_v4, %v1055_v15  ;;  %v8557_v49 = vpack.c.bf16 %v1060_v26, %v1056_v33 }
 0x13f   :  { %2186 = vmatmul.bf16.gmra.mxu2 %v8517_v21  ;;  %v936_v62 = vmul.f32 0.1, %v617_v31  ;;  %v938_v15 = vmul.f32 0.1, %v441_v28 }
 0x140   :  { %11309 = vst [vmem:[#allocation27_spill] sm:$0xff] %v8535_v56  ;;  %v646_v23 = vpop.f32.mrf.mxu3 }
 0x141   :  { %v647_v41 = vadd.f32 %v646_v23, %v8292_v17  ;;  %11310 = vst [vmem:[#allocation28_spill] sm:$0xff] %v8550_v16 }
 0x142   :  { %v8543_v45 = vpop.f32.mrf.mxu2  ;;  %v8545_v63 = vpop.f32.mrf.mxu0  ;;  %11311 = vst [vmem:[#allocation29_spill] sm:$0xff] %v8555_v55 }
 0x143   :  { %v8547_v43 = vpop.f32.mrf.mxu1  ;;  %v984_v37 = vmul.f32 0.1, %v647_v41  ;;  %11312 = vst [vmem:[#allocation30_spill] sm:$0xff] %v8557_v49  ;;  %vm856_vm12 = vcmp.ge.f32.partialorder %v647_v41, 0.0 }
 0x145   :  { %v1112_v5 = vsel %vm856_vm12, %v647_v41, %v984_v37  ;;  %v6954_v41 = vor.u32 %v7461_v18, %v6953_v22  ;;  %v1066_v37 = vsel %vm810_vm15, %v441_v28, %v938_v15  ;;  %v533_v28 = vadd.f32 %v8483_v12, %v8283_v3 }
 0x146   :  { %v624_v12 = vadd.f32 %v8512_v11, %v8292_v17 }
 0x147   :  { %2246 = vmatpush.bf16.msra.mxu3 %v6954_v41  ;;  %vm815_vm8 = vcmp.ge.f32.partialorder %v533_v28, 0.0 }
 0x148   :  { %v648_v14 = vpop.f32.mrf.mxu3  ;;  %vm820_vm11 = vcmp.ge.f32.partialorder %v624_v12, 0.0 }
 0x149   :  { %v649_v60 = vadd.f32 %v648_v14, %v8292_v17  ;;  %v1062_v14 = vsel %vm806_vm14, %v439_v1, %v934_v9  ;;  %v7762_v9 = vld [vmem:[%s11135_s0 + $0x38] sm:$0xff] }
 0x14a   :  { %v8552_v21 = vpop.f32.mrf.mxu2  ;;  %v8559_v23 = vpop.f32.mrf.mxu0  ;;  %v8590_v18 = vpack.c.bf16 %v1066_v37, %v1062_v14 }
 0x14b   :  { %vm860_vm13 = vcmp.ge.f32.partialorder %v649_v60, 0.0  ;;  %v988_v35 = vmul.f32 0.1, %v649_v60  ;;  %v8561_v57 = vpop.f32.mrf.mxu1 }
 0x14c   :  { %11313 = vst [vmem:[#allocation31_spill] sm:$0xff] %v8590_v18 }
 0x14d   :  { %v1116_v19 = vsel %vm860_vm13, %v649_v60, %v988_v35  ;;  %699 = vmatmul.bf16.gmra.mxu3 %v7761_v42  ;;  %2013 = vmatmul.bf16.gmra.mxu0 %v8550_v16  ;;  %v530_v60 = vadd.f32 %v8469_v50, %v8283_v3  ;;  %v940_v50 = vmul.f32 0.1, %v619_v20  ;;  %v1063_v35 = vsel %vm807_vm0, %v528_v51, %v935_v30 }
 0x14e   :  { %v8575_v10 = vpack.c.bf16 %v1116_v19, %v1112_v5  ;;  %2102 = vmatmul.bf16.gmra.mxu1 %v8555_v55  ;;  %v1064_v5 = vsel %vm808_vm1, %v617_v31, %v936_v62  ;;  %v444_v31 = vadd.f32 %v8481_v2, %v8209_v40  ;;  %v622_v30 = vadd.f32 %v8503_v34, %v8292_v17 }
 0x14f   :  { %2191 = vmatmul.bf16.gmra.mxu2 %v8557_v49  ;;  %v939_v4 = vmul.f32 0.1, %v530_v60  ;;  %vm811_vm2 = vcmp.ge.f32.partialorder %v530_v60, 0.0  ;;  %v1068_v42 = vsel %vm812_vm3, %v619_v20, %v940_v50  ;;  %v446_v62 = vadd.f32 %v8505_v39, %v8209_v40 }
 0x150   :  { %v651_v13 = vpop.f32.mrf.mxu3  ;;  %v8597_v47 = vpack.c.bf16 %v1068_v42, %v1064_v5  ;;  %v535_v2 = vadd.f32 %v8507_v29, %v8283_v3  ;;  %v943_v34 = vmul.f32 0.1, %v533_v28  ;;  %vm814_vm6 = vcmp.ge.f32.partialorder %v444_v31, 0.0  ;;  %v93_v42 = vld [vmem:[#allocation2 + $0x4] sm:$0xf] }
 0x151   :  { %v652_v32 = vadd.f32 %v651_v13, %v8292_v17  ;;  %v1067_v19 = vsel %vm811_vm2, %v530_v60, %v939_v4  ;;  %v942_v4 = vmul.f32 0.1, %v444_v31  ;;  %v946_v14 = vmul.f32 0.1, %v446_v62 }
 0x152   :  { %v8583_v25 = vpop.f32.mrf.mxu2  ;;  %v8585_v33 = vpop.f32.mrf.mxu0  ;;  %v8595_v16 = vpack.c.bf16 %v1067_v19, %v1063_v35  ;;  %11315 = vst [vmem:[#allocation33_spill] sm:$0xff] %v8597_v47  ;;  %vm818_vm7 = vcmp.ge.f32.partialorder %v446_v62, 0.0  ;;  %v947_v37 = vmul.f32 0.1, %v535_v2  ;;  %v948_v35 = vmul.f32 0.1, %v624_v12 }
 0x153   :  { %v8587_v26 = vpop.f32.mrf.mxu1  ;;  %v992_v41 = vmul.f32 0.1, %v652_v32  ;;  %vm864_vm4 = vcmp.ge.f32.partialorder %v652_v32, 0.0  ;;  %vm816_vm9 = vcmp.ge.f32.partialorder %v622_v30, 0.0  ;;  %vm819_vm10 = vcmp.ge.f32.partialorder %v535_v2, 0.0 }
 0x154   :  { %11314 = vst [vmem:[#allocation32_spill] sm:$0xff] %v8595_v16  ;;  %v1070_v29 = vsel %vm814_vm6, %v444_v31, %v942_v4  ;;  %v1074_v19 = vsel %vm818_vm7, %v446_v62, %v946_v14  ;;  %v8635_v61 = vperm.slane %v93_v42, 0  ;;  %v7763_v14 = vld [vmem:[%s11135_s0 + $0x40] sm:$0xff] }
 0x155   :  { %v1120_v60 = vsel %vm864_vm4, %v652_v32, %v992_v41  ;;  %v944_v32 = vmul.f32 0.1, %v622_v30  ;;  %v7764_v42 = vld [vmem:[#allocation2] sm:$0xf] }
 0x157   :  { %v1072_v41 = vsel %vm816_vm9, %v622_v30, %v944_v32 }
 0x158   :  { %v653_v22 = vpop.f32.mrf.mxu3 }
 0x159   :  { %v654_v55 = vadd.f32 %v653_v22, %v8292_v17  ;;  %v1071_v22 = vsel %vm815_vm8, %v533_v28, %v943_v34 }
 0x15a   :  { %v8592_v49 = vpop.f32.mrf.mxu2  ;;  %v8599_v13 = vpop.f32.mrf.mxu0 }
 0x15b   :  { %vm868_vm5 = vcmp.ge.f32.partialorder %v654_v55, 0.0  ;;  %v996_v1 = vmul.f32 0.1, %v654_v55  ;;  %v8601_v51 = vpop.f32.mrf.mxu1 }
 0x15d   :  { %v1124_v20 = vsel %vm868_vm5, %v654_v55, %v996_v1  ;;  %704 = vmatmul.bf16.gmra.mxu3 %v7762_v9  ;;  %2018 = vmatmul.bf16.gmra.mxu0 %v8590_v18  ;;  %v1075_v1 = vsel %vm819_vm10, %v535_v2, %v947_v37  ;;  %v8630_v9 = vpack.c.bf16 %v1074_v19, %v1070_v29 }
 0x15e   :  { %v8615_v15 = vpack.c.bf16 %v1124_v20, %v1120_v60  ;;  %2107 = vmatmul.bf16.gmra.mxu1 %v8595_v16  ;;  %v1076_v60 = vsel %vm820_vm11, %v624_v12, %v948_v35  ;;  %v8637_v53 = vpack.c.bf16 %v1075_v1, %v1071_v22  ;;  %v449_v2 = vadd.f32 %v8519_v6, %v8209_v40 }
 0x15f   :  { %2196 = vmatmul.bf16.gmra.mxu2 %v8597_v47  ;;  %11316 = vst [vmem:[#allocation34_spill] sm:$0xff] %v8630_v9  ;;  %v538_v12 = vadd.f32 %v8521_v38, %v8283_v3  ;;  %v627_v37 = vadd.f32 %v8543_v45, %v8292_v17  ;;  %v451_v35 = vadd.f32 %v8545_v63, %v8209_v40  ;;  %v7457_v38 = vld [vmem:[#allocation4 + $0x34c] sm:$0xf0]  ;;  %v8662_v63 = vperm.slane %v7764_v42, 3 }
 0x160   :  { %v656_v55 = vpop.f32.mrf.mxu3  ;;  %11317 = vst [vmem:[#allocation35_spill] sm:$0xff] %v8637_v53  ;;  %vm822_vm14 = vcmp.ge.f32.partialorder %v449_v2, 0.0  ;;  %v950_v45 = vmul.f32 0.1, %v449_v2 }
 0x161   :  { %v657_v11 = vadd.f32 %v656_v55, %v8292_v17  ;;  %v8639_v55 = vpack.c.bf16 %v1076_v60, %v1072_v41  ;;  %v951_v41 = vmul.f32 0.1, %v538_v12  ;;  %v952_v1 = vmul.f32 0.1, %v627_v37 }
 0x162   :  { %v8623_v50 = vpop.f32.mrf.mxu2  ;;  %v8625_v39 = vpop.f32.mrf.mxu0  ;;  %v954_v60 = vmul.f32 0.1, %v451_v35  ;;  %vm826_vm15 = vcmp.ge.f32.partialorder %v451_v35, 0.0  ;;  %vm823_vm0 = vcmp.ge.f32.partialorder %v538_v12, 0.0  ;;  %vm824_vm1 = vcmp.ge.f32.partialorder %v627_v37, 0.0 }
 0x163   :  { %v8627_v5 = vpop.f32.mrf.mxu1  ;;  %v1000_v47 = vmul.f32 0.1, %v657_v11  ;;  %11318 = vst [vmem:[#allocation36_spill] sm:$0xff] %v8639_v55  ;;  %vm872_vm12 = vcmp.ge.f32.partialorder %v657_v11, 0.0 }
 0x165   :  { %v1128_v4 = vsel %vm872_vm12, %v657_v11, %v1000_v47  ;;  %v6937_v47 = vld [vmem:[#allocation4 + $0x340] sm:$0xf]  ;;  %v629_v11 = vadd.f32 %v8552_v21, %v8292_v17 }
 0x166   :  { %v6938_v29 = vor.u32 %v7457_v38, %v6937_v47  ;;  %v1079_v47 = vsel %vm823_vm0, %v538_v12, %v951_v41 }
 0x167   :  { %vm828_vm3 = vcmp.ge.f32.partialorder %v629_v11, 0.0 }
 0x168   :  { %v658_v20 = vpop.f32.mrf.mxu3  ;;  %2247 = vmatpush.bf16.msra.mxu3 %v6938_v29 }
 0x169   :  { %v659_v18 = vadd.f32 %v658_v20, %v8292_v17 }
 0x16a   :  { %v8632_v16 = vpop.f32.mrf.mxu2  ;;  %v1984_v31 = vpop.f32.mrf.mxu0 }
 0x16b   :  { %vm876_vm13 = vcmp.ge.f32.partialorder %v659_v18, 0.0  ;;  %v1004_v28 = vmul.f32 0.1, %v659_v18  ;;  %v1985_v30 = vadd.f32 %v1984_v31, %v8635_v61  ;;  %v2073_v62 = vpop.f32.mrf.mxu1 }
 0x16d   :  { %v1132_v34 = vsel %vm876_vm13, %v659_v18, %v1004_v28  ;;  %v2074_v32 = vadd.f32 %v2073_v62, %v1985_v30  ;;  %709 = vmatmul.bf16.gmra.mxu3 %v7763_v14  ;;  %2023 = vmatmul.bf16.gmra.mxu0 %v8630_v9  ;;  %v540_v18 = vadd.f32 %v8547_v43, %v8283_v3  ;;  %v956_v28 = vmul.f32 0.1, %v629_v11 }
 0x16e   :  { %v8654_v6 = vpack.c.bf16 %v1132_v34, %v1128_v4  ;;  %2112 = vmatmul.bf16.gmra.mxu1 %v8637_v53  ;;  %v1078_v34 = vsel %vm822_vm14, %v449_v2, %v950_v45  ;;  %v1082_v14 = vsel %vm826_vm15, %v451_v35, %v954_v60  ;;  %v632_v60 = vadd.f32 %v8583_v25, %v8292_v17 }
 0x16f   :  { %2201 = vmatmul.bf16.gmra.mxu2 %v8639_v55  ;;  %v955_v43 = vmul.f32 0.1, %v540_v18  ;;  %vm827_vm2 = vcmp.ge.f32.partialorder %v540_v18, 0.0  ;;  %v1084_v29 = vsel %vm828_vm3, %v629_v11, %v956_v28  ;;  %v543_v11 = vadd.f32 %v8561_v57, %v8283_v3 }
 0x170   :  { %v670_v19 = vpop.f32.mrf.mxu3  ;;  %v545_v57 = vadd.f32 %v8587_v26, %v8283_v3  ;;  %vm832_vm9 = vcmp.ge.f32.partialorder %v632_v60, 0.0 }
 0x171   :  { %v671_v62 = vadd.f32 %v670_v19, %v8662_v63  ;;  %v1083_v38 = vsel %vm827_vm2, %v540_v18, %v955_v43  ;;  %v454_v18 = vadd.f32 %v8559_v23, %v8209_v40  ;;  %v456_v43 = vadd.f32 %v8585_v33, %v8209_v40 }
 0x172   :  { %v2162_v22 = vpop.f32.mrf.mxu2  ;;  %v1986_v31 = vpop.f32.mrf.mxu0  ;;  %v8672_v53 = vpack.c.bf16 %v1083_v38, %v1079_v47  ;;  %v959_v25 = vmul.f32 0.1, %v543_v11  ;;  %vm831_vm8 = vcmp.ge.f32.partialorder %v543_v11, 0.0  ;;  %vm835_vm10 = vcmp.ge.f32.partialorder %v545_v57, 0.0 }
 0x173   :  { %v8664_v20 = vadd.f32 %v2162_v22, %v2074_v32  ;;  %v1987_v21 = vadd.f32 %v1986_v31, %v8635_v61  ;;  %v2075_v30 = vpop.f32.mrf.mxu1  ;;  %v1080_v32 = vsel %vm824_vm1, %v627_v37, %v952_v1  ;;  %v8669_v22 = vpack.c.bf16 %v1082_v14, %v1078_v34 }
 0x174   :  { %v8674_v9 = vpack.c.bf16 %v1084_v29, %v1080_v32  ;;  %vm753_vm4 = vcmp.ge.f32.partialorder %v671_v62, 0.0  ;;  %vm830_vm6 = vcmp.ge.f32.partialorder %v454_v18, 0.0  ;;  %vm834_vm7 = vcmp.ge.f32.partialorder %v456_v43, 0.0 }
 0x175   :  { %11319 = vst [vmem:[#allocation37_spill] sm:$0xff] %v8664_v20  ;;  %v2076_v4 = vadd.f32 %v2075_v30, %v1987_v21  ;;  %v881_v20 = vmul.f32 0.1, %v671_v62  ;;  %v958_v21 = vmul.f32 0.1, %v454_v18 }
 0x176   :  { %v963_v14 = vmul.f32 0.1, %v545_v57 }
 0x177   :  { %v1009_v45 = vsel %vm753_vm4, %v671_v62, %v881_v20  ;;  %v634_v20 = vadd.f32 %v8592_v49, %v8292_v17  ;;  %v960_v62 = vmul.f32 0.1, %v632_v60  ;;  %v1086_v29 = vsel %vm830_vm6, %v454_v18, %v958_v21 }
 0x178   :  { %v672_v42 = vpop.f32.mrf.mxu3 }
 0x179   :  { %v673_v31 = vadd.f32 %v672_v42, %v8662_v63  ;;  %v964_v47 = vmul.f32 0.1, %v634_v20  ;;  %vm836_vm11 = vcmp.ge.f32.partialorder %v634_v20, 0.0 }
 0x17a   :  { %v2164_v55 = vpop.f32.mrf.mxu2  ;;  %v1989_v2 = vpop.f32.mrf.mxu0 }
 0x17b   :  { %v8676_v19 = vadd.f32 %v2164_v55, %v2076_v4  ;;  %vm757_vm5 = vcmp.ge.f32.partialorder %v673_v31, 0.0  ;;  %v885_v12 = vmul.f32 0.1, %v673_v31  ;;  %v1990_v37 = vadd.f32 %v1989_v2, %v8635_v61  ;;  %v2078_v35 = vpop.f32.mrf.mxu1  ;;  %v7765_v55 = vld [vmem:[%s11135_s0 + $0x48] sm:$0xff] }
 0x17c   :  { %v962_v4 = vmul.f32 0.1, %v456_v43  ;;  %v1088_v2 = vsel %vm832_vm9, %v632_v60, %v960_v62 }
 0x17d   :  { %v1013_v41 = vsel %vm757_vm5, %v673_v31, %v885_v12  ;;  %v2079_v1 = vadd.f32 %v2078_v35, %v1990_v37  ;;  %714 = vmatmul.bf16.gmra.mxu3 %v7765_v55  ;;  %2028 = vmatmul.bf16.gmra.mxu0 %v8669_v22  ;;  %v1087_v31 = vsel %vm831_vm8, %v543_v11, %v959_v25 }
 0x17e   :  { %v8691_v23 = vpack.c.bf16 %v1013_v41, %v1009_v45  ;;  %2117 = vmatmul.bf16.gmra.mxu1 %v8672_v53  ;;  %v1090_v42 = vsel %vm834_vm7, %v456_v43, %v962_v4  ;;  %v1091_v12 = vsel %vm835_vm10, %v545_v57, %v963_v14  ;;  %v1092_v37 = vsel %vm836_vm11, %v634_v20, %v964_v47  ;;  %v7766_v4 = vld [vmem:[%s11135_s0 + $0x50] sm:$0xff] }
 0x17f   :  { %2206 = vmatmul.bf16.gmra.mxu2 %v8674_v9  ;;  %v8704_v45 = vpack.c.bf16 %v1090_v42, %v1086_v29  ;;  %v459_v57 = vadd.f32 %v8599_v13, %v8209_v40  ;;  %v548_v20 = vadd.f32 %v8601_v51, %v8283_v3  ;;  %v637_v14 = vadd.f32 %v8623_v50, %v8292_v17  ;;  %v6921_v51 = vld [vmem:[#allocation4 + $0x320] sm:$0xf] }
 0x180   :  { %v675_v28 = vpop.f32.mrf.mxu3  ;;  %v461_v47 = vadd.f32 %v8625_v39, %v8209_v40 }
 0x181   :  { %v676_v49 = vadd.f32 %v675_v28, %v8662_v63  ;;  %vm838_vm14 = vcmp.ge.f32.partialorder %v459_v57, 0.0  ;;  %v966_v50 = vmul.f32 0.1, %v459_v57  ;;  %v967_v40 = vmul.f32 0.1, %v548_v20 }
 0x182   :  { %v2167_v30 = vpop.f32.mrf.mxu2  ;;  %v1991_v34 = vpop.f32.mrf.mxu0  ;;  %v968_v39 = vmul.f32 0.1, %v637_v14  ;;  %vm842_vm15 = vcmp.ge.f32.partialorder %v461_v47, 0.0  ;;  %vm839_vm0 = vcmp.ge.f32.partialorder %v548_v20, 0.0  ;;  %vm840_vm1 = vcmp.ge.f32.partialorder %v637_v14, 0.0 }
 0x183   :  { %v8699_v33 = vadd.f32 %v2167_v30, %v2079_v1  ;;  %v1992_v32 = vadd.f32 %v1991_v34, %v8635_v61  ;;  %v2080_v38 = vpop.f32.mrf.mxu1  ;;  %v889_v41 = vmul.f32 0.1, %v676_v49  ;;  %v8707_v30 = vpack.c.bf16 %v1091_v12, %v1087_v31 }
 0x184   :  { %v8709_v34 = vpack.c.bf16 %v1092_v37, %v1088_v2  ;;  %vm761_vm12 = vcmp.ge.f32.partialorder %v676_v49, 0.0  ;;  %v970_v31 = vmul.f32 0.1, %v461_v47 }
 0x185   :  { %v2081_v26 = vadd.f32 %v2080_v38, %v1992_v32  ;;  %11320 = vst [vmem:[#allocation38_spill] sm:$0xff] %v8707_v30  ;;  %v1017_v21 = vsel %vm761_vm12, %v676_v49, %v889_v41  ;;  %v7453_v32 = vld [vmem:[#allocation4 + $0x32c] sm:$0xf0]  ;;  %v550_v38 = vadd.f32 %v8627_v5, %v8283_v3  ;;  %v639_v49 = vadd.f32 %v8632_v16, %v8292_v17 }
 0x186   :  { %11321 = vst [vmem:[#allocation39_spill] sm:$0xff] %v8709_v34  ;;  %v1094_v41 = vsel %vm838_vm14, %v459_v57, %v966_v50  ;;  %v7767_v50 = vld [vmem:[%s11135_s0 + $0x58] sm:$0xff] }
 0x187   :  { %v971_v37 = vmul.f32 0.1, %v550_v38  ;;  %vm843_vm2 = vcmp.ge.f32.partialorder %v550_v38, 0.0  ;;  %vm844_vm3 = vcmp.ge.f32.partialorder %v639_v49, 0.0 }
 0x188   :  { %v677_v35 = vpop.f32.mrf.mxu3 }
 0x189   :  { %v678_v1 = vadd.f32 %v677_v35, %v8662_v63  ;;  %v972_v35 = vmul.f32 0.1, %v639_v49 }
 0x18a   :  { %v2169_v55 = vpop.f32.mrf.mxu2  ;;  %v1994_v18 = vpop.f32.mrf.mxu0 }
 0x18b   :  { %v8711_v28 = vadd.f32 %v2169_v55, %v2081_v26  ;;  %vm765_vm13 = vcmp.ge.f32.partialorder %v678_v1, 0.0  ;;  %v893_v11 = vmul.f32 0.1, %v678_v1  ;;  %v1995_v60 = vadd.f32 %v1994_v18, %v8635_v61  ;;  %v2083_v43 = vpop.f32.mrf.mxu1 }
 0x18c   :  { %v6922_v26 = vor.u32 %v7453_v32, %v6921_v51  ;;  %v1095_v55 = vsel %vm839_vm0, %v548_v20, %v967_v40  ;;  %v1096_v18 = vsel %vm840_vm1, %v637_v14, %v968_v39 }
 0x18d   :  { %v1021_v25 = vsel %vm765_vm13, %v678_v1, %v893_v11  ;;  %v2084_v62 = vadd.f32 %v2083_v43, %v1995_v60  ;;  %719 = vmatmul.bf16.gmra.mxu3 %v7766_v4  ;;  %2033 = vmatmul.bf16.gmra.mxu0 %v8704_v45  ;;  %v1098_v1 = vsel %vm842_vm15, %v461_v47, %v970_v31 }
 0x18e   :  { %v8726_v13 = vpack.c.bf16 %v1021_v25, %v1017_v21  ;;  %2122 = vmatmul.bf16.gmra.mxu1 %v8707_v30  ;;  %2248 = vmatpush.bf16.msra.mxu3 %v6922_v26  ;;  %v1099_v11 = vsel %vm843_vm2, %v550_v38, %v971_v37  ;;  %v1100_v60 = vsel %vm844_vm3, %v639_v49, %v972_v35 }
 0x18f   :  { %2211 = vmatmul.bf16.gmra.mxu2 %v8709_v34  ;;  %v8739_v21 = vpack.c.bf16 %v1098_v1, %v1094_v41  ;;  %v8742_v51 = vpack.c.bf16 %v1099_v11, %v1095_v55  ;;  %v8744_v32 = vpack.c.bf16 %v1100_v60, %v1096_v18 }
 0x190   :  { %11322 = vst [vmem:[#allocation40_spill] sm:$0xff] %v8726_v13  ;;  %v680_v29 = vpop.f32.mrf.mxu3 }
 0x191   :  { %v681_v17 = vadd.f32 %v680_v29, %v8662_v63  ;;  %11323 = vst [vmem:[#allocation41_spill] sm:$0xff] %v8742_v51 }
 0x192   :  { %v2172_v42 = vpop.f32.mrf.mxu2  ;;  %v1996_v12 = vpop.f32.mrf.mxu0  ;;  %11324 = vst [vmem:[#allocation42_spill] sm:$0xff] %v8744_v32 }
 0x193   :  { %v8734_v2 = vadd.f32 %v2172_v42, %v2084_v62  ;;  %v1997_v3 = vadd.f32 %v1996_v12, %v8635_v61  ;;  %v2085_v5 = vpop.f32.mrf.mxu1  ;;  %v897_v25 = vmul.f32 0.1, %v681_v17  ;;  %vm769_vm4 = vcmp.ge.f32.partialorder %v681_v17, 0.0 }
 0x195   :  { %v2086_v16 = vadd.f32 %v2085_v5, %v1997_v3  ;;  %v1025_v38 = vsel %vm769_vm4, %v681_v17, %v897_v25 }
 0x198   :  { %v682_v43 = vpop.f32.mrf.mxu3 }
 0x199   :  { %v683_v62 = vadd.f32 %v682_v43, %v8662_v63 }
 0x19a   :  { %v2174_v4 = vpop.f32.mrf.mxu2  ;;  %v1999_v57 = vpop.f32.mrf.mxu0 }
 0x19b   :  { %v8746_v26 = vadd.f32 %v2174_v4, %v2086_v16  ;;  %vm773_vm5 = vcmp.ge.f32.partialorder %v683_v62, 0.0  ;;  %v901_v20 = vmul.f32 0.1, %v683_v62  ;;  %v2000_v14 = vadd.f32 %v1999_v57, %v8635_v61  ;;  %v2088_v47 = vpop.f32.mrf.mxu1  ;;  %v6635_v4 = vld [vmem:[#allocation4 + $0xf0] sm:$0xf0] }
 0x19c   :  { %v7411_v57 = vld [vmem:[#allocation4 + $0x1e4] sm:$0xf] }
 0x19d   :  { %v1029_v49 = vsel %vm773_vm5, %v683_v62, %v901_v20  ;;  %v2089_v29 = vadd.f32 %v2088_v47, %v2000_v14  ;;  %724 = vmatmul.bf16.gmra.mxu3 %v7767_v50  ;;  %2038 = vmatmul.bf16.gmra.mxu0 %v8739_v21  ;;  %v7379_v62 = vld [vmem:[#allocation4 + $0xe4] sm:$0xf]  ;;  %v7768_v47 = vld [vmem:[%s11135_s0 + $0x60] sm:$0xff] }
 0x19e   :  { %v8753_v42 = vpack.c.bf16 %v1029_v49, %v1025_v38  ;;  %2127 = vmatmul.bf16.gmra.mxu1 %v8742_v51  ;;  %v6638_v38 = vor.u32 %v7379_v62, %v6635_v4  ;;  %v6763_v49 = vld [vmem:[#allocation4 + $0x1f0] sm:$0xf0] }
 0x19f   :  { %2216 = vmatmul.bf16.gmra.mxu2 %v8744_v32  ;;  %v6891_v50 = vld [vmem:[#allocation4 + $0x2f0] sm:$0xf0] }
 0x1a0   :  { %11325 = vst [vmem:[#allocation43_spill] sm:$0xff] %v8753_v42  ;;  %v685_v40 = vpop.f32.mrf.mxu3  ;;  %2331 = vmatpush.bf16.msra.mxu0 %v6638_v38 }
 0x1a1   :  { %v686_v3 = vadd.f32 %v685_v40, %v8662_v63 }
 0x1a2   :  { %v2177_v39 = vpop.f32.mrf.mxu2  ;;  %v2001_v12 = vpop.f32.mrf.mxu0 }
 0x1a3   :  { %v8757_v31 = vadd.f32 %v2177_v39, %v2089_v29  ;;  %v2002_v37 = vadd.f32 %v2001_v12, %v8635_v61  ;;  %v2090_v35 = vpop.f32.mrf.mxu1  ;;  %v905_v17 = vmul.f32 0.1, %v686_v3  ;;  %vm777_vm6 = vcmp.ge.f32.partialorder %v686_v3, 0.0  ;;  %v7443_v29 = vld [vmem:[#allocation4 + $0x2e4] sm:$0xf] }
 0x1a4   :  { %v6905_v39 = vld [vmem:[#allocation4 + $0x300] sm:$0xf]  ;;  %v7449_v12 = vld [vmem:[#allocation4 + $0x30c] sm:$0xf0] }
 0x1a5   :  { %v2091_v5 = vadd.f32 %v2090_v35, %v2002_v37  ;;  %v1033_v25 = vsel %vm777_vm6, %v686_v3, %v905_v17  ;;  %v6766_v37 = vor.u32 %v7411_v57, %v6763_v49  ;;  %v6894_v35 = vor.u32 %v7443_v29, %v6891_v50  ;;  %v7375_v17 = vld [vmem:[#allocation4 + $0xc4] sm:$0xf]  ;;  %v6603_v29 = vld [vmem:[#allocation4 + $0xb0] sm:$0xf0] }
 0x1a6   :  { %v6906_v3 = vor.u32 %v7449_v12, %v6905_v39  ;;  %v7371_v49 = vld [vmem:[#allocation4 + $0xa4] sm:$0xf] }
 0x1a7   :  { %2420 = vmatpush.bf16.msra.mxu1 %v6766_v37  ;;  %2509 = vmatpush.bf16.msra.mxu2 %v6894_v35  ;;  %v7403_v50 = vld [vmem:[#allocation4 + $0x1a4] sm:$0xf]  ;;  %v6606_v12 = vor.u32 %v7371_v49, %v6603_v29  ;;  %v6731_v37 = vld [vmem:[#allocation4 + $0x1b0] sm:$0xf0] }
 0x1a8   :  { %v687_v16 = vpop.f32.mrf.mxu3  ;;  %2249 = vmatpush.bf16.msra.mxu3 %v6906_v3  ;;  %v7435_v35 = vld [vmem:[#allocation4 + $0x2a4] sm:$0xf]  ;;  %v6734_v3 = vor.u32 %v7403_v50, %v6731_v37 }
 0x1a9   :  { %v688_v41 = vadd.f32 %v687_v16, %v8662_v63  ;;  %v6619_v16 = vld [vmem:[#allocation4 + $0xd0] sm:$0xf0] }
 0x1aa   :  { %v2179_v1 = vpop.f32.mrf.mxu2  ;;  %v2004_v18 = vpop.f32.mrf.mxu0 }
 0x1ab   :  { %v8762_v55 = vadd.f32 %v2179_v1, %v2091_v5  ;;  %vm781_vm7 = vcmp.ge.f32.partialorder %v688_v41, 0.0  ;;  %v909_v11 = vmul.f32 0.1, %v688_v41  ;;  %v2005_v60 = vadd.f32 %v2004_v18, %v8635_v61  ;;  %v2093_v43 = vpop.f32.mrf.mxu1 }
 0x1ac   :  { %v6622_v18 = vor.u32 %v7375_v17, %v6619_v16 }
 0x1ad   :  { %v1037_v20 = vsel %vm781_vm7, %v688_v41, %v909_v11  ;;  %v2094_v14 = vadd.f32 %v2093_v43, %v2005_v60  ;;  %729 = vmatmul.bf16.gmra.mxu3 %v7768_v47  ;;  %2043 = vmatmul.bf16.gmra.mxu0 %v8241_v44  ;;  %v7407_v41 = vld [vmem:[#allocation4 + $0x1c4] sm:$0xf]  ;;  %v6747_v11 = vld [vmem:[#allocation4 + $0x1d0] sm:$0xf0] }
 0x1ae   :  { %v8769_v40 = vpack.c.bf16 %v1037_v20, %v1033_v25  ;;  %2132 = vmatmul.bf16.gmra.mxu1 %v8381_v36  ;;  %v7439_v60 = vld [vmem:[#allocation4 + $0x2c4] sm:$0xf]  ;;  %v6875_v43 = vld [vmem:[#allocation4 + $0x2d0] sm:$0xf0]  ;;  %v6750_v4 = vor.u32 %v7407_v41, %v6747_v11  ;;  %2332 = vmatpush.bf16.msra.mxu0 %v6622_v18 }
 0x1af   :  { %2221 = vmatmul.bf16.gmra.mxu2 %v8535_v56  ;;  %v6878_v57 = vor.u32 %v7439_v60, %v6875_v43  ;;  %v7367_v41 = vld [vmem:[#allocation4 + $0x84] sm:$0xf] }
 0x1b0   :  { %11326 = vst [vmem:[#allocation44_spill] sm:$0xff] %v8769_v40  ;;  %v690_v5 = vpop.f32.mrf.mxu3  ;;  %2421 = vmatpush.bf16.msra.mxu1 %v6750_v4  ;;  %v7399_v18 = vld [vmem:[#allocation4 + $0x184] sm:$0xf] }
 0x1b1   :  { %v691_v20 = vadd.f32 %v690_v5, %v8662_v63  ;;  %2510 = vmatpush.bf16.msra.mxu2 %v6878_v57  ;;  %v7431_v4 = vld [vmem:[#allocation4 + $0x284] sm:$0xf]  ;;  %v6843_v57 = vld [vmem:[#allocation4 + $0x290] sm:$0xf0] }
 0x1b2   :  { %v2182_v1 = vpop.f32.mrf.mxu2  ;;  %v2006_v62 = vpop.f32.mrf.mxu0  ;;  %2333 = vmatpush.bf16.msra.mxu0 %v6606_v12  ;;  %v6846_v29 = vor.u32 %v7431_v4, %v6843_v57  ;;  %v7359_v4 = vld [vmem:[#allocation4 + $0x44] sm:$0xf]  ;;  %v6555_v57 = vld [vmem:[#allocation4 + $0x50] sm:$0xf0] }
 0x1b3   :  { %v8773_v25 = vadd.f32 %v2182_v1, %v2094_v14  ;;  %v2007_v47 = vadd.f32 %v2006_v62, %v8635_v61  ;;  %v2095_v38 = vpop.f32.mrf.mxu1  ;;  %v6859_v14 = vld [vmem:[#allocation4 + $0x2b0] sm:$0xf0]  ;;  %vm785_vm8 = vcmp.ge.f32.partialorder %v691_v20, 0.0  ;;  %v913_v16 = vmul.f32 0.1, %v691_v20 }
 0x1b4   :  { %v6862_v17 = vor.u32 %v7435_v35, %v6859_v14  ;;  %2422 = vmatpush.bf16.msra.mxu1 %v6734_v3  ;;  %v6587_v1 = vld [vmem:[#allocation4 + $0x90] sm:$0xf0]  ;;  %v7363_v14 = vld [vmem:[#allocation4 + $0x64] sm:$0xf] }
 0x1b5   :  { %v2096_v39 = vadd.f32 %v2095_v38, %v2007_v47  ;;  %v6590_v43 = vor.u32 %v7367_v41, %v6587_v1  ;;  %v6715_v62 = vld [vmem:[#allocation4 + $0x190] sm:$0xf0]  ;;  %v1041_v35 = vsel %vm785_vm8, %v691_v20, %v913_v16 }
 0x1b6   :  { %2511 = vmatpush.bf16.msra.mxu2 %v6862_v17  ;;  %v6718_v49 = vor.u32 %v7399_v18, %v6715_v62  ;;  %v6571_v3 = vld [vmem:[#allocation4 + $0x70] sm:$0xf0]  ;;  %v7395_v17 = vld [vmem:[#allocation4 + $0x164] sm:$0xf] }
 0x1b7   :  { %2334 = vmatpush.bf16.msra.mxu0 %v6590_v43  ;;  %v6574_v1 = vor.u32 %v7363_v14, %v6571_v3  ;;  %v6699_v18 = vld [vmem:[#allocation4 + $0x170] sm:$0xf0] }
 0x1b8   :  { %v692_v5 = vpop.f32.mrf.mxu3  ;;  %2423 = vmatpush.bf16.msra.mxu1 %v6718_v49  ;;  %v6827_v43 = vld [vmem:[#allocation4 + $0x270] sm:$0xf0]  ;;  %v6702_v20 = vor.u32 %v7395_v17, %v6699_v18  ;;  %v7355_v18 = vld [vmem:[#allocation4 + $0x24] sm:$0xf] }
 0x1b9   :  { %v693_v11 = vadd.f32 %v692_v5, %v8662_v63 }
 0x1ba   :  { %v2184_v60 = vpop.f32.mrf.mxu2  ;;  %v2009_v38 = vpop.f32.mrf.mxu0  ;;  %2512 = vmatpush.bf16.msra.mxu2 %v6846_v29  ;;  %v6558_v29 = vor.u32 %v7359_v4, %v6555_v57  ;;  %v6667_v4 = vld [vmem:[#allocation4 + $0x130] sm:$0xf0]  ;;  %v7419_v57 = vld [vmem:[#allocation4 + $0x224] sm:$0xf] }
 0x1bb   :  { %v8778_v47 = vadd.f32 %v2184_v60, %v2096_v39  ;;  %vm789_vm9 = vcmp.ge.f32.partialorder %v693_v11, 0.0  ;;  %v917_v50 = vmul.f32 0.1, %v693_v11  ;;  %v2010_v12 = vadd.f32 %v2009_v38, %v8635_v61  ;;  %v2098_v37 = vpop.f32.mrf.mxu1  ;;  %v7769_v39 = vld [vmem:[%s11135_s0 + $0x68] sm:$0xff]  ;;  %v7427_v60 = vld [vmem:[#allocation4 + $0x264] sm:$0xf]  ;;  %2335 = vmatpush.bf16.msra.mxu0 %v6574_v1 }
 0x1bc   :  { %v6830_v16 = vor.u32 %v7427_v60, %v6827_v43  ;;  %2424 = vmatpush.bf16.msra.mxu1 %v6702_v20  ;;  %v7391_v38 = vld [vmem:[#allocation4 + $0x144] sm:$0xf]  ;;  %v6539_v60 = vld [vmem:[#allocation4 + $0x30] sm:$0xf0] }
 0x1bd   :  { %v1045_v5 = vsel %vm789_vm9, %v693_v11, %v917_v50  ;;  %v2099_v41 = vadd.f32 %v2098_v37, %v2010_v12  ;;  %734 = vmatmul.bf16.gmra.mxu3 %v7769_v39  ;;  %2048 = vmatmul.bf16.gmra.mxu0 %v8273_v54  ;;  %v6683_v50 = vld [vmem:[#allocation4 + $0x150] sm:$0xf0]  ;;  %v7423_v12 = vld [vmem:[#allocation4 + $0x244] sm:$0xf] }
 0x1be   :  { %v8786_v62 = vpack.c.bf16 %v1045_v5, %v1041_v35  ;;  %2137 = vmatmul.bf16.gmra.mxu1 %v8419_v48  ;;  %2513 = vmatpush.bf16.msra.mxu2 %v6830_v16  ;;  %v6811_v37 = vld [vmem:[#allocation4 + $0x250] sm:$0xf0]  ;;  %v6686_v3 = vor.u32 %v7391_v38, %v6683_v50  ;;  %v7387_v43 = vld [vmem:[#allocation4 + $0x124] sm:$0xf]  ;;  %v6542_v16 = vor.u32 %v7355_v18, %v6539_v60 }
 0x1bf   :  { %2226 = vmatmul.bf16.gmra.mxu2 %v8575_v10  ;;  %v6814_v5 = vor.u32 %v7423_v12, %v6811_v37  ;;  %2336 = vmatpush.bf16.msra.mxu0 %v6558_v29  ;;  %v6523_v12 = vld [vmem:[#allocation4 + $0x10] sm:$0xf0]  ;;  %v7383_v29 = vld [vmem:[#allocation4 + $0x104] sm:$0xf] }
 0x1c0   :  { %11327 = vst [vmem:[#allocation45_spill] sm:$0xff] %v8786_v62  ;;  %v695_v11 = vpop.f32.mrf.mxu3  ;;  %2425 = vmatpush.bf16.msra.mxu1 %v6686_v3 }
 0x1c1   :  { %v696_v17 = vadd.f32 %v695_v11, %v8662_v63  ;;  %v7351_v11 = vld [vmem:[#allocation4 + $0x4] sm:$0xf] }
 0x1c2   :  { %v2187_v49 = vpop.f32.mrf.mxu2  ;;  %v2011_v14 = vpop.f32.mrf.mxu0  ;;  %2514 = vmatpush.bf16.msra.mxu2 %v6814_v5  ;;  %v6526_v3 = vor.u32 %v7351_v11, %v6523_v12  ;;  %v6651_v5 = vld [vmem:[#allocation4 + $0x110] sm:$0xf0]  ;;  %v7770_v11 = vld [vmem:[%s11135_s0 + $0x70] sm:$0xff] }
 0x1c3   :  { %v8790_v35 = vadd.f32 %v2187_v49, %v2099_v41  ;;  %v2012_v39 = vadd.f32 %v2011_v14, %v8635_v61  ;;  %v2100_v1 = vpop.f32.mrf.mxu1  ;;  %v6795_v41 = vld [vmem:[#allocation4 + $0x230] sm:$0xf0]  ;;  %v6670_v49 = vor.u32 %v7387_v43, %v6667_v4  ;;  %v921_v38 = vmul.f32 0.1, %v696_v17  ;;  %2337 = vmatpush.bf16.msra.mxu0 %v6542_v16  ;;  %v7475_v12 = vld [vmem:[#allocation4 + $0x3e4] sm:$0xf] }
 0x1c4   :  { %vm793_vm10 = vcmp.ge.f32.partialorder %v696_v17, 0.0  ;;  %v6654_v43 = vor.u32 %v7383_v29, %v6651_v5  ;;  %v7019_v29 = vld [vmem:[#allocation4 + $0x3f0] sm:$0xf0] }
 0x1c5   :  { %11328 = vst [vmem:[#allocation46_spill] sm:$0xff] %v8790_v35  ;;  %v2101_v20 = vadd.f32 %v2100_v1, %v2012_v39  ;;  %v6798_v35 = vor.u32 %v7419_v57, %v6795_v41  ;;  %2426 = vmatpush.bf16.msra.mxu1 %v6670_v49  ;;  %v7415_v39 = vld [vmem:[#allocation4 + $0x204] sm:$0xf]  ;;  %v6779_v1 = vld [vmem:[#allocation4 + $0x210] sm:$0xf0]  ;;  %v1049_v41 = vsel %vm793_vm10, %v696_v17, %v921_v38 }
 0x1c6   :  { %v6782_v4 = vor.u32 %v7415_v39, %v6779_v1 }
 0x1c7   :  { %2515 = vmatpush.bf16.msra.mxu2 %v6798_v35  ;;  %2338 = vmatpush.bf16.msra.mxu0 %v6526_v3 }
 0x1c8   :  { %v697_v50 = vpop.f32.mrf.mxu3 }
 0x1c9   :  { %v698_v37 = vadd.f32 %v697_v50, %v8662_v63  ;;  %2427 = vmatpush.bf16.msra.mxu1 %v6654_v43 }
 0x1ca   :  { %v2189_v14 = vpop.f32.mrf.mxu2  ;;  %v2014_v60 = vpop.f32.mrf.mxu0 }
 0x1cb   :  { %v8795_v18 = vadd.f32 %v2189_v14, %v2101_v20  ;;  %vm797_vm11 = vcmp.ge.f32.partialorder %v698_v37, 0.0  ;;  %v925_v16 = vmul.f32 0.1, %v698_v37  ;;  %v2015_v35 = vadd.f32 %v2014_v60, %v8635_v61  ;;  %v2103_v57 = vpop.f32.mrf.mxu1  ;;  %2516 = vmatpush.bf16.msra.mxu2 %v6782_v4 }
 0x1cc   :  { %v7022_v14 = vor.u32 %v7475_v12, %v7019_v29 }
 0x1cd   :  { %v1053_v49 = vsel %vm797_vm11, %v698_v37, %v925_v16  ;;  %v2104_v50 = vadd.f32 %v2103_v57, %v2015_v35  ;;  %739 = vmatmul.bf16.gmra.mxu3 %v7770_v11  ;;  %2053 = vmatmul.bf16.gmra.mxu0 %v8307_v27 }
 0x1ce   :  { %v8802_v20 = vpack.c.bf16 %v1053_v49, %v1049_v41  ;;  %2142 = vmatmul.bf16.gmra.mxu1 %v8457_v0  ;;  %2598 = vmatpush.bf16.msrb.mxu3 %v7022_v14 }
 0x1cf   :  { %2231 = vmatmul.bf16.gmra.mxu2 %v8615_v15 }
 0x1d0   :  { %11329 = vst [vmem:[#allocation47_spill] sm:$0xff] %v8802_v20  ;;  %v700_v3 = vpop.f32.mrf.mxu3 }
 0x1d1   :  { %v701_v1 = vadd.f32 %v700_v3, %v8662_v63  ;;  %v7771_v3 = vld [vmem:[%s11135_s0 + $0x78] sm:$0xff] }
 0x1d2   :  { %v2192_v17 = vpop.f32.mrf.mxu2  ;;  %v2016_v37 = vpop.f32.mrf.mxu0 }
 0x1d3   :  { %v8806_v38 = vadd.f32 %v2192_v17, %v2104_v50  ;;  %v2017_v5 = vadd.f32 %v2016_v37, %v8635_v61  ;;  %v2105_v39 = vpop.f32.mrf.mxu1  ;;  %v929_v4 = vmul.f32 0.1, %v701_v1  ;;  %vm801_vm12 = vcmp.ge.f32.partialorder %v701_v1, 0.0 }
 0x1d5   :  { %v2106_v60 = vadd.f32 %v2105_v39, %v2017_v5  ;;  %v1057_v12 = vsel %vm801_vm12, %v701_v1, %v929_v4 }
 0x1d8   :  { %v702_v43 = vpop.f32.mrf.mxu3 }
 0x1d9   :  { %v703_v16 = vadd.f32 %v702_v43, %v8662_v63 }
 0x1da   :  { %v2194_v35 = vpop.f32.mrf.mxu2  ;;  %v2019_v41 = vpop.f32.mrf.mxu0 }
 0x1db   :  { %v8811_v57 = vadd.f32 %v2194_v35, %v2106_v60  ;;  %vm805_vm13 = vcmp.ge.f32.partialorder %v703_v16, 0.0  ;;  %v933_v49 = vmul.f32 0.1, %v703_v16  ;;  %v2020_v50 = vadd.f32 %v2019_v41, %v8635_v61  ;;  %v2108_v11 = vpop.f32.mrf.mxu1 }
 0x1dd   :  { %v1061_v29 = vsel %vm805_vm13, %v703_v16, %v933_v49  ;;  %v2109_v14 = vadd.f32 %v2108_v11, %v2020_v50  ;;  %744 = vmatmul.bf16.gmra.mxu3 %v7771_v3  ;;  %2058 = vmatmul.bf16.gmra.mxu0 %v8343_v24 }
 0x1de   :  { %v8818_v17 = vpack.c.bf16 %v1061_v29, %v1057_v12  ;;  %2147 = vmatmul.bf16.gmra.mxu1 %v8495_v8 }
 0x1df   :  { %2236 = vmatmul.bf16.gmra.mxu2 %v8654_v6 }
 0x1e0   :  { %11330 = vst [vmem:[#allocation48_spill] sm:$0xff] %v8818_v17  ;;  %v705_v37 = vpop.f32.mrf.mxu3 }
 0x1e1   :  { %v706_v4 = vadd.f32 %v705_v37, %v8662_v63 }
 0x1e2   :  { %v2197_v5 = vpop.f32.mrf.mxu2  ;;  %v2021_v1 = vpop.f32.mrf.mxu0 }
 0x1e3   :  { %v8822_v39 = vadd.f32 %v2197_v5, %v2109_v14  ;;  %v2022_v60 = vadd.f32 %v2021_v1, %v8635_v61  ;;  %v2110_v43 = vpop.f32.mrf.mxu1  ;;  %v937_v41 = vmul.f32 0.1, %v706_v4  ;;  %vm809_vm14 = vcmp.ge.f32.partialorder %v706_v4, 0.0 }
 0x1e5   :  { %11331 = vst [vmem:[#allocation49_spill] sm:$0xff] %v8822_v39  ;;  %v2111_v16 = vadd.f32 %v2110_v43, %v2022_v60  ;;  %v1065_v5 = vsel %vm809_vm14, %v706_v4, %v937_v41  ;;  %v7471_v60 = vld [vmem:[#allocation4 + $0x3c4] sm:$0xf]  ;;  %v7003_v43 = vld [vmem:[#allocation4 + $0x3d0] sm:$0xf0] }
 0x1e8   :  { %v707_v35 = vpop.f32.mrf.mxu3 }
 0x1e9   :  { %v708_v49 = vadd.f32 %v707_v35, %v8662_v63 }
 0x1ea   :  { %v2199_v50 = vpop.f32.mrf.mxu2  ;;  %v2024_v12 = vpop.f32.mrf.mxu0 }
 0x1eb   :  { %v8827_v11 = vadd.f32 %v2199_v50, %v2111_v16  ;;  %vm813_vm15 = vcmp.ge.f32.partialorder %v708_v49, 0.0  ;;  %v941_v29 = vmul.f32 0.1, %v708_v49  ;;  %v2025_v14 = vadd.f32 %v2024_v12, %v8635_v61  ;;  %v2113_v3 = vpop.f32.mrf.mxu1 }
 0x1ec   :  { %v7006_v16 = vor.u32 %v7471_v60, %v7003_v43 }
 0x1ed   :  { %v1069_v1 = vsel %vm813_vm15, %v708_v49, %v941_v29  ;;  %v2114_v39 = vadd.f32 %v2113_v3, %v2025_v14  ;;  %2250 = vmatmul.bf16.vlgmr.msra.gmra.mxu3 %v8691_v23  ;;  %2339 = vmatmul.bf16.vlgmr.msra.gmra.mxu0 %v8320_v52 }
 0x1ee   :  { %v8832_v37 = vpack.c.bf16 %v1069_v1, %v1065_v5  ;;  %2428 = vmatmul.bf16.vlgmr.msra.gmra.mxu1 %v8325_v58  ;;  %2599 = vmatpush.bf16.msrb.mxu3 %v7006_v16 }
 0x1ef   :  { %2517 = vmatmul.bf16.vlgmr.msra.gmra.mxu2 %v8327_v59 }
 0x1f0   :  { %11332 = vst [vmem:[#allocation50_spill] sm:$0xff] %v8832_v37  ;;  %v710_v35 = vpop.f32.mrf.mxu3 }
 0x1f1   :  { %v711_v29 = vadd.f32 %v710_v35, %v8662_v63 }
 0x1f2   :  { %v2202_v50 = vpop.f32.mrf.mxu2  ;;  %v2026_v4 = vpop.f32.mrf.mxu0 }
 0x1f3   :  { %v8836_v12 = vadd.f32 %v2202_v50, %v2114_v39  ;;  %v2027_v41 = vadd.f32 %v2026_v4, %v8635_v61  ;;  %v2115_v49 = vpop.f32.mrf.mxu1  ;;  %v945_v5 = vmul.f32 0.1, %v711_v29  ;;  %vm817_vm0 = vcmp.ge.f32.partialorder %v711_v29, 0.0 }
 0x1f5   :  { %11333 = vst [vmem:[#allocation51_spill] sm:$0xff] %v8836_v12  ;;  %v2116_v14 = vadd.f32 %v2115_v49, %v2027_v41  ;;  %v1073_v50 = vsel %vm817_vm0, %v711_v29, %v945_v5  ;;  %v11336_v41 = vld [vmem:[#allocation13_spill] sm:$0xff] }
 0x1f8   :  { %v712_v3 = vpop.f32.mrf.mxu3 }
 0x1f9   :  { %v713_v1 = vadd.f32 %v712_v3, %v8662_v63 }
 0x1fa   :  { %v2204_v59 = vpop.f32.mrf.mxu2  ;;  %v2029_v60 = vpop.f32.mrf.mxu0 }
 0x1fb   :  { %v8841_v58 = vadd.f32 %v2204_v59, %v2116_v14  ;;  %vm821_vm1 = vcmp.ge.f32.partialorder %v713_v1, 0.0  ;;  %v949_v43 = vmul.f32 0.1, %v713_v1  ;;  %v2030_v39 = vadd.f32 %v2029_v60, %v8635_v61  ;;  %v2118_v16 = vpop.f32.mrf.mxu1 }
 0x1fd   :  { %11334 = vst [vmem:[#allocation52_spill] sm:$0xff] %v8841_v58  ;;  %v1077_v4 = vsel %vm821_vm1, %v713_v1, %v949_v43  ;;  %v2119_v12 = vadd.f32 %v2118_v16, %v2030_v39  ;;  %2255 = vmatmul.bf16.gmra.mxu3 %v8726_v13  ;;  %2344 = vmatmul.bf16.gmra.mxu0 %v8358_v46 }
 0x1fe   :  { %v8846_v35 = vpack.c.bf16 %v1077_v4, %v1073_v50  ;;  %2433 = vmatmul.bf16.gmra.mxu1 %v8363_v7 }
 0x1ff   :  { %2522 = vmatmul.bf16.gmra.mxu2 %v11336_v41 }
 0x200   :  { %11335 = vst [vmem:[#allocation53_spill] sm:$0xff] %v8846_v35  ;;  %v715_v59 = vpop.f32.mrf.mxu3 }
 0x201   :  { %v716_v5 = vadd.f32 %v715_v59, %v8662_v63  ;;  %v11339_v59 = vld [vmem:[#allocation15_spill] sm:$0xff] }
 0x202   :  { %v2207_v49 = vpop.f32.mrf.mxu2  ;;  %v2031_v3 = vpop.f32.mrf.mxu0 }
 0x203   :  { %v8850_v14 = vadd.f32 %v2207_v49, %v2119_v12  ;;  %v2032_v60 = vadd.f32 %v2031_v3, %v8635_v61  ;;  %v2120_v29 = vpop.f32.mrf.mxu1  ;;  %v953_v39 = vmul.f32 0.1, %v716_v5  ;;  %vm825_vm2 = vcmp.ge.f32.partialorder %v716_v5, 0.0 }
 0x205   :  { %11337 = vst [vmem:[#allocation54_spill] sm:$0xff] %v8850_v14  ;;  %v2121_v1 = vadd.f32 %v2120_v29, %v2032_v60  ;;  %v1081_v14 = vsel %vm825_vm2, %v716_v5, %v953_v39  ;;  %v11340_v29 = vld [vmem:[#allocation16_spill] sm:$0xff] }
 0x208   :  { %v717_v43 = vpop.f32.mrf.mxu3 }
 0x209   :  { %v718_v16 = vadd.f32 %v717_v43, %v8662_v63  ;;  %v11341_v43 = vld [vmem:[#allocation17_spill] sm:$0xff] }
 0x20a   :  { %v2209_v50 = vpop.f32.mrf.mxu2  ;;  %v2034_v41 = vpop.f32.mrf.mxu0 }
 0x20b   :  { %v8855_v4 = vadd.f32 %v2209_v50, %v2121_v1  ;;  %vm829_vm3 = vcmp.ge.f32.partialorder %v718_v16, 0.0  ;;  %v957_v7 = vmul.f32 0.1, %v718_v16  ;;  %v2035_v12 = vadd.f32 %v2034_v41, %v8635_v61  ;;  %v2123_v49 = vpop.f32.mrf.mxu1  ;;  %v7467_v1 = vld [vmem:[#allocation4 + $0x3a4] sm:$0xf] }
 0x20c   :  { %v6987_v50 = vld [vmem:[#allocation4 + $0x3b0] sm:$0xf0] }
 0x20d   :  { %11338 = vst [vmem:[#allocation55_spill] sm:$0xff] %v8855_v4  ;;  %v1085_v3 = vsel %vm829_vm3, %v718_v16, %v957_v7  ;;  %v2124_v46 = vadd.f32 %v2123_v49, %v2035_v12  ;;  %2260 = vmatmul.bf16.gmra.mxu3 %v8753_v42  ;;  %2349 = vmatmul.bf16.gmra.mxu0 %v11339_v59 }
 0x20e   :  { %v8860_v60 = vpack.c.bf16 %v1085_v3, %v1081_v14  ;;  %2438 = vmatmul.bf16.gmra.mxu1 %v11340_v29  ;;  %v6990_v4 = vor.u32 %v7467_v1, %v6987_v50 }
 0x20f   :  { %2527 = vmatmul.bf16.gmra.mxu2 %v11341_v43 }
 0x210   :  { %v720_v13 = vpop.f32.mrf.mxu3  ;;  %2600 = vmatpush.bf16.msrb.mxu3 %v6990_v4 }
 0x211   :  { %v721_v16 = vadd.f32 %v720_v13, %v8662_v63  ;;  %v11344_v13 = vld [vmem:[#allocation18_spill] sm:$0xff] }
 0x212   :  { %v2212_v58 = vpop.f32.mrf.mxu2  ;;  %v2036_v7 = vpop.f32.mrf.mxu0 }
 0x213   :  { %v8864_v41 = vadd.f32 %v2212_v58, %v2124_v46  ;;  %v2037_v5 = vadd.f32 %v2036_v7, %v8635_v61  ;;  %v2125_v39 = vpop.f32.mrf.mxu1  ;;  %v961_v49 = vmul.f32 0.1, %v721_v16  ;;  %vm833_vm4 = vcmp.ge.f32.partialorder %v721_v16, 0.0 }
 0x215   :  { %11342 = vst [vmem:[#allocation56_spill] sm:$0xff] %v8864_v41  ;;  %v2126_v14 = vadd.f32 %v2125_v39, %v2037_v5  ;;  %v1089_v50 = vsel %vm833_vm4, %v721_v16, %v961_v49  ;;  %v11345_v39 = vld [vmem:[#allocation19_spill] sm:$0xff] }
 0x218   :  { %v722_v12 = vpop.f32.mrf.mxu3 }
 0x219   :  { %v723_v3 = vadd.f32 %v722_v12, %v8662_v63  ;;  %v11346_v12 = vld [vmem:[#allocation20_spill] sm:$0xff] }
 0x21a   :  { %v2214_v43 = vpop.f32.mrf.mxu2  ;;  %v2039_v1 = vpop.f32.mrf.mxu0 }
 0x21b   :  { %v8869_v29 = vadd.f32 %v2214_v43, %v2126_v14  ;;  %vm837_vm5 = vcmp.ge.f32.partialorder %v723_v3, 0.0  ;;  %v965_v4 = vmul.f32 0.1, %v723_v3  ;;  %v2040_v58 = vadd.f32 %v2039_v1, %v8635_v61  ;;  %v2128_v46 = vpop.f32.mrf.mxu1 }
 0x21d   :  { %11343 = vst [vmem:[#allocation57_spill] sm:$0xff] %v8869_v29  ;;  %v1093_v7 = vsel %vm837_vm5, %v723_v3, %v965_v4  ;;  %v2129_v41 = vadd.f32 %v2128_v46, %v2040_v58  ;;  %2265 = vmatmul.bf16.gmra.mxu3 %v8769_v40  ;;  %2354 = vmatmul.bf16.gmra.mxu0 %v11344_v13 }
 0x21e   :  { %v8874_v5 = vpack.c.bf16 %v1093_v7, %v1089_v50  ;;  %2443 = vmatmul.bf16.gmra.mxu1 %v11345_v39 }
 0x21f   :  { %2532 = vmatmul.bf16.gmra.mxu2 %v11346_v12 }
 0x220   :  { %v725_v43 = vpop.f32.mrf.mxu3 }
 0x221   :  { %v726_v49 = vadd.f32 %v725_v43, %v8662_v63  ;;  %v11349_v43 = vld [vmem:[#allocation21_spill] sm:$0xff] }
 0x222   :  { %v2217_v14 = vpop.f32.mrf.mxu2  ;;  %v2041_v59 = vpop.f32.mrf.mxu0 }
 0x223   :  { %v8878_v29 = vadd.f32 %v2217_v14, %v2129_v41  ;;  %v2042_v1 = vadd.f32 %v2041_v59, %v8635_v61  ;;  %v2130_v16 = vpop.f32.mrf.mxu1  ;;  %v969_v58 = vmul.f32 0.1, %v726_v49  ;;  %vm841_vm6 = vcmp.ge.f32.partialorder %v726_v49, 0.0 }
 0x225   :  { %11347 = vst [vmem:[#allocation58_spill] sm:$0xff] %v8878_v29  ;;  %v2131_v3 = vadd.f32 %v2130_v16, %v2042_v1  ;;  %v1097_v29 = vsel %vm841_vm6, %v726_v49, %v969_v58  ;;  %v11350_v16 = vld [vmem:[#allocation22_spill] sm:$0xff] }
 0x228   :  { %v727_v4 = vpop.f32.mrf.mxu3 }
 0x229   :  { %v728_v46 = vadd.f32 %v727_v4, %v8662_v63  ;;  %v11351_v4 = vld [vmem:[#allocation23_spill] sm:$0xff] }
 0x22a   :  { %v2219_v50 = vpop.f32.mrf.mxu2  ;;  %v2044_v12 = vpop.f32.mrf.mxu0 }
 0x22b   :  { %v8883_v7 = vadd.f32 %v2219_v50, %v2131_v3  ;;  %vm845_vm7 = vcmp.ge.f32.partialorder %v728_v46, 0.0  ;;  %v973_v39 = vmul.f32 0.1, %v728_v46  ;;  %v2045_v41 = vadd.f32 %v2044_v12, %v8635_v61  ;;  %v2133_v14 = vpop.f32.mrf.mxu1  ;;  %v7463_v3 = vld [vmem:[#allocation4 + $0x384] sm:$0xf] }
 0x22c   :  { %v6971_v50 = vld [vmem:[#allocation4 + $0x390] sm:$0xf0] }
 0x22d   :  { %11348 = vst [vmem:[#allocation59_spill] sm:$0xff] %v8883_v7  ;;  %v1101_v59 = vsel %vm845_vm7, %v728_v46, %v973_v39  ;;  %v2134_v13 = vadd.f32 %v2133_v14, %v2045_v41  ;;  %2270 = vmatmul.bf16.gmra.mxu3 %v8786_v62  ;;  %2359 = vmatmul.bf16.gmra.mxu0 %v11349_v43 }
 0x22e   :  { %v8888_v1 = vpack.c.bf16 %v1101_v59, %v1097_v29  ;;  %2448 = vmatmul.bf16.gmra.mxu1 %v11350_v16  ;;  %v6974_v7 = vor.u32 %v7463_v3, %v6971_v50 }
 0x22f   :  { %2537 = vmatmul.bf16.gmra.mxu2 %v11351_v4 }
 0x230   :  { %v730_v40 = vpop.f32.mrf.mxu3  ;;  %2601 = vmatpush.bf16.msrb.mxu3 %v6974_v7 }
 0x231   :  { %v731_v46 = vadd.f32 %v730_v40, %v8662_v63  ;;  %v11354_v40 = vld [vmem:[#allocation24_spill] sm:$0xff] }
 0x232   :  { %v2222_v42 = vpop.f32.mrf.mxu2  ;;  %v2046_v39 = vpop.f32.mrf.mxu0 }
 0x233   :  { %v8892_v12 = vadd.f32 %v2222_v42, %v2134_v13  ;;  %v2047_v49 = vadd.f32 %v2046_v39, %v8635_v61  ;;  %v2135_v58 = vpop.f32.mrf.mxu1  ;;  %v977_v14 = vmul.f32 0.1, %v731_v46  ;;  %vm849_vm8 = vcmp.ge.f32.partialorder %v731_v46, 0.0 }
 0x235   :  { %11352 = vst [vmem:[#allocation60_spill] sm:$0xff] %v8892_v12  ;;  %v2136_v29 = vadd.f32 %v2135_v58, %v2047_v49  ;;  %v1105_v50 = vsel %vm849_vm8, %v731_v46, %v977_v14  ;;  %v11356_v58 = vld [vmem:[#allocation25_spill] sm:$0xff] }
 0x238   :  { %v732_v41 = vpop.f32.mrf.mxu3 }
 0x239   :  { %v733_v59 = vadd.f32 %v732_v41, %v8662_v63  ;;  %v11357_v41 = vld [vmem:[#allocation26_spill] sm:$0xff] }
 0x23a   :  { %v2224_v4 = vpop.f32.mrf.mxu2  ;;  %v2049_v3 = vpop.f32.mrf.mxu0 }
 0x23b   :  { %v8897_v16 = vadd.f32 %v2224_v4, %v2136_v29  ;;  %vm853_vm9 = vcmp.ge.f32.partialorder %v733_v59, 0.0  ;;  %v981_v7 = vmul.f32 0.1, %v733_v59  ;;  %v2050_v42 = vadd.f32 %v2049_v3, %v8635_v61  ;;  %v2138_v13 = vpop.f32.mrf.mxu1 }
 0x23d   :  { %11353 = vst [vmem:[#allocation61_spill] sm:$0xff] %v8897_v16  ;;  %v1109_v39 = vsel %vm853_vm9, %v733_v59, %v981_v7  ;;  %v2139_v12 = vadd.f32 %v2138_v13, %v2050_v42  ;;  %2275 = vmatmul.bf16.gmra.mxu3 %v8802_v20  ;;  %2364 = vmatmul.bf16.gmra.mxu0 %v11354_v40 }
 0x23e   :  { %v8902_v49 = vpack.c.bf16 %v1109_v39, %v1105_v50  ;;  %2453 = vmatmul.bf16.gmra.mxu1 %v11356_v58 }
 0x23f   :  { %2542 = vmatmul.bf16.gmra.mxu2 %v11357_v41 }
 0x240   :  { %11355 = vst [vmem:[#allocation62_spill] sm:$0xff] %v8902_v49  ;;  %v735_v4 = vpop.f32.mrf.mxu3 }
 0x241   :  { %v736_v14 = vadd.f32 %v735_v4, %v8662_v63  ;;  %v11360_v4 = vld [vmem:[#allocation28_spill] sm:$0xff] }
 0x242   :  { %v2227_v29 = vpop.f32.mrf.mxu2  ;;  %v2051_v43 = vpop.f32.mrf.mxu0 }
 0x243   :  { %v8906_v16 = vadd.f32 %v2227_v29, %v2139_v12  ;;  %v2052_v3 = vadd.f32 %v2051_v43, %v8635_v61  ;;  %v2140_v46 = vpop.f32.mrf.mxu1  ;;  %v985_v42 = vmul.f32 0.1, %v736_v14  ;;  %vm857_vm10 = vcmp.ge.f32.partialorder %v736_v14, 0.0 }
 0x245   :  { %11358 = vst [vmem:[#allocation63_spill] sm:$0xff] %v8906_v16  ;;  %v2141_v59 = vadd.f32 %v2140_v46, %v2052_v3  ;;  %v1113_v16 = vsel %vm857_vm10, %v736_v14, %v985_v42  ;;  %v11361_v46 = vld [vmem:[#allocation29_spill] sm:$0xff] }
 0x248   :  { %v737_v7 = vpop.f32.mrf.mxu3 }
 0x249   :  { %v738_v13 = vadd.f32 %v737_v7, %v8662_v63  ;;  %v11362_v7 = vld [vmem:[#allocation30_spill] sm:$0xff] }
 0x24a   :  { %v2229_v50 = vpop.f32.mrf.mxu2  ;;  %v2054_v41 = vpop.f32.mrf.mxu0 }
 0x24b   :  { %v8911_v39 = vadd.f32 %v2229_v50, %v2141_v59  ;;  %vm861_vm11 = vcmp.ge.f32.partialorder %v738_v13, 0.0  ;;  %v989_v58 = vmul.f32 0.1, %v738_v13  ;;  %v2055_v12 = vadd.f32 %v2054_v41, %v8635_v61  ;;  %v2143_v29 = vpop.f32.mrf.mxu1  ;;  %v7459_v59 = vld [vmem:[#allocation4 + $0x364] sm:$0xf] }
 0x24c   :  { %v6955_v50 = vld [vmem:[#allocation4 + $0x370] sm:$0xf0] }
 0x24d   :  { %11359 = vst [vmem:[#allocation64_spill] sm:$0xff] %v8911_v39  ;;  %v1117_v43 = vsel %vm861_vm11, %v738_v13, %v989_v58  ;;  %v2144_v40 = vadd.f32 %v2143_v29, %v2055_v12  ;;  %2280 = vmatmul.bf16.gmra.mxu3 %v8818_v17  ;;  %2369 = vmatmul.bf16.gmra.mxu0 %v11360_v4 }
 0x24e   :  { %v8916_v3 = vpack.c.bf16 %v1117_v43, %v1113_v16  ;;  %2458 = vmatmul.bf16.gmra.mxu1 %v11361_v46  ;;  %v6958_v39 = vor.u32 %v7459_v59, %v6955_v50 }
 0x24f   :  { %2547 = vmatmul.bf16.gmra.mxu2 %v11362_v7 }
 0x250   :  { %v740_v20 = vpop.f32.mrf.mxu3  ;;  %2602 = vmatpush.bf16.msrb.mxu3 %v6958_v39 }
 0x251   :  { %v741_v13 = vadd.f32 %v740_v20, %v8662_v63  ;;  %v11365_v20 = vld [vmem:[#allocation31_spill] sm:$0xff] }
 0x252   :  { %v2232_v62 = vpop.f32.mrf.mxu2  ;;  %v2056_v58 = vpop.f32.mrf.mxu0 }
 0x253   :  { %v8920_v41 = vadd.f32 %v2232_v62, %v2144_v40  ;;  %v2057_v14 = vadd.f32 %v2056_v58, %v8635_v61  ;;  %v2145_v42 = vpop.f32.mrf.mxu1  ;;  %v993_v29 = vmul.f32 0.1, %v741_v13  ;;  %vm865_vm12 = vcmp.ge.f32.partialorder %v741_v13, 0.0 }
 0x255   :  { %11363 = vst [vmem:[#allocation65_spill] sm:$0xff] %v8920_v41  ;;  %v2146_v16 = vadd.f32 %v2145_v42, %v2057_v14  ;;  %v1121_v50 = vsel %vm865_vm12, %v741_v13, %v993_v29  ;;  %v11366_v42 = vld [vmem:[#allocation32_spill] sm:$0xff] }
 0x258   :  { %v742_v12 = vpop.f32.mrf.mxu3 }
 0x259   :  { %v743_v43 = vadd.f32 %v742_v12, %v8662_v63  ;;  %v11367_v12 = vld [vmem:[#allocation33_spill] sm:$0xff] }
 0x25a   :  { %v2234_v7 = vpop.f32.mrf.mxu2  ;;  %v2059_v59 = vpop.f32.mrf.mxu0 }
 0x25b   :  { %v8925_v46 = vadd.f32 %v2234_v7, %v2146_v16  ;;  %vm869_vm13 = vcmp.ge.f32.partialorder %v743_v43, 0.0  ;;  %v997_v39 = vmul.f32 0.1, %v743_v43  ;;  %v2060_v62 = vadd.f32 %v2059_v59, %v8635_v61  ;;  %v2148_v40 = vpop.f32.mrf.mxu1 }
 0x25d   :  { %11364 = vst [vmem:[#allocation66_spill] sm:$0xff] %v8925_v46  ;;  %v1125_v58 = vsel %vm869_vm13, %v743_v43, %v997_v39  ;;  %v2149_v41 = vadd.f32 %v2148_v40, %v2060_v62  ;;  %2285 = vmatmul.bf16.gmra.mxu3 %v8832_v37  ;;  %2374 = vmatmul.bf16.gmra.mxu0 %v11365_v20  ;;  %v7772_v39 = vld [vmem:[#allocation2 + $0x4] sm:$0xf]  ;;  %v11373_v37 = vld [vmem:[#allocation37_spill] sm:$0xff] }
 0x25e   :  { %v8930_v14 = vpack.c.bf16 %v1125_v58, %v1121_v50  ;;  %2463 = vmatmul.bf16.gmra.mxu1 %v11366_v42  ;;  %v8938_v62 = vperm.slane %v7772_v39, 1 }
 0x25f   :  { %2552 = vmatmul.bf16.gmra.mxu2 %v11367_v12 }
 0x260   :  { %v745_v7 = vpop.f32.mrf.mxu3 }
 0x261   :  { %v746_v29 = vadd.f32 %v745_v7, %v8662_v63 }
 0x262   :  { %v2237_v16 = vpop.f32.mrf.mxu2  ;;  %v2061_v4 = vpop.f32.mrf.mxu0 }
 0x263   :  { %v8934_v46 = vadd.f32 %v2237_v16, %v2149_v41  ;;  %v2062_v59 = vadd.f32 %v2061_v4, %v8635_v61  ;;  %v2150_v13 = vpop.f32.mrf.mxu1  ;;  %v1001_v50 = vmul.f32 0.1, %v746_v29  ;;  %vm873_vm14 = vcmp.ge.f32.partialorder %v746_v29, 0.0 }
 0x265   :  { %11368 = vst [vmem:[#allocation67_spill] sm:$0xff] %v8934_v46  ;;  %v2151_v43 = vadd.f32 %v2150_v13, %v2062_v59  ;;  %v1129_v46 = vsel %vm873_vm14, %v746_v29, %v1001_v50  ;;  %v11370_v13 = vld [vmem:[#allocation34_spill] sm:$0xff] }
 0x268   :  { %v747_v40 = vpop.f32.mrf.mxu3 }
 0x269   :  { %v748_v58 = vadd.f32 %v747_v40, %v8662_v63  ;;  %v11371_v63 = vld [vmem:[#allocation35_spill] sm:$0xff]  ;;  %v11372_v40 = vld [vmem:[#allocation36_spill] sm:$0xff] }
 0x26a   :  { %v2239_v42 = vpop.f32.mrf.mxu2  ;;  %v2340_v41 = vpop.f32.mrf.mxu0 }
 0x26b   :  { %v8941_v12 = vadd.f32 %v2239_v42, %v2151_v43  ;;  %vm877_vm15 = vcmp.ge.f32.partialorder %v748_v58, 0.0  ;;  %v1005_v16 = vmul.f32 0.1, %v748_v58  ;;  %v2341_v61 = vadd.f32 %v2340_v41, %v8938_v62  ;;  %v2429_v4 = vpop.f32.mrf.mxu1  ;;  %v7455_v42 = vld [vmem:[#allocation4 + $0x344] sm:$0xf] }
 0x26c   :  { %v6939_v43 = vld [vmem:[#allocation4 + $0x350] sm:$0xf0] }
 0x26d   :  { %11369 = vst [vmem:[#allocation68_spill] sm:$0xff] %v8941_v12  ;;  %v1133_v7 = vsel %vm877_vm15, %v748_v58, %v1005_v16  ;;  %v2430_v59 = vadd.f32 %v2429_v4, %v2341_v61  ;;  %2290 = vmatmul.bf16.gmra.mxu3 %v8846_v35  ;;  %2379 = vmatmul.bf16.gmra.mxu0 %v11370_v13 }
 0x26e   :  { %v8946_v39 = vpack.c.bf16 %v1133_v7, %v1129_v46  ;;  %2468 = vmatmul.bf16.gmra.mxu1 %v11371_v63  ;;  %v6942_v12 = vor.u32 %v7455_v42, %v6939_v43 }
 0x26f   :  { %2557 = vmatmul.bf16.gmra.mxu2 %v11372_v40 }
 0x270   :  { %v2251_v20 = vpop.f32.mrf.mxu3  ;;  %2603 = vmatpush.bf16.msrb.mxu3 %v6942_v12 }
 0x271   :  { %v2252_v41 = vadd.f32 %v2251_v20, %v11373_v37 }
 0x272   :  { %v2518_v17 = vpop.f32.mrf.mxu2  ;;  %v2342_v50 = vpop.f32.mrf.mxu0 }
 0x273   :  { %v8951_v29 = vadd.f32 %v2518_v17, %v2430_v59  ;;  %v2343_v58 = vadd.f32 %v2342_v50, %v8938_v62  ;;  %v2431_v16 = vpop.f32.mrf.mxu1  ;;  %v3527_v4 = vmul.f32 0.1, %v2252_v41  ;;  %vm3399_vm0 = vcmp.ge.f32.partialorder %v2252_v41, 0.0 }
 0x275   :  { %v2432_v46 = vadd.f32 %v2431_v16, %v2343_v58  ;;  %v8958_v12 = vsel %vm3399_vm0, %v2252_v41, %v3527_v4 }
 0x276   :  { %11374 = vst [vmem:[#allocation37_spill] sm:$0xff] %v8958_v12 }
 0x278   :  { %v2253_v61 = vpop.f32.mrf.mxu3 }
 0x279   :  { %v2254_v7 = vadd.f32 %v2253_v61, %v8676_v19 }
 0x27a   :  { %v2520_v40 = vpop.f32.mrf.mxu2  ;;  %v2345_v42 = vpop.f32.mrf.mxu0 }
 0x27b   :  { %v8955_v63 = vadd.f32 %v2520_v40, %v2432_v46  ;;  %vm3403_vm1 = vcmp.ge.f32.partialorder %v2254_v7, 0.0  ;;  %v3531_v37 = vmul.f32 0.1, %v2254_v7  ;;  %v2346_v20 = vadd.f32 %v2345_v42, %v8938_v62  ;;  %v2434_v17 = vpop.f32.mrf.mxu1 }
 0x27d   :  { %v8960_v59 = vsel %vm3403_vm1, %v2254_v7, %v3531_v37  ;;  %v2435_v43 = vadd.f32 %v2434_v17, %v2346_v20  ;;  %2295 = vmatmul.bf16.gmra.mxu3 %v8860_v60  ;;  %2384 = vmatmul.bf16.gmra.mxu0 %v8669_v22 }
 0x27e   :  { %11375 = vst [vmem:[#allocation69_spill] sm:$0xff] %v8960_v59  ;;  %2473 = vmatmul.bf16.gmra.mxu1 %v8672_v53 }
 0x27f   :  { %2562 = vmatmul.bf16.gmra.mxu2 %v8674_v9 }
 0x280   :  { %v2256_v40 = vpop.f32.mrf.mxu3 }
 0x281   :  { %v2257_v50 = vadd.f32 %v2256_v40, %v8699_v33 }
 0x282   :  { %v2523_v58 = vpop.f32.mrf.mxu2  ;;  %v2347_v16 = vpop.f32.mrf.mxu0 }
 0x283   :  { %v8969_v41 = vadd.f32 %v2523_v58, %v2435_v43  ;;  %v2348_v46 = vadd.f32 %v2347_v16, %v8938_v62  ;;  %v2436_v61 = vpop.f32.mrf.mxu1  ;;  %v3535_v42 = vmul.f32 0.1, %v2257_v50  ;;  %vm3407_vm2 = vcmp.ge.f32.partialorder %v2257_v50, 0.0 }
 0x285   :  { %v2437_v4 = vadd.f32 %v2436_v61, %v2348_v46  ;;  %v8978_v58 = vsel %vm3407_vm2, %v2257_v50, %v3535_v42  ;;  %v6923_v46 = vld [vmem:[#allocation4 + $0x330] sm:$0xf0] }
 0x286   :  { %11376 = vst [vmem:[#allocation70_spill] sm:$0xff] %v8978_v58  ;;  %v6907_v58 = vld [vmem:[#allocation4 + $0x310] sm:$0xf0] }
 0x288   :  { %v2258_v7 = vpop.f32.mrf.mxu3 }
 0x289   :  { %v2259_v37 = vadd.f32 %v2258_v7, %v8711_v28  ;;  %v7451_v28 = vld [vmem:[#allocation4 + $0x324] sm:$0xf] }
 0x28a   :  { %v2525_v20 = vpop.f32.mrf.mxu2  ;;  %v2350_v19 = vpop.f32.mrf.mxu0 }
 0x28b   :  { %v8973_v17 = vadd.f32 %v2525_v20, %v2437_v4  ;;  %vm3411_vm3 = vcmp.ge.f32.partialorder %v2259_v37, 0.0  ;;  %v3539_v12 = vmul.f32 0.1, %v2259_v37  ;;  %v2351_v33 = vadd.f32 %v2350_v19, %v8938_v62  ;;  %v2439_v43 = vpop.f32.mrf.mxu1 }
 0x28c   :  { %v6926_v19 = vor.u32 %v7451_v28, %v6923_v46 }
 0x28d   :  { %v2440_v40 = vadd.f32 %v2439_v43, %v2351_v33  ;;  %2300 = vmatmul.bf16.gmra.mxu3 %v8874_v5  ;;  %2389 = vmatmul.bf16.gmra.mxu0 %v8704_v45  ;;  %v8980_v16 = vsel %vm3411_vm3, %v2259_v37, %v3539_v12 }
 0x28e   :  { %11377 = vst [vmem:[#allocation71_spill] sm:$0xff] %v8980_v16  ;;  %2478 = vmatmul.bf16.gmra.mxu1 %v8707_v30  ;;  %2604 = vmatpush.bf16.msrb.mxu3 %v6926_v19 }
 0x28f   :  { %2567 = vmatmul.bf16.gmra.mxu2 %v8709_v34 }
 0x290   :  { %v2261_v4 = vpop.f32.mrf.mxu3 }
 0x291   :  { %v2262_v7 = vadd.f32 %v2261_v4, %v8734_v2 }
 0x292   :  { %v2528_v20 = vpop.f32.mrf.mxu2  ;;  %v2352_v50 = vpop.f32.mrf.mxu0 }
 0x293   :  { %v8987_v33 = vadd.f32 %v2528_v20, %v2440_v40  ;;  %v2353_v12 = vadd.f32 %v2352_v50, %v8938_v62  ;;  %v2441_v42 = vpop.f32.mrf.mxu1  ;;  %v3543_v59 = vmul.f32 0.1, %v2262_v7  ;;  %vm3415_vm4 = vcmp.ge.f32.partialorder %v2262_v7, 0.0 }
 0x295   :  { %v2442_v37 = vadd.f32 %v2441_v42, %v2353_v12  ;;  %v8996_v4 = vsel %vm3415_vm4, %v2262_v7, %v3543_v59 }
 0x296   :  { %11378 = vst [vmem:[#allocation72_spill] sm:$0xff] %v8996_v4 }
 0x298   :  { %v2263_v43 = vpop.f32.mrf.mxu3 }
 0x299   :  { %v2264_v34 = vadd.f32 %v2263_v43, %v8746_v26 }
 0x29a   :  { %v2530_v30 = vpop.f32.mrf.mxu2  ;;  %v2355_v28 = vpop.f32.mrf.mxu0 }
 0x29b   :  { %v8991_v61 = vadd.f32 %v2530_v30, %v2442_v37  ;;  %vm3419_vm5 = vcmp.ge.f32.partialorder %v2264_v34, 0.0  ;;  %v3547_v2 = vmul.f32 0.1, %v2264_v34  ;;  %v2356_v46 = vadd.f32 %v2355_v28, %v8938_v62  ;;  %v2444_v40 = vpop.f32.mrf.mxu1 }
 0x29d   :  { %v2445_v19 = vadd.f32 %v2444_v40, %v2356_v46  ;;  %2305 = vmatmul.bf16.gmra.mxu3 %v8888_v1  ;;  %2394 = vmatmul.bf16.gmra.mxu0 %v8739_v21  ;;  %v8998_v20 = vsel %vm3419_vm5, %v2264_v34, %v3547_v2 }
 0x29e   :  { %11379 = vst [vmem:[#allocation73_spill] sm:$0xff] %v8998_v20  ;;  %2483 = vmatmul.bf16.gmra.mxu1 %v8742_v51  ;;  %v6769_v20 = vld [vmem:[#allocation4 + $0x1e8] sm:$0xf] }
 0x29f   :  { %2572 = vmatmul.bf16.gmra.mxu2 %v8744_v32 }
 0x2a0   :  { %v2266_v26 = vpop.f32.mrf.mxu3 }
 0x2a1   :  { %v2267_v50 = vadd.f32 %v2266_v26, %v8757_v31  ;;  %v6641_v26 = vld [vmem:[#allocation4 + $0xe8] sm:$0xf] }
 0x2a2   :  { %v2533_v12 = vpop.f32.mrf.mxu2  ;;  %v2357_v37 = vpop.f32.mrf.mxu0 }
 0x2a3   :  { %v9005_v42 = vadd.f32 %v2533_v12, %v2445_v19  ;;  %v2358_v43 = vadd.f32 %v2357_v37, %v8938_v62  ;;  %v2446_v59 = vpop.f32.mrf.mxu1  ;;  %v3551_v34 = vmul.f32 0.1, %v2267_v50  ;;  %vm3423_vm6 = vcmp.ge.f32.partialorder %v2267_v50, 0.0  ;;  %v7382_v12 = vld [vmem:[#allocation4 + $0xf4] sm:$0xf0] }
 0x2a5   :  { %v2447_v7 = vadd.f32 %v2446_v59, %v2358_v43  ;;  %v9012_v37 = vsel %vm3423_vm6, %v2267_v50, %v3551_v34  ;;  %v7414_v59 = vld [vmem:[#allocation4 + $0x1f4] sm:$0xf0] }
 0x2a6   :  { %11380 = vst [vmem:[#allocation74_spill] sm:$0xff] %v9012_v37  ;;  %v6770_v16 = vor.u32 %v7414_v59, %v6769_v20  ;;  %v7442_v20 = vld [vmem:[#allocation4 + $0x2d4] sm:$0xf0] }
 0x2a7   :  { %v7438_v34 = vld [vmem:[#allocation4 + $0x2b4] sm:$0xf0] }
 0x2a8   :  { %v2268_v28 = vpop.f32.mrf.mxu3  ;;  %2776 = vmatpush.bf16.msrb.mxu1 %v6770_v16 }
 0x2a9   :  { %v2269_v2 = vadd.f32 %v2268_v28, %v8762_v55  ;;  %v6642_v55 = vor.u32 %v7382_v12, %v6641_v26  ;;  %v7446_v28 = vld [vmem:[#allocation4 + $0x2f4] sm:$0xf0]  ;;  %v6625_v26 = vld [vmem:[#allocation4 + $0xc8] sm:$0xf] }
 0x2aa   :  { %v2535_v46 = vpop.f32.mrf.mxu2  ;;  %v2360_v30 = vpop.f32.mrf.mxu0  ;;  %v7378_v12 = vld [vmem:[#allocation4 + $0xd4] sm:$0xf0] }
 0x2ab   :  { %v9009_v40 = vadd.f32 %v2535_v46, %v2447_v7  ;;  %vm3427_vm7 = vcmp.ge.f32.partialorder %v2269_v2, 0.0  ;;  %v3555_v4 = vmul.f32 0.1, %v2269_v2  ;;  %v2361_v31 = vadd.f32 %v2360_v30, %v8938_v62  ;;  %v2449_v19 = vpop.f32.mrf.mxu1  ;;  %v6897_v7 = vld [vmem:[#allocation4 + $0x2e8] sm:$0xf]  ;;  %2687 = vmatpush.bf16.msrb.mxu0 %v6642_v55 }
 0x2ac   :  { %v7447_v30 = vld [vmem:[#allocation4 + $0x304] sm:$0xf]  ;;  %v6898_v50 = vor.u32 %v7446_v28, %v6897_v7 }
 0x2ad   :  { %v2450_v43 = vadd.f32 %v2449_v19, %v2361_v31  ;;  %2310 = vmatmul.bf16.gmra.mxu3 %v8902_v49  ;;  %2399 = vmatmul.bf16.gmra.mxu0 %v8241_v44  ;;  %v9016_v46 = vsel %vm3427_vm7, %v2269_v2, %v3555_v4  ;;  %v6910_v31 = vor.u32 %v7447_v30, %v6907_v58  ;;  %v6753_v4 = vld [vmem:[#allocation4 + $0x1c8] sm:$0xf]  ;;  %v7410_v44 = vld [vmem:[#allocation4 + $0x1d4] sm:$0xf0] }
 0x2ae   :  { %11381 = vst [vmem:[#allocation75_spill] sm:$0xff] %v9016_v46  ;;  %2488 = vmatmul.bf16.gmra.mxu1 %v8381_v36  ;;  %2865 = vmatpush.bf16.msrb.mxu2 %v6898_v50  ;;  %v6881_v49 = vld [vmem:[#allocation4 + $0x2c8] sm:$0xf]  ;;  %v6754_v28 = vor.u32 %v7410_v44, %v6753_v4  ;;  %v7374_v50 = vld [vmem:[#allocation4 + $0xb4] sm:$0xf0] }
 0x2af   :  { %2577 = vmatmul.bf16.gmra.mxu2 %v8535_v56  ;;  %2605 = vmatpush.bf16.msrb.mxu3 %v6910_v31  ;;  %v6626_v56 = vor.u32 %v7378_v12, %v6625_v26  ;;  %v6882_v58 = vor.u32 %v7442_v20, %v6881_v49  ;;  %v6609_v30 = vld [vmem:[#allocation4 + $0xa8] sm:$0xf]  ;;  %v7406_v26 = vld [vmem:[#allocation4 + $0x1b4] sm:$0xf0] }
 0x2b0   :  { %v2271_v19 = vpop.f32.mrf.mxu3  ;;  %2777 = vmatpush.bf16.msrb.mxu1 %v6754_v28  ;;  %v6610_v31 = vor.u32 %v7374_v50, %v6609_v30  ;;  %v6865_v12 = vld [vmem:[#allocation4 + $0x2a8] sm:$0xf] }
 0x2b1   :  { %v2272_v2 = vadd.f32 %v2271_v19, %v8773_v25  ;;  %2688 = vmatpush.bf16.msrb.mxu0 %v6626_v56  ;;  %v6737_v25 = vld [vmem:[#allocation4 + $0x1a8] sm:$0xf]  ;;  %v7370_v56 = vld [vmem:[#allocation4 + $0x94] sm:$0xf0] }
 0x2b2   :  { %v2538_v36 = vpop.f32.mrf.mxu2  ;;  %v2362_v7 = vpop.f32.mrf.mxu0  ;;  %2866 = vmatpush.bf16.msrb.mxu2 %v6882_v58  ;;  %v6738_v37 = vor.u32 %v7406_v26, %v6737_v25  ;;  %v6593_v49 = vld [vmem:[#allocation4 + $0x88] sm:$0xf]  ;;  %v7402_v58 = vld [vmem:[#allocation4 + $0x194] sm:$0xf0] }
 0x2b3   :  { %v9023_v59 = vadd.f32 %v2538_v36, %v2450_v43  ;;  %v2363_v55 = vadd.f32 %v2362_v7, %v8938_v62  ;;  %v2451_v16 = vpop.f32.mrf.mxu1  ;;  %v6866_v36 = vor.u32 %v7438_v34, %v6865_v12  ;;  %vm3431_vm8 = vcmp.ge.f32.partialorder %v2272_v2, 0.0  ;;  %v6721_v4 = vld [vmem:[#allocation4 + $0x188] sm:$0xf] }
 0x2b4   :  { %v3559_v43 = vmul.f32 0.1, %v2272_v2  ;;  %2778 = vmatpush.bf16.msrb.mxu1 %v6738_v37  ;;  %v6594_v28 = vor.u32 %v7370_v56, %v6593_v49  ;;  %v6722_v34 = vor.u32 %v7402_v58, %v6721_v4  ;;  %v6577_v12 = vld [vmem:[#allocation4 + $0x68] sm:$0xf]  ;;  %v7398_v56 = vld [vmem:[#allocation4 + $0x174] sm:$0xf0] }
 0x2b5   :  { %v2452_v19 = vadd.f32 %v2451_v16, %v2363_v55  ;;  %2689 = vmatpush.bf16.msrb.mxu0 %v6610_v31  ;;  %v6849_v55 = vld [vmem:[#allocation4 + $0x288] sm:$0xf]  ;;  %v7434_v16 = vld [vmem:[#allocation4 + $0x294] sm:$0xf0] }
 0x2b6   :  { %2867 = vmatpush.bf16.msrb.mxu2 %v6866_v36  ;;  %v6850_v25 = vor.u32 %v7434_v16, %v6849_v55  ;;  %v6705_v36 = vld [vmem:[#allocation4 + $0x168] sm:$0xf] }
 0x2b7   :  { %v6833_v4 = vld [vmem:[#allocation4 + $0x268] sm:$0xf] }
 0x2b8   :  { %v2273_v44 = vpop.f32.mrf.mxu3  ;;  %2779 = vmatpush.bf16.msrb.mxu1 %v6722_v34  ;;  %v6561_v16 = vld [vmem:[#allocation4 + $0x48] sm:$0xf] }
 0x2b9   :  { %v2274_v20 = vadd.f32 %v2273_v44, %v8778_v47  ;;  %2690 = vmatpush.bf16.msrb.mxu0 %v6594_v28  ;;  %v7366_v47 = vld [vmem:[#allocation4 + $0x74] sm:$0xf0]  ;;  %v9031_v44 = vsel %vm3431_vm8, %v2272_v2, %v3559_v43  ;;  %v6706_v28 = vor.u32 %v7398_v56, %v6705_v36  ;;  %v6689_v34 = vld [vmem:[#allocation4 + $0x148] sm:$0xf] }
 0x2ba   :  { %v2540_v7 = vpop.f32.mrf.mxu2  ;;  %v2365_v50 = vpop.f32.mrf.mxu0  ;;  %2868 = vmatpush.bf16.msrb.mxu2 %v6850_v25  ;;  %11382 = vst [vmem:[#allocation76_spill] sm:$0xff] %v9031_v44  ;;  %v11384_v25 = vld [vmem:[#allocation46_spill] sm:$0xff]  ;;  %v6673_v2 = vld [vmem:[#allocation4 + $0x128] sm:$0xf]  ;;  %v7422_v44 = vld [vmem:[#allocation4 + $0x234] sm:$0xf0] }
 0x2bb   :  { %v9027_v30 = vadd.f32 %v2540_v7, %v2452_v19  ;;  %vm3435_vm9 = vcmp.ge.f32.partialorder %v2274_v20, 0.0  ;;  %v3563_v31 = vmul.f32 0.1, %v2274_v20  ;;  %v2366_v37 = vadd.f32 %v2365_v50, %v8938_v62  ;;  %v2454_v26 = vpop.f32.mrf.mxu1  ;;  %v7430_v7 = vld [vmem:[#allocation4 + $0x274] sm:$0xf0] }
 0x2bc   :  { %v6578_v19 = vor.u32 %v7366_v47, %v6577_v12  ;;  %v6834_v55 = vor.u32 %v7430_v7, %v6833_v4  ;;  %2780 = vmatpush.bf16.msrb.mxu1 %v6706_v28  ;;  %v7362_v50 = vld [vmem:[#allocation4 + $0x54] sm:$0xf0]  ;;  %v6817_v12 = vld [vmem:[#allocation4 + $0x248] sm:$0xf] }
 0x2bd   :  { %v2455_v49 = vadd.f32 %v2454_v26, %v2366_v37  ;;  %2315 = vmatmul.bf16.gmra.mxu3 %v8916_v3  ;;  %2404 = vmatmul.bf16.gmra.mxu0 %v8273_v54  ;;  %v9036_v58 = vsel %vm3435_vm9, %v2274_v20, %v3563_v31  ;;  %v6562_v31 = vor.u32 %v7362_v50, %v6561_v16  ;;  %v7394_v26 = vld [vmem:[#allocation4 + $0x154] sm:$0xf0]  ;;  %v6545_v28 = vld [vmem:[#allocation4 + $0x28] sm:$0xf] }
 0x2be   :  { %11383 = vst [vmem:[#allocation77_spill] sm:$0xff] %v9036_v58  ;;  %2493 = vmatmul.bf16.gmra.mxu1 %v8419_v48  ;;  %2691 = vmatpush.bf16.msrb.mxu0 %v6578_v19  ;;  %v7426_v47 = vld [vmem:[#allocation4 + $0x254] sm:$0xf0]  ;;  %v6690_v56 = vor.u32 %v7394_v26, %v6689_v34  ;;  %v6801_v50 = vld [vmem:[#allocation4 + $0x228] sm:$0xf] }
 0x2bf   :  { %2582 = vmatmul.bf16.gmra.mxu2 %v8575_v10  ;;  %v6818_v4 = vor.u32 %v7426_v47, %v6817_v12  ;;  %v7390_v16 = vld [vmem:[#allocation4 + $0x134] sm:$0xf0]  ;;  %v6529_v26 = vld [vmem:[#allocation4 + $0x8] sm:$0xf] }
 0x2c0   :  { %v2276_v43 = vpop.f32.mrf.mxu3  ;;  %2869 = vmatpush.bf16.msrb.mxu2 %v6834_v55  ;;  %2781 = vmatpush.bf16.msrb.mxu1 %v6690_v56  ;;  %v7358_v55 = vld [vmem:[#allocation4 + $0x34] sm:$0xf0]  ;;  %v6674_v58 = vor.u32 %v7390_v16, %v6673_v2 }
 0x2c1   :  { %v2277_v37 = vadd.f32 %v2276_v43, %v11384_v25  ;;  %v6546_v25 = vor.u32 %v7358_v55, %v6545_v28  ;;  %v7354_v12 = vld [vmem:[#allocation4 + $0x14] sm:$0xf0] }
 0x2c2   :  { %v2543_v20 = vpop.f32.mrf.mxu2  ;;  %v2367_v36 = vpop.f32.mrf.mxu0  ;;  %2692 = vmatpush.bf16.msrb.mxu0 %v6562_v31  ;;  %v6657_v31 = vld [vmem:[#allocation4 + $0x108] sm:$0xf]  ;;  %v6530_v56 = vor.u32 %v7354_v12, %v6529_v26 }
 0x2c3   :  { %v9043_v46 = vadd.f32 %v2543_v20, %v2455_v49  ;;  %v2368_v19 = vadd.f32 %v2367_v36, %v8938_v62  ;;  %v2456_v7 = vpop.f32.mrf.mxu1  ;;  %v6802_v49 = vor.u32 %v7422_v44, %v6801_v50  ;;  %v3567_v20 = vmul.f32 0.1, %v2277_v37 }
 0x2c4   :  { %2870 = vmatpush.bf16.msrb.mxu2 %v6818_v4  ;;  %2782 = vmatpush.bf16.msrb.mxu1 %v6674_v58  ;;  %v7386_v4 = vld [vmem:[#allocation4 + $0x114] sm:$0xf0]  ;;  %vm3439_vm10 = vcmp.ge.f32.partialorder %v2277_v37, 0.0 }
 0x2c5   :  { %v2457_v43 = vadd.f32 %v2456_v7, %v2368_v19  ;;  %v6785_v19 = vld [vmem:[#allocation4 + $0x208] sm:$0xf]  ;;  %v7418_v7 = vld [vmem:[#allocation4 + $0x214] sm:$0xf0]  ;;  %v6658_v44 = vor.u32 %v7386_v4, %v6657_v31  ;;  %v9052_v50 = vsel %vm3439_vm10, %v2277_v37, %v3567_v20 }
 0x2c6   :  { %2693 = vmatpush.bf16.msrb.mxu0 %v6546_v25  ;;  %v6786_v55 = vor.u32 %v7418_v7, %v6785_v19  ;;  %11385 = vst [vmem:[#allocation46_spill] sm:$0xff] %v9052_v50 }
 0x2c8   :  { %v2278_v34 = vpop.f32.mrf.mxu3  ;;  %2871 = vmatpush.bf16.msrb.mxu2 %v6802_v49  ;;  %2783 = vmatpush.bf16.msrb.mxu1 %v6658_v44  ;;  %v7025_v49 = vld [vmem:[#allocation4 + $0x3e8] sm:$0xf] }
 0x2c9   :  { %v2279_v47 = vadd.f32 %v2278_v34, %v8795_v18  ;;  %v7478_v34 = vld [vmem:[#allocation4 + $0x3f4] sm:$0xf0] }
 0x2ca   :  { %v2545_v36 = vpop.f32.mrf.mxu2  ;;  %v2370_v2 = vpop.f32.mrf.mxu0  ;;  %2694 = vmatpush.bf16.msrb.mxu0 %v6530_v56  ;;  %v7026_v12 = vor.u32 %v7478_v34, %v7025_v49 }
 0x2cb   :  { %v9047_v28 = vadd.f32 %v2545_v36, %v2457_v43  ;;  %vm3443_vm11 = vcmp.ge.f32.partialorder %v2279_v47, 0.0  ;;  %v3571_v25 = vmul.f32 0.1, %v2279_v47  ;;  %v2371_v58 = vadd.f32 %v2370_v2, %v8938_v62  ;;  %v2459_v16 = vpop.f32.mrf.mxu1 }
 0x2cc   :  { %2872 = vmatpush.bf16.msrb.mxu2 %v6786_v55  ;;  %2954 = vmatpush.bf16.msra.mxu3 %v7026_v12 }
 0x2cd   :  { %v2460_v18 = vadd.f32 %v2459_v16, %v2371_v58  ;;  %2320 = vmatmul.bf16.gmra.mxu3 %v8930_v14  ;;  %2409 = vmatmul.bf16.gmra.mxu0 %v8307_v27  ;;  %v9054_v43 = vsel %vm3443_vm11, %v2279_v47, %v3571_v25 }
 0x2ce   :  { %11386 = vst [vmem:[#allocation78_spill] sm:$0xff] %v9054_v43  ;;  %2498 = vmatmul.bf16.gmra.mxu1 %v8457_v0  ;;  %v11396_v43 = vld [vmem:[#allocation52_spill] sm:$0xff] }
 0x2cf   :  { %2587 = vmatmul.bf16.gmra.mxu2 %v8615_v15 }
 0x2d0   :  { %v2281_v31 = vpop.f32.mrf.mxu3 }
 0x2d1   :  { %v2282_v36 = vadd.f32 %v2281_v31, %v8806_v38 }
 0x2d2   :  { %v2548_v56 = vpop.f32.mrf.mxu2  ;;  %v2372_v37 = vpop.f32.mrf.mxu0 }
 0x2d3   :  { %v9061_v4 = vadd.f32 %v2548_v56, %v2460_v18  ;;  %v2373_v20 = vadd.f32 %v2372_v37, %v8938_v62  ;;  %v2461_v47 = vpop.f32.mrf.mxu1  ;;  %v3575_v2 = vmul.f32 0.1, %v2282_v36  ;;  %vm3447_vm12 = vcmp.ge.f32.partialorder %v2282_v36, 0.0  ;;  %v11389_v56 = vld [vmem:[#allocation49_spill] sm:$0xff] }
 0x2d5   :  { %v2462_v19 = vadd.f32 %v2461_v47, %v2373_v20  ;;  %v9070_v34 = vsel %vm3447_vm12, %v2282_v36, %v3575_v2 }
 0x2d6   :  { %11387 = vst [vmem:[#allocation79_spill] sm:$0xff] %v9070_v34 }
 0x2d8   :  { %v2283_v7 = vpop.f32.mrf.mxu3 }
 0x2d9   :  { %v2284_v44 = vadd.f32 %v2283_v7, %v8811_v57 }
 0x2da   :  { %v2550_v55 = vpop.f32.mrf.mxu2  ;;  %v2375_v58 = vpop.f32.mrf.mxu0 }
 0x2db   :  { %v9065_v25 = vadd.f32 %v2550_v55, %v2462_v19  ;;  %vm3451_vm13 = vcmp.ge.f32.partialorder %v2284_v44, 0.0  ;;  %v3579_v38 = vmul.f32 0.1, %v2284_v44  ;;  %v2376_v16 = vadd.f32 %v2375_v58, %v8938_v62  ;;  %v2464_v18 = vpop.f32.mrf.mxu1 }
 0x2dd   :  { %v2465_v49 = vadd.f32 %v2464_v18, %v2376_v16  ;;  %2325 = vmatmul.bf16.gmra.mxu3 %v8946_v39  ;;  %2414 = vmatmul.bf16.gmra.mxu0 %v8343_v24  ;;  %v9072_v12 = vsel %vm3451_vm13, %v2284_v44, %v3579_v38 }
 0x2de   :  { %11388 = vst [vmem:[#allocation80_spill] sm:$0xff] %v9072_v12  ;;  %2503 = vmatmul.bf16.gmra.mxu1 %v8495_v8 }
 0x2df   :  { %2592 = vmatmul.bf16.gmra.mxu2 %v8654_v6 }
 0x2e0   :  { %v2286_v31 = vpop.f32.mrf.mxu3 }
 0x2e1   :  { %v2287_v37 = vadd.f32 %v2286_v31, %v11389_v56 }
 0x2e2   :  { %v2553_v20 = vpop.f32.mrf.mxu2  ;;  %v2377_v19 = vpop.f32.mrf.mxu0 }
 0x2e3   :  { %v9079_v47 = vadd.f32 %v2553_v20, %v2465_v49  ;;  %v2378_v7 = vadd.f32 %v2377_v19, %v8938_v62  ;;  %v2466_v36 = vpop.f32.mrf.mxu1  ;;  %v3583_v55 = vmul.f32 0.1, %v2287_v37  ;;  %vm3455_vm14 = vcmp.ge.f32.partialorder %v2287_v37, 0.0 }
 0x2e5   :  { %v2467_v2 = vadd.f32 %v2466_v36, %v2378_v7  ;;  %v9088_v20 = vsel %vm3455_vm14, %v2287_v37, %v3583_v55  ;;  %v11393_v7 = vld [vmem:[#allocation10_spill] sm:$0xff]  ;;  %v7009_v36 = vld [vmem:[#allocation4 + $0x3c8] sm:$0xf] }
 0x2e6   :  { %11390 = vst [vmem:[#allocation49_spill] sm:$0xff] %v9088_v20 }
 0x2e8   :  { %v2288_v44 = vpop.f32.mrf.mxu3 }
 0x2e9   :  { %v2289_v58 = vadd.f32 %v2288_v44, %v8827_v11  ;;  %v11392_v11 = vld [vmem:[#allocation9_spill] sm:$0xff] }
 0x2ea   :  { %v2555_v38 = vpop.f32.mrf.mxu2  ;;  %v2380_v18 = vpop.f32.mrf.mxu0 }
 0x2eb   :  { %v9083_v16 = vadd.f32 %v2555_v38, %v2467_v2  ;;  %vm3459_vm15 = vcmp.ge.f32.partialorder %v2289_v58, 0.0  ;;  %v3587_v57 = vmul.f32 0.1, %v2289_v58  ;;  %v2381_v31 = vadd.f32 %v2380_v18, %v8938_v62  ;;  %v2469_v49 = vpop.f32.mrf.mxu1  ;;  %v7474_v2 = vld [vmem:[#allocation4 + $0x3d4] sm:$0xf0] }
 0x2ec   :  { %v7010_v38 = vor.u32 %v7474_v2, %v7009_v36 }
 0x2ed   :  { %v2470_v56 = vadd.f32 %v2469_v49, %v2381_v31  ;;  %2606 = vmatmul.bf16.vlgmr.msrb.gmra.mxu3 %v8691_v23  ;;  %2695 = vmatmul.bf16.vlgmr.msrb.gmra.mxu0 %v8320_v52  ;;  %v9090_v19 = vsel %vm3459_vm15, %v2289_v58, %v3587_v57  ;;  %v11394_v31 = vld [vmem:[#allocation51_spill] sm:$0xff] }
 0x2ee   :  { %11391 = vst [vmem:[#allocation81_spill] sm:$0xff] %v9090_v19  ;;  %2784 = vmatmul.bf16.vlgmr.msrb.gmra.mxu1 %v11392_v11  ;;  %2955 = vmatpush.bf16.msra.mxu3 %v7010_v38 }
 0x2ef   :  { %2873 = vmatmul.bf16.vlgmr.msrb.gmra.mxu2 %v11393_v7 }
 0x2f0   :  { %v2291_v18 = vpop.f32.mrf.mxu3 }
 0x2f1   :  { %v2292_v49 = vadd.f32 %v2291_v18, %v11394_v31  ;;  %v11398_v18 = vld [vmem:[#allocation40_spill] sm:$0xff]  ;;  %v11399_v31 = vld [vmem:[#allocation11_spill] sm:$0xff] }
 0x2f2   :  { %v2558_v26 = vpop.f32.mrf.mxu2  ;;  %v2382_v37 = vpop.f32.mrf.mxu0 }
 0x2f3   :  { %v9097_v34 = vadd.f32 %v2558_v26, %v2470_v56  ;;  %v2383_v57 = vadd.f32 %v2382_v37, %v8938_v62  ;;  %v2471_v55 = vpop.f32.mrf.mxu1  ;;  %v3591_v50 = vmul.f32 0.1, %v2292_v49  ;;  %vm3463_vm0 = vcmp.ge.f32.partialorder %v2292_v49, 0.0 }
 0x2f5   :  { %11395 = vst [vmem:[#allocation51_spill] sm:$0xff] %v9097_v34  ;;  %v2472_v58 = vadd.f32 %v2471_v55, %v2383_v57  ;;  %v9106_v37 = vsel %vm3463_vm0, %v2292_v49, %v3591_v50 }
 0x2f6   :  { %11400 = vst [vmem:[#allocation82_spill] sm:$0xff] %v9106_v37 }
 0x2f8   :  { %v2293_v12 = vpop.f32.mrf.mxu3 }
 0x2f9   :  { %v2294_v7 = vadd.f32 %v2293_v12, %v11396_v43  ;;  %v11402_v43 = vld [vmem:[#allocation12_spill] sm:$0xff]  ;;  %v11403_v12 = vld [vmem:[#allocation13_spill] sm:$0xff] }
 0x2fa   :  { %v2560_v11 = vpop.f32.mrf.mxu2  ;;  %v2385_v36 = vpop.f32.mrf.mxu0 }
 0x2fb   :  { %v9101_v44 = vadd.f32 %v2560_v11, %v2472_v58  ;;  %vm3467_vm1 = vcmp.ge.f32.partialorder %v2294_v7, 0.0  ;;  %v3595_v2 = vmul.f32 0.1, %v2294_v7  ;;  %v2386_v38 = vadd.f32 %v2385_v36, %v8938_v62  ;;  %v2474_v26 = vpop.f32.mrf.mxu1  ;;  %v11404_v58 = vld [vmem:[#allocation54_spill] sm:$0xff] }
 0x2fd   :  { %11397 = vst [vmem:[#allocation52_spill] sm:$0xff] %v9101_v44  ;;  %v2475_v56 = vadd.f32 %v2474_v26, %v2386_v38  ;;  %2611 = vmatmul.bf16.gmra.mxu3 %v11398_v18  ;;  %2700 = vmatmul.bf16.gmra.mxu0 %v11399_v31  ;;  %v9108_v57 = vsel %vm3467_vm1, %v2294_v7, %v3595_v2  ;;  %v11406_v31 = vld [vmem:[#allocation55_spill] sm:$0xff] }
 0x2fe   :  { %11401 = vst [vmem:[#allocation83_spill] sm:$0xff] %v9108_v57  ;;  %2789 = vmatmul.bf16.gmra.mxu1 %v11402_v43 }
 0x2ff   :  { %2878 = vmatmul.bf16.gmra.mxu2 %v11403_v12 }
 0x300   :  { %v2296_v55 = vpop.f32.mrf.mxu3 }
 0x301   :  { %v2297_v36 = vadd.f32 %v2296_v55, %v11404_v58  ;;  %v11408_v58 = vld [vmem:[#allocation43_spill] sm:$0xff] }
 0x302   :  { %v2563_v20 = vpop.f32.mrf.mxu2  ;;  %v2387_v26 = vpop.f32.mrf.mxu0 }
 0x303   :  { %v9115_v38 = vadd.f32 %v2563_v20, %v2475_v56  ;;  %v2388_v19 = vadd.f32 %v2387_v26, %v8938_v62  ;;  %v2476_v50 = vpop.f32.mrf.mxu1  ;;  %v3599_v2 = vmul.f32 0.1, %v2297_v36  ;;  %vm3471_vm2 = vcmp.ge.f32.partialorder %v2297_v36, 0.0  ;;  %v11409_v26 = vld [vmem:[#allocation15_spill] sm:$0xff] }
 0x305   :  { %11405 = vst [vmem:[#allocation54_spill] sm:$0xff] %v9115_v38  ;;  %v2477_v49 = vadd.f32 %v2476_v50, %v2388_v19  ;;  %v9124_v19 = vsel %vm3471_vm2, %v2297_v36, %v3599_v2  ;;  %v11416_v38 = vld [vmem:[#allocation57_spill] sm:$0xff] }
 0x306   :  { %11410 = vst [vmem:[#allocation84_spill] sm:$0xff] %v9124_v19 }
 0x308   :  { %v2298_v7 = vpop.f32.mrf.mxu3 }
 0x309   :  { %v2299_v43 = vadd.f32 %v2298_v7, %v11406_v31  ;;  %v11412_v31 = vld [vmem:[#allocation16_spill] sm:$0xff]  ;;  %v11413_v7 = vld [vmem:[#allocation17_spill] sm:$0xff] }
 0x30a   :  { %v2565_v18 = vpop.f32.mrf.mxu2  ;;  %v2390_v11 = vpop.f32.mrf.mxu0 }
 0x30b   :  { %v9119_v12 = vadd.f32 %v2565_v18, %v2477_v49  ;;  %vm3475_vm3 = vcmp.ge.f32.partialorder %v2299_v43, 0.0  ;;  %v3603_v37 = vmul.f32 0.1, %v2299_v43  ;;  %v2391_v55 = vadd.f32 %v2390_v11, %v8938_v62  ;;  %v2479_v20 = vpop.f32.mrf.mxu1  ;;  %v6993_v18 = vld [vmem:[#allocation4 + $0x3a8] sm:$0xf] }
 0x30c   :  { %v7470_v49 = vld [vmem:[#allocation4 + $0x3b4] sm:$0xf0] }
 0x30d   :  { %11407 = vst [vmem:[#allocation55_spill] sm:$0xff] %v9119_v12  ;;  %v2480_v56 = vadd.f32 %v2479_v20, %v2391_v55  ;;  %2616 = vmatmul.bf16.gmra.mxu3 %v11408_v58  ;;  %2705 = vmatmul.bf16.gmra.mxu0 %v11409_v26  ;;  %v9126_v50 = vsel %vm3475_vm3, %v2299_v43, %v3603_v37  ;;  %v11414_v55 = vld [vmem:[#allocation56_spill] sm:$0xff] }
 0x30e   :  { %11411 = vst [vmem:[#allocation85_spill] sm:$0xff] %v9126_v50  ;;  %2794 = vmatmul.bf16.gmra.mxu1 %v11412_v31  ;;  %v6994_v11 = vor.u32 %v7470_v49, %v6993_v18 }
 0x30f   :  { %2883 = vmatmul.bf16.gmra.mxu2 %v11413_v7 }
 0x310   :  { %v2301_v12 = vpop.f32.mrf.mxu3  ;;  %2956 = vmatpush.bf16.msra.mxu3 %v6994_v11  ;;  %v11418_v11 = vld [vmem:[#allocation44_spill] sm:$0xff] }
 0x311   :  { %v2302_v20 = vadd.f32 %v2301_v12, %v11414_v55  ;;  %v11419_v55 = vld [vmem:[#allocation18_spill] sm:$0xff] }
 0x312   :  { %v2568_v58 = vpop.f32.mrf.mxu2  ;;  %v2392_v36 = vpop.f32.mrf.mxu0 }
 0x313   :  { %v9133_v26 = vadd.f32 %v2568_v58, %v2480_v56  ;;  %v2393_v37 = vadd.f32 %v2392_v36, %v8938_v62  ;;  %v2481_v43 = vpop.f32.mrf.mxu1  ;;  %v3607_v7 = vmul.f32 0.1, %v2302_v20  ;;  %vm3479_vm4 = vcmp.ge.f32.partialorder %v2302_v20, 0.0 }
 0x315   :  { %11415 = vst [vmem:[#allocation56_spill] sm:$0xff] %v9133_v26  ;;  %v2482_v2 = vadd.f32 %v2481_v43, %v2393_v37  ;;  %v9142_v36 = vsel %vm3479_vm4, %v2302_v20, %v3607_v7 }
 0x316   :  { %11420 = vst [vmem:[#allocation86_spill] sm:$0xff] %v9142_v36 }
 0x318   :  { %v2303_v31 = vpop.f32.mrf.mxu3 }
 0x319   :  { %v2304_v44 = vadd.f32 %v2303_v31, %v11416_v38  ;;  %v11422_v38 = vld [vmem:[#allocation19_spill] sm:$0xff]  ;;  %v11423_v31 = vld [vmem:[#allocation20_spill] sm:$0xff] }
 0x31a   :  { %v2570_v34 = vpop.f32.mrf.mxu2  ;;  %v2395_v18 = vpop.f32.mrf.mxu0 }
 0x31b   :  { %v9137_v57 = vadd.f32 %v2570_v34, %v2482_v2  ;;  %vm3483_vm5 = vcmp.ge.f32.partialorder %v2304_v44, 0.0  ;;  %v3611_v12 = vmul.f32 0.1, %v2304_v44  ;;  %v2396_v49 = vadd.f32 %v2395_v18, %v8938_v62  ;;  %v2484_v56 = vpop.f32.mrf.mxu1  ;;  %v11424_v2 = vld [vmem:[#allocation58_spill] sm:$0xff] }
 0x31d   :  { %11417 = vst [vmem:[#allocation57_spill] sm:$0xff] %v9137_v57  ;;  %v2485_v58 = vadd.f32 %v2484_v56, %v2396_v49  ;;  %2621 = vmatmul.bf16.gmra.mxu3 %v11418_v11  ;;  %2710 = vmatmul.bf16.gmra.mxu0 %v11419_v55  ;;  %v9144_v37 = vsel %vm3483_vm5, %v2304_v44, %v3611_v12  ;;  %v11426_v55 = vld [vmem:[#allocation59_spill] sm:$0xff] }
 0x31e   :  { %11421 = vst [vmem:[#allocation87_spill] sm:$0xff] %v9144_v37  ;;  %2799 = vmatmul.bf16.gmra.mxu1 %v11422_v38 }
 0x31f   :  { %2888 = vmatmul.bf16.gmra.mxu2 %v11423_v31 }
 0x320   :  { %v2306_v43 = vpop.f32.mrf.mxu3 }
 0x321   :  { %v2307_v18 = vadd.f32 %v2306_v43, %v11424_v2  ;;  %v11428_v2 = vld [vmem:[#allocation45_spill] sm:$0xff] }
 0x322   :  { %v2573_v19 = vpop.f32.mrf.mxu2  ;;  %v2397_v56 = vpop.f32.mrf.mxu0 }
 0x323   :  { %v9151_v49 = vadd.f32 %v2573_v19, %v2485_v58  ;;  %v2398_v50 = vadd.f32 %v2397_v56, %v8938_v62  ;;  %v2486_v7 = vpop.f32.mrf.mxu1  ;;  %v3615_v12 = vmul.f32 0.1, %v2307_v18  ;;  %vm3487_vm6 = vcmp.ge.f32.partialorder %v2307_v18, 0.0  ;;  %v11429_v56 = vld [vmem:[#allocation21_spill] sm:$0xff] }
 0x325   :  { %11425 = vst [vmem:[#allocation58_spill] sm:$0xff] %v9151_v49  ;;  %v2487_v20 = vadd.f32 %v2486_v7, %v2398_v50  ;;  %v9160_v50 = vsel %vm3487_vm6, %v2307_v18, %v3615_v12  ;;  %v11436_v49 = vld [vmem:[#allocation61_spill] sm:$0xff] }
 0x326   :  { %11430 = vst [vmem:[#allocation88_spill] sm:$0xff] %v9160_v50 }
 0x328   :  { %v2308_v44 = vpop.f32.mrf.mxu3 }
 0x329   :  { %v2309_v38 = vadd.f32 %v2308_v44, %v11426_v55  ;;  %v11432_v55 = vld [vmem:[#allocation22_spill] sm:$0xff]  ;;  %v11433_v44 = vld [vmem:[#allocation23_spill] sm:$0xff] }
 0x32a   :  { %v2575_v11 = vpop.f32.mrf.mxu2  ;;  %v2400_v34 = vpop.f32.mrf.mxu0 }
 0x32b   :  { %v9155_v31 = vadd.f32 %v2575_v11, %v2487_v20  ;;  %vm3491_vm7 = vcmp.ge.f32.partialorder %v2309_v38, 0.0  ;;  %v3619_v36 = vmul.f32 0.1, %v2309_v38  ;;  %v2401_v43 = vadd.f32 %v2400_v34, %v8938_v62  ;;  %v2489_v19 = vpop.f32.mrf.mxu1  ;;  %v6977_v11 = vld [vmem:[#allocation4 + $0x388] sm:$0xf] }
 0x32c   :  { %v7466_v20 = vld [vmem:[#allocation4 + $0x394] sm:$0xf0] }
 0x32d   :  { %11427 = vst [vmem:[#allocation59_spill] sm:$0xff] %v9155_v31  ;;  %v2490_v58 = vadd.f32 %v2489_v19, %v2401_v43  ;;  %2626 = vmatmul.bf16.gmra.mxu3 %v11428_v2  ;;  %2715 = vmatmul.bf16.gmra.mxu0 %v11429_v56  ;;  %v9162_v7 = vsel %vm3491_vm7, %v2309_v38, %v3619_v36  ;;  %v11434_v43 = vld [vmem:[#allocation60_spill] sm:$0xff] }
 0x32e   :  { %11431 = vst [vmem:[#allocation89_spill] sm:$0xff] %v9162_v7  ;;  %2804 = vmatmul.bf16.gmra.mxu1 %v11432_v55  ;;  %v6978_v34 = vor.u32 %v7466_v20, %v6977_v11 }
 0x32f   :  { %2893 = vmatmul.bf16.gmra.mxu2 %v11433_v44 }
 0x330   :  { %v2311_v31 = vpop.f32.mrf.mxu3  ;;  %2957 = vmatpush.bf16.msra.mxu3 %v6978_v34  ;;  %v11438_v34 = vld [vmem:[#allocation47_spill] sm:$0xff] }
 0x331   :  { %v2312_v19 = vadd.f32 %v2311_v31, %v11434_v43  ;;  %v11439_v43 = vld [vmem:[#allocation24_spill] sm:$0xff] }
 0x332   :  { %v2578_v2 = vpop.f32.mrf.mxu2  ;;  %v2402_v18 = vpop.f32.mrf.mxu0 }
 0x333   :  { %v9169_v56 = vadd.f32 %v2578_v2, %v2490_v58  ;;  %v2403_v36 = vadd.f32 %v2402_v18, %v8938_v62  ;;  %v2491_v38 = vpop.f32.mrf.mxu1  ;;  %v3623_v44 = vmul.f32 0.1, %v2312_v19  ;;  %vm3495_vm8 = vcmp.ge.f32.partialorder %v2312_v19, 0.0 }
 0x335   :  { %11435 = vst [vmem:[#allocation60_spill] sm:$0xff] %v9169_v56  ;;  %v2492_v12 = vadd.f32 %v2491_v38, %v2403_v36  ;;  %v9178_v18 = vsel %vm3495_vm8, %v2312_v19, %v3623_v44 }
 0x336   :  { %11440 = vst [vmem:[#allocation90_spill] sm:$0xff] %v9178_v18 }
 0x338   :  { %v2313_v55 = vpop.f32.mrf.mxu3 }
 0x339   :  { %v2314_v57 = vadd.f32 %v2313_v55, %v11436_v49  ;;  %v11442_v49 = vld [vmem:[#allocation25_spill] sm:$0xff]  ;;  %v11443_v55 = vld [vmem:[#allocation26_spill] sm:$0xff] }
 0x33a   :  { %v2580_v26 = vpop.f32.mrf.mxu2  ;;  %v2405_v11 = vpop.f32.mrf.mxu0 }
 0x33b   :  { %v9173_v37 = vadd.f32 %v2580_v26, %v2492_v12  ;;  %vm3499_vm9 = vcmp.ge.f32.partialorder %v2314_v57, 0.0  ;;  %v3627_v31 = vmul.f32 0.1, %v2314_v57  ;;  %v2406_v20 = vadd.f32 %v2405_v11, %v8938_v62  ;;  %v2494_v58 = vpop.f32.mrf.mxu1  ;;  %v11444_v12 = vld [vmem:[#allocation63_spill] sm:$0xff] }
 0x33d   :  { %11437 = vst [vmem:[#allocation61_spill] sm:$0xff] %v9173_v37  ;;  %v2495_v2 = vadd.f32 %v2494_v58, %v2406_v20  ;;  %2631 = vmatmul.bf16.gmra.mxu3 %v11438_v34  ;;  %2720 = vmatmul.bf16.gmra.mxu0 %v11439_v43  ;;  %v9180_v36 = vsel %vm3499_vm9, %v2314_v57, %v3627_v31  ;;  %v11446_v43 = vld [vmem:[#allocation64_spill] sm:$0xff] }
 0x33e   :  { %11441 = vst [vmem:[#allocation91_spill] sm:$0xff] %v9180_v36  ;;  %2809 = vmatmul.bf16.gmra.mxu1 %v11442_v49 }
 0x33f   :  { %2898 = vmatmul.bf16.gmra.mxu2 %v11443_v55 }
 0x340   :  { %v2316_v38 = vpop.f32.mrf.mxu3 }
 0x341   :  { %v2317_v11 = vadd.f32 %v2316_v38, %v11444_v12  ;;  %v11448_v12 = vld [vmem:[#allocation48_spill] sm:$0xff] }
 0x342   :  { %v2583_v50 = vpop.f32.mrf.mxu2  ;;  %v2407_v58 = vpop.f32.mrf.mxu0 }
 0x343   :  { %v9187_v20 = vadd.f32 %v2583_v50, %v2495_v2  ;;  %v2408_v7 = vadd.f32 %v2407_v58, %v8938_v62  ;;  %v2496_v44 = vpop.f32.mrf.mxu1  ;;  %v3631_v31 = vmul.f32 0.1, %v2317_v11  ;;  %vm3503_vm10 = vcmp.ge.f32.partialorder %v2317_v11, 0.0  ;;  %v11449_v58 = vld [vmem:[#allocation28_spill] sm:$0xff] }
 0x345   :  { %11445 = vst [vmem:[#allocation63_spill] sm:$0xff] %v9187_v20  ;;  %v2497_v19 = vadd.f32 %v2496_v44, %v2408_v7  ;;  %v9196_v7 = vsel %vm3503_vm10, %v2317_v11, %v3631_v31  ;;  %v11455_v20 = vld [vmem:[#allocation66_spill] sm:$0xff] }
 0x346   :  { %11450 = vst [vmem:[#allocation92_spill] sm:$0xff] %v9196_v7 }
 0x348   :  { %v2318_v57 = vpop.f32.mrf.mxu3 }
 0x349   :  { %v2319_v49 = vadd.f32 %v2318_v57, %v11446_v43  ;;  %v11452_v43 = vld [vmem:[#allocation29_spill] sm:$0xff]  ;;  %v11453_v57 = vld [vmem:[#allocation30_spill] sm:$0xff] }
 0x34a   :  { %v2585_v34 = vpop.f32.mrf.mxu2  ;;  %v2410_v26 = vpop.f32.mrf.mxu0 }
 0x34b   :  { %v9191_v55 = vadd.f32 %v2585_v34, %v2497_v19  ;;  %vm3507_vm11 = vcmp.ge.f32.partialorder %v2319_v49, 0.0  ;;  %v3635_v18 = vmul.f32 0.1, %v2319_v49  ;;  %v2411_v38 = vadd.f32 %v2410_v26, %v8938_v62  ;;  %v2499_v50 = vpop.f32.mrf.mxu1  ;;  %v6961_v34 = vld [vmem:[#allocation4 + $0x368] sm:$0xf] }
 0x34c   :  { %v7462_v19 = vld [vmem:[#allocation4 + $0x374] sm:$0xf0] }
 0x34d   :  { %11447 = vst [vmem:[#allocation64_spill] sm:$0xff] %v9191_v55  ;;  %v2500_v2 = vadd.f32 %v2499_v50, %v2411_v38  ;;  %2636 = vmatmul.bf16.gmra.mxu3 %v11448_v12  ;;  %2725 = vmatmul.bf16.gmra.mxu0 %v11449_v58  ;;  %v9198_v44 = vsel %vm3507_vm11, %v2319_v49, %v3635_v18  ;;  %v11454_v38 = vld [vmem:[#allocation65_spill] sm:$0xff] }
 0x34e   :  { %11451 = vst [vmem:[#allocation93_spill] sm:$0xff] %v9198_v44  ;;  %2814 = vmatmul.bf16.gmra.mxu1 %v11452_v43  ;;  %v6962_v26 = vor.u32 %v7462_v19, %v6961_v34 }
 0x34f   :  { %2903 = vmatmul.bf16.gmra.mxu2 %v11453_v57 }
 0x350   :  { %v2321_v55 = vpop.f32.mrf.mxu3  ;;  %2958 = vmatpush.bf16.msra.mxu3 %v6962_v26  ;;  %v11457_v26 = vld [vmem:[#allocation50_spill] sm:$0xff] }
 0x351   :  { %v2322_v50 = vadd.f32 %v2321_v55, %v11454_v38  ;;  %v11458_v38 = vld [vmem:[#allocation31_spill] sm:$0xff] }
 0x352   :  { %v2588_v12 = vpop.f32.mrf.mxu2  ;;  %v2412_v11 = vpop.f32.mrf.mxu0 }
 0x353   :  { %v9205_v58 = vadd.f32 %v2588_v12, %v2500_v2  ;;  %v2413_v18 = vadd.f32 %v2412_v11, %v8938_v62  ;;  %v2501_v49 = vpop.f32.mrf.mxu1  ;;  %v3639_v57 = vmul.f32 0.1, %v2322_v50  ;;  %vm3511_vm12 = vcmp.ge.f32.partialorder %v2322_v50, 0.0 }
 0x355   :  { %v2502_v31 = vadd.f32 %v2501_v49, %v2413_v18  ;;  %v9214_v11 = vsel %vm3511_vm12, %v2322_v50, %v3639_v57 }
 0x356   :  { %11459 = vst [vmem:[#allocation66_spill] sm:$0xff] %v9214_v11 }
 0x358   :  { %v2323_v43 = vpop.f32.mrf.mxu3 }
 0x359   :  { %v2324_v37 = vadd.f32 %v2323_v43, %v11455_v20  ;;  %v11461_v20 = vld [vmem:[#allocation32_spill] sm:$0xff]  ;;  %v11462_v43 = vld [vmem:[#allocation33_spill] sm:$0xff] }
 0x35a   :  { %v2590_v56 = vpop.f32.mrf.mxu2  ;;  %v2415_v34 = vpop.f32.mrf.mxu0 }
 0x35b   :  { %v9209_v36 = vadd.f32 %v2590_v56, %v2502_v31  ;;  %vm3515_vm13 = vcmp.ge.f32.partialorder %v2324_v37, 0.0  ;;  %v3643_v55 = vmul.f32 0.1, %v2324_v37  ;;  %v2416_v19 = vadd.f32 %v2415_v34, %v8938_v62  ;;  %v2504_v2 = vpop.f32.mrf.mxu1  ;;  %v11463_v31 = vld [vmem:[#allocation67_spill] sm:$0xff] }
 0x35d   :  { %11456 = vst [vmem:[#allocation65_spill] sm:$0xff] %v9209_v36  ;;  %v2505_v12 = vadd.f32 %v2504_v2, %v2416_v19  ;;  %2641 = vmatmul.bf16.gmra.mxu3 %v11457_v26  ;;  %2730 = vmatmul.bf16.gmra.mxu0 %v11458_v38  ;;  %v9216_v18 = vsel %vm3515_vm13, %v2324_v37, %v3643_v55  ;;  %v7773_v37 = vld [vmem:[#allocation2 + $0x4] sm:$0xf] }
 0x35e   :  { %11460 = vst [vmem:[#allocation94_spill] sm:$0xff] %v9216_v18  ;;  %2819 = vmatmul.bf16.gmra.mxu1 %v11461_v20  ;;  %v9226_v55 = vperm.slane %v7773_v37, 2 }
 0x35f   :  { %2908 = vmatmul.bf16.gmra.mxu2 %v11462_v43  ;;  %v11464_v43 = vld [vmem:[#allocation68_spill] sm:$0xff] }
 0x360   :  { %v2326_v49 = vpop.f32.mrf.mxu3 }
 0x361   :  { %v2327_v34 = vadd.f32 %v2326_v49, %v11463_v31 }
 0x362   :  { %v2593_v7 = vpop.f32.mrf.mxu2  ;;  %v2417_v2 = vpop.f32.mrf.mxu0 }
 0x363   :  { %v9223_v19 = vadd.f32 %v2593_v7, %v2505_v12  ;;  %v2418_v44 = vadd.f32 %v2417_v2, %v8938_v62  ;;  %v2506_v57 = vpop.f32.mrf.mxu1  ;;  %v3647_v38 = vmul.f32 0.1, %v2327_v34  ;;  %vm3519_vm14 = vcmp.ge.f32.partialorder %v2327_v34, 0.0 }
 0x365   :  { %v2507_v50 = vadd.f32 %v2506_v57, %v2418_v44  ;;  %v9234_v44 = vsel %vm3519_vm14, %v2327_v34, %v3647_v38  ;;  %v7458_v57 = vld [vmem:[#allocation4 + $0x354] sm:$0xf0] }
 0x366   :  { %11465 = vst [vmem:[#allocation67_spill] sm:$0xff] %v9234_v44 }
 0x368   :  { %v2328_v20 = vpop.f32.mrf.mxu3 }
 0x369   :  { %v2329_v26 = vadd.f32 %v2328_v20, %v11464_v43  ;;  %v11467_v20 = vld [vmem:[#allocation35_spill] sm:$0xff]  ;;  %v11468_v43 = vld [vmem:[#allocation36_spill] sm:$0xff] }
 0x36a   :  { %v2595_v36 = vpop.f32.mrf.mxu2  ;;  %v2696_v49 = vpop.f32.mrf.mxu0 }
 0x36b   :  { %v9229_v56 = vadd.f32 %v2595_v36, %v2507_v50  ;;  %vm3523_vm15 = vcmp.ge.f32.partialorder %v2329_v26, 0.0  ;;  %v3651_v7 = vmul.f32 0.1, %v2329_v26  ;;  %v2697_v12 = vadd.f32 %v2696_v49, %v9226_v55  ;;  %v2785_v31 = vpop.f32.mrf.mxu1  ;;  %v6945_v36 = vld [vmem:[#allocation4 + $0x348] sm:$0xf] }
 0x36c   :  { %v6946_v37 = vor.u32 %v7458_v57, %v6945_v36 }
 0x36d   :  { %v2786_v62 = vadd.f32 %v2785_v31, %v2697_v12  ;;  %2646 = vmatmul.bf16.gmra.mxu3 %v8846_v35  ;;  %2735 = vmatmul.bf16.gmra.mxu0 %v11370_v13  ;;  %v9236_v2 = vsel %vm3523_vm15, %v2329_v26, %v3651_v7 }
 0x36e   :  { %11466 = vst [vmem:[#allocation68_spill] sm:$0xff] %v9236_v2  ;;  %2824 = vmatmul.bf16.gmra.mxu1 %v11467_v20  ;;  %2959 = vmatpush.bf16.msra.mxu3 %v6946_v37 }
 0x36f   :  { %2913 = vmatmul.bf16.gmra.mxu2 %v11468_v43 }
 0x370   :  { %v2607_v49 = vpop.f32.mrf.mxu3 }
 0x371   :  { %v2608_v12 = vadd.f32 %v2607_v49, %v8951_v29 }
 0x372   :  { %v2874_v31 = vpop.f32.mrf.mxu2  ;;  %v2698_v38 = vpop.f32.mrf.mxu0 }
 0x373   :  { %v9243_v11 = vadd.f32 %v2874_v31, %v2786_v62  ;;  %v2699_v26 = vadd.f32 %v2698_v38, %v9226_v55  ;;  %v2787_v34 = vpop.f32.mrf.mxu1  ;;  %v3528_v43 = vmul.f32 0.1, %v2608_v12  ;;  %vm3400_vm0 = vcmp.ge.f32.partialorder %v2608_v12, 0.0 }
 0x375   :  { %v2788_v7 = vadd.f32 %v2787_v34, %v2699_v26  ;;  %v9250_v37 = vsel %vm3400_vm0, %v2608_v12, %v3528_v43 }
 0x376   :  { %11469 = vst [vmem:[#allocation95_spill] sm:$0xff] %v9250_v37 }
 0x378   :  { %v2609_v18 = vpop.f32.mrf.mxu3 }
 0x379   :  { %v2610_v20 = vadd.f32 %v2609_v18, %v8955_v63 }
 0x37a   :  { %v2876_v13 = vpop.f32.mrf.mxu2  ;;  %v2701_v36 = vpop.f32.mrf.mxu0 }
 0x37b   :  { %v9247_v50 = vadd.f32 %v2876_v13, %v2788_v7  ;;  %vm3404_vm1 = vcmp.ge.f32.partialorder %v2610_v20, 0.0  ;;  %v3532_v29 = vmul.f32 0.1, %v2610_v20  ;;  %v2702_v57 = vadd.f32 %v2701_v36, %v9226_v55  ;;  %v2790_v62 = vpop.f32.mrf.mxu1 }
 0x37d   :  { %v9252_v49 = vsel %vm3404_vm1, %v2610_v20, %v3532_v29  ;;  %v2791_v31 = vadd.f32 %v2790_v62, %v2702_v57  ;;  %2651 = vmatmul.bf16.gmra.mxu3 %v8860_v60  ;;  %2740 = vmatmul.bf16.gmra.mxu0 %v8669_v22 }
 0x37e   :  { %11470 = vst [vmem:[#allocation96_spill] sm:$0xff] %v9252_v49  ;;  %2829 = vmatmul.bf16.gmra.mxu1 %v8672_v53 }
 0x37f   :  { %2918 = vmatmul.bf16.gmra.mxu2 %v8674_v9 }
 0x380   :  { %v2612_v13 = vpop.f32.mrf.mxu3 }
 0x381   :  { %v2613_v18 = vadd.f32 %v2612_v13, %v8969_v41 }
 0x382   :  { %v2879_v38 = vpop.f32.mrf.mxu2  ;;  %v2703_v20 = vpop.f32.mrf.mxu0 }
 0x383   :  { %v9261_v43 = vadd.f32 %v2879_v38, %v2791_v31  ;;  %v2704_v12 = vadd.f32 %v2703_v20, %v9226_v55  ;;  %v2792_v26 = vpop.f32.mrf.mxu1  ;;  %v3536_v36 = vmul.f32 0.1, %v2613_v18  ;;  %vm3408_vm2 = vcmp.ge.f32.partialorder %v2613_v18, 0.0 }
 0x385   :  { %v2793_v34 = vadd.f32 %v2792_v26, %v2704_v12  ;;  %v9270_v38 = vsel %vm3408_vm2, %v2613_v18, %v3536_v36  ;;  %v11474_v12 = vld [vmem:[#allocation39_spill] sm:$0xff]  ;;  %v6929_v26 = vld [vmem:[#allocation4 + $0x328] sm:$0xf] }
 0x386   :  { %11471 = vst [vmem:[#allocation97_spill] sm:$0xff] %v9270_v38  ;;  %v11481_v38 = vld [vmem:[#allocation8_spill] sm:$0xff] }
 0x388   :  { %v2614_v7 = vpop.f32.mrf.mxu3 }
 0x389   :  { %v2615_v29 = vadd.f32 %v2614_v7, %v8973_v17  ;;  %v11473_v17 = vld [vmem:[#allocation38_spill] sm:$0xff] }
 0x38a   :  { %v2881_v57 = vpop.f32.mrf.mxu2  ;;  %v2706_v63 = vpop.f32.mrf.mxu0 }
 0x38b   :  { %v9265_v62 = vadd.f32 %v2881_v57, %v2793_v34  ;;  %vm3412_vm3 = vcmp.ge.f32.partialorder %v2615_v29, 0.0  ;;  %v3540_v44 = vmul.f32 0.1, %v2615_v29  ;;  %v2707_v41 = vadd.f32 %v2706_v63, %v9226_v55  ;;  %v2795_v31 = vpop.f32.mrf.mxu1  ;;  %v7454_v34 = vld [vmem:[#allocation4 + $0x334] sm:$0xf0] }
 0x38c   :  { %v6930_v63 = vor.u32 %v7454_v34, %v6929_v26 }
 0x38d   :  { %v2796_v13 = vadd.f32 %v2795_v31, %v2707_v41  ;;  %2656 = vmatmul.bf16.gmra.mxu3 %v8874_v5  ;;  %2745 = vmatmul.bf16.gmra.mxu0 %v8704_v45  ;;  %v9272_v20 = vsel %vm3412_vm3, %v2615_v29, %v3540_v44 }
 0x38e   :  { %11472 = vst [vmem:[#allocation98_spill] sm:$0xff] %v9272_v20  ;;  %2834 = vmatmul.bf16.gmra.mxu1 %v11473_v17  ;;  %2960 = vmatpush.bf16.msra.mxu3 %v6930_v63 }
 0x38f   :  { %2923 = vmatmul.bf16.gmra.mxu2 %v11474_v12 }
 0x390   :  { %v2617_v57 = vpop.f32.mrf.mxu3 }
 0x391   :  { %v2618_v41 = vadd.f32 %v2617_v57, %v8987_v33 }
 0x392   :  { %v2884_v31 = vpop.f32.mrf.mxu2  ;;  %v2708_v18 = vpop.f32.mrf.mxu0 }
 0x393   :  { %v9279_v2 = vadd.f32 %v2884_v31, %v2796_v13  ;;  %v2709_v44 = vadd.f32 %v2708_v18, %v9226_v55  ;;  %v2797_v36 = vpop.f32.mrf.mxu1  ;;  %v3544_v49 = vmul.f32 0.1, %v2618_v41  ;;  %vm3416_vm4 = vcmp.ge.f32.partialorder %v2618_v41, 0.0 }
 0x395   :  { %v2798_v29 = vadd.f32 %v2797_v36, %v2709_v44  ;;  %v9288_v57 = vsel %vm3416_vm4, %v2618_v41, %v3544_v49 }
 0x396   :  { %11475 = vst [vmem:[#allocation99_spill] sm:$0xff] %v9288_v57 }
 0x398   :  { %v2619_v37 = vpop.f32.mrf.mxu3 }
 0x399   :  { %v2620_v12 = vadd.f32 %v2619_v37, %v8991_v61 }
 0x39a   :  { %v2886_v17 = vpop.f32.mrf.mxu2  ;;  %v2711_v26 = vpop.f32.mrf.mxu0 }
 0x39b   :  { %v9283_v7 = vadd.f32 %v2886_v17, %v2798_v29  ;;  %vm3420_vm5 = vcmp.ge.f32.partialorder %v2620_v12, 0.0  ;;  %v3548_v33 = vmul.f32 0.1, %v2620_v12  ;;  %v2712_v34 = vadd.f32 %v2711_v26, %v9226_v55  ;;  %v2800_v13 = vpop.f32.mrf.mxu1 }
 0x39d   :  { %v2801_v63 = vadd.f32 %v2800_v13, %v2712_v34  ;;  %2661 = vmatmul.bf16.gmra.mxu3 %v8888_v1  ;;  %2750 = vmatmul.bf16.gmra.mxu0 %v8739_v21  ;;  %v9290_v31 = vsel %vm3420_vm5, %v2620_v12, %v3548_v33 }
 0x39e   :  { %11476 = vst [vmem:[#allocation100_spill] sm:$0xff] %v9290_v31  ;;  %2839 = vmatmul.bf16.gmra.mxu1 %v8742_v51  ;;  %v7412_v31 = vld [vmem:[#allocation4 + $0x1ec] sm:$0xf] }
 0x39f   :  { %2928 = vmatmul.bf16.gmra.mxu2 %v8744_v32  ;;  %v7450_v32 = vld [vmem:[#allocation4 + $0x314] sm:$0xf0] }
 0x3a0   :  { %v2622_v37 = vpop.f32.mrf.mxu3 }
 0x3a1   :  { %v2623_v17 = vadd.f32 %v2622_v37, %v9005_v42  ;;  %v7380_v37 = vld [vmem:[#allocation4 + $0xec] sm:$0xf] }
 0x3a2   :  { %v2889_v18 = vpop.f32.mrf.mxu2  ;;  %v2713_v36 = vpop.f32.mrf.mxu0 }
 0x3a3   :  { %v9297_v44 = vadd.f32 %v2889_v18, %v2801_v63  ;;  %v2714_v29 = vadd.f32 %v2713_v36, %v9226_v55  ;;  %v2802_v49 = vpop.f32.mrf.mxu1  ;;  %v3552_v12 = vmul.f32 0.1, %v2623_v17  ;;  %vm3424_vm6 = vcmp.ge.f32.partialorder %v2623_v17, 0.0  ;;  %v6643_v18 = vld [vmem:[#allocation4 + $0xf8] sm:$0xf0] }
 0x3a5   :  { %11477 = vst [vmem:[#allocation101_spill] sm:$0xff] %v9297_v44  ;;  %v2803_v41 = vadd.f32 %v2802_v49, %v2714_v29  ;;  %v9304_v36 = vsel %vm3424_vm6, %v2623_v17, %v3552_v12  ;;  %v11480_v49 = vld [vmem:[#allocation62_spill] sm:$0xff]  ;;  %v6913_v44 = vld [vmem:[#allocation4 + $0x308] sm:$0xf]  ;;  %v6867_v12 = vld [vmem:[#allocation4 + $0x2b8] sm:$0xf0] }
 0x3a6   :  { %11479 = vst [vmem:[#allocation103_spill] sm:$0xff] %v9304_v36 }
 0x3a8   :  { %v2624_v26 = vpop.f32.mrf.mxu3 }
 0x3a9   :  { %v2625_v33 = vadd.f32 %v2624_v26, %v9009_v40  ;;  %v6646_v40 = vor.u32 %v7380_v37, %v6643_v18  ;;  %v6771_v26 = vld [vmem:[#allocation4 + $0x1f8] sm:$0xf0]  ;;  %v7376_v37 = vld [vmem:[#allocation4 + $0xcc] sm:$0xf] }
 0x3aa   :  { %v2891_v34 = vpop.f32.mrf.mxu2  ;;  %v2716_v61 = vpop.f32.mrf.mxu0  ;;  %v6774_v51 = vor.u32 %v7412_v31, %v6771_v26  ;;  %v6627_v18 = vld [vmem:[#allocation4 + $0xd8] sm:$0xf0] }
 0x3ab   :  { %v9301_v13 = vadd.f32 %v2891_v34, %v2803_v41  ;;  %vm3428_vm7 = vcmp.ge.f32.partialorder %v2625_v33, 0.0  ;;  %v3556_v57 = vmul.f32 0.1, %v2625_v33  ;;  %v2717_v42 = vadd.f32 %v2716_v61, %v9226_v55  ;;  %v2805_v63 = vpop.f32.mrf.mxu1  ;;  %v7444_v41 = vld [vmem:[#allocation4 + $0x2ec] sm:$0xf]  ;;  %v11484_v61 = vld [vmem:[#allocation27_spill] sm:$0xff]  ;;  %3043 = vmatpush.bf16.msra.mxu0 %v6646_v40 }
 0x3ac   :  { %v6899_v34 = vld [vmem:[#allocation4 + $0x2f8] sm:$0xf0]  ;;  %3132 = vmatpush.bf16.msra.mxu1 %v6774_v51  ;;  %v7372_v40 = vld [vmem:[#allocation4 + $0xac] sm:$0xf] }
 0x3ad   :  { %11478 = vst [vmem:[#allocation102_spill] sm:$0xff] %v9301_v13  ;;  %v2806_v29 = vadd.f32 %v2805_v63, %v2717_v42  ;;  %2666 = vmatmul.bf16.gmra.mxu3 %v11480_v49  ;;  %2755 = vmatmul.bf16.gmra.mxu0 %v11481_v38  ;;  %v9308_v20 = vsel %vm3428_vm7, %v2625_v33, %v3556_v57  ;;  %v11483_v13 = vld [vmem:[#allocation14_spill] sm:$0xff]  ;;  %v7408_v57 = vld [vmem:[#allocation4 + $0x1cc] sm:$0xf]  ;;  %v6755_v38 = vld [vmem:[#allocation4 + $0x1d8] sm:$0xf0] }
 0x3ae   :  { %11482 = vst [vmem:[#allocation104_spill] sm:$0xff] %v9308_v20  ;;  %2844 = vmatmul.bf16.gmra.mxu1 %v11483_v13  ;;  %v6902_v17 = vor.u32 %v7444_v41, %v6899_v34  ;;  %v6914_v42 = vor.u32 %v7450_v32, %v6913_v44  ;;  %v7440_v49 = vld [vmem:[#allocation4 + $0x2cc] sm:$0xf]  ;;  %v6883_v31 = vld [vmem:[#allocation4 + $0x2d8] sm:$0xf0]  ;;  %v6758_v34 = vor.u32 %v7408_v57, %v6755_v38 }
 0x3af   :  { %2933 = vmatmul.bf16.gmra.mxu2 %v11484_v61  ;;  %v6630_v61 = vor.u32 %v7376_v37, %v6627_v18  ;;  %v6886_v32 = vor.u32 %v7440_v49, %v6883_v31  ;;  %v6739_v37 = vld [vmem:[#allocation4 + $0x1b8] sm:$0xf0]  ;;  %v7436_v18 = vld [vmem:[#allocation4 + $0x2ac] sm:$0xf] }
 0x3b0   :  { %v2627_v63 = vpop.f32.mrf.mxu3  ;;  %3221 = vmatpush.bf16.msra.mxu2 %v6902_v17  ;;  %2961 = vmatpush.bf16.msra.mxu3 %v6914_v42  ;;  %v6611_v17 = vld [vmem:[#allocation4 + $0xb8] sm:$0xf0]  ;;  %v7368_v49 = vld [vmem:[#allocation4 + $0x8c] sm:$0xf] }
 0x3b1   :  { %v2628_v33 = vadd.f32 %v2627_v63, %v9023_v59  ;;  %3044 = vmatpush.bf16.msra.mxu0 %v6630_v61  ;;  %3133 = vmatpush.bf16.msra.mxu1 %v6758_v34  ;;  %v7404_v59 = vld [vmem:[#allocation4 + $0x1ac] sm:$0xf]  ;;  %v6614_v42 = vor.u32 %v7372_v40, %v6611_v17  ;;  %v6595_v61 = vld [vmem:[#allocation4 + $0x98] sm:$0xf0] }
 0x3b2   :  { %v2894_v13 = vpop.f32.mrf.mxu2  ;;  %v2718_v41 = vpop.f32.mrf.mxu0  ;;  %v6742_v36 = vor.u32 %v7404_v59, %v6739_v37  ;;  %v7400_v57 = vld [vmem:[#allocation4 + $0x18c] sm:$0xf]  ;;  %v6598_v34 = vor.u32 %v7368_v49, %v6595_v61  ;;  %v6707_v61 = vld [vmem:[#allocation4 + $0x178] sm:$0xf0] }
 0x3b3   :  { %v9315_v26 = vadd.f32 %v2894_v13, %v2806_v29  ;;  %v2719_v44 = vadd.f32 %v2718_v41, %v9226_v55  ;;  %v2807_v51 = vpop.f32.mrf.mxu1  ;;  %v6870_v13 = vor.u32 %v7436_v18, %v6867_v12  ;;  %vm3432_vm8 = vcmp.ge.f32.partialorder %v2628_v33, 0.0  ;;  %v7364_v18 = vld [vmem:[#allocation4 + $0x6c] sm:$0xf] }
 0x3b4   :  { %3222 = vmatpush.bf16.msra.mxu2 %v6886_v32  ;;  %v3560_v29 = vmul.f32 0.1, %v2628_v33  ;;  %v6723_v32 = vld [vmem:[#allocation4 + $0x198] sm:$0xf0] }
 0x3b5   :  { %v2808_v63 = vadd.f32 %v2807_v51, %v2719_v44  ;;  %3045 = vmatpush.bf16.msra.mxu0 %v6614_v42  ;;  %3134 = vmatpush.bf16.msra.mxu1 %v6742_v36  ;;  %v7432_v44 = vld [vmem:[#allocation4 + $0x28c] sm:$0xf]  ;;  %v6851_v51 = vld [vmem:[#allocation4 + $0x298] sm:$0xf0]  ;;  %v6726_v12 = vor.u32 %v7400_v57, %v6723_v32 }
 0x3b6   :  { %v6854_v59 = vor.u32 %v7432_v44, %v6851_v51  ;;  %v7428_v57 = vld [vmem:[#allocation4 + $0x26c] sm:$0xf] }
 0x3b7   :  { %v7360_v51 = vld [vmem:[#allocation4 + $0x4c] sm:$0xf] }
 0x3b8   :  { %v2629_v38 = vpop.f32.mrf.mxu3  ;;  %3223 = vmatpush.bf16.msra.mxu2 %v6870_v13  ;;  %v7396_v13 = vld [vmem:[#allocation4 + $0x16c] sm:$0xf] }
 0x3b9   :  { %v2630_v31 = vadd.f32 %v2629_v38, %v9027_v30  ;;  %3046 = vmatpush.bf16.msra.mxu0 %v6598_v34  ;;  %3135 = vmatpush.bf16.msra.mxu1 %v6726_v12  ;;  %v6579_v30 = vld [vmem:[#allocation4 + $0x78] sm:$0xf0]  ;;  %v9323_v38 = vsel %vm3432_vm8, %v2628_v33, %v3560_v29  ;;  %v6710_v34 = vor.u32 %v7396_v13, %v6707_v61  ;;  %v7392_v12 = vld [vmem:[#allocation4 + $0x14c] sm:$0xf] }
 0x3ba   :  { %v2896_v41 = vpop.f32.mrf.mxu2  ;;  %v2721_v17 = vpop.f32.mrf.mxu0  ;;  %11485 = vst [vmem:[#allocation105_spill] sm:$0xff] %v9323_v38  ;;  %v7388_v33 = vld [vmem:[#allocation4 + $0x12c] sm:$0xf]  ;;  %v6803_v38 = vld [vmem:[#allocation4 + $0x238] sm:$0xf0] }
 0x3bb   :  { %v9319_v40 = vadd.f32 %v2896_v41, %v2808_v63  ;;  %vm3436_vm9 = vcmp.ge.f32.partialorder %v2630_v31, 0.0  ;;  %v3564_v42 = vmul.f32 0.1, %v2630_v31  ;;  %v2722_v36 = vadd.f32 %v2721_v17, %v9226_v55  ;;  %v2810_v37 = vpop.f32.mrf.mxu1  ;;  %v6835_v41 = vld [vmem:[#allocation4 + $0x278] sm:$0xf0] }
 0x3bc   :  { %3224 = vmatpush.bf16.msra.mxu2 %v6854_v59  ;;  %v6582_v63 = vor.u32 %v7364_v18, %v6579_v30  ;;  %v6838_v44 = vor.u32 %v7428_v57, %v6835_v41  ;;  %v6563_v17 = vld [vmem:[#allocation4 + $0x58] sm:$0xf0] }
 0x3bd   :  { %v2811_v49 = vadd.f32 %v2810_v37, %v2722_v36  ;;  %2671 = vmatmul.bf16.gmra.mxu3 %v8916_v3  ;;  %2760 = vmatmul.bf16.gmra.mxu0 %v8273_v54  ;;  %v9328_v32 = vsel %vm3436_vm9, %v2630_v31, %v3564_v42  ;;  %v6566_v42 = vor.u32 %v7360_v51, %v6563_v17  ;;  %v6691_v36 = vld [vmem:[#allocation4 + $0x158] sm:$0xf0]  ;;  %v7424_v37 = vld [vmem:[#allocation4 + $0x24c] sm:$0xf] }
 0x3be   :  { %11486 = vst [vmem:[#allocation106_spill] sm:$0xff] %v9328_v32  ;;  %2849 = vmatmul.bf16.gmra.mxu1 %v8419_v48  ;;  %3047 = vmatpush.bf16.msra.mxu0 %v6582_v63  ;;  %v6819_v18 = vld [vmem:[#allocation4 + $0x258] sm:$0xf0]  ;;  %v6694_v61 = vor.u32 %v7392_v12, %v6691_v36  ;;  %v7420_v17 = vld [vmem:[#allocation4 + $0x22c] sm:$0xf] }
 0x3bf   :  { %2938 = vmatmul.bf16.gmra.mxu2 %v8575_v10  ;;  %3136 = vmatpush.bf16.msra.mxu1 %v6710_v34  ;;  %v6822_v57 = vor.u32 %v7424_v37, %v6819_v18  ;;  %v7356_v34 = vld [vmem:[#allocation4 + $0x2c] sm:$0xf]  ;;  %v6675_v51 = vld [vmem:[#allocation4 + $0x138] sm:$0xf0] }
 0x3c0   :  { %v2632_v29 = vpop.f32.mrf.mxu3  ;;  %3225 = vmatpush.bf16.msra.mxu2 %v6838_v44  ;;  %v6547_v44 = vld [vmem:[#allocation4 + $0x38] sm:$0xf0]  ;;  %v6678_v32 = vor.u32 %v7388_v33, %v6675_v51  ;;  %v7352_v36 = vld [vmem:[#allocation4 + $0xc] sm:$0xf] }
 0x3c1   :  { %v2633_v59 = vadd.f32 %v2632_v29, %v9043_v46  ;;  %v6550_v29 = vor.u32 %v7356_v34, %v6547_v44  ;;  %v6531_v37 = vld [vmem:[#allocation4 + $0x18] sm:$0xf0] }
 0x3c2   :  { %v2899_v31 = vpop.f32.mrf.mxu2  ;;  %v2723_v13 = vpop.f32.mrf.mxu0  ;;  %3048 = vmatpush.bf16.msra.mxu0 %v6566_v42  ;;  %v7384_v42 = vld [vmem:[#allocation4 + $0x10c] sm:$0xf] }
 0x3c3   :  { %v9335_v30 = vadd.f32 %v2899_v31, %v2811_v49  ;;  %v2724_v63 = vadd.f32 %v2723_v13, %v9226_v55  ;;  %v2812_v41 = vpop.f32.mrf.mxu1  ;;  %3137 = vmatpush.bf16.msra.mxu1 %v6694_v61  ;;  %v6806_v49 = vor.u32 %v7420_v17, %v6803_v38  ;;  %v3568_v31 = vmul.f32 0.1, %v2633_v59 }
 0x3c4   :  { %3226 = vmatpush.bf16.msra.mxu2 %v6822_v57  ;;  %v6534_v61 = vor.u32 %v7352_v36, %v6531_v37  ;;  %v6659_v57 = vld [vmem:[#allocation4 + $0x118] sm:$0xf0]  ;;  %vm3440_vm10 = vcmp.ge.f32.partialorder %v2633_v59, 0.0  ;;  %v11496_v36 = vld [vmem:[#allocation52_spill] sm:$0xff] }
 0x3c5   :  { %v2813_v46 = vadd.f32 %v2812_v41, %v2724_v63  ;;  %v7416_v63 = vld [vmem:[#allocation4 + $0x20c] sm:$0xf]  ;;  %v6787_v41 = vld [vmem:[#allocation4 + $0x218] sm:$0xf0]  ;;  %v6662_v38 = vor.u32 %v7384_v42, %v6659_v57  ;;  %v9344_v17 = vsel %vm3440_vm10, %v2633_v59, %v3568_v31 }
 0x3c6   :  { %3049 = vmatpush.bf16.msra.mxu0 %v6550_v29  ;;  %v6790_v44 = vor.u32 %v7416_v63, %v6787_v41  ;;  %11487 = vst [vmem:[#allocation107_spill] sm:$0xff] %v9344_v17 }
 0x3c7   :  { %3138 = vmatpush.bf16.msra.mxu1 %v6678_v32 }
 0x3c8   :  { %v2634_v12 = vpop.f32.mrf.mxu3  ;;  %3227 = vmatpush.bf16.msra.mxu2 %v6806_v49  ;;  %v7476_v49 = vld [vmem:[#allocation4 + $0x3ec] sm:$0xf] }
 0x3c9   :  { %v2635_v18 = vadd.f32 %v2634_v12, %v9047_v28  ;;  %v7027_v12 = vld [vmem:[#allocation4 + $0x3f8] sm:$0xf0] }
 0x3ca   :  { %v2901_v13 = vpop.f32.mrf.mxu2  ;;  %v2726_v33 = vpop.f32.mrf.mxu0  ;;  %3050 = vmatpush.bf16.msra.mxu0 %v6534_v61  ;;  %v7030_v37 = vor.u32 %v7476_v49, %v7027_v12 }
 0x3cb   :  { %v9339_v34 = vadd.f32 %v2901_v13, %v2813_v46  ;;  %vm3444_vm11 = vcmp.ge.f32.partialorder %v2635_v18, 0.0  ;;  %v3572_v29 = vmul.f32 0.1, %v2635_v18  ;;  %v2727_v32 = vadd.f32 %v2726_v33, %v9226_v55  ;;  %v2815_v51 = vpop.f32.mrf.mxu1  ;;  %3139 = vmatpush.bf16.msra.mxu1 %v6662_v38 }
 0x3cc   :  { %3228 = vmatpush.bf16.msra.mxu2 %v6790_v44  ;;  %3310 = vmatpush.bf16.msrb.mxu3 %v7030_v37 }
 0x3cd   :  { %v2816_v28 = vadd.f32 %v2815_v51, %v2727_v32  ;;  %2676 = vmatmul.bf16.gmra.mxu3 %v8930_v14  ;;  %2765 = vmatmul.bf16.gmra.mxu0 %v8307_v27  ;;  %v9346_v46 = vsel %vm3444_vm11, %v2635_v18, %v3572_v29 }
 0x3ce   :  { %11488 = vst [vmem:[#allocation108_spill] sm:$0xff] %v9346_v46  ;;  %2854 = vmatmul.bf16.gmra.mxu1 %v8457_v0 }
 0x3cf   :  { %2943 = vmatmul.bf16.gmra.mxu2 %v8615_v15 }
 0x3d0   :  { %v2637_v42 = vpop.f32.mrf.mxu3 }
 0x3d1   :  { %v2638_v13 = vadd.f32 %v2637_v42, %v9061_v4 }
 0x3d2   :  { %v2904_v61 = vpop.f32.mrf.mxu2  ;;  %v2728_v59 = vpop.f32.mrf.mxu0 }
 0x3d3   :  { %v9353_v57 = vadd.f32 %v2904_v61, %v2816_v28  ;;  %v2729_v31 = vadd.f32 %v2728_v59, %v9226_v55  ;;  %v2817_v18 = vpop.f32.mrf.mxu1  ;;  %v3576_v33 = vmul.f32 0.1, %v2638_v13  ;;  %vm3448_vm12 = vcmp.ge.f32.partialorder %v2638_v13, 0.0 }
 0x3d5   :  { %v2818_v63 = vadd.f32 %v2817_v18, %v2729_v31  ;;  %v9362_v12 = vsel %vm3448_vm12, %v2638_v13, %v3576_v33 }
 0x3d6   :  { %11489 = vst [vmem:[#allocation109_spill] sm:$0xff] %v9362_v12 }
 0x3d8   :  { %v2639_v41 = vpop.f32.mrf.mxu3 }
 0x3d9   :  { %v2640_v38 = vadd.f32 %v2639_v41, %v9065_v25 }
 0x3da   :  { %v2906_v44 = vpop.f32.mrf.mxu2  ;;  %v2731_v32 = vpop.f32.mrf.mxu0 }
 0x3db   :  { %v9357_v29 = vadd.f32 %v2906_v44, %v2818_v63  ;;  %vm3452_vm13 = vcmp.ge.f32.partialorder %v2640_v38, 0.0  ;;  %v3580_v4 = vmul.f32 0.1, %v2640_v38  ;;  %v2732_v51 = vadd.f32 %v2731_v32, %v9226_v55  ;;  %v2820_v28 = vpop.f32.mrf.mxu1 }
 0x3dd   :  { %v2821_v49 = vadd.f32 %v2820_v28, %v2732_v51  ;;  %2681 = vmatmul.bf16.gmra.mxu3 %v8946_v39  ;;  %2770 = vmatmul.bf16.gmra.mxu0 %v8343_v24  ;;  %v9364_v37 = vsel %vm3452_vm13, %v2640_v38, %v3580_v4 }
 0x3de   :  { %11490 = vst [vmem:[#allocation110_spill] sm:$0xff] %v9364_v37  ;;  %2859 = vmatmul.bf16.gmra.mxu1 %v8495_v8 }
 0x3df   :  { %2948 = vmatmul.bf16.gmra.mxu2 %v8654_v6 }
 0x3e0   :  { %v2642_v42 = vpop.f32.mrf.mxu3 }
 0x3e1   :  { %v2643_v61 = vadd.f32 %v2642_v42, %v9079_v47 }
 0x3e2   :  { %v2909_v59 = vpop.f32.mrf.mxu2  ;;  %v2733_v18 = vpop.f32.mrf.mxu0 }
 0x3e3   :  { %v9371_v31 = vadd.f32 %v2909_v59, %v2821_v49  ;;  %v2734_v63 = vadd.f32 %v2733_v18, %v9226_v55  ;;  %v2822_v13 = vpop.f32.mrf.mxu1  ;;  %v3584_v38 = vmul.f32 0.1, %v2643_v61  ;;  %vm3456_vm14 = vcmp.ge.f32.partialorder %v2643_v61, 0.0 }
 0x3e5   :  { %v2823_v41 = vadd.f32 %v2822_v13, %v2734_v63  ;;  %v9380_v59 = vsel %vm3456_vm14, %v2643_v61, %v3584_v38  ;;  %v11494_v63 = vld [vmem:[#allocation10_spill] sm:$0xff]  ;;  %v7472_v13 = vld [vmem:[#allocation4 + $0x3cc] sm:$0xf] }
 0x3e6   :  { %11491 = vst [vmem:[#allocation111_spill] sm:$0xff] %v9380_v59 }
 0x3e8   :  { %v2644_v33 = vpop.f32.mrf.mxu3 }
 0x3e9   :  { %v2645_v44 = vadd.f32 %v2644_v33, %v9083_v16  ;;  %v11493_v16 = vld [vmem:[#allocation9_spill] sm:$0xff] }
 0x3ea   :  { %v2911_v32 = vpop.f32.mrf.mxu2  ;;  %v2736_v51 = vpop.f32.mrf.mxu0 }
 0x3eb   :  { %v9375_v4 = vadd.f32 %v2911_v32, %v2823_v41  ;;  %vm3460_vm15 = vcmp.ge.f32.partialorder %v2645_v44, 0.0  ;;  %v3588_v28 = vmul.f32 0.1, %v2645_v44  ;;  %v2737_v47 = vadd.f32 %v2736_v51, %v9226_v55  ;;  %v2825_v49 = vpop.f32.mrf.mxu1  ;;  %v7011_v41 = vld [vmem:[#allocation4 + $0x3d8] sm:$0xf0] }
 0x3ec   :  { %v7014_v32 = vor.u32 %v7472_v13, %v7011_v41 }
 0x3ed   :  { %v2826_v42 = vadd.f32 %v2825_v49, %v2737_v47  ;;  %2962 = vmatmul.bf16.vlgmr.msra.gmra.mxu3 %v8691_v23  ;;  %3051 = vmatmul.bf16.vlgmr.msra.gmra.mxu0 %v8320_v52  ;;  %v9382_v18 = vsel %vm3460_vm15, %v2645_v44, %v3588_v28  ;;  %v11495_v47 = vld [vmem:[#allocation51_spill] sm:$0xff] }
 0x3ee   :  { %11492 = vst [vmem:[#allocation112_spill] sm:$0xff] %v9382_v18  ;;  %3140 = vmatmul.bf16.vlgmr.msra.gmra.mxu1 %v11493_v16  ;;  %3311 = vmatpush.bf16.msrb.mxu3 %v7014_v32  ;;  %v11505_v18 = vld [vmem:[#allocation55_spill] sm:$0xff] }
 0x3ef   :  { %3229 = vmatmul.bf16.vlgmr.msra.gmra.mxu2 %v11494_v63 }
 0x3f0   :  { %v2647_v51 = vpop.f32.mrf.mxu3 }
 0x3f1   :  { %v2648_v49 = vadd.f32 %v2647_v51, %v11495_v47  ;;  %v11497_v51 = vld [vmem:[#allocation40_spill] sm:$0xff]  ;;  %v11498_v47 = vld [vmem:[#allocation11_spill] sm:$0xff] }
 0x3f2   :  { %v2914_v25 = vpop.f32.mrf.mxu2  ;;  %v2738_v61 = vpop.f32.mrf.mxu0 }
 0x3f3   :  { %v9389_v52 = vadd.f32 %v2914_v25, %v2826_v42  ;;  %v2739_v38 = vadd.f32 %v2738_v61, %v9226_v55  ;;  %v2827_v44 = vpop.f32.mrf.mxu1  ;;  %v3592_v63 = vmul.f32 0.1, %v2648_v49  ;;  %vm3464_vm0 = vcmp.ge.f32.partialorder %v2648_v49, 0.0 }
 0x3f5   :  { %v2828_v28 = vadd.f32 %v2827_v44, %v2739_v38  ;;  %v9398_v61 = vsel %vm3464_vm0, %v2648_v49, %v3592_v63  ;;  %v11502_v44 = vld [vmem:[#allocation13_spill] sm:$0xff] }
 0x3f6   :  { %11499 = vst [vmem:[#allocation9_spill] sm:$0xff] %v9398_v61 }
 0x3f8   :  { %v2649_v16 = vpop.f32.mrf.mxu3 }
 0x3f9   :  { %v2650_v12 = vadd.f32 %v2649_v16, %v11496_v36  ;;  %v11501_v36 = vld [vmem:[#allocation12_spill] sm:$0xff]  ;;  %v11503_v16 = vld [vmem:[#allocation54_spill] sm:$0xff] }
 0x3fa   :  { %v2916_v37 = vpop.f32.mrf.mxu2  ;;  %v2741_v13 = vpop.f32.mrf.mxu0 }
 0x3fb   :  { %v9393_v33 = vadd.f32 %v2916_v37, %v2828_v28  ;;  %vm3468_vm1 = vcmp.ge.f32.partialorder %v2650_v12, 0.0  ;;  %v3596_v41 = vmul.f32 0.1, %v2650_v12  ;;  %v2742_v32 = vadd.f32 %v2741_v13, %v9226_v55  ;;  %v2830_v25 = vpop.f32.mrf.mxu1 }
 0x3fd   :  { %v2831_v42 = vadd.f32 %v2830_v25, %v2742_v32  ;;  %2967 = vmatmul.bf16.gmra.mxu3 %v11497_v51  ;;  %3056 = vmatmul.bf16.gmra.mxu0 %v11498_v47  ;;  %v9400_v38 = vsel %vm3468_vm1, %v2650_v12, %v3596_v41 }
 0x3fe   :  { %11500 = vst [vmem:[#allocation10_spill] sm:$0xff] %v9400_v38  ;;  %3145 = vmatmul.bf16.gmra.mxu1 %v11501_v36 }
 0x3ff   :  { %3234 = vmatmul.bf16.gmra.mxu2 %v11502_v44 }
 0x400   :  { %v2652_v28 = vpop.f32.mrf.mxu3 }
 0x401   :  { %v2653_v13 = vadd.f32 %v2652_v28, %v11503_v16  ;;  %v11507_v16 = vld [vmem:[#allocation43_spill] sm:$0xff] }
 0x402   :  { %v2919_v59 = vpop.f32.mrf.mxu2  ;;  %v2743_v25 = vpop.f32.mrf.mxu0 }
 0x403   :  { %v9407_v32 = vadd.f32 %v2919_v59, %v2831_v42  ;;  %v2744_v47 = vadd.f32 %v2743_v25, %v9226_v55  ;;  %v2832_v49 = vpop.f32.mrf.mxu1  ;;  %v3600_v41 = vmul.f32 0.1, %v2653_v13  ;;  %vm3472_vm2 = vcmp.ge.f32.partialorder %v2653_v13, 0.0  ;;  %v11508_v25 = vld [vmem:[#allocation15_spill] sm:$0xff] }
 0x405   :  { %11504 = vst [vmem:[#allocation51_spill] sm:$0xff] %v9407_v32  ;;  %v2833_v63 = vadd.f32 %v2832_v49, %v2744_v47  ;;  %v9416_v47 = vsel %vm3472_vm2, %v2653_v13, %v3600_v41 }
 0x406   :  { %11509 = vst [vmem:[#allocation40_spill] sm:$0xff] %v9416_v47 }
 0x408   :  { %v2654_v12 = vpop.f32.mrf.mxu3 }
 0x409   :  { %v2655_v36 = vadd.f32 %v2654_v12, %v11505_v18  ;;  %v11511_v18 = vld [vmem:[#allocation16_spill] sm:$0xff]  ;;  %v11512_v12 = vld [vmem:[#allocation17_spill] sm:$0xff] }
 0x40a   :  { %v2921_v17 = vpop.f32.mrf.mxu2  ;;  %v2746_v37 = vpop.f32.mrf.mxu0 }
 0x40b   :  { %v9411_v44 = vadd.f32 %v2921_v17, %v2833_v63  ;;  %vm3476_vm3 = vcmp.ge.f32.partialorder %v2655_v36, 0.0  ;;  %v3604_v61 = vmul.f32 0.1, %v2655_v36  ;;  %v2747_v28 = vadd.f32 %v2746_v37, %v9226_v55  ;;  %v2835_v59 = vpop.f32.mrf.mxu1  ;;  %v7468_v17 = vld [vmem:[#allocation4 + $0x3ac] sm:$0xf] }
 0x40c   :  { %v6995_v63 = vld [vmem:[#allocation4 + $0x3b8] sm:$0xf0] }
 0x40d   :  { %11506 = vst [vmem:[#allocation52_spill] sm:$0xff] %v9411_v44  ;;  %v2836_v42 = vadd.f32 %v2835_v59, %v2747_v28  ;;  %2972 = vmatmul.bf16.gmra.mxu3 %v11507_v16  ;;  %3061 = vmatmul.bf16.gmra.mxu0 %v11508_v25  ;;  %v9418_v49 = vsel %vm3476_vm3, %v2655_v36, %v3604_v61  ;;  %v11513_v28 = vld [vmem:[#allocation56_spill] sm:$0xff]  ;;  %v11515_v16 = vld [vmem:[#allocation57_spill] sm:$0xff] }
 0x40e   :  { %11510 = vst [vmem:[#allocation11_spill] sm:$0xff] %v9418_v49  ;;  %3150 = vmatmul.bf16.gmra.mxu1 %v11511_v18  ;;  %v6998_v37 = vor.u32 %v7468_v17, %v6995_v63  ;;  %v11525_v49 = vld [vmem:[#allocation59_spill] sm:$0xff] }
 0x40f   :  { %3239 = vmatmul.bf16.gmra.mxu2 %v11512_v12 }
 0x410   :  { %v2657_v46 = vpop.f32.mrf.mxu3  ;;  %3312 = vmatpush.bf16.msrb.mxu3 %v6998_v37  ;;  %v11517_v37 = vld [vmem:[#allocation44_spill] sm:$0xff] }
 0x411   :  { %v2658_v59 = vadd.f32 %v2657_v46, %v11513_v28  ;;  %v11518_v28 = vld [vmem:[#allocation18_spill] sm:$0xff] }
 0x412   :  { %v2924_v20 = vpop.f32.mrf.mxu2  ;;  %v2748_v13 = vpop.f32.mrf.mxu0 }
 0x413   :  { %v9425_v25 = vadd.f32 %v2924_v20, %v2836_v42  ;;  %v2749_v61 = vadd.f32 %v2748_v13, %v9226_v55  ;;  %v2837_v41 = vpop.f32.mrf.mxu1  ;;  %v3608_v12 = vmul.f32 0.1, %v2658_v59  ;;  %vm3480_vm4 = vcmp.ge.f32.partialorder %v2658_v59, 0.0 }
 0x415   :  { %11514 = vst [vmem:[#allocation12_spill] sm:$0xff] %v9425_v25  ;;  %v2838_v36 = vadd.f32 %v2837_v41, %v2749_v61  ;;  %v9434_v13 = vsel %vm3480_vm4, %v2658_v59, %v3608_v12  ;;  %v11522_v41 = vld [vmem:[#allocation20_spill] sm:$0xff] }
 0x416   :  { %11519 = vst [vmem:[#allocation54_spill] sm:$0xff] %v9434_v13 }
 0x418   :  { %v2659_v18 = vpop.f32.mrf.mxu3 }
 0x419   :  { %v2660_v44 = vadd.f32 %v2659_v18, %v11515_v16  ;;  %v11521_v16 = vld [vmem:[#allocation19_spill] sm:$0xff]  ;;  %v11523_v18 = vld [vmem:[#allocation58_spill] sm:$0xff] }
 0x41a   :  { %v2926_v32 = vpop.f32.mrf.mxu2  ;;  %v2751_v17 = vpop.f32.mrf.mxu0 }
 0x41b   :  { %v9429_v38 = vadd.f32 %v2926_v32, %v2838_v36  ;;  %vm3484_vm5 = vcmp.ge.f32.partialorder %v2660_v44, 0.0  ;;  %v3612_v46 = vmul.f32 0.1, %v2660_v44  ;;  %v2752_v63 = vadd.f32 %v2751_v17, %v9226_v55  ;;  %v2840_v20 = vpop.f32.mrf.mxu1 }
 0x41d   :  { %11516 = vst [vmem:[#allocation13_spill] sm:$0xff] %v9429_v38  ;;  %v2841_v42 = vadd.f32 %v2840_v20, %v2752_v63  ;;  %2977 = vmatmul.bf16.gmra.mxu3 %v11517_v37  ;;  %3066 = vmatmul.bf16.gmra.mxu0 %v11518_v28  ;;  %v9436_v61 = vsel %vm3484_vm5, %v2660_v44, %v3612_v46 }
 0x41e   :  { %11520 = vst [vmem:[#allocation55_spill] sm:$0xff] %v9436_v61  ;;  %3155 = vmatmul.bf16.gmra.mxu1 %v11521_v16 }
 0x41f   :  { %3244 = vmatmul.bf16.gmra.mxu2 %v11522_v41 }
 0x420   :  { %v2662_v36 = vpop.f32.mrf.mxu3 }
 0x421   :  { %v2663_v17 = vadd.f32 %v2662_v36, %v11523_v18  ;;  %v11527_v18 = vld [vmem:[#allocation45_spill] sm:$0xff] }
 0x422   :  { %v2929_v47 = vpop.f32.mrf.mxu2  ;;  %v2753_v20 = vpop.f32.mrf.mxu0 }
 0x423   :  { %v9443_v63 = vadd.f32 %v2929_v47, %v2841_v42  ;;  %v2754_v28 = vadd.f32 %v2753_v20, %v9226_v55  ;;  %v2842_v59 = vpop.f32.mrf.mxu1  ;;  %v3616_v46 = vmul.f32 0.1, %v2663_v17  ;;  %vm3488_vm6 = vcmp.ge.f32.partialorder %v2663_v17, 0.0  ;;  %v11528_v20 = vld [vmem:[#allocation21_spill] sm:$0xff] }
 0x425   :  { %11524 = vst [vmem:[#allocation15_spill] sm:$0xff] %v9443_v63  ;;  %v2843_v12 = vadd.f32 %v2842_v59, %v2754_v28  ;;  %v9452_v28 = vsel %vm3488_vm6, %v2663_v17, %v3616_v46  ;;  %v11534_v63 = vld [vmem:[#allocation61_spill] sm:$0xff] }
 0x426   :  { %11529 = vst [vmem:[#allocation17_spill] sm:$0xff] %v9452_v28 }
 0x428   :  { %v2664_v44 = vpop.f32.mrf.mxu3 }
 0x429   :  { %v2665_v16 = vadd.f32 %v2664_v44, %v11525_v49  ;;  %v11531_v49 = vld [vmem:[#allocation22_spill] sm:$0xff]  ;;  %v11532_v44 = vld [vmem:[#allocation23_spill] sm:$0xff] }
 0x42a   :  { %v2931_v37 = vpop.f32.mrf.mxu2  ;;  %v2756_v32 = vpop.f32.mrf.mxu0 }
 0x42b   :  { %v9447_v41 = vadd.f32 %v2931_v37, %v2843_v12  ;;  %vm3492_vm7 = vcmp.ge.f32.partialorder %v2665_v16, 0.0  ;;  %v3620_v13 = vmul.f32 0.1, %v2665_v16  ;;  %v2757_v36 = vadd.f32 %v2756_v32, %v9226_v55  ;;  %v2845_v47 = vpop.f32.mrf.mxu1  ;;  %v7464_v37 = vld [vmem:[#allocation4 + $0x38c] sm:$0xf] }
 0x42c   :  { %v6979_v12 = vld [vmem:[#allocation4 + $0x398] sm:$0xf0] }
 0x42d   :  { %11526 = vst [vmem:[#allocation16_spill] sm:$0xff] %v9447_v41  ;;  %v2846_v42 = vadd.f32 %v2845_v47, %v2757_v36  ;;  %2982 = vmatmul.bf16.gmra.mxu3 %v11527_v18  ;;  %3071 = vmatmul.bf16.gmra.mxu0 %v11528_v20  ;;  %v9454_v59 = vsel %vm3492_vm7, %v2665_v16, %v3620_v13  ;;  %v11533_v36 = vld [vmem:[#allocation60_spill] sm:$0xff] }
 0x42e   :  { %11530 = vst [vmem:[#allocation56_spill] sm:$0xff] %v9454_v59  ;;  %3160 = vmatmul.bf16.gmra.mxu1 %v11531_v49  ;;  %v6982_v32 = vor.u32 %v7464_v37, %v6979_v12  ;;  %v11544_v59 = vld [vmem:[#allocation64_spill] sm:$0xff] }
 0x42f   :  { %3249 = vmatmul.bf16.gmra.mxu2 %v11532_v44 }
 0x430   :  { %v2667_v41 = vpop.f32.mrf.mxu3  ;;  %3313 = vmatpush.bf16.msrb.mxu3 %v6982_v32  ;;  %v11536_v32 = vld [vmem:[#allocation47_spill] sm:$0xff] }
 0x431   :  { %v2668_v47 = vadd.f32 %v2667_v41, %v11533_v36  ;;  %v11537_v36 = vld [vmem:[#allocation24_spill] sm:$0xff] }
 0x432   :  { %v2934_v18 = vpop.f32.mrf.mxu2  ;;  %v2758_v17 = vpop.f32.mrf.mxu0 }
 0x433   :  { %v9461_v20 = vadd.f32 %v2934_v18, %v2846_v42  ;;  %v2759_v13 = vadd.f32 %v2758_v17, %v9226_v55  ;;  %v2847_v46 = vpop.f32.mrf.mxu1  ;;  %v3624_v44 = vmul.f32 0.1, %v2668_v47  ;;  %vm3496_vm8 = vcmp.ge.f32.partialorder %v2668_v47, 0.0 }
 0x435   :  { %v2848_v16 = vadd.f32 %v2847_v46, %v2759_v13  ;;  %v9470_v17 = vsel %vm3496_vm8, %v2668_v47, %v3624_v44  ;;  %v11541_v46 = vld [vmem:[#allocation26_spill] sm:$0xff] }
 0x436   :  { %11538 = vst [vmem:[#allocation18_spill] sm:$0xff] %v9470_v17 }
 0x438   :  { %v2669_v49 = vpop.f32.mrf.mxu3 }
 0x439   :  { %v2670_v38 = vadd.f32 %v2669_v49, %v11534_v63  ;;  %v11540_v63 = vld [vmem:[#allocation25_spill] sm:$0xff]  ;;  %v11542_v49 = vld [vmem:[#allocation63_spill] sm:$0xff] }
 0x43a   :  { %v2936_v25 = vpop.f32.mrf.mxu2  ;;  %v2761_v37 = vpop.f32.mrf.mxu0 }
 0x43b   :  { %v9465_v61 = vadd.f32 %v2936_v25, %v2848_v16  ;;  %vm3500_vm9 = vcmp.ge.f32.partialorder %v2670_v38, 0.0  ;;  %v3628_v41 = vmul.f32 0.1, %v2670_v38  ;;  %v2762_v12 = vadd.f32 %v2761_v37, %v9226_v55  ;;  %v2850_v42 = vpop.f32.mrf.mxu1 }
 0x43d   :  { %11535 = vst [vmem:[#allocation57_spill] sm:$0xff] %v9465_v61  ;;  %v2851_v18 = vadd.f32 %v2850_v42, %v2762_v12  ;;  %2987 = vmatmul.bf16.gmra.mxu3 %v11536_v32  ;;  %3076 = vmatmul.bf16.gmra.mxu0 %v11537_v36  ;;  %v9472_v13 = vsel %vm3500_vm9, %v2670_v38, %v3628_v41 }
 0x43e   :  { %11539 = vst [vmem:[#allocation19_spill] sm:$0xff] %v9472_v13  ;;  %3165 = vmatmul.bf16.gmra.mxu1 %v11540_v63 }
 0x43f   :  { %3254 = vmatmul.bf16.gmra.mxu2 %v11541_v46 }
 0x440   :  { %v2672_v16 = vpop.f32.mrf.mxu3 }
 0x441   :  { %v2673_v37 = vadd.f32 %v2672_v16, %v11542_v49  ;;  %v11546_v49 = vld [vmem:[#allocation48_spill] sm:$0xff] }
 0x442   :  { %v2939_v28 = vpop.f32.mrf.mxu2  ;;  %v2763_v42 = vpop.f32.mrf.mxu0 }
 0x443   :  { %v9479_v12 = vadd.f32 %v2939_v28, %v2851_v18  ;;  %v2764_v36 = vadd.f32 %v2763_v42, %v9226_v55  ;;  %v2852_v47 = vpop.f32.mrf.mxu1  ;;  %v3632_v41 = vmul.f32 0.1, %v2673_v37  ;;  %vm3504_vm10 = vcmp.ge.f32.partialorder %v2673_v37, 0.0  ;;  %v11547_v42 = vld [vmem:[#allocation28_spill] sm:$0xff] }
 0x445   :  { %11543 = vst [vmem:[#allocation20_spill] sm:$0xff] %v9479_v12  ;;  %v2853_v44 = vadd.f32 %v2852_v47, %v2764_v36  ;;  %v9488_v36 = vsel %vm3504_vm10, %v2673_v37, %v3632_v41 }
 0x446   :  { %11548 = vst [vmem:[#allocation59_spill] sm:$0xff] %v9488_v36 }
 0x448   :  { %v2674_v38 = vpop.f32.mrf.mxu3 }
 0x449   :  { %v2675_v63 = vadd.f32 %v2674_v38, %v11544_v59  ;;  %v11550_v59 = vld [vmem:[#allocation29_spill] sm:$0xff]  ;;  %v11551_v38 = vld [vmem:[#allocation30_spill] sm:$0xff] }
 0x44a   :  { %v2941_v32 = vpop.f32.mrf.mxu2  ;;  %v2766_v25 = vpop.f32.mrf.mxu0 }
 0x44b   :  { %v9483_v46 = vadd.f32 %v2941_v32, %v2853_v44  ;;  %vm3508_vm11 = vcmp.ge.f32.partialorder %v2675_v63, 0.0  ;;  %v3636_v17 = vmul.f32 0.1, %v2675_v63  ;;  %v2767_v16 = vadd.f32 %v2766_v25, %v9226_v55  ;;  %v2855_v28 = vpop.f32.mrf.mxu1  ;;  %v7460_v32 = vld [vmem:[#allocation4 + $0x36c] sm:$0xf] }
 0x44c   :  { %v6963_v44 = vld [vmem:[#allocation4 + $0x378] sm:$0xf0] }
 0x44d   :  { %11545 = vst [vmem:[#allocation58_spill] sm:$0xff] %v9483_v46  ;;  %v2856_v18 = vadd.f32 %v2855_v28, %v2767_v16  ;;  %2992 = vmatmul.bf16.gmra.mxu3 %v11546_v49  ;;  %3081 = vmatmul.bf16.gmra.mxu0 %v11547_v42  ;;  %v9490_v47 = vsel %vm3508_vm11, %v2675_v63, %v3636_v17  ;;  %v11552_v49 = vld [vmem:[#allocation65_spill] sm:$0xff] }
 0x44e   :  { %11549 = vst [vmem:[#allocation21_spill] sm:$0xff] %v9490_v47  ;;  %3170 = vmatmul.bf16.gmra.mxu1 %v11550_v59  ;;  %v6966_v25 = vor.u32 %v7460_v32, %v6963_v44 }
 0x44f   :  { %3259 = vmatmul.bf16.gmra.mxu2 %v11551_v38 }
 0x450   :  { %v2677_v46 = vpop.f32.mrf.mxu3  ;;  %3314 = vmatpush.bf16.msrb.mxu3 %v6966_v25  ;;  %v11553_v25 = vld [vmem:[#allocation50_spill] sm:$0xff] }
 0x451   :  { %v2678_v16 = vadd.f32 %v2677_v46, %v9205_v58 }
 0x452   :  { %v2944_v28 = vpop.f32.mrf.mxu2  ;;  %v2768_v37 = vpop.f32.mrf.mxu0 }
 0x453   :  { %v9497_v42 = vadd.f32 %v2944_v28, %v2856_v18  ;;  %v2769_v17 = vadd.f32 %v2768_v37, %v9226_v55  ;;  %v2857_v41 = vpop.f32.mrf.mxu1  ;;  %v3640_v38 = vmul.f32 0.1, %v2678_v16  ;;  %vm3512_vm12 = vcmp.ge.f32.partialorder %v2678_v16, 0.0  ;;  %v11554_v28 = vld [vmem:[#allocation31_spill] sm:$0xff] }
 0x455   :  { %v2858_v63 = vadd.f32 %v2857_v41, %v2769_v17  ;;  %v9506_v37 = vsel %vm3512_vm12, %v2678_v16, %v3640_v38  ;;  %v11558_v41 = vld [vmem:[#allocation33_spill] sm:$0xff] }
 0x456   :  { %11555 = vst [vmem:[#allocation22_spill] sm:$0xff] %v9506_v37 }
 0x458   :  { %v2679_v59 = vpop.f32.mrf.mxu3 }
 0x459   :  { %v2680_v12 = vadd.f32 %v2679_v59, %v11552_v49  ;;  %v11557_v49 = vld [vmem:[#allocation32_spill] sm:$0xff] }
 0x45a   :  { %v2946_v61 = vpop.f32.mrf.mxu2  ;;  %v2771_v32 = vpop.f32.mrf.mxu0 }
 0x45b   :  { %v9501_v13 = vadd.f32 %v2946_v61, %v2858_v63  ;;  %vm3516_vm13 = vcmp.ge.f32.partialorder %v2680_v12, 0.0  ;;  %v3644_v58 = vmul.f32 0.1, %v2680_v12  ;;  %v2772_v46 = vadd.f32 %v2771_v32, %v9226_v55  ;;  %v2860_v18 = vpop.f32.mrf.mxu1 }
 0x45d   :  { %v2861_v44 = vadd.f32 %v2860_v18, %v2772_v46  ;;  %2997 = vmatmul.bf16.gmra.mxu3 %v11553_v25  ;;  %3086 = vmatmul.bf16.gmra.mxu0 %v11554_v28  ;;  %v9508_v17 = vsel %vm3516_vm13, %v2680_v12, %v3644_v58  ;;  %v7774_v12 = vld [vmem:[#allocation2 + $0x4] sm:$0xf] }
 0x45e   :  { %11556 = vst [vmem:[#allocation23_spill] sm:$0xff] %v9508_v17  ;;  %3175 = vmatmul.bf16.gmra.mxu1 %v11557_v49  ;;  %v9518_v58 = vperm.slane %v7774_v12, 3  ;;  %v11563_v12 = vld [vmem:[#allocation36_spill] sm:$0xff] }
 0x45f   :  { %3264 = vmatmul.bf16.gmra.mxu2 %v11558_v41 }
 0x460   :  { %v2682_v63 = vpop.f32.mrf.mxu3 }
 0x461   :  { %v2683_v59 = vadd.f32 %v2682_v63, %v9223_v19 }
 0x462   :  { %v2949_v32 = vpop.f32.mrf.mxu2  ;;  %v2773_v18 = vpop.f32.mrf.mxu0 }
 0x463   :  { %v9515_v46 = vadd.f32 %v2949_v32, %v2861_v44  ;;  %v2774_v28 = vadd.f32 %v2773_v18, %v9226_v55  ;;  %v2862_v16 = vpop.f32.mrf.mxu1  ;;  %v3648_v36 = vmul.f32 0.1, %v2683_v59  ;;  %vm3520_vm14 = vcmp.ge.f32.partialorder %v2683_v59, 0.0  ;;  %v11559_v18 = vld [vmem:[#allocation34_spill] sm:$0xff] }
 0x465   :  { %v2863_v38 = vadd.f32 %v2862_v16, %v2774_v28  ;;  %v9526_v28 = vsel %vm3520_vm14, %v2683_v59, %v3648_v36 }
 0x466   :  { %11560 = vst [vmem:[#allocation60_spill] sm:$0xff] %v9526_v28 }
 0x468   :  { %v2684_v49 = vpop.f32.mrf.mxu3 }
 0x469   :  { %v2685_v41 = vadd.f32 %v2684_v49, %v9229_v56  ;;  %v11562_v56 = vld [vmem:[#allocation35_spill] sm:$0xff] }
 0x46a   :  { %v2951_v47 = vpop.f32.mrf.mxu2  ;;  %v3052_v19 = vpop.f32.mrf.mxu0 }
 0x46b   :  { %v9521_v61 = vadd.f32 %v2951_v47, %v2863_v38  ;;  %vm3524_vm15 = vcmp.ge.f32.partialorder %v2685_v41, 0.0  ;;  %v3652_v44 = vmul.f32 0.1, %v2685_v41  ;;  %v3053_v63 = vadd.f32 %v3052_v19, %v9518_v58  ;;  %v3141_v32 = vpop.f32.mrf.mxu1  ;;  %v7456_v47 = vld [vmem:[#allocation4 + $0x34c] sm:$0xf] }
 0x46c   :  { %v6947_v38 = vld [vmem:[#allocation4 + $0x358] sm:$0xf0] }
 0x46d   :  { %v3142_v55 = vadd.f32 %v3141_v32, %v3053_v63  ;;  %3002 = vmatmul.bf16.gmra.mxu3 %v8846_v35  ;;  %3091 = vmatmul.bf16.gmra.mxu0 %v11559_v18  ;;  %v9528_v16 = vsel %vm3524_vm15, %v2685_v41, %v3652_v44  ;;  %v6950_v19 = vor.u32 %v7456_v47, %v6947_v38 }
 0x46e   :  { %11561 = vst [vmem:[#allocation61_spill] sm:$0xff] %v9528_v16  ;;  %3180 = vmatmul.bf16.gmra.mxu1 %v11562_v56 }
 0x46f   :  { %3269 = vmatmul.bf16.gmra.mxu2 %v11563_v12  ;;  %3315 = vmatpush.bf16.msrb.mxu3 %v6950_v19 }
 0x470   :  { %v2963_v37 = vpop.f32.mrf.mxu3 }
 0x471   :  { %v2964_v63 = vadd.f32 %v2963_v37, %v9243_v11 }
 0x472   :  { %v3230_v32 = vpop.f32.mrf.mxu2  ;;  %v3054_v36 = vpop.f32.mrf.mxu0 }
 0x473   :  { %v9535_v18 = vadd.f32 %v3230_v32, %v3142_v55  ;;  %v3055_v59 = vadd.f32 %v3054_v36, %v9518_v58  ;;  %v3143_v41 = vpop.f32.mrf.mxu1  ;;  %v3529_v12 = vmul.f32 0.1, %v2964_v63  ;;  %vm3401_vm0 = vcmp.ge.f32.partialorder %v2964_v63, 0.0 }
 0x475   :  { %v3144_v44 = vadd.f32 %v3143_v41, %v3055_v59  ;;  %v9542_v38 = vsel %vm3401_vm0, %v2964_v63, %v3529_v12 }
 0x478   :  { %v2965_v56 = vpop.f32.mrf.mxu3 }
 0x479   :  { %v2966_v17 = vadd.f32 %v2965_v56, %v9247_v50 }
 0x47a   :  { %v3232_v35 = vpop.f32.mrf.mxu2  ;;  %v3057_v47 = vpop.f32.mrf.mxu0 }
 0x47b   :  { %v9539_v49 = vadd.f32 %v3232_v35, %v3144_v44  ;;  %vm3405_vm1 = vcmp.ge.f32.partialorder %v2966_v17, 0.0  ;;  %v3533_v11 = vmul.f32 0.1, %v2966_v17  ;;  %v3058_v37 = vadd.f32 %v3057_v47, %v9518_v58  ;;  %v3146_v55 = vpop.f32.mrf.mxu1 }
 0x47d   :  { %v9544_v19 = vsel %vm3405_vm1, %v2966_v17, %v3533_v11  ;;  %v3147_v32 = vadd.f32 %v3146_v55, %v3058_v37  ;;  %3007 = vmatmul.bf16.gmra.mxu3 %v8860_v60  ;;  %3096 = vmatmul.bf16.gmra.mxu0 %v8669_v22 }
 0x47e   :  { %3185 = vmatmul.bf16.gmra.mxu1 %v8672_v53 }
 0x47f   :  { %3274 = vmatmul.bf16.gmra.mxu2 %v8674_v9 }
 0x480   :  { %v2968_v35 = vpop.f32.mrf.mxu3 }
 0x481   :  { %v2969_v36 = vadd.f32 %v2968_v35, %v9261_v43 }
 0x482   :  { %v3235_v59 = vpop.f32.mrf.mxu2  ;;  %v3059_v17 = vpop.f32.mrf.mxu0 }
 0x483   :  { %v9553_v63 = vadd.f32 %v3235_v59, %v3147_v32  ;;  %v3060_v41 = vadd.f32 %v3059_v17, %v9518_v58  ;;  %v3148_v44 = vpop.f32.mrf.mxu1  ;;  %v3537_v22 = vmul.f32 0.1, %v2969_v36  ;;  %vm3409_vm2 = vcmp.ge.f32.partialorder %v2969_v36, 0.0  ;;  %v11565_v17 = vld [vmem:[#allocation39_spill] sm:$0xff] }
 0x485   :  { %v3149_v56 = vadd.f32 %v3148_v44, %v3060_v41  ;;  %v9562_v35 = vsel %vm3409_vm2, %v2969_v36, %v3537_v22  ;;  %v7452_v41 = vld [vmem:[#allocation4 + $0x32c] sm:$0xf]  ;;  %v6931_v44 = vld [vmem:[#allocation4 + $0x338] sm:$0xf0] }
 0x488   :  { %v2970_v12 = vpop.f32.mrf.mxu3 }
 0x489   :  { %v2971_v47 = vadd.f32 %v2970_v12, %v9265_v62  ;;  %v11564_v62 = vld [vmem:[#allocation38_spill] sm:$0xff]  ;;  %v6934_v12 = vor.u32 %v7452_v41, %v6931_v44 }
 0x48a   :  { %v3237_v11 = vpop.f32.mrf.mxu2  ;;  %v3062_v9 = vpop.f32.mrf.mxu0 }
 0x48b   :  { %v9557_v53 = vadd.f32 %v3237_v11, %v3149_v56  ;;  %vm3413_vm3 = vcmp.ge.f32.partialorder %v2971_v47, 0.0  ;;  %v3541_v37 = vmul.f32 0.1, %v2971_v47  ;;  %v3063_v43 = vadd.f32 %v3062_v9, %v9518_v58  ;;  %v3151_v55 = vpop.f32.mrf.mxu1  ;;  %3316 = vmatpush.bf16.msrb.mxu3 %v6934_v12 }
 0x48d   :  { %v3152_v32 = vadd.f32 %v3151_v55, %v3063_v43  ;;  %3012 = vmatmul.bf16.gmra.mxu3 %v8874_v5  ;;  %3101 = vmatmul.bf16.gmra.mxu0 %v8704_v45  ;;  %v9564_v59 = vsel %vm3413_vm3, %v2971_v47, %v3541_v37 }
 0x48e   :  { %3190 = vmatmul.bf16.gmra.mxu1 %v11564_v62 }
 0x48f   :  { %3279 = vmatmul.bf16.gmra.mxu2 %v11565_v17 }
 0x490   :  { %v2973_v11 = vpop.f32.mrf.mxu3 }
 0x491   :  { %v2974_v9 = vadd.f32 %v2973_v11, %v9279_v2 }
 0x492   :  { %v3240_v43 = vpop.f32.mrf.mxu2  ;;  %v3064_v36 = vpop.f32.mrf.mxu0 }
 0x493   :  { %v9571_v45 = vadd.f32 %v3240_v43, %v3152_v32  ;;  %v3065_v22 = vadd.f32 %v3064_v36, %v9518_v58  ;;  %v3153_v47 = vpop.f32.mrf.mxu1  ;;  %v3545_v62 = vmul.f32 0.1, %v2974_v9  ;;  %vm3417_vm4 = vcmp.ge.f32.partialorder %v2974_v9, 0.0  ;;  %v11567_v36 = vld [vmem:[#allocation42_spill] sm:$0xff] }
 0x495   :  { %v3154_v37 = vadd.f32 %v3153_v47, %v3065_v22  ;;  %v9580_v11 = vsel %vm3417_vm4, %v2974_v9, %v3545_v62  ;;  %v11568_v47 = vld [vmem:[#allocation101_spill] sm:$0xff] }
 0x498   :  { %v2975_v55 = vpop.f32.mrf.mxu3 }
 0x499   :  { %v2976_v17 = vadd.f32 %v2975_v55, %v9283_v7  ;;  %v11566_v7 = vld [vmem:[#allocation41_spill] sm:$0xff] }
 0x49a   :  { %v3242_v50 = vpop.f32.mrf.mxu2  ;;  %v3067_v41 = vpop.f32.mrf.mxu0 }
 0x49b   :  { %v9575_v56 = vadd.f32 %v3242_v50, %v3154_v37  ;;  %vm3421_vm5 = vcmp.ge.f32.partialorder %v2976_v17, 0.0  ;;  %v3549_v2 = vmul.f32 0.1, %v2976_v17  ;;  %v3068_v44 = vadd.f32 %v3067_v41, %v9518_v58  ;;  %v3156_v32 = vpop.f32.mrf.mxu1 }
 0x49d   :  { %v3157_v12 = vadd.f32 %v3156_v32, %v3068_v44  ;;  %3017 = vmatmul.bf16.gmra.mxu3 %v8888_v1  ;;  %3106 = vmatmul.bf16.gmra.mxu0 %v8739_v21  ;;  %v9582_v43 = vsel %vm3421_vm5, %v2976_v17, %v3549_v2  ;;  %v11570_v32 = vld [vmem:[#allocation102_spill] sm:$0xff] }
 0x49e   :  { %3195 = vmatmul.bf16.gmra.mxu1 %v11566_v7 }
 0x49f   :  { %3284 = vmatmul.bf16.gmra.mxu2 %v11567_v36 }
 0x4a0   :  { %v2978_v22 = vpop.f32.mrf.mxu3 }
 0x4a1   :  { %v2979_v37 = vadd.f32 %v2978_v22, %v11568_v47 }
 0x4a2   :  { %v3245_v55 = vpop.f32.mrf.mxu2  ;;  %v3069_v44 = vpop.f32.mrf.mxu0 }
 0x4a3   :  { %v9589_v41 = vadd.f32 %v3245_v55, %v3157_v12  ;;  %v3070_v21 = vadd.f32 %v3069_v44, %v9518_v58  ;;  %v3158_v9 = vpop.f32.mrf.mxu1  ;;  %v3553_v2 = vmul.f32 0.1, %v2979_v37  ;;  %vm3425_vm6 = vcmp.ge.f32.partialorder %v2979_v37, 0.0  ;;  %v11572_v55 = vld [vmem:[#allocation62_spill] sm:$0xff]  ;;  %v11573_v44 = vld [vmem:[#allocation8_spill] sm:$0xff] }
 0x4a5   :  { %11569 = vst [vmem:[#allocation24_spill] sm:$0xff] %v9589_v41  ;;  %v3159_v62 = vadd.f32 %v3158_v9, %v3070_v21  ;;  %v7486_v21 = vld [vmem:[%s11140_s5 + $0x38] sm:$0xff] }
 0x4a6   :  { %v7502_v9 = vld [vmem:[%s11140_s5 + $0xb8] sm:$0xff]  ;;  %4106 = vmatpush.bf16.msrb.mxu0 %v7486_v21 }
 0x4a7   :  { %4284 = vmatpush.bf16.msrb.mxu2 %v7502_v9 }
 0x4a8   :  { %v2980_v17 = vpop.f32.mrf.mxu3 }
 0x4a9   :  { %v2981_v7 = vadd.f32 %v2980_v17, %v11570_v32  ;;  %v11574_v17 = vld [vmem:[#allocation14_spill] sm:$0xff]  ;;  %v11575_v32 = vld [vmem:[#allocation27_spill] sm:$0xff] }
 0x4aa   :  { %v3247_v28 = vpop.f32.mrf.mxu2  ;;  %v3072_v50 = vpop.f32.mrf.mxu0 }
 0x4ab   :  { %v9593_v36 = vadd.f32 %v3247_v28, %v3159_v62  ;;  %vm3429_vm7 = vcmp.ge.f32.partialorder %v2981_v7, 0.0  ;;  %v3557_v16 = vmul.f32 0.1, %v2981_v7  ;;  %v3073_v22 = vadd.f32 %v3072_v50, %v9518_v58  ;;  %v3161_v12 = vpop.f32.mrf.mxu1  ;;  %v7494_v28 = vld [vmem:[%s11140_s5 + $0x78] sm:$0xff] }
 0x4ac   :  { %v9607_v62 = vsel %vm3425_vm6, %v2979_v37, %v3553_v2  ;;  %4195 = vmatpush.bf16.msrb.mxu1 %v7494_v28  ;;  %v7493_v2 = vld [vmem:[%s11140_s5 + $0x70] sm:$0xff] }
 0x4ad   :  { %11571 = vst [vmem:[#allocation25_spill] sm:$0xff] %v9593_v36  ;;  %v3162_v47 = vadd.f32 %v3161_v12, %v3073_v22  ;;  %3022 = vmatmul.bf16.gmra.mxu3 %v11572_v55  ;;  %3111 = vmatmul.bf16.gmra.mxu0 %v11573_v44  ;;  %v9609_v50 = vsel %vm3429_vm7, %v2981_v7, %v3557_v16  ;;  %v7448_v22 = vld [vmem:[#allocation4 + $0x30c] sm:$0xf]  ;;  %v6915_v12 = vld [vmem:[#allocation4 + $0x318] sm:$0xf0]  ;;  %v7485_v16 = vld [vmem:[%s11140_s5 + $0x30] sm:$0xff] }
 0x4ae   :  { %3200 = vmatmul.bf16.gmra.mxu1 %v11574_v17  ;;  %v6918_v55 = vor.u32 %v7448_v22, %v6915_v12  ;;  %v7501_v7 = vld [vmem:[%s11140_s5 + $0xb0] sm:$0xff]  ;;  %4107 = vmatpush.bf16.msrb.mxu0 %v7485_v16  ;;  %v7492_v17 = vld [vmem:[%s11140_s5 + $0x68] sm:$0xff]  ;;  %v7483_v16 = vld [vmem:[%s11140_s5 + $0x20] sm:$0xff] }
 0x4af   :  { %3289 = vmatmul.bf16.gmra.mxu2 %v11575_v32  ;;  %v11605_v44 = vld [vmem:[#allocation74_spill] sm:$0xff] }
 0x4b0   :  { %v2983_v36 = vpop.f32.mrf.mxu3  ;;  %3317 = vmatpush.bf16.msrb.mxu3 %v6918_v55  ;;  %4196 = vmatpush.bf16.msrb.mxu1 %v7493_v2  ;;  %v7484_v55 = vld [vmem:[%s11140_s5 + $0x28] sm:$0xff]  ;;  %v7491_v2 = vld [vmem:[%s11140_s5 + $0x60] sm:$0xff] }
 0x4b1   :  { %v2984_v41 = vadd.f32 %v2983_v36, %v9315_v26  ;;  %4285 = vmatpush.bf16.msrb.mxu2 %v7501_v7  ;;  %v7499_v7 = vld [vmem:[%s11140_s5 + $0xa0] sm:$0xff] }
 0x4b2   :  { %v3250_v37 = vpop.f32.mrf.mxu2  ;;  %v3074_v28 = vpop.f32.mrf.mxu0  ;;  %4108 = vmatpush.bf16.msrb.mxu0 %v7484_v55 }
 0x4b3   :  { %v9625_v21 = vadd.f32 %v3250_v37, %v3162_v47  ;;  %v3075_v9 = vadd.f32 %v3074_v28, %v9518_v58  ;;  %v3163_v26 = vpop.f32.mrf.mxu1  ;;  %v7500_v47 = vld [vmem:[%s11140_s5 + $0xa8] sm:$0xff]  ;;  %v3561_v22 = vmul.f32 0.1, %v2984_v41  ;;  %vm3433_vm8 = vcmp.ge.f32.partialorder %v2984_v41, 0.0 }
 0x4b4   :  { %4197 = vmatpush.bf16.msrb.mxu1 %v7492_v17 }
 0x4b5   :  { %v3164_v36 = vadd.f32 %v3163_v26, %v3075_v9  ;;  %4286 = vmatpush.bf16.msrb.mxu2 %v7500_v47  ;;  %v7482_v47 = vld [vmem:[%s11140_s5 + $0x18] sm:$0xff] }
 0x4b6   :  { %4109 = vmatpush.bf16.msrb.mxu0 %v7483_v16 }
 0x4b8   :  { %v2985_v32 = vpop.f32.mrf.mxu3  ;;  %4198 = vmatpush.bf16.msrb.mxu1 %v7491_v2 }
 0x4b9   :  { %v2986_v12 = vadd.f32 %v2985_v32, %v9319_v40  ;;  %4287 = vmatpush.bf16.msrb.mxu2 %v7499_v7  ;;  %v7498_v32 = vld [vmem:[%s11140_s5 + $0x98] sm:$0xff] }
 0x4ba   :  { %v3252_v37 = vpop.f32.mrf.mxu2  ;;  %v3077_v9 = vpop.f32.mrf.mxu0  ;;  %4110 = vmatpush.bf16.msrb.mxu0 %v7482_v47  ;;  %v7488_v47 = vld [vmem:[%s11140_s5 + $0x48] sm:$0xff] }
 0x4bb   :  { %v9647_v28 = vadd.f32 %v3252_v37, %v3164_v36  ;;  %vm3437_vm9 = vcmp.ge.f32.partialorder %v2986_v12, 0.0  ;;  %v3565_v26 = vmul.f32 0.1, %v2986_v12  ;;  %v3078_v40 = vadd.f32 %v3077_v9, %v9518_v58  ;;  %v3166_v55 = vpop.f32.mrf.mxu1  ;;  %v7490_v36 = vld [vmem:[%s11140_s5 + $0x58] sm:$0xff] }
 0x4bc   :  { %v9662_v37 = vsel %vm3433_vm8, %v2984_v41, %v3561_v22  ;;  %4199 = vmatpush.bf16.msrb.mxu1 %v7490_v36  ;;  %v7481_v41 = vld [vmem:[%s11140_s5 + $0x10] sm:$0xff] }
 0x4bd   :  { %v3167_v17 = vadd.f32 %v3166_v55, %v3078_v40  ;;  %3027 = vmatmul.bf16.gmra.mxu3 %v8916_v3  ;;  %3116 = vmatmul.bf16.gmra.mxu0 %v8273_v54  ;;  %v9664_v16 = vsel %vm3437_vm9, %v2986_v12, %v3565_v26  ;;  %v7480_v55 = vld [vmem:[%s11140_s5 + $0x8] sm:$0xff]  ;;  %v11599_v54 = vpack.c.bf16 %v9582_v43, %v9580_v11 }
 0x4be   :  { %3205 = vmatmul.bf16.gmra.mxu1 %v8419_v48  ;;  %4288 = vmatpush.bf16.msrb.mxu2 %v7498_v32  ;;  %v7489_v48 = vld [vmem:[%s11140_s5 + $0x50] sm:$0xff] }
 0x4bf   :  { %3294 = vmatmul.bf16.gmra.mxu2 %v8575_v10  ;;  %v7497_v10 = vld [vmem:[%s11140_s5 + $0x90] sm:$0xff]  ;;  %4111 = vmatpush.bf16.msrb.mxu0 %v7481_v41  ;;  %v7479_v41 = vld [vmem:[%s11140_s5] sm:$0xff] }
 0x4c0   :  { %v2988_v2 = vpop.f32.mrf.mxu3  ;;  %4200 = vmatpush.bf16.msrb.mxu1 %v7489_v48  ;;  %v7487_v48 = vld [vmem:[%s11140_s5 + $0x40] sm:$0xff] }
 0x4c1   :  { %v2989_v7 = vadd.f32 %v2988_v2, %v9335_v30 }
 0x4c2   :  { %v3255_v9 = vpop.f32.mrf.mxu2  ;;  %v3079_v12 = vpop.f32.mrf.mxu0  ;;  %4289 = vmatpush.bf16.msrb.mxu2 %v7497_v10  ;;  %v7495_v10 = vld [vmem:[%s11140_s5 + $0x80] sm:$0xff] }
 0x4c3   :  { %v9680_v22 = vadd.f32 %v3255_v9, %v3167_v17  ;;  %v3080_v26 = vadd.f32 %v3079_v12, %v9518_v58  ;;  %v3168_v40 = vpop.f32.mrf.mxu1  ;;  %v7496_v17 = vld [vmem:[%s11140_s5 + $0x88] sm:$0xff]  ;;  %4112 = vmatpush.bf16.msrb.mxu0 %v7480_v55  ;;  %v3569_v32 = vmul.f32 0.1, %v2989_v7  ;;  %vm3441_vm10 = vcmp.ge.f32.partialorder %v2989_v7, 0.0 }
 0x4c4   :  { %4201 = vmatpush.bf16.msrb.mxu1 %v7488_v47 }
 0x4c5   :  { %v3169_v30 = vadd.f32 %v3168_v40, %v3080_v26 }
 0x4c6   :  { %4290 = vmatpush.bf16.msrb.mxu2 %v7496_v17  ;;  %v9707_v17 = vsel %vm3441_vm10, %v2989_v7, %v3569_v32 }
 0x4c7   :  { %4113 = vmatpush.bf16.msrb.mxu0 %v7479_v41 }
 0x4c8   :  { %v2990_v36 = vpop.f32.mrf.mxu3  ;;  %4202 = vmatpush.bf16.msrb.mxu1 %v7487_v48 }
 0x4c9   :  { %v2991_v2 = vadd.f32 %v2990_v36, %v9339_v34 }
 0x4ca   :  { %v3257_v9 = vpop.f32.mrf.mxu2  ;;  %v3082_v26 = vpop.f32.mrf.mxu0  ;;  %4291 = vmatpush.bf16.msrb.mxu2 %v7495_v10 }
 0x4cb   :  { %v9702_v12 = vadd.f32 %v3257_v9, %v3169_v30  ;;  %vm3445_vm11 = vcmp.ge.f32.partialorder %v2991_v2, 0.0  ;;  %v3573_v40 = vmul.f32 0.1, %v2991_v2  ;;  %v3083_v34 = vadd.f32 %v3082_v26, %v9518_v58  ;;  %v3171_v55 = vpop.f32.mrf.mxu1  ;;  %v7510_v30 = vld [vmem:[%s11140_s5 + $0xf8] sm:$0xff] }
 0x4cc   :  { %4373 = vmatpush.bf16.msra.mxu3 %v7510_v30 }
 0x4cd   :  { %v3172_v47 = vadd.f32 %v3171_v55, %v3083_v34  ;;  %3032 = vmatmul.bf16.gmra.mxu3 %v8930_v14  ;;  %3121 = vmatmul.bf16.gmra.mxu0 %v8307_v27  ;;  %v9709_v36 = vsel %vm3445_vm11, %v2991_v2, %v3573_v40 }
 0x4ce   :  { %3210 = vmatmul.bf16.gmra.mxu1 %v8457_v0 }
 0x4cf   :  { %3299 = vmatmul.bf16.gmra.mxu2 %v8615_v15 }
 0x4d0   :  { %v2993_v41 = vpop.f32.mrf.mxu3 }
 0x4d1   :  { %v2994_v48 = vadd.f32 %v2993_v41, %v9353_v57 }
 0x4d2   :  { %v3260_v27 = vpop.f32.mrf.mxu2  ;;  %v3084_v32 = vpop.f32.mrf.mxu0 }
 0x4d3   :  { %v9719_v7 = vadd.f32 %v3260_v27, %v3172_v47  ;;  %v3085_v2 = vadd.f32 %v3084_v32, %v9518_v58  ;;  %v3173_v0 = vpop.f32.mrf.mxu1  ;;  %v3577_v26 = vmul.f32 0.1, %v2994_v48  ;;  %vm3449_vm12 = vcmp.ge.f32.partialorder %v2994_v48, 0.0 }
 0x4d5   :  { %v3174_v10 = vadd.f32 %v3173_v0, %v3085_v2  ;;  %v9728_v27 = vsel %vm3449_vm12, %v2994_v48, %v3577_v26 }
 0x4d8   :  { %v2995_v15 = vpop.f32.mrf.mxu3 }
 0x4d9   :  { %v2996_v40 = vadd.f32 %v2995_v15, %v9357_v29  ;;  %v11582_v29 = vpack.c.bf16 %v9544_v19, %v9542_v38 }
 0x4da   :  { %v3262_v34 = vpop.f32.mrf.mxu2  ;;  %v3087_v9 = vpop.f32.mrf.mxu0 }
 0x4db   :  { %v9723_v55 = vadd.f32 %v3262_v34, %v3174_v10  ;;  %vm3453_vm13 = vcmp.ge.f32.partialorder %v2996_v40, 0.0  ;;  %v3581_v30 = vmul.f32 0.1, %v2996_v40  ;;  %v3088_v57 = vadd.f32 %v3087_v9, %v9518_v58  ;;  %v3176_v47 = vpop.f32.mrf.mxu1 }
 0x4dd   :  { %v3177_v41 = vadd.f32 %v3176_v47, %v3088_v57  ;;  %3037 = vmatmul.bf16.gmra.mxu3 %v8946_v39  ;;  %3126 = vmatmul.bf16.gmra.mxu0 %v8343_v24  ;;  %v9730_v32 = vsel %vm3453_vm13, %v2996_v40, %v3581_v30 }
 0x4de   :  { %3215 = vmatmul.bf16.gmra.mxu1 %v8495_v8 }
 0x4df   :  { %3304 = vmatmul.bf16.gmra.mxu2 %v8654_v6 }
 0x4e0   :  { %v2998_v2 = vpop.f32.mrf.mxu3 }
 0x4e1   :  { %v2999_v9 = vadd.f32 %v2998_v2, %v9371_v31 }
 0x4e2   :  { %v3265_v0 = vpop.f32.mrf.mxu2  ;;  %v3089_v15 = vpop.f32.mrf.mxu0 }
 0x4e3   :  { %v9737_v10 = vadd.f32 %v3265_v0, %v3177_v41  ;;  %v3090_v24 = vadd.f32 %v3089_v15, %v9518_v58  ;;  %v3178_v48 = vpop.f32.mrf.mxu1  ;;  %v3585_v34 = vmul.f32 0.1, %v2999_v9  ;;  %vm3457_vm14 = vcmp.ge.f32.partialorder %v2999_v9, 0.0  ;;  %v11576_v0 = vld [vmem:[#allocation69_spill] sm:$0xff] }
 0x4e4   :  { %v11577_v15 = vld [vmem:[#allocation37_spill] sm:$0xff] }
 0x4e5   :  { %v3179_v26 = vadd.f32 %v3178_v48, %v3090_v24  ;;  %v11578_v24 = vpack.c.bf16 %v11576_v0, %v11577_v15  ;;  %v9748_v48 = vsel %vm3457_vm14, %v2999_v9, %v3585_v34 }
 0x4e8   :  { %v3000_v40 = vpop.f32.mrf.mxu3 }
 0x4e9   :  { %v3001_v8 = vadd.f32 %v3000_v40, %v9375_v4  ;;  %v11579_v40 = vld [vmem:[#allocation96_spill] sm:$0xff] }
 0x4ea   :  { %v3267_v30 = vpop.f32.mrf.mxu2  ;;  %v3092_v57 = vpop.f32.mrf.mxu0 }
 0x4eb   :  { %v9741_v6 = vadd.f32 %v3267_v30, %v3179_v26  ;;  %vm3461_vm15 = vcmp.ge.f32.partialorder %v3001_v8, 0.0  ;;  %v3589_v47 = vmul.f32 0.1, %v3001_v8  ;;  %v3093_v31 = vadd.f32 %v3092_v57, %v9518_v58  ;;  %v3181_v41 = vpop.f32.mrf.mxu1  ;;  %v11580_v26 = vld [vmem:[#allocation95_spill] sm:$0xff]  ;;  %v11594_v57 = vld [vmem:[#allocation72_spill] sm:$0xff] }
 0x4ec   :  { %v11581_v30 = vpack.c.bf16 %v11579_v40, %v11580_v26 }
 0x4ed   :  { %v3182_v2 = vadd.f32 %v3181_v41, %v3093_v31  ;;  %3318 = vmatmul.bf16.vlgmr.msrb.gmra.mxu3 %v8691_v23  ;;  %4114 = vmatmul.bf16.vlgmr.msrb.gmra.mxu0 %v11578_v24  ;;  %v9750_v4 = vsel %vm3461_vm15, %v3001_v8, %v3589_v47  ;;  %v7509_v23 = vld [vmem:[%s11140_s5 + $0xf0] sm:$0xff] }
 0x4ee   :  { %4203 = vmatmul.bf16.vlgmr.msrb.gmra.mxu1 %v11581_v30  ;;  %4374 = vmatpush.bf16.msra.mxu3 %v7509_v23 }
 0x4ef   :  { %4292 = vmatmul.bf16.vlgmr.msrb.gmra.mxu2 %v11582_v29 }
 0x4f0   :  { %v3003_v31 = vpop.f32.mrf.mxu3 }
 0x4f1   :  { %v3004_v9 = vadd.f32 %v3003_v31, %v9389_v52  ;;  %v11583_v31 = vld [vmem:[#allocation71_spill] sm:$0xff] }
 0x4f2   :  { %v3270_v34 = vpop.f32.mrf.mxu2  ;;  %v3094_v47 = vpop.f32.mrf.mxu0 }
 0x4f3   :  { %v9764_v8 = vadd.f32 %v3270_v34, %v3182_v2  ;;  %v3095_v41 = vadd.f32 %v3094_v47, %v9518_v58  ;;  %v3183_v0 = vpop.f32.mrf.mxu1  ;;  %v3593_v29 = vmul.f32 0.1, %v3004_v9  ;;  %vm3465_vm0 = vcmp.ge.f32.partialorder %v3004_v9, 0.0  ;;  %v11584_v34 = vld [vmem:[#allocation70_spill] sm:$0xff] }
 0x4f4   :  { %v11585_v47 = vpack.c.bf16 %v11583_v31, %v11584_v34 }
 0x4f5   :  { %v3184_v38 = vadd.f32 %v3183_v0, %v3095_v41  ;;  %v9775_v41 = vsel %vm3465_vm0, %v3004_v9, %v3593_v29  ;;  %v11586_v0 = vld [vmem:[#allocation98_spill] sm:$0xff] }
 0x4f8   :  { %v3005_v19 = vpop.f32.mrf.mxu3 }
 0x4f9   :  { %v3006_v15 = vadd.f32 %v3005_v19, %v9393_v33 }
 0x4fa   :  { %v3272_v24 = vpop.f32.mrf.mxu2  ;;  %v3097_v26 = vpop.f32.mrf.mxu0 }
 0x4fb   :  { %v9768_v40 = vadd.f32 %v3272_v24, %v3184_v38  ;;  %vm3469_vm1 = vcmp.ge.f32.partialorder %v3006_v15, 0.0  ;;  %v3597_v30 = vmul.f32 0.1, %v3006_v15  ;;  %v3098_v52 = vadd.f32 %v3097_v26, %v9518_v58  ;;  %v3186_v2 = vpop.f32.mrf.mxu1  ;;  %v11587_v38 = vld [vmem:[#allocation97_spill] sm:$0xff] }
 0x4fc   :  { %v11588_v19 = vpack.c.bf16 %v11586_v0, %v11587_v38  ;;  %v11589_v24 = vpack.c.bf16 %v9564_v59, %v9562_v35  ;;  %v11591_v38 = vld [vmem:[#allocation52_spill] sm:$0xff] }
 0x4fd   :  { %v3187_v23 = vadd.f32 %v3186_v2, %v3098_v52  ;;  %3323 = vmatmul.bf16.gmra.mxu3 %v11497_v51  ;;  %4119 = vmatmul.bf16.gmra.mxu0 %v11585_v47  ;;  %v9777_v33 = vsel %vm3469_vm1, %v3006_v15, %v3597_v30  ;;  %v11590_v52 = vld [vmem:[#allocation51_spill] sm:$0xff] }
 0x4fe   :  { %4208 = vmatmul.bf16.gmra.mxu1 %v11588_v19 }
 0x4ff   :  { %4297 = vmatmul.bf16.gmra.mxu2 %v11589_v24 }
 0x500   :  { %v3008_v51 = vpop.f32.mrf.mxu3 }
 0x501   :  { %v3009_v2 = vadd.f32 %v3008_v51, %v11590_v52 }
 0x502   :  { %v3275_v31 = vpop.f32.mrf.mxu2  ;;  %v3099_v9 = vpop.f32.mrf.mxu0 }
 0x503   :  { %v9788_v34 = vadd.f32 %v3275_v31, %v3187_v23  ;;  %v3100_v29 = vadd.f32 %v3099_v9, %v9518_v58  ;;  %v3188_v15 = vpop.f32.mrf.mxu1  ;;  %v3601_v0 = vmul.f32 0.1, %v3009_v2  ;;  %vm3473_vm2 = vcmp.ge.f32.partialorder %v3009_v2, 0.0  ;;  %v11592_v31 = vld [vmem:[#allocation43_spill] sm:$0xff]  ;;  %v11593_v9 = vld [vmem:[#allocation73_spill] sm:$0xff] }
 0x505   :  { %v3189_v30 = vadd.f32 %v3188_v15, %v3100_v29  ;;  %v11595_v29 = vpack.c.bf16 %v11593_v9, %v11594_v57  ;;  %v9799_v15 = vsel %vm3473_vm2, %v3009_v2, %v3601_v0  ;;  %v11600_v2 = vld [vmem:[#allocation12_spill] sm:$0xff] }
 0x508   :  { %v3010_v47 = vpop.f32.mrf.mxu3 }
 0x509   :  { %v3011_v19 = vadd.f32 %v3010_v47, %v11591_v38  ;;  %v11596_v38 = vld [vmem:[#allocation100_spill] sm:$0xff] }
 0x50a   :  { %v3277_v35 = vpop.f32.mrf.mxu2  ;;  %v3102_v24 = vpop.f32.mrf.mxu0 }
 0x50b   :  { %v9792_v59 = vadd.f32 %v3277_v35, %v3189_v30  ;;  %vm3477_vm3 = vcmp.ge.f32.partialorder %v3011_v19, 0.0  ;;  %v3605_v26 = vmul.f32 0.1, %v3011_v19  ;;  %v3103_v51 = vadd.f32 %v3102_v24, %v9518_v58  ;;  %v3191_v23 = vpop.f32.mrf.mxu1  ;;  %v11597_v30 = vld [vmem:[#allocation99_spill] sm:$0xff] }
 0x50c   :  { %v11598_v35 = vpack.c.bf16 %v11596_v38, %v11597_v30  ;;  %v7508_v24 = vld [vmem:[%s11140_s5 + $0xe8] sm:$0xff] }
 0x50d   :  { %v3192_v52 = vadd.f32 %v3191_v23, %v3103_v51  ;;  %3328 = vmatmul.bf16.gmra.mxu3 %v11592_v31  ;;  %4124 = vmatmul.bf16.gmra.mxu0 %v11595_v29  ;;  %v9801_v47 = vsel %vm3477_vm3, %v3011_v19, %v3605_v26  ;;  %v11601_v29 = vld [vmem:[#allocation13_spill] sm:$0xff] }
 0x50e   :  { %4213 = vmatmul.bf16.gmra.mxu1 %v11598_v35  ;;  %4375 = vmatpush.bf16.msra.mxu3 %v7508_v24 }
 0x50f   :  { %4302 = vmatmul.bf16.gmra.mxu2 %v11599_v54 }
 0x510   :  { %v3013_v51 = vpop.f32.mrf.mxu3 }
 0x511   :  { %v3014_v26 = vadd.f32 %v3013_v51, %v11600_v2 }
 0x512   :  { %v3280_v0 = vpop.f32.mrf.mxu2  ;;  %v3104_v23 = vpop.f32.mrf.mxu0 }
 0x513   :  { %v9815_v19 = vadd.f32 %v3280_v0, %v3192_v52  ;;  %v3105_v31 = vadd.f32 %v3104_v23, %v9518_v58  ;;  %v3193_v9 = vpop.f32.mrf.mxu1  ;;  %v3609_v54 = vmul.f32 0.1, %v3014_v26  ;;  %vm3481_vm4 = vcmp.ge.f32.partialorder %v3014_v26, 0.0  ;;  %v11603_v0 = vld [vmem:[#allocation44_spill] sm:$0xff]  ;;  %v11604_v23 = vld [vmem:[#allocation75_spill] sm:$0xff] }
 0x515   :  { %v3194_v11 = vadd.f32 %v3193_v9, %v3105_v31  ;;  %v11606_v31 = vpack.c.bf16 %v11604_v23, %v11605_v44  ;;  %v9826_v9 = vsel %vm3481_vm4, %v3014_v26, %v3609_v54 }
 0x518   :  { %v3015_v43 = vpop.f32.mrf.mxu3 }
 0x519   :  { %v3016_v38 = vadd.f32 %v3015_v43, %v11601_v29  ;;  %v11607_v29 = vld [vmem:[#allocation104_spill] sm:$0xff] }
 0x51a   :  { %v3282_v30 = vpop.f32.mrf.mxu2  ;;  %v3107_v57 = vpop.f32.mrf.mxu0 }
 0x51b   :  { %v9819_v35 = vadd.f32 %v3282_v30, %v3194_v11  ;;  %vm3485_vm5 = vcmp.ge.f32.partialorder %v3016_v38, 0.0  ;;  %v3613_v24 = vmul.f32 0.1, %v3016_v38  ;;  %v3108_v51 = vadd.f32 %v3107_v57, %v9518_v58  ;;  %v3196_v52 = vpop.f32.mrf.mxu1  ;;  %v11608_v11 = vld [vmem:[#allocation103_spill] sm:$0xff] }
 0x51c   :  { %v11609_v30 = vpack.c.bf16 %v11607_v29, %v11608_v11  ;;  %v11613_v11 = vld [vmem:[#allocation16_spill] sm:$0xff] }
 0x51d   :  { %11602 = vst [vmem:[#allocation26_spill] sm:$0xff] %v9819_v35  ;;  %v3197_v2 = vadd.f32 %v3196_v52, %v3108_v51  ;;  %3333 = vmatmul.bf16.gmra.mxu3 %v11603_v0  ;;  %4129 = vmatmul.bf16.gmra.mxu0 %v11606_v31  ;;  %v9828_v43 = vsel %vm3485_vm5, %v3016_v38, %v3613_v24  ;;  %v11611_v52 = vld [vmem:[#allocation15_spill] sm:$0xff] }
 0x51e   :  { %4218 = vmatmul.bf16.gmra.mxu1 %v11609_v30  ;;  %v11610_v35 = vpack.c.bf16 %v9609_v50, %v9607_v62 }
 0x520   :  { %4307 = vmatmul.bf16.gmra.mxu2 %v11610_v35  ;;  %v3018_v51 = vpop.f32.mrf.mxu3 }
 0x521   :  { %v3019_v0 = vadd.f32 %v3018_v51, %v11611_v52 }
 0x522   :  { %v3285_v44 = vpop.f32.mrf.mxu2  ;;  %v3109_v26 = vpop.f32.mrf.mxu0 }
 0x523   :  { %v9839_v23 = vadd.f32 %v3285_v44, %v3197_v2  ;;  %v3110_v54 = vadd.f32 %v3109_v26, %v9518_v58  ;;  %v3198_v38 = vpop.f32.mrf.mxu1  ;;  %v3617_v29 = vmul.f32 0.1, %v3019_v0  ;;  %vm3489_vm6 = vcmp.ge.f32.partialorder %v3019_v0, 0.0  ;;  %v11615_v44 = vld [vmem:[#allocation45_spill] sm:$0xff] }
 0x524   :  { %v11616_v26 = vld [vmem:[#allocation77_spill] sm:$0xff] }
 0x525   :  { %11612 = vst [vmem:[#allocation63_spill] sm:$0xff] %v9839_v23  ;;  %v3199_v24 = vadd.f32 %v3198_v38, %v3110_v54  ;;  %v11617_v23 = vld [vmem:[#allocation76_spill] sm:$0xff]  ;;  %v9850_v38 = vsel %vm3489_vm6, %v3019_v0, %v3617_v29 }
 0x526   :  { %v11618_v54 = vpack.c.bf16 %v11616_v26, %v11617_v23  ;;  %v11623_v26 = vld [vmem:[#allocation57_spill] sm:$0xff]  ;;  %v11627_v23 = vld [vmem:[#allocation46_spill] sm:$0xff] }
 0x528   :  { %v3020_v31 = vpop.f32.mrf.mxu3 }
 0x529   :  { %v3021_v30 = vadd.f32 %v3020_v31, %v11613_v11  ;;  %v11619_v11 = vld [vmem:[#allocation106_spill] sm:$0xff] }
 0x52a   :  { %v3287_v62 = vpop.f32.mrf.mxu2  ;;  %v3112_v35 = vpop.f32.mrf.mxu0 }
 0x52b   :  { %v9843_v50 = vadd.f32 %v3287_v62, %v3199_v24  ;;  %vm3493_vm7 = vcmp.ge.f32.partialorder %v3021_v30, 0.0  ;;  %v3621_v57 = vmul.f32 0.1, %v3021_v30  ;;  %v3113_v51 = vadd.f32 %v3112_v35, %v9518_v58  ;;  %v3201_v2 = vpop.f32.mrf.mxu1  ;;  %v11620_v24 = vld [vmem:[#allocation105_spill] sm:$0xff]  ;;  %v7507_v35 = vld [vmem:[%s11140_s5 + $0xe0] sm:$0xff] }
 0x52c   :  { %v11621_v62 = vpack.c.bf16 %v11619_v11, %v11620_v24  ;;  %4376 = vmatpush.bf16.msra.mxu3 %v7507_v35 }
 0x52d   :  { %11614 = vst [vmem:[#allocation64_spill] sm:$0xff] %v9843_v50  ;;  %v3202_v52 = vadd.f32 %v3201_v2, %v3113_v51  ;;  %3338 = vmatmul.bf16.gmra.mxu3 %v11615_v44  ;;  %4134 = vmatmul.bf16.gmra.mxu0 %v11618_v54  ;;  %v9852_v31 = vsel %vm3493_vm7, %v3021_v30, %v3621_v57 }
 0x52e   :  { %4223 = vmatmul.bf16.gmra.mxu1 %v11621_v62  ;;  %v11622_v50 = vpack.c.bf16 %v9664_v16, %v9662_v37 }
 0x530   :  { %4312 = vmatmul.bf16.gmra.mxu2 %v11622_v50  ;;  %v3023_v51 = vpop.f32.mrf.mxu3 }
 0x531   :  { %v3024_v57 = vadd.f32 %v3023_v51, %v9461_v20 }
 0x532   :  { %v3290_v0 = vpop.f32.mrf.mxu2  ;;  %v3114_v30 = vpop.f32.mrf.mxu0 }
 0x533   :  { %v9866_v29 = vadd.f32 %v3290_v0, %v3202_v52  ;;  %v3115_v2 = vadd.f32 %v3114_v30, %v9518_v58  ;;  %v3203_v44 = vpop.f32.mrf.mxu1  ;;  %v3625_v50 = vmul.f32 0.1, %v3024_v57  ;;  %vm3497_vm8 = vcmp.ge.f32.partialorder %v3024_v57, 0.0  ;;  %v11625_v0 = vld [vmem:[#allocation47_spill] sm:$0xff]  ;;  %v11626_v30 = vld [vmem:[#allocation78_spill] sm:$0xff] }
 0x535   :  { %v3204_v37 = vadd.f32 %v3203_v44, %v3115_v2  ;;  %v11628_v2 = vpack.c.bf16 %v11626_v30, %v11627_v23  ;;  %v9877_v44 = vsel %vm3497_vm8, %v3024_v57, %v3625_v50 }
 0x538   :  { %v3025_v16 = vpop.f32.mrf.mxu3 }
 0x539   :  { %v3026_v54 = vadd.f32 %v3025_v16, %v11623_v26  ;;  %v11629_v26 = vld [vmem:[#allocation108_spill] sm:$0xff] }
 0x53a   :  { %v3292_v11 = vpop.f32.mrf.mxu2  ;;  %v3117_v62 = vpop.f32.mrf.mxu0 }
 0x53b   :  { %v9870_v24 = vadd.f32 %v3292_v11, %v3204_v37  ;;  %vm3501_vm9 = vcmp.ge.f32.partialorder %v3026_v54, 0.0  ;;  %v3629_v35 = vmul.f32 0.1, %v3026_v54  ;;  %v3118_v20 = vadd.f32 %v3117_v62, %v9518_v58  ;;  %v3206_v52 = vpop.f32.mrf.mxu1  ;;  %v11630_v37 = vld [vmem:[#allocation107_spill] sm:$0xff] }
 0x53c   :  { %v11631_v11 = vpack.c.bf16 %v11629_v26, %v11630_v37  ;;  %v11635_v37 = vld [vmem:[#allocation58_spill] sm:$0xff] }
 0x53d   :  { %11624 = vst [vmem:[#allocation28_spill] sm:$0xff] %v9870_v24  ;;  %v3207_v51 = vadd.f32 %v3206_v52, %v3118_v20  ;;  %3343 = vmatmul.bf16.gmra.mxu3 %v11625_v0  ;;  %4139 = vmatmul.bf16.gmra.mxu0 %v11628_v2  ;;  %v9879_v16 = vsel %vm3501_vm9, %v3026_v54, %v3629_v35  ;;  %v11633_v52 = vld [vmem:[#allocation20_spill] sm:$0xff] }
 0x53e   :  { %4228 = vmatmul.bf16.gmra.mxu1 %v11631_v11  ;;  %v11632_v24 = vpack.c.bf16 %v9709_v36, %v9707_v17 }
 0x540   :  { %4317 = vmatmul.bf16.gmra.mxu2 %v11632_v24  ;;  %v3028_v20 = vpop.f32.mrf.mxu3 }
 0x541   :  { %v3029_v0 = vadd.f32 %v3028_v20, %v11633_v52 }
 0x542   :  { %v3295_v23 = vpop.f32.mrf.mxu2  ;;  %v3119_v57 = vpop.f32.mrf.mxu0 }
 0x543   :  { %v9890_v30 = vadd.f32 %v3295_v23, %v3207_v51  ;;  %v3120_v50 = vadd.f32 %v3119_v57, %v9518_v58  ;;  %v3208_v54 = vpop.f32.mrf.mxu1  ;;  %v3633_v26 = vmul.f32 0.1, %v3029_v0  ;;  %vm3505_vm10 = vcmp.ge.f32.partialorder %v3029_v0, 0.0  ;;  %v11637_v23 = vld [vmem:[#allocation48_spill] sm:$0xff] }
 0x544   :  { %v11638_v57 = vld [vmem:[#allocation80_spill] sm:$0xff] }
 0x545   :  { %11634 = vst [vmem:[#allocation29_spill] sm:$0xff] %v9890_v30  ;;  %v3209_v35 = vadd.f32 %v3208_v54, %v3120_v50  ;;  %v11639_v30 = vld [vmem:[#allocation79_spill] sm:$0xff]  ;;  %v9901_v54 = vsel %vm3505_vm10, %v3029_v0, %v3633_v26 }
 0x546   :  { %v11640_v50 = vpack.c.bf16 %v11638_v57, %v11639_v30 }
 0x548   :  { %v3030_v2 = vpop.f32.mrf.mxu3 }
 0x549   :  { %v3031_v11 = vadd.f32 %v3030_v2, %v11635_v37  ;;  %v11641_v37 = vld [vmem:[#allocation110_spill] sm:$0xff] }
 0x54a   :  { %v3297_v17 = vpop.f32.mrf.mxu2  ;;  %v3122_v24 = vpop.f32.mrf.mxu0 }
 0x54b   :  { %v9894_v36 = vadd.f32 %v3297_v17, %v3209_v35  ;;  %vm3509_vm11 = vcmp.ge.f32.partialorder %v3031_v11, 0.0  ;;  %v3637_v62 = vmul.f32 0.1, %v3031_v11  ;;  %v3123_v20 = vadd.f32 %v3122_v24, %v9518_v58  ;;  %v3211_v51 = vpop.f32.mrf.mxu1  ;;  %v11642_v35 = vld [vmem:[#allocation109_spill] sm:$0xff] }
 0x54c   :  { %v11643_v17 = vpack.c.bf16 %v11641_v37, %v11642_v35  ;;  %v7506_v24 = vld [vmem:[%s11140_s5 + $0xd8] sm:$0xff] }
 0x54d   :  { %11636 = vst [vmem:[#allocation30_spill] sm:$0xff] %v9894_v36  ;;  %v3212_v52 = vadd.f32 %v3211_v51, %v3123_v20  ;;  %3348 = vmatmul.bf16.gmra.mxu3 %v11637_v23  ;;  %4144 = vmatmul.bf16.gmra.mxu0 %v11640_v50  ;;  %v9903_v2 = vsel %vm3509_vm11, %v3031_v11, %v3637_v62 }
 0x54e   :  { %4233 = vmatmul.bf16.gmra.mxu1 %v11643_v17  ;;  %v11644_v36 = vpack.c.bf16 %v9730_v32, %v9728_v27  ;;  %v3837_v30 = vpack.c.bf16 %v9903_v2, %v9901_v54  ;;  %4377 = vmatpush.bf16.msra.mxu3 %v7506_v24 }
 0x550   :  { %4322 = vmatmul.bf16.gmra.mxu2 %v11644_v36  ;;  %v3033_v20 = vpop.f32.mrf.mxu3 }
 0x551   :  { %v3034_v62 = vadd.f32 %v3033_v20, %v9497_v42  ;;  %v11645_v20 = vld [vmem:[#allocation81_spill] sm:$0xff] }
 0x552   :  { %v3300_v0 = vpop.f32.mrf.mxu2  ;;  %v3124_v11 = vpop.f32.mrf.mxu0 }
 0x553   :  { %v9917_v26 = vadd.f32 %v3300_v0, %v3212_v52  ;;  %v3125_v51 = vadd.f32 %v3124_v11, %v9518_v58  ;;  %v3213_v23 = vpop.f32.mrf.mxu1  ;;  %v3641_v36 = vmul.f32 0.1, %v3034_v62  ;;  %vm3513_vm12 = vcmp.ge.f32.partialorder %v3034_v62, 0.0  ;;  %v11646_v0 = vld [vmem:[#allocation49_spill] sm:$0xff] }
 0x554   :  { %v11647_v11 = vpack.c.bf16 %v11645_v20, %v11646_v0  ;;  %v9944_v0 = vld [vmem:[#allocation2 + $0x8] ss:$0 sm:$0xff] }
 0x555   :  { %v3214_v27 = vadd.f32 %v3213_v23, %v3125_v51  ;;  %v9928_v51 = vsel %vm3513_vm12, %v3034_v62, %v3641_v36  ;;  %v11648_v23 = vld [vmem:[#allocation112_spill] sm:$0xff] }
 0x558   :  { %v3035_v32 = vpop.f32.mrf.mxu3 }
 0x559   :  { %v3036_v57 = vadd.f32 %v3035_v32, %v9501_v13 }
 0x55a   :  { %v3302_v50 = vpop.f32.mrf.mxu2  ;;  %v3127_v35 = vpop.f32.mrf.mxu0 }
 0x55b   :  { %v9921_v37 = vadd.f32 %v3302_v50, %v3214_v27  ;;  %vm3517_vm13 = vcmp.ge.f32.partialorder %v3036_v57, 0.0  ;;  %v3645_v17 = vmul.f32 0.1, %v3036_v57  ;;  %v3128_v42 = vadd.f32 %v3127_v35, %v9518_v58  ;;  %v3216_v52 = vpop.f32.mrf.mxu1  ;;  %v11649_v27 = vld [vmem:[#allocation111_spill] sm:$0xff] }
 0x55c   :  { %v11650_v32 = vpack.c.bf16 %v11648_v23, %v11649_v27  ;;  %v11651_v50 = vpack.c.bf16 %v9750_v4, %v9748_v48  ;;  %v11659_v35 = vpack.c.bf16 %v9777_v33, %v9775_v41 }
 0x55d   :  { %v3217_v24 = vadd.f32 %v3216_v52, %v3128_v42  ;;  %3353 = vmatmul.bf16.gmra.mxu3 %v11553_v25  ;;  %4149 = vmatmul.bf16.gmra.mxu0 %v11647_v11  ;;  %v9930_v13 = vsel %vm3517_vm13, %v3036_v57, %v3645_v17 }
 0x55e   :  { %4238 = vmatmul.bf16.gmra.mxu1 %v11650_v32 }
 0x560   :  { %4327 = vmatmul.bf16.gmra.mxu2 %v11651_v50  ;;  %v3038_v25 = vpop.f32.mrf.mxu3 }
 0x561   :  { %v3039_v42 = vadd.f32 %v3038_v25, %v9515_v46 }
 0x562   :  { %v3305_v52 = vpop.f32.mrf.mxu2  ;;  %v3129_v62 = vpop.f32.mrf.mxu0 }
 0x563   :  { %v9941_v20 = vadd.f32 %v3305_v52, %v3217_v24  ;;  %v3130_v36 = vadd.f32 %v3129_v62, %v9518_v58  ;;  %v3218_v57 = vpop.f32.mrf.mxu1  ;;  %v3649_v23 = vmul.f32 0.1, %v3039_v42  ;;  %vm3521_vm14 = vcmp.ge.f32.partialorder %v3039_v42, 0.0  ;;  %v11652_v58 = vld [vmem:[#allocation53_spill] sm:$0xff]  ;;  %v11653_v52 = vld [vmem:[#allocation83_spill] sm:$0xff]  ;;  %v11654_v62 = vld [vmem:[#allocation82_spill] sm:$0xff] }
 0x565   :  { %v3219_v17 = vadd.f32 %v3218_v57, %v3130_v36  ;;  %v11655_v36 = vpack.c.bf16 %v11653_v52, %v11654_v62  ;;  %v9954_v57 = vsel %vm3521_vm14, %v3039_v42, %v3649_v23 }
 0x568   :  { %v3040_v11 = vpop.f32.mrf.mxu3 }
 0x569   :  { %v3041_v48 = vadd.f32 %v3040_v11, %v9521_v61  ;;  %v11656_v11 = vld [vmem:[#allocation10_spill] sm:$0xff] }
 0x56a   :  { %v3307_v4 = vpop.f32.mrf.mxu2  ;;  %v4115_v32 = vpop.f32.mrf.mxu0 }
 0x56b   :  { %v9947_v27 = vadd.f32 %v3307_v4, %v3219_v17  ;;  %vm3525_vm15 = vcmp.ge.f32.partialorder %v3041_v48, 0.0  ;;  %v3653_v46 = vmul.f32 0.1, %v3041_v48  ;;  %v4116_v24 = vadd.f32 %v9944_v0, %v4115_v32  ;;  %v4204_v50 = vpop.f32.mrf.mxu1  ;;  %v11657_v17 = vld [vmem:[#allocation9_spill] sm:$0xff] }
 0x56c   :  { %v11658_v4 = vpack.c.bf16 %v11656_v11, %v11657_v17  ;;  %v7505_v32 = vld [vmem:[%s11140_s5 + $0xd0] sm:$0xff] }
 0x56d   :  { %v4205_v25 = vadd.f32 %v4204_v50, %v4116_v24  ;;  %3358 = vmatmul.bf16.gmra.mxu3 %v11652_v58  ;;  %4154 = vmatmul.bf16.gmra.mxu0 %v11655_v36  ;;  %v9956_v61 = vsel %vm3525_vm15, %v3041_v48, %v3653_v46 }
 0x56e   :  { %4243 = vmatmul.bf16.gmra.mxu1 %v11658_v4  ;;  %v3845_v24 = vpack.c.bf16 %v9956_v61, %v9954_v57  ;;  %4378 = vmatpush.bf16.msra.mxu3 %v7505_v32 }
 0x570   :  { %4332 = vmatmul.bf16.gmra.mxu2 %v11659_v35  ;;  %v3319_v50 = vpop.f32.mrf.mxu3 }
 0x571   :  { %v3320_v42 = vadd.f32 %v3319_v50, %v9535_v18 }
 0x572   :  { %v4293_v23 = vpop.f32.mrf.mxu2  ;;  %v4117_v46 = vpop.f32.mrf.mxu0 }
 0x573   :  { %v9970_v48 = vadd.f32 %v4293_v23, %v4205_v25  ;;  %v4118_v58 = vadd.f32 %v9944_v0, %v4117_v46  ;;  %v4206_v52 = vpop.f32.mrf.mxu1  ;;  %v3530_v35 = vmul.f32 0.1, %v3320_v42  ;;  %vm3402_vm0 = vcmp.ge.f32.partialorder %v3320_v42, 0.0  ;;  %v11660_v46 = vld [vmem:[#allocation85_spill] sm:$0xff] }
 0x575   :  { %v4207_v41 = vadd.f32 %v4206_v52, %v4118_v58  ;;  %v9977_v32 = vsel %vm3402_vm0, %v3320_v42, %v3530_v35  ;;  %v11661_v58 = vld [vmem:[#allocation84_spill] sm:$0xff]  ;;  %v11666_v42 = vpack.c.bf16 %v9801_v47, %v9799_v15 }
 0x578   :  { %v3321_v33 = vpop.f32.mrf.mxu3 }
 0x579   :  { %v3322_v62 = vadd.f32 %v3321_v33, %v9539_v49  ;;  %v11662_v49 = vpack.c.bf16 %v11660_v46, %v11661_v58  ;;  %v11664_v33 = vld [vmem:[#allocation40_spill] sm:$0xff] }
 0x57a   :  { %v4295_v36 = vpop.f32.mrf.mxu2  ;;  %v4120_v17 = vpop.f32.mrf.mxu0 }
 0x57b   :  { %v9974_v11 = vadd.f32 %v4295_v36, %v4207_v41  ;;  %vm3406_vm1 = vcmp.ge.f32.partialorder %v3322_v62, 0.0  ;;  %v3534_v4 = vmul.f32 0.1, %v3322_v62  ;;  %v4121_v18 = vadd.f32 %v9944_v0, %v4120_v17  ;;  %v4209_v25 = vpop.f32.mrf.mxu1  ;;  %v11663_v41 = vld [vmem:[#allocation11_spill] sm:$0xff] }
 0x57c   :  { %v11665_v36 = vpack.c.bf16 %v11663_v41, %v11664_v33 }
 0x57d   :  { %v9979_v50 = vsel %vm3406_vm1, %v3322_v62, %v3534_v4  ;;  %v4210_v23 = vadd.f32 %v4209_v25, %v4121_v18  ;;  %3363 = vmatmul.bf16.gmra.mxu3 %v8860_v60  ;;  %4159 = vmatmul.bf16.gmra.mxu0 %v11662_v49 }
 0x57e   :  { %v3786_v52 = vpack.c.bf16 %v9979_v50, %v9977_v32  ;;  %4248 = vmatmul.bf16.gmra.mxu1 %v11665_v36 }
 0x580   :  { %4337 = vmatmul.bf16.gmra.mxu2 %v11666_v42  ;;  %v3324_v35 = vpop.f32.mrf.mxu3 }
 0x581   :  { %v3325_v62 = vadd.f32 %v3324_v35, %v9553_v63  ;;  %v11667_v35 = vld [vmem:[#allocation87_spill] sm:$0xff] }
 0x582   :  { %v4298_v17 = vpop.f32.mrf.mxu2  ;;  %v4122_v4 = vpop.f32.mrf.mxu0 }
 0x583   :  { %v9994_v60 = vadd.f32 %v4298_v17, %v4210_v23  ;;  %v4123_v18 = vadd.f32 %v9944_v0, %v4122_v4  ;;  %v4211_v25 = vpop.f32.mrf.mxu1  ;;  %v3538_v49 = vmul.f32 0.1, %v3325_v62  ;;  %vm3410_vm2 = vcmp.ge.f32.partialorder %v3325_v62, 0.0  ;;  %v11668_v17 = vld [vmem:[#allocation86_spill] sm:$0xff] }
 0x584   :  { %v11669_v4 = vpack.c.bf16 %v11667_v35, %v11668_v17 }
 0x585   :  { %v4212_v46 = vadd.f32 %v4211_v25, %v4123_v18  ;;  %v10005_v18 = vsel %vm3410_vm2, %v3325_v62, %v3538_v49  ;;  %v11670_v25 = vld [vmem:[#allocation55_spill] sm:$0xff] }
 0x588   :  { %v3326_v58 = vpop.f32.mrf.mxu3 }
 0x589   :  { %v3327_v41 = vadd.f32 %v3326_v58, %v9557_v53 }
 0x58a   :  { %v4300_v33 = vpop.f32.mrf.mxu2  ;;  %v4125_v15 = vpop.f32.mrf.mxu0 }
 0x58b   :  { %v9998_v36 = vadd.f32 %v4300_v33, %v4212_v46  ;;  %vm3414_vm3 = vcmp.ge.f32.partialorder %v3327_v41, 0.0  ;;  %v3542_v47 = vmul.f32 0.1, %v3327_v41  ;;  %v4126_v63 = vadd.f32 %v9944_v0, %v4125_v15  ;;  %v4214_v23 = vpop.f32.mrf.mxu1  ;;  %v11671_v46 = vld [vmem:[#allocation54_spill] sm:$0xff] }
 0x58c   :  { %v11672_v58 = vpack.c.bf16 %v11670_v25, %v11671_v46  ;;  %v11673_v33 = vpack.c.bf16 %v9828_v43, %v9826_v9 }
 0x58d   :  { %v4215_v42 = vadd.f32 %v4214_v23, %v4126_v63  ;;  %3368 = vmatmul.bf16.gmra.mxu3 %v8874_v5  ;;  %4164 = vmatmul.bf16.gmra.mxu0 %v11669_v4  ;;  %v10007_v53 = vsel %vm3414_vm3, %v3327_v41, %v3542_v47  ;;  %v7504_v5 = vld [vmem:[%s11140_s5 + $0xc8] sm:$0xff] }
 0x58e   :  { %4253 = vmatmul.bf16.gmra.mxu1 %v11672_v58  ;;  %4379 = vmatpush.bf16.msra.mxu3 %v7504_v5 }
 0x590   :  { %4342 = vmatmul.bf16.gmra.mxu2 %v11673_v33  ;;  %v3329_v63 = vpop.f32.mrf.mxu3 }
 0x591   :  { %v3330_v62 = vadd.f32 %v3329_v63, %v9571_v45  ;;  %v11674_v63 = vld [vmem:[#allocation89_spill] sm:$0xff] }
 0x592   :  { %v4303_v49 = vpop.f32.mrf.mxu2  ;;  %v4127_v47 = vpop.f32.mrf.mxu0 }
 0x593   :  { %v10021_v41 = vadd.f32 %v4303_v49, %v4215_v42  ;;  %v4128_v23 = vadd.f32 %v9944_v0, %v4127_v47  ;;  %v4216_v35 = vpop.f32.mrf.mxu1  ;;  %v3546_v17 = vmul.f32 0.1, %v3330_v62  ;;  %vm3418_vm4 = vcmp.ge.f32.partialorder %v3330_v62, 0.0  ;;  %v11675_v49 = vld [vmem:[#allocation88_spill] sm:$0xff] }
 0x594   :  { %v11676_v47 = vpack.c.bf16 %v11674_v63, %v11675_v49 }
 0x595   :  { %v4217_v9 = vadd.f32 %v4216_v35, %v4128_v23  ;;  %v10032_v23 = vsel %vm3418_vm4, %v3330_v62, %v3546_v17  ;;  %v11677_v35 = vld [vmem:[#allocation56_spill] sm:$0xff] }
 0x598   :  { %v3331_v43 = vpop.f32.mrf.mxu3 }
 0x599   :  { %v3332_v4 = vadd.f32 %v3331_v43, %v9575_v56 }
 0x59a   :  { %v4305_v25 = vpop.f32.mrf.mxu2  ;;  %v4130_v58 = vpop.f32.mrf.mxu0 }
 0x59b   :  { %v10025_v46 = vadd.f32 %v4305_v25, %v4217_v9  ;;  %vm3422_vm5 = vcmp.ge.f32.partialorder %v3332_v4, 0.0  ;;  %v3550_v33 = vmul.f32 0.1, %v3332_v4  ;;  %v4131_v45 = vadd.f32 %v9944_v0, %v4130_v58  ;;  %v4219_v42 = vpop.f32.mrf.mxu1  ;;  %v11678_v9 = vld [vmem:[#allocation17_spill] sm:$0xff]  ;;  %v11683_v58 = vld [vmem:[#allocation62_spill] sm:$0xff] }
 0x59c   :  { %v11679_v43 = vpack.c.bf16 %v11677_v35, %v11678_v9  ;;  %v11680_v25 = vpack.c.bf16 %v9852_v31, %v9850_v38  ;;  %v11682_v9 = vld [vmem:[#allocation25_spill] sm:$0xff] }
 0x59d   :  { %v4220_v5 = vadd.f32 %v4219_v42, %v4131_v45  ;;  %3373 = vmatmul.bf16.gmra.mxu3 %v8888_v1  ;;  %4169 = vmatmul.bf16.gmra.mxu0 %v11676_v47  ;;  %v10034_v56 = vsel %vm3422_vm5, %v3332_v4, %v3550_v33  ;;  %v11681_v45 = vld [vmem:[#allocation24_spill] sm:$0xff] }
 0x59e   :  { %4258 = vmatmul.bf16.gmra.mxu1 %v11679_v43 }
 0x5a0   :  { %4347 = vmatmul.bf16.gmra.mxu2 %v11680_v25  ;;  %v3334_v1 = vpop.f32.mrf.mxu3 }
 0x5a1   :  { %v3335_v42 = vadd.f32 %v3334_v1, %v11681_v45  ;;  %v11684_v1 = vld [vmem:[#allocation91_spill] sm:$0xff] }
 0x5a2   :  { %v4132_v62 = vpop.f32.mrf.mxu0 }
 0x5a3   :  { %v4308_v63 = vpop.f32.mrf.mxu2  ;;  %v4133_v17 = vadd.f32 %v9944_v0, %v4132_v62  ;;  %v4221_v4 = vpop.f32.mrf.mxu1  ;;  %v3554_v35 = vmul.f32 0.1, %v3335_v42  ;;  %vm3426_vm6 = vcmp.ge.f32.partialorder %v3335_v42, 0.0 }
 0x5a4   :  { %v10045_v49 = vadd.f32 %v4308_v63, %v4220_v5  ;;  %v11685_v5 = vld [vmem:[#allocation90_spill] sm:$0xff] }
 0x5a5   :  { %v4222_v33 = vadd.f32 %v4221_v4, %v4133_v17  ;;  %v11686_v45 = vpack.c.bf16 %v11684_v1, %v11685_v5  ;;  %v10055_v63 = vsel %vm3426_vm6, %v3335_v42, %v3554_v35  ;;  %v11687_v17 = vld [vmem:[#allocation19_spill] sm:$0xff]  ;;  %v11688_v4 = vld [vmem:[#allocation18_spill] sm:$0xff] }
 0x5a6   :  { %v11689_v15 = vpack.c.bf16 %v11687_v17, %v11688_v4  ;;  %v11695_v17 = vld [vmem:[#allocation59_spill] sm:$0xff] }
 0x5a8   :  { %v3336_v47 = vpop.f32.mrf.mxu3 }
 0x5a9   :  { %v3337_v43 = vadd.f32 %v3336_v47, %v11682_v9 }
 0x5ab   :  { %v4310_v38 = vpop.f32.mrf.mxu2  ;;  %vm3430_vm7 = vcmp.ge.f32.partialorder %v3337_v43, 0.0  ;;  %v3558_v25 = vmul.f32 0.1, %v3337_v43 }
 0x5ac   :  { %v10049_v31 = vadd.f32 %v4310_v38, %v4222_v33  ;;  %v11690_v33 = vpack.c.bf16 %v9879_v16, %v9877_v44  ;;  %v11691_v44 = vld [vmem:[#allocation93_spill] sm:$0xff]  ;;  %v11692_v16 = vld [vmem:[#allocation92_spill] sm:$0xff] }
 0x5ad   :  { %3378 = vmatmul.bf16.gmra.mxu3 %v11683_v58  ;;  %4174 = vmatmul.bf16.gmra.mxu0 %v11686_v45  ;;  %v10057_v62 = vsel %vm3430_vm7, %v3337_v43, %v3558_v25  ;;  %v7503_v58 = vld [vmem:[%s11140_s5 + $0xc0] sm:$0xff]  ;;  %v11693_v25 = vpack.c.bf16 %v11691_v44, %v11692_v16  ;;  %v11694_v45 = vld [vmem:[#allocation21_spill] sm:$0xff] }
 0x5ae   :  { %4263 = vmatmul.bf16.gmra.mxu1 %v11689_v15  ;;  %v3798_v47 = vpack.c.bf16 %v10057_v62, %v10055_v63  ;;  %4380 = vmatpush.bf16.msra.mxu3 %v7503_v58  ;;  %v11714_v63 = vld [vmem:[#allocation64_spill] sm:$0xff] }
 0x5b0   :  { %4352 = vmatmul.bf16.gmra.mxu2 %v11690_v33  ;;  %v3339_v9 = vpop.f32.mrf.mxu3 }
 0x5b1   :  { %v3340_v42 = vadd.f32 %v3339_v9, %v9625_v21  ;;  %v11696_v21 = vpack.c.bf16 %v11694_v45, %v11695_v17 }
 0x5b3   :  { %v3562_v43 = vmul.f32 0.1, %v3340_v42  ;;  %vm3434_vm8 = vcmp.ge.f32.partialorder %v3340_v42, 0.0 }
 0x5b5   :  { %v10076_v1 = vsel %vm3434_vm8, %v3340_v42, %v3562_v43  ;;  %v11698_v43 = vld [vmem:[#allocation66_spill] sm:$0xff] }
 0x5b8   :  { %v3341_v35 = vpop.f32.mrf.mxu3 }
 0x5b9   :  { %v3342_v38 = vadd.f32 %v3341_v35, %v9647_v28  ;;  %v11697_v35 = vld [vmem:[#allocation94_spill] sm:$0xff] }
 0x5bb   :  { %vm3438_vm9 = vcmp.ge.f32.partialorder %v3342_v38, 0.0  ;;  %v3566_v15 = vmul.f32 0.1, %v3342_v38 }
 0x5bd   :  { %3383 = vmatmul.bf16.gmra.mxu3 %v8916_v3  ;;  %4179 = vmatmul.bf16.gmra.mxu0 %v11693_v25  ;;  %v10078_v5 = vsel %vm3438_vm9, %v3342_v38, %v3566_v15  ;;  %v11699_v38 = vpack.c.bf16 %v11697_v35, %v11698_v43  ;;  %v11701_v15 = vld [vmem:[#allocation22_spill] sm:$0xff] }
 0x5be   :  { %4268 = vmatmul.bf16.gmra.mxu1 %v11696_v21  ;;  %v3802_v28 = vpack.c.bf16 %v10078_v5, %v10076_v1  ;;  %v11715_v1 = vld [vmem:[#allocation28_spill] sm:$0xff] }
 0x5c0   :  { %4357 = vmatmul.bf16.gmra.mxu2 %v3837_v30  ;;  %v3344_v3 = vpop.f32.mrf.mxu3  ;;  %v11700_v30 = vld [vmem:[#allocation23_spill] sm:$0xff] }
 0x5c1   :  { %v3345_v4 = vadd.f32 %v3344_v3, %v9680_v22  ;;  %v11702_v22 = vpack.c.bf16 %v11700_v30, %v11701_v15  ;;  %v11704_v3 = vld [vmem:[#allocation68_spill] sm:$0xff]  ;;  %v4558_v15 = vld [vmem:[%s11136_s1] sm:$0xff] }
 0x5c2   :  { %4622 = vrot.lane.b32.xlu0 %v4558_v15, %s7860_s19 }
 0x5c3   :  { %v3570_v58 = vmul.f32 0.1, %v3345_v4  ;;  %vm3442_vm10 = vcmp.ge.f32.partialorder %v3345_v4, 0.0 }
 0x5c5   :  { %v10094_v54 = vsel %vm3442_vm10, %v3345_v4, %v3570_v58  ;;  %v11705_v4 = vld [vmem:[#allocation67_spill] sm:$0xff]  ;;  %v11707_v58 = vld [vmem:[#allocation61_spill] sm:$0xff] }
 0x5c8   :  { %v3346_v33 = vpop.f32.mrf.mxu3 }
 0x5c9   :  { %v3347_v9 = vadd.f32 %v3346_v33, %v9702_v12  ;;  %v11703_v12 = vpack.c.bf16 %v9930_v13, %v9928_v51  ;;  %v11706_v33 = vpack.c.bf16 %v11704_v3, %v11705_v4 }
 0x5cb   :  { %vm3446_vm11 = vcmp.ge.f32.partialorder %v3347_v9, 0.0  ;;  %v3574_v42 = vmul.f32 0.1, %v3347_v9 }
 0x5cd   :  { %3388 = vmatmul.bf16.gmra.mxu3 %v8930_v14  ;;  %4184 = vmatmul.bf16.gmra.mxu0 %v11699_v38  ;;  %v10096_v2 = vsel %vm3446_vm11, %v3347_v9, %v3574_v42  ;;  %v11708_v9 = vld [vmem:[#allocation60_spill] sm:$0xff] }
 0x5ce   :  { %4273 = vmatmul.bf16.gmra.mxu1 %v11702_v22  ;;  %v3806_v44 = vpack.c.bf16 %v10096_v2, %v10094_v54  ;;  %v4559_v22 = vld [vmem:[%s11136_s1 + $0x8] sm:$0xff] }
 0x5cf   :  { %4624 = vrot.lane.b32.xlu0 %v4559_v22, %s7860_s19 }
 0x5d0   :  { %4362 = vmatmul.bf16.gmra.mxu2 %v11703_v12  ;;  %v3349_v14 = vpop.f32.mrf.mxu3 }
 0x5d1   :  { %v3350_v16 = vadd.f32 %v3349_v14, %v9719_v7  ;;  %v11709_v7 = vpack.c.bf16 %v11707_v58, %v11708_v9 }
 0x5d3   :  { %v3578_v45 = vmul.f32 0.1, %v3350_v16  ;;  %vm3450_vm12 = vcmp.ge.f32.partialorder %v3350_v16, 0.0 }
 0x5d5   :  { %v10112_v51 = vsel %vm3450_vm12, %v3350_v16, %v3578_v45 }
 0x5d8   :  { %v3351_v25 = vpop.f32.mrf.mxu3 }
 0x5d9   :  { %v3352_v17 = vadd.f32 %v3351_v25, %v9723_v55 }
 0x5db   :  { %vm3454_vm13 = vcmp.ge.f32.partialorder %v3352_v17, 0.0  ;;  %v3582_v21 = vmul.f32 0.1, %v3352_v17 }
 0x5dd   :  { %3393 = vmatmul.bf16.gmra.mxu3 %v8946_v39  ;;  %4189 = vmatmul.bf16.gmra.mxu0 %v11706_v33  ;;  %v10114_v13 = vsel %vm3454_vm13, %v3352_v17, %v3582_v21  ;;  %v4561_v21 = vld [vmem:[%s11136_s1 + $0x18] sm:$0xff]  ;;  %v11711_v33 = vpack.c.bf16 %v10034_v56, %v10032_v23 }
 0x5de   :  { %4278 = vmatmul.bf16.gmra.mxu1 %v11709_v7  ;;  %v3810_v55 = vpack.c.bf16 %v10114_v13, %v10112_v51 }
 0x5e0   :  { %4367 = vmatmul.bf16.gmra.mxu2 %v3845_v24  ;;  %v3354_v39 = vpop.f32.mrf.mxu3 }
 0x5e1   :  { %v3355_v42 = vadd.f32 %v3354_v39, %v9737_v10 }
 0x5e3   :  { %v3586_v43 = vmul.f32 0.1, %v3355_v42  ;;  %vm3458_vm14 = vcmp.ge.f32.partialorder %v3355_v42, 0.0 }
 0x5e5   :  { %v10133_v57 = vsel %vm3458_vm14, %v3355_v42, %v3586_v43 }
 0x5e8   :  { %v3356_v35 = vpop.f32.mrf.mxu3 }
 0x5e9   :  { %v3357_v38 = vadd.f32 %v3356_v35, %v9741_v6 }
 0x5eb   :  { %vm3462_vm15 = vcmp.ge.f32.partialorder %v3357_v38, 0.0  ;;  %v3590_v30 = vmul.f32 0.1, %v3357_v38 }
 0x5ed   :  { %4381 = vmatmul.bf16.vlgmr.msra.gmra.mxu3 %v3786_v52  ;;  %v10135_v10 = vsel %vm3462_vm15, %v3357_v38, %v3590_v30  ;;  %v4560_v52 = vld [vmem:[%s11136_s1 + $0x10] sm:$0xff] }
 0x5ee   :  { %v3814_v6 = vpack.c.bf16 %v10135_v10, %v10133_v57  ;;  %4626 = vrot.lane.b32.xlu1 %v4560_v52, %s7860_s19 }
 0x5f0   :  { %v3359_v61 = vpop.f32.mrf.mxu3 }
 0x5f1   :  { %v3360_v24 = vadd.f32 %v3359_v61, %v9764_v8  ;;  %v11710_v8 = vpack.c.bf16 %v10007_v53, %v10005_v18 }
 0x5f3   :  { %v3594_v14 = vmul.f32 0.1, %v3360_v24  ;;  %vm3466_vm0 = vcmp.ge.f32.partialorder %v3360_v24, 0.0 }
 0x5f5   :  { %v10152_v16 = vsel %vm3466_vm0, %v3360_v24, %v3594_v14  ;;  %v4562_v24 = vld [vmem:[%s11136_s1 + $0x20] sm:$0xff]  ;;  %v4563_v14 = vld [vmem:[%s11136_s1 + $0x28] sm:$0xff]  ;;  %vm5022_vm0 = vcmask 261120  }
 0x5f6   :  { %4628 = vrot.lane.b32.xlu1 %v4561_v21, %s7860_s19  ;;  %4630 = vrot.lane.b32.xlu2 %v4562_v24, %s7860_s19 }
 0x5f8   :  { %v3361_v12 = vpop.f32.mrf.mxu3 }
 0x5f9   :  { %v3362_v32 = vadd.f32 %v3361_v12, %v9768_v40 }
 0x5fb   :  { %vm3470_vm1 = vcmp.ge.f32.partialorder %v3362_v32, 0.0  ;;  %v3598_v50 = vmul.f32 0.1, %v3362_v32 }
 0x5fd   :  { %4386 = vmatmul.bf16.gmra.mxu3 %v11710_v8  ;;  %v10154_v25 = vsel %vm3470_vm1, %v3362_v32, %v3598_v50 }
 0x5fe   :  { %v3818_v40 = vpack.c.bf16 %v10154_v25, %v10152_v16  ;;  %4632 = vrot.lane.b32.xlu2 %v4563_v14, %s7860_s19  ;;  %v10259_v25 = vpop.f32.mrf.mxu0 }
 0x600   :  { %v3364_v45 = vpop.f32.mrf.mxu3 }
 0x601   :  { %v3365_v17 = vadd.f32 %v3364_v45, %v9788_v34 }
 0x603   :  { %v3602_v4 = vmul.f32 0.1, %v3365_v17  ;;  %vm3474_vm2 = vcmp.ge.f32.partialorder %v3365_v17, 0.0 }
 0x605   :  { %v10167_v58 = vsel %vm3474_vm2, %v3365_v17, %v3602_v4  ;;  %v4564_v17 = vld [vmem:[%s11136_s1 + $0x30] sm:$0xff] }
 0x606   :  { %4634 = vrot.lane.b32.xlu2 %v4564_v17, %s7860_s19 }
 0x608   :  { %v3366_v3 = vpop.f32.mrf.mxu3 }
 0x609   :  { %v3367_v18 = vadd.f32 %v3366_v3, %v9792_v59  ;;  %v11712_v59 = vld [vmem:[#allocation26_spill] sm:$0xff] }
 0x60b   :  { %vm3478_vm3 = vcmp.ge.f32.partialorder %v3367_v18, 0.0  ;;  %v3606_v53 = vmul.f32 0.1, %v3367_v18 }
 0x60d   :  { %4391 = vmatmul.bf16.gmra.mxu3 %v11711_v33  ;;  %v10169_v34 = vsel %vm3478_vm3, %v3367_v18, %v3606_v53  ;;  %v11716_v33 = vld [vmem:[#allocation29_spill] sm:$0xff] }
 0x60e   :  { %v3822_v9 = vpack.c.bf16 %v10169_v34, %v10167_v58 }
 0x610   :  { %v3369_v7 = vpop.f32.mrf.mxu3 }
 0x611   :  { %v3370_v39 = vadd.f32 %v3369_v7, %v9815_v19  ;;  %v11713_v19 = vld [vmem:[#allocation63_spill] sm:$0xff] }
 0x613   :  { %v3610_v35 = vmul.f32 0.1, %v3370_v39  ;;  %vm3482_vm4 = vcmp.ge.f32.partialorder %v3370_v39, 0.0 }
 0x615   :  { %v10178_v23 = vsel %vm3482_vm4, %v3370_v39, %v3610_v35  ;;  %v11717_v35 = vld [vmem:[#allocation30_spill] sm:$0xff] }
 0x618   :  { %v3371_v42 = vpop.f32.mrf.mxu3 }
 0x619   :  { %v3372_v43 = vadd.f32 %v3371_v42, %v11712_v59 }
 0x61b   :  { %vm3486_vm5 = vcmp.ge.f32.partialorder %v3372_v43, 0.0  ;;  %v3614_v38 = vmul.f32 0.1, %v3372_v43 }
 0x61d   :  { %4396 = vmatmul.bf16.gmra.mxu3 %v3798_v47  ;;  %v10180_v56 = vsel %vm3486_vm5, %v3372_v43, %v3614_v38 }
 0x61e   :  { %v3826_v30 = vpack.c.bf16 %v10180_v56, %v10178_v23 }
 0x620   :  { %v3374_v15 = vpop.f32.mrf.mxu3 }
 0x621   :  { %v3375_v61 = vadd.f32 %v3374_v15, %v11713_v19 }
 0x623   :  { %v3618_v12 = vmul.f32 0.1, %v3375_v61  ;;  %vm3490_vm6 = vcmp.ge.f32.partialorder %v3375_v61, 0.0 }
 0x625   :  { %v10197_v32 = vsel %vm3490_vm6, %v3375_v61, %v3618_v12 }
 0x628   :  { %v3376_v22 = vpop.f32.mrf.mxu3 }
 0x629   :  { %v3377_v62 = vadd.f32 %v3376_v22, %v11714_v63 }
 0x62b   :  { %vm3494_vm7 = vcmp.ge.f32.partialorder %v3377_v62, 0.0  ;;  %v3622_v47 = vmul.f32 0.1, %v3377_v62 }
 0x62d   :  { %4401 = vmatmul.bf16.gmra.mxu3 %v3802_v28  ;;  %v10199_v50 = vsel %vm3494_vm7, %v3377_v62, %v3622_v47 }
 0x62e   :  { %v3830_v52 = vpack.c.bf16 %v10199_v50, %v10197_v32 }
 0x630   :  { %v3379_v8 = vpop.f32.mrf.mxu3 }
 0x631   :  { %v3380_v45 = vadd.f32 %v3379_v8, %v9866_v29 }
 0x633   :  { %v3626_v3 = vmul.f32 0.1, %v3380_v45  ;;  %vm3498_vm8 = vcmp.ge.f32.partialorder %v3380_v45, 0.0 }
 0x635   :  { %v10212_v4 = vsel %vm3498_vm8, %v3380_v45, %v3626_v3  ;;  %v4623_v45 = vpop.permute.xlu0 %4622  ;;  %v10271_v3 = vpop.f32.mrf.mxu2 }
 0x638   :  { %v3381_v21 = vpop.f32.mrf.mxu3 }
 0x639   :  { %v3382_v5 = vadd.f32 %v3381_v21, %v11715_v1  ;;  %v10269_v21 = vpop.f32.mrf.mxu1 }
 0x63b   :  { %vm3502_vm9 = vcmp.ge.f32.partialorder %v3382_v5, 0.0  ;;  %v3630_v28 = vmul.f32 0.1, %v3382_v5 }
 0x63d   :  { %4406 = vmatmul.bf16.gmra.mxu3 %v3806_v44  ;;  %v10214_v29 = vsel %vm3502_vm9, %v3382_v5, %v3630_v28  ;;  %v10277_v28 = vpop.f32.mrf.mxu0 }
 0x63e   :  { %v3834_v18 = vpack.c.bf16 %v10214_v29, %v10212_v4  ;;  %v4138_v4 = vadd.f32 %v9944_v0, %v10277_v28 }
 0x640   :  { %v3384_v53 = vpop.f32.mrf.mxu3 }
 0x641   :  { %v3385_v7 = vadd.f32 %v3384_v53, %v11716_v33  ;;  %v4625_v58 = vpop.permute.xlu0 %4624 }
 0x643   :  { %v3634_v42 = vmul.f32 0.1, %v3385_v7  ;;  %vm3506_vm10 = vcmp.ge.f32.partialorder %v3385_v7, 0.0 }
 0x645   :  { %v10223_v54 = vsel %vm3506_vm10, %v3385_v7, %v3634_v42  ;;  %v4565_v7 = vld [vmem:[%s11136_s1 + $0x38] sm:$0xff]  ;;  %v10290_v42 = vpop.f32.mrf.mxu1 }
 0x648   :  { %v3386_v39 = vpop.f32.mrf.mxu3 }
 0x649   :  { %v3387_v59 = vadd.f32 %v3386_v39, %v11717_v35  ;;  %v10292_v35 = vpop.f32.mrf.mxu2 }
 0x64b   :  { %vm3510_vm11 = vcmp.ge.f32.partialorder %v3387_v59, 0.0  ;;  %v3638_v43 = vmul.f32 0.1, %v3387_v59 }
 0x64d   :  { %4411 = vmatmul.bf16.gmra.mxu3 %v3810_v55  ;;  %v10225_v2 = vsel %vm3510_vm11, %v3387_v59, %v3638_v43 }
 0x64e   :  { %v3838_v44 = vpack.c.bf16 %v10225_v2, %v10223_v54  ;;  %v7518_v54 = vld [vmem:[%s11141_s6 + $0x38] sm:$0xff] }
 0x64f   :  { %5203 = vmatpush.bf16.msra.mxu0 %v7518_v54 }
 0x650   :  { %v3389_v38 = vpop.f32.mrf.mxu3 }
 0x651   :  { %v3390_v15 = vadd.f32 %v3389_v38, %v9917_v26  ;;  %v10299_v38 = vpop.f32.mrf.mxu0 }
 0x652   :  { %v4141_v28 = vadd.f32 %v9944_v0, %v10299_v38  ;;  %v4572_v38 = vld [vmem:[%s11136_s1 + $0x70] sm:$0xff] }
 0x653   :  { %v3642_v61 = vmul.f32 0.1, %v3390_v15  ;;  %vm3514_vm12 = vcmp.ge.f32.partialorder %v3390_v15, 0.0 }
 0x655   :  { %v10234_v51 = vsel %vm3514_vm12, %v3390_v15, %v3642_v61 }
 0x658   :  { %v3391_v19 = vpop.f32.mrf.mxu3 }
 0x659   :  { %v3392_v24 = vadd.f32 %v3391_v19, %v9921_v37 }
 0x65b   :  { %vm3518_vm13 = vcmp.ge.f32.partialorder %v3392_v24, 0.0  ;;  %v3646_v22 = vmul.f32 0.1, %v3392_v24 }
 0x65d   :  { %4416 = vmatmul.bf16.gmra.mxu3 %v3814_v6  ;;  %v10236_v13 = vsel %vm3518_vm13, %v3392_v24, %v3646_v22 }
 0x65e   :  { %v3842_v55 = vpack.c.bf16 %v10236_v13, %v10234_v51  ;;  %v7523_v51 = vld [vmem:[%s11141_s6 + $0x60] sm:$0xff]  ;;  %v7514_v13 = vld [vmem:[%s11141_s6 + $0x18] sm:$0xff] }
 0x660   :  { %v3394_v12 = vpop.f32.mrf.mxu3  ;;  %v4627_v43 = vpop.permute.xlu1 %4626 }
 0x661   :  { %v3395_v26 = vadd.f32 %v3394_v12, %v9941_v20  ;;  %v10314_v12 = vpop.f32.mrf.mxu1 }
 0x663   :  { %v3650_v62 = vmul.f32 0.1, %v3395_v26  ;;  %vm3522_vm14 = vcmp.ge.f32.partialorder %v3395_v26, 0.0 }
 0x665   :  { %v10245_v57 = vsel %vm3522_vm14, %v3395_v26, %v3650_v62  ;;  %v10316_v26 = vpop.f32.mrf.mxu2  ;;  %v10326_v62 = vpop.f32.mrf.mxu0 }
 0x668   :  { %v3396_v63 = vpop.f32.mrf.mxu3  ;;  %v4629_v56 = vpop.permute.xlu1 %4628 }
 0x669   :  { %v3397_v37 = vadd.f32 %v3396_v63, %v9947_v27 }
 0x66b   :  { %vm3526_vm15 = vcmp.ge.f32.partialorder %v3397_v37, 0.0  ;;  %v3654_v47 = vmul.f32 0.1, %v3397_v37 }
 0x66d   :  { %4421 = vmatmul.bf16.gmra.mxu3 %v3818_v40  ;;  %v10247_v10 = vsel %vm3526_vm15, %v3397_v37, %v3654_v47  ;;  %v4567_v47 = vld [vmem:[%s11136_s1 + $0x48] sm:$0xff] }
 0x66e   :  { %v3846_v6 = vpack.c.bf16 %v10247_v10, %v10245_v57  ;;  %v7519_v10 = vld [vmem:[%s11141_s6 + $0x40] sm:$0xff] }
 0x670   :  { %v4382_v14 = vpop.f32.mrf.mxu3 }
 0x671   :  { %v10252_v20 = vadd.f32 %v4382_v14, %v9970_v48 }
 0x673   :  { %v4462_v27 = vmul.f32 0.5, %v10252_v20  ;;  %6258 = vst [vmem:[%s11143_s8 + $0x8] sm:$0xff] %v10252_v20 }
 0x675   :  { %v4494_v16 = vmul.f32 1.442695, %v4462_v27 }
 0x677   :  { %7568 = vpow2.f32 %v4494_v16 }
 0x678   :  { %v4384_v40 = vpop.f32.mrf.mxu3 }
 0x679   :  { %v10262_v8 = vadd.f32 %v4384_v40, %v9974_v11  ;;  %v10336_v40 = vpop.f32.mrf.mxu1 }
 0x67b   :  { %v4463_v17 = vmul.f32 0.5, %v10262_v8  ;;  %6260 = vst [vmem:[%s11143_s8 + $0x18] sm:$0xff] %v10262_v8 }
 0x67d   :  { %v7569_v48 = vpop.eup %7568  ;;  %v4496_v1 = vmul.f32 1.442695, %v4463_v17  ;;  %4426 = vmatmul.bf16.gmra.mxu3 %v3822_v9 }
 0x67e   :  { %v4718_v11 = vmul.f32 %v7569_v48, %v4623_v45  ;;  %v10338_v45 = vpop.f32.mrf.mxu2 }
 0x67f   :  { %7570 = vpow2.f32 %v4496_v1 }
 0x680   :  { %v4387_v5 = vpop.f32.mrf.mxu3  ;;  %4782 = vrot.lane.b32.xlu0 %v4718_v11, %s7861_s12 }
 0x681   :  { %v10280_v53 = vadd.f32 %v4387_v5, %v9994_v60  ;;  %v10351_v5 = vpop.f32.mrf.mxu0 }
 0x683   :  { %v4464_v33 = vmul.f32 0.5, %v10280_v53  ;;  %6262 = vst [vmem:[%s11143_s8 + $0x28] sm:$0xff] %v10280_v53 }
 0x685   :  { %v7571_v34 = vpop.eup %7570  ;;  %v4498_v9 = vmul.f32 1.442695, %v4464_v33 }
 0x686   :  { %v4719_v39 = vmul.f32 %v7571_v34, %v4625_v58 }
 0x687   :  { %7572 = vpow2.f32 %v4498_v9  ;;  %v10365_v9 = vpop.f32.mrf.mxu2 }
 0x688   :  { %v4389_v60 = vpop.f32.mrf.mxu3  ;;  %4784 = vrot.lane.b32.xlu1 %v4719_v39, %s7861_s12  ;;  %4636 = vrot.lane.b32.xlu0 %v4565_v7, %s7860_s19  ;;  %v4569_v39 = vld [vmem:[%s11136_s1 + $0x58] sm:$0xff] }
 0x689   :  { %v10297_v59 = vadd.f32 %v4389_v60, %v9998_v36  ;;  %v4566_v36 = vld [vmem:[%s11136_s1 + $0x40] sm:$0xff] }
 0x68b   :  { %v4465_v15 = vmul.f32 0.5, %v10297_v59  ;;  %6264 = vst [vmem:[%s11143_s8 + $0x38] sm:$0xff] %v10297_v59 }
 0x68d   :  { %v7573_v19 = vpop.eup %7572  ;;  %v4500_v61 = vmul.f32 1.442695, %v4465_v15  ;;  %4431 = vmatmul.bf16.gmra.mxu3 %v3826_v30  ;;  %v10374_v15 = vpop.f32.mrf.mxu0 }
 0x68e   :  { %v4720_v24 = vmul.f32 %v7573_v19, %v4627_v43  ;;  %v4136_v43 = vadd.f32 %v9944_v0, %v10259_v25  ;;  %v4570_v25 = vld [vmem:[%s11136_s1 + $0x60] sm:$0xff] }
 0x68f   :  { %7574 = vpow2.f32 %v4500_v61 }
 0x690   :  { %v4392_v22 = vpop.f32.mrf.mxu3  ;;  %4786 = vrot.lane.b32.xlu1 %v4720_v24, %s7861_s12  ;;  %4638 = vrot.lane.b32.xlu0 %v4566_v36, %s7860_s19  ;;  %v4225_v24 = vadd.f32 %v10269_v21, %v4136_v43  ;;  %v4227_v21 = vadd.f32 %v10290_v42, %v4138_v4  ;;  %v4230_v42 = vadd.f32 %v10314_v12, %v4141_v28  ;;  %v7515_v43 = vld [vmem:[%s11141_s6 + $0x20] sm:$0xff] }
 0x691   :  { %v10319_v63 = vadd.f32 %v4392_v22, %v10021_v41  ;;  %v4631_v41 = vpop.permute.xlu2 %4630  ;;  %v7511_v28 = vld [vmem:[%s11141_s6] sm:$0xff] }
 0x693   :  { %v4466_v23 = vmul.f32 0.5, %v10319_v63  ;;  %6266 = vst [vmem:[%s11143_s8 + $0x48] sm:$0xff] %v10319_v63 }
 0x695   :  { %v7575_v30 = vpop.eup %7574  ;;  %v4502_v37 = vmul.f32 1.442695, %v4466_v23 }
 0x696   :  { %v4721_v14 = vmul.f32 %v7575_v30, %v4629_v56  ;;  %v10393_v56 = vpop.f32.mrf.mxu2 }
 0x697   :  { %7576 = vpow2.f32 %v4502_v37  ;;  %v4316_v37 = vadd.f32 %v10292_v35, %v4227_v21 }
 0x698   :  { %v4394_v27 = vpop.f32.mrf.mxu3  ;;  %4788 = vrot.lane.b32.xlu2 %v4721_v14, %s7861_s12  ;;  %4640 = vrot.lane.b32.xlu1 %v4567_v47, %s7860_s19 }
 0x699   :  { %v10334_v16 = vadd.f32 %v4394_v27, %v10025_v46  ;;  %v4568_v46 = vld [vmem:[%s11136_s1 + $0x50] sm:$0xff]  ;;  %v4633_v34 = vpop.permute.xlu2 %4632 }
 0x69b   :  { %v4467_v17 = vmul.f32 0.5, %v10334_v16  ;;  %6268 = vst [vmem:[%s11143_s8 + $0x58] sm:$0xff] %v10334_v16 }
 0x69d   :  { %v7577_v48 = vpop.eup %7576  ;;  %v4504_v1 = vmul.f32 1.442695, %v4467_v17  ;;  %4436 = vmatmul.bf16.gmra.mxu3 %v3830_v52  ;;  %v10363_v52 = vpop.f32.mrf.mxu1  ;;  %v4319_v17 = vadd.f32 %v10316_v26, %v4230_v42 }
 0x69e   :  { %v4722_v11 = vmul.f32 %v7577_v48, %v4631_v41  ;;  %v10417_v41 = vpop.f32.mrf.mxu2 }
 0x69f   :  { %7578 = vpow2.f32 %v4504_v1  ;;  %v4143_v1 = vadd.f32 %v9944_v0, %v10326_v62 }
 0x6a0   :  { %v4397_v33 = vpop.f32.mrf.mxu3  ;;  %4790 = vrot.lane.b32.xlu2 %v4722_v11, %s7861_s12  ;;  %4642 = vrot.lane.b32.xlu1 %v4568_v46, %s7860_s19 }
 0x6a1   :  { %v10356_v58 = vadd.f32 %v4397_v33, %v10045_v49  ;;  %v4635_v61 = vpop.permute.xlu2 %4634  ;;  %v4232_v2 = vadd.f32 %v10336_v40, %v4143_v1  ;;  %v7517_v33 = vld [vmem:[%s11141_s6 + $0x30] sm:$0xff] }
 0x6a2   :  { %5204 = vmatpush.bf16.msra.mxu0 %v7517_v33  ;;  %v7525_v40 = vld [vmem:[%s11141_s6 + $0x70] sm:$0xff] }
 0x6a3   :  { %v4468_v32 = vmul.f32 0.5, %v10356_v58  ;;  %6270 = vst [vmem:[%s11143_s8 + $0x68] sm:$0xff] %v10356_v58  ;;  %v4321_v26 = vadd.f32 %v10338_v45, %v4232_v2  ;;  %v7516_v45 = vld [vmem:[%s11141_s6 + $0x28] sm:$0xff] }
 0x6a5   :  { %v7579_v50 = vpop.eup %7578  ;;  %v4506_v7 = vmul.f32 1.442695, %v4468_v32  ;;  %v10391_v23 = vpop.f32.mrf.mxu1  ;;  %v4146_v32 = vadd.f32 %v9944_v0, %v10351_v5 }
 0x6a6   :  { %v4723_v49 = vmul.f32 %v7579_v50, %v4633_v34  ;;  %v10442_v11 = vpop.f32.mrf.mxu2  ;;  %5205 = vmatpush.bf16.msra.mxu0 %v7516_v45 }
 0x6a7   :  { %7580 = vpow2.f32 %v4506_v7  ;;  %v4235_v7 = vadd.f32 %v10363_v52, %v4146_v32  ;;  %v4148_v52 = vadd.f32 %v9944_v0, %v10374_v15 }
 0x6a8   :  { %v4399_v60 = vpop.f32.mrf.mxu3  ;;  %4644 = vrot.lane.b32.xlu2 %v4569_v39, %s7860_s19  ;;  %4792 = vrot.lane.b32.xlu0 %v4723_v49, %s7861_s12  ;;  %v7524_v49 = vld [vmem:[%s11141_s6 + $0x68] sm:$0xff] }
 0x6a9   :  { %v10377_v19 = vadd.f32 %v4399_v60, %v10049_v31  ;;  %v4314_v31 = vadd.f32 %v10271_v3, %v4225_v24  ;;  %v4571_v3 = vld [vmem:[%s11136_s1 + $0x68] sm:$0xff]  ;;  %v4324_v60 = vadd.f32 %v10365_v9, %v4235_v7  ;;  %v7522_v9 = vld [vmem:[%s11141_s6 + $0x58] sm:$0xff] }
 0x6aa   :  { %5206 = vmatpush.bf16.msra.mxu0 %v7515_v43 }
 0x6ab   :  { %6272 = vst [vmem:[%s11143_s8 + $0x78] sm:$0xff] %v10377_v19  ;;  %v4469_v33 = vmul.f32 0.5, %v10377_v19 }
 0x6ad   :  { %v7581_v36 = vpop.eup %7580  ;;  %4441 = vmatmul.bf16.gmra.mxu3 %v3834_v18  ;;  %v10401_v18 = vpop.f32.mrf.mxu0 }
 0x6ae   :  { %v4724_v22 = vmul.f32 %v7581_v36, %v4635_v61  ;;  %v10415_v14 = vpop.f32.mrf.mxu1  ;;  %v4333_v39 = vpop.f32.mrf.mxu2  ;;  %5207 = vmatpush.bf16.msra.mxu0 %v7514_v13  ;;  %v4151_v4 = vadd.f32 %v9944_v0, %v10401_v18 }
 0x6b0   :  { %v4402_v30 = vpop.f32.mrf.mxu3  ;;  %4646 = vrot.lane.b32.xlu2 %v4570_v25, %s7860_s19  ;;  %4794 = vrot.lane.b32.xlu0 %v4724_v22, %s7861_s12  ;;  %v4240_v18 = vadd.f32 %v10415_v14, %v4151_v4 }
 0x6b1   :  { %v10399_v29 = vadd.f32 %v4402_v30, %v4314_v31  ;;  %v7513_v31 = vld [vmem:[%s11141_s6 + $0x10] sm:$0xff] }
 0x6b2   :  { %5208 = vmatpush.bf16.msra.mxu0 %v7513_v31 }
 0x6b3   :  { %6274 = vst [vmem:[%s11143_s8 + $0x88] sm:$0xff] %v10399_v29 }
 0x6b5   :  { %v10426_v35 = vpop.f32.mrf.mxu0 }
 0x6b6   :  { %v10440_v12 = vpop.f32.mrf.mxu1  ;;  %v4335_v22 = vpop.f32.mrf.mxu2  ;;  %v4153_v14 = vadd.f32 %v9944_v0, %v10426_v35  ;;  %v7775_v35 = vld [vmem:[%s11135_s0] sm:$0xff] }
 0x6b8   :  { %v4404_v47 = vpop.f32.mrf.mxu3  ;;  %4648 = vrot.lane.b32.xlu0 %v4571_v3, %s7860_s19 }
 0x6b9   :  { %v10419_v27 = vadd.f32 %v4404_v47, %v4316_v37  ;;  %v7520_v37 = vld [vmem:[%s11141_s6 + $0x48] sm:$0xff]  ;;  %v4329_v47 = vadd.f32 %v10417_v41, %v4240_v18 }
 0x6bb   :  { %6276 = vst [vmem:[%s11143_s8 + $0x98] sm:$0xff] %v10419_v27 }
 0x6bd   :  { %4446 = vmatmul.bf16.gmra.mxu3 %v3838_v44  ;;  %v7526_v44 = vld [vmem:[%s11141_s6 + $0x78] sm:$0xff]  ;;  %v10456_v62 = vpop.f32.mrf.mxu0 }
 0x6be   :  { %5292 = vmatpush.bf16.msra.mxu1 %v7526_v44  ;;  %v4244_v5 = vpop.f32.mrf.mxu1  ;;  %v4156_v54 = vadd.f32 %v9944_v0, %v10456_v62  ;;  %v4508_v62 = vmul.f32 1.442695, %v4469_v33 }
 0x6c0   :  { %v4407_v48 = vpop.f32.mrf.mxu3  ;;  %4650 = vrot.lane.b32.xlu0 %v4572_v38, %s7860_s19  ;;  %7582 = vpow2.f32 %v4508_v62 }
 0x6c1   :  { %v10438_v46 = vadd.f32 %v4407_v48, %v4319_v17  ;;  %v4338_v17 = vpop.f32.mrf.mxu2 }
 0x6c2   :  { %5293 = vmatpush.bf16.msra.mxu1 %v7525_v40  ;;  %v10564_v40 = vld [vmem:[#allocation2 + $0x8] ss:$0 sm:$0xff] }
 0x6c3   :  { %6278 = vst [vmem:[%s11143_s8 + $0xa8] sm:$0xff] %v10438_v46 }
 0x6c5   :  { %v4157_v36 = vpop.f32.mrf.mxu0 }
 0x6c6   :  { %5294 = vmatpush.bf16.msra.mxu1 %v7524_v49  ;;  %v4246_v25 = vpop.f32.mrf.mxu1  ;;  %v4158_v0 = vadd.f32 %v10564_v40, %v4157_v36 }
 0x6c8   :  { %v4409_v34 = vpop.f32.mrf.mxu3 }
 0x6c9   :  { %v10463_v50 = vadd.f32 %v4409_v34, %v4321_v26  ;;  %v10555_v26 = vpop.f32.mrf.mxu2 }
 0x6ca   :  { %5295 = vmatpush.bf16.msra.mxu1 %v7523_v51 }
 0x6cb   :  { %6280 = vst [vmem:[%s11143_s8 + $0xb8] sm:$0xff] %v10463_v50 }
 0x6cd   :  { %4451 = vmatmul.bf16.gmra.mxu3 %v3842_v55  ;;  %v4237_v55 = vadd.f32 %v10391_v23, %v4148_v52  ;;  %v7521_v23 = vld [vmem:[%s11141_s6 + $0x50] sm:$0xff]  ;;  %v4160_v3 = vpop.f32.mrf.mxu0  ;;  %v7777_v52 = vld [vmem:[%s11135_s0 + $0x8] sm:$0xff] }
 0x6ce   :  { %5296 = vmatpush.bf16.msra.mxu1 %v7522_v9  ;;  %v4249_v38 = vpop.f32.mrf.mxu1  ;;  %v4161_v9 = vadd.f32 %v10564_v40, %v4160_v3 }
 0x6cf   :  { %v4326_v15 = vadd.f32 %v10393_v56, %v4237_v55  ;;  %v7512_v56 = vld [vmem:[%s11141_s6 + $0x8] sm:$0xff] }
 0x6d0   :  { %v4412_v61 = vpop.f32.mrf.mxu3  ;;  %5209 = vmatpush.bf16.msra.mxu0 %v7512_v56  ;;  %v4471_v56 = vmul.f32 0.5, %v10419_v27 }
 0x6d1   :  { %v10488_v24 = vadd.f32 %v4412_v61, %v4324_v60  ;;  %v10578_v43 = vpop.f32.mrf.mxu2  ;;  %v4470_v61 = vmul.f32 0.5, %v10399_v29 }
 0x6d2   :  { %5297 = vmatpush.bf16.msra.mxu1 %v7521_v23  ;;  %v7583_v23 = vpop.eup %7582 }
 0x6d3   :  { %6282 = vst [vmem:[%s11143_s8 + $0xc8] sm:$0xff] %v10488_v24  ;;  %v4474_v3 = vmul.f32 0.5, %v10488_v24 }
 0x6d4   :  { %5210 = vmatpush.bf16.msra.mxu0 %v7511_v28 }
 0x6d5   :  { %v4162_v41 = vpop.f32.mrf.mxu0 }
 0x6d6   :  { %5298 = vmatpush.bf16.msra.mxu1 %v7520_v37  ;;  %v10553_v44 = vpop.f32.mrf.mxu1 }
 0x6d8   :  { %v4414_v30 = vpop.f32.mrf.mxu3 }
 0x6d9   :  { %v10510_v21 = vadd.f32 %v4414_v30, %v4326_v15 }
 0x6da   :  { %5299 = vmatpush.bf16.msra.mxu1 %v7519_v10  ;;  %v10602_v10 = vpop.f32.mrf.mxu2 }
 0x6db   :  { %6284 = vst [vmem:[%s11143_s8 + $0xd8] sm:$0xff] %v10510_v21 }
 0x6dd   :  { %4456 = vmatmul.bf16.gmra.mxu3 %v3846_v6  ;;  %v4242_v6 = vadd.f32 %v10440_v12, %v4153_v14  ;;  %5300 = vmatmul.bf16.vlgmr.msra.gmra.mxu1 %v7775_v35  ;;  %v4245_v12 = vadd.f32 %v4244_v5, %v4156_v54  ;;  %v4473_v5 = vmul.f32 0.5, %v10463_v50  ;;  %v4163_v54 = vadd.f32 %v10564_v40, %v4162_v41 }
 0x6de   :  { %v10576_v60 = vpop.f32.mrf.mxu1  ;;  %v4472_v41 = vmul.f32 0.5, %v10438_v46 }
 0x6df   :  { %v4331_v48 = vadd.f32 %v10442_v11, %v4242_v6  ;;  %v4334_v34 = vadd.f32 %v4333_v39, %v4245_v12  ;;  %v10562_v11 = vpop.f32.mrf.mxu0  ;;  %v4247_v39 = vadd.f32 %v4246_v25, %v4158_v0  ;;  %v4516_v13 = vmul.f32 1.442695, %v4473_v5 }
 0x6e0   :  { %v4417_v42 = vpop.f32.mrf.mxu3  ;;  %v4510_v25 = vmul.f32 1.442695, %v4470_v61  ;;  %v4512_v6 = vmul.f32 1.442695, %v4471_v56 }
 0x6e1   :  { %v10535_v57 = vadd.f32 %v4417_v42, %v4329_v47  ;;  %v4336_v36 = vadd.f32 %v4335_v22, %v4247_v39  ;;  %7584 = vpow2.f32 %v4516_v13  ;;  %v4250_v47 = vadd.f32 %v4249_v38, %v4161_v9 }
 0x6e2   :  { %7586 = vpow2.f32 %v4510_v25  ;;  %v4252_v39 = vadd.f32 %v10553_v44, %v4163_v54  ;;  %v4514_v13 = vmul.f32 1.442695, %v4472_v41  ;;  %v4348_v25 = vpop.f32.mrf.mxu2 }
 0x6e3   :  { %6286 = vst [vmem:[%s11143_s8 + $0xe8] sm:$0xff] %v10535_v57  ;;  %v4339_v42 = vadd.f32 %v4338_v17, %v4250_v47  ;;  %7588 = vpow2.f32 %v4512_v6 }
 0x6e6   :  { %v10600_v14 = vpop.f32.mrf.mxu1 }
 0x6e7   :  { %v10586_v15 = vpop.f32.mrf.mxu0  ;;  %v7585_v38 = vpop.eup %7584 }
 0x6e8   :  { %v4419_v1 = vpop.f32.mrf.mxu3  ;;  %v7587_v0 = vpop.eup %7586  ;;  %v4168_v6 = vadd.f32 %v10564_v40, %v10586_v15  ;;  %v4574_v15 = vld [vmem:[%s11136_s1 + $0x80] sm:$0xff] }
 0x6e9   :  { %v10551_v2 = vadd.f32 %v4419_v1, %v4331_v48  ;;  %v4518_v1 = vmul.f32 1.442695, %v4474_v3  ;;  %v7589_v9 = vpop.eup %7588 }
 0x6eb   :  { %6288 = vst [vmem:[%s11143_s8 + $0xf8] sm:$0xff] %v10551_v2  ;;  %7590 = vpow2.f32 %v4518_v1 }
 0x6ec   :  { %7592 = vpow2.f32 %v4514_v13 }
 0x6ed   :  { %5305 = vmatmul.bf16.gmra.mxu1 %v7777_v52  ;;  %v7778_v52 = vld [vmem:[%s11135_s0 + $0x10] sm:$0xff] }
 0x6ee   :  { %v4259_v44 = vpop.f32.mrf.mxu1 }
 0x6f0   :  { %v4422_v32 = vpop.f32.mrf.mxu3 }
 0x6f1   :  { %v10567_v45 = vadd.f32 %v4422_v32, %v4334_v34  ;;  %v7591_v56 = vpop.eup %7590 }
 0x6f2   :  { %v10569_v7 = vpop.permute.xlu2 %4788  ;;  %v4783_v49 = vpop.permute.xlu0 %4782 }
 0x6f3   :  { %6290 = vst [vmem:[%s11143_s8 + $0x108] sm:$0xff] %v10567_v45  ;;  %v4878_v51 = vadd.f32 %v4783_v49, %v10252_v20  ;;  %v4170_v49 = vpop.f32.mrf.mxu0  ;;  %v7593_v1 = vpop.eup %7592 }
 0x6f5   :  { %v4910_v18 = vpack.c.bf16 %v4878_v51, %v4878_v51  ;;  %v4881_v51 = vadd.f32 %v10569_v7, %v10297_v59 }
 0x6f6   :  { %v4261_v54 = vpop.f32.mrf.mxu1 }
 0x6f7   :  { %v4974_v35 = vunpack.c.l.b16 %v4910_v18 }
 0x6f8   :  { %v4424_v55 = vpop.f32.mrf.mxu3 }
 0x6f9   :  { %v10588_v31 = vadd.f32 %v4424_v55, %v4336_v36  ;;  %v4341_v36 = vadd.f32 %v10555_v26, %v4252_v39  ;;  %v4575_v39 = vld [vmem:[%s11136_s1 + $0x88] sm:$0xff] }
 0x6fa   :  { %v10590_v30 = vpop.permute.xlu2 %4790  ;;  %v4785_v4 = vpop.permute.xlu1 %4784 }
 0x6fb   :  { %6292 = vst [vmem:[%s11143_s8 + $0x118] sm:$0xff] %v10588_v31  ;;  %v4879_v20 = vadd.f32 %v4785_v4, %v10262_v8  ;;  %v4637_v22 = vpop.permute.xlu0 %4636 }
 0x6fc   :  { %v4725_v37 = vmul.f32 %v7583_v23, %v4637_v22  ;;  %v4913_v22 = vpack.c.bf16 %v4881_v51, %v4881_v51 }
 0x6fd   :  { %v4911_v28 = vpack.c.bf16 %v4879_v20, %v4879_v20  ;;  %5310 = vmatmul.bf16.gmra.mxu1 %v7778_v52 }
 0x6fe   :  { %4796 = vrot.lane.b32.xlu1 %v4725_v37, %s7861_s12  ;;  %v4172_v37 = vpop.f32.mrf.mxu0 }
 0x6ff   :  { %v4975_v48 = vunpack.c.l.b16 %v4911_v28  ;;  %v4977_v28 = vunpack.c.l.b16 %v4913_v22 }
 0x700   :  { %v4427_v8 = vpop.f32.mrf.mxu3 }
 0x701   :  { %v5006_v12 = vpack.c.b16 %v4975_v48, %v4974_v35  ;;  %v10605_v33 = vadd.f32 %v4427_v8, %v4339_v42  ;;  %v4577_v8 = vld [vmem:[%s11136_s1 + $0x98] sm:$0xff] }
 0x702   :  { %v4645_v34 = vpop.permute.xlu2 %4644  ;;  %v4787_v32 = vpop.permute.xlu1 %4786 }
 0x703   :  { %6294 = vst [vmem:[%s11143_s8 + $0x128] sm:$0xff] %v10605_v33  ;;  %v4729_v17 = vmul.f32 %v7585_v38, %v4645_v34  ;;  %v4639_v62 = vpop.permute.xlu0 %4638  ;;  %7223 = vmatmul.msk.bf16.vlgmr.msra.gmra.mxu0 %vm5022_vm0, %v5006_v12  ;;  %v4880_v61 = vadd.f32 %v4787_v32, %v10280_v53  ;;  %v4166_v53 = vadd.f32 %v10564_v40, %v10562_v11  ;;  %v4573_v11 = vld [vmem:[%s11136_s1 + $0x78] sm:$0xff]  ;;  %v4350_v12 = vpop.f32.mrf.mxu2 }
 0x704   :  { %v4726_v5 = vmul.f32 %v7587_v0, %v4639_v62  ;;  %v4257_v38 = vadd.f32 %v10600_v14, %v4168_v6  ;;  %v7779_v34 = vld [vmem:[%s11135_s0 + $0x18] sm:$0xff]  ;;  %v4882_v0 = vadd.f32 %v10590_v30, %v10319_v63  ;;  %v4171_v14 = vadd.f32 %v10564_v40, %v4170_v49  ;;  %v4264_v49 = vpop.f32.mrf.mxu1 }
 0x705   :  { %4804 = vrot.lane.b32.xlu0 %v4729_v17, %s7861_s12  ;;  %v4912_v4 = vpack.c.bf16 %v4880_v61, %v4880_v61  ;;  %v4255_v7 = vadd.f32 %v10576_v60, %v4166_v53  ;;  %v4578_v61 = vld [vmem:[%s11136_s1 + $0xa0] sm:$0xff]  ;;  %v4475_v30 = vmul.f32 0.5, %v10510_v21 }
 0x706   :  { %4798 = vrot.lane.b32.xlu1 %v4726_v5, %s7861_s12  ;;  %v4346_v32 = vadd.f32 %v10602_v10, %v4257_v38  ;;  %v4175_v17 = vpop.f32.mrf.mxu0  ;;  %v4914_v52 = vpack.c.bf16 %v4882_v0, %v4882_v0  ;;  %v4260_v10 = vadd.f32 %v4259_v44, %v4171_v14  ;;  %v4576_v44 = vld [vmem:[%s11136_s1 + $0x90] sm:$0xff] }
 0x707   :  { %v4976_v3 = vunpack.c.l.b16 %v4912_v4  ;;  %v4344_v47 = vadd.f32 %v10578_v43, %v4255_v7  ;;  %v4520_v53 = vmul.f32 1.442695, %v4475_v30  ;;  %v4579_v30 = vld [vmem:[%s11136_s1 + $0xa8] sm:$0xff] }
 0x708   :  { %v4429_v55 = vpop.f32.mrf.mxu3  ;;  %v4349_v13 = vadd.f32 %v4348_v25, %v4260_v10  ;;  %v4476_v25 = vmul.f32 0.5, %v10535_v57 }
 0x709   :  { %v10625_v23 = vadd.f32 %v4429_v55, %v4341_v36  ;;  %v5007_v35 = vpack.c.b16 %v4977_v28, %v4976_v3  ;;  %v4978_v55 = vunpack.c.l.b16 %v4914_v52  ;;  %7594 = vpow2.f32 %v4520_v53 }
 0x70a   :  { %v4647_v18 = vpop.permute.xlu2 %4646  ;;  %v4641_v20 = vpop.permute.xlu1 %4640  ;;  %v4176_v28 = vadd.f32 %v10564_v40, %v4175_v17 }
 0x70b   :  { %6296 = vst [vmem:[%s11143_s8 + $0x138] sm:$0xff] %v10625_v23  ;;  %v4730_v59 = vmul.f32 %v7591_v56, %v4647_v18  ;;  %v4727_v26 = vmul.f32 %v7589_v9, %v4641_v20  ;;  %v4353_v51 = vpop.f32.mrf.mxu2  ;;  %v4173_v56 = vadd.f32 %v10564_v40, %v4172_v37  ;;  %v4522_v37 = vmul.f32 1.442695, %v4476_v25 }
 0x70c   :  { %v4266_v7 = vpop.f32.mrf.mxu1 }
 0x70d   :  { %4800 = vrot.lane.b32.xlu2 %v4727_v26, %s7861_s12  ;;  %4806 = vrot.lane.b32.xlu0 %v4730_v59, %s7861_s12  ;;  %v4262_v59 = vadd.f32 %v4261_v54, %v4173_v56  ;;  %v7780_v26 = vld [vmem:[%s11135_s0 + $0x20] sm:$0xff]  ;;  %7596 = vpow2.f32 %v4522_v37 }
 0x70e   :  { %4652 = vrot.lane.b32.xlu1 %v4573_v11, %s7860_s19  ;;  %5315 = vmatmul.bf16.gmra.mxu1 %v7779_v34 }
 0x70f   :  { %v4351_v11 = vadd.f32 %v4350_v12, %v4262_v59  ;;  %v7595_v6 = vpop.eup %7594 }
 0x710   :  { %v4432_v42 = vpop.f32.mrf.mxu3 }
 0x711   :  { %v10641_v48 = vadd.f32 %v4432_v42, %v4344_v47 }
 0x712   :  { %v4643_v60 = vpop.permute.xlu1 %4642 }
 0x713   :  { %6298 = vst [vmem:[%s11143_s8 + $0x148] sm:$0xff] %v10641_v48  ;;  %v4728_v43 = vmul.f32 %v7593_v1, %v4643_v60  ;;  %7224 = vmatmul.msk.bf16.gmra.mxu0 %vm5022_vm0, %v5007_v35  ;;  %v4355_v3 = vpop.f32.mrf.mxu2  ;;  %v7597_v34 = vpop.eup %7596 }
 0x714   :  { %v4269_v12 = vpop.f32.mrf.mxu1 }
 0x715   :  { %4802 = vrot.lane.b32.xlu2 %v4728_v43, %s7861_s12  ;;  %4660 = vrot.lane.b32.xlu0 %v4577_v8, %s7860_s19  ;;  %v4265_v8 = vadd.f32 %v4264_v49, %v4176_v28 }
 0x716   :  { %4654 = vrot.lane.b32.xlu1 %v4574_v15, %s7860_s19 }
 0x717   :  { %v4354_v54 = vadd.f32 %v4353_v51, %v4265_v8 }
 0x718   :  { %v4434_v62 = vpop.f32.mrf.mxu3 }
 0x719   :  { %v10665_v41 = vadd.f32 %v4434_v62, %v4346_v32 }
 0x71a   :  { %v4793_v5 = vpop.permute.xlu0 %4792 }
 0x71b   :  { %6300 = vst [vmem:[%s11143_s8 + $0x158] sm:$0xff] %v10665_v41  ;;  %v4883_v63 = vadd.f32 %v4793_v5, %v10334_v16  ;;  %v4177_v16 = vpop.f32.mrf.mxu0  ;;  %v4358_v32 = vpop.f32.mrf.mxu2  ;;  %v7781_v5 = vld [vmem:[%s11135_s0 + $0x28] sm:$0xff] }
 0x71c   :  { %v4178_v15 = vadd.f32 %v10564_v40, %v4177_v16  ;;  %v4271_v10 = vpop.f32.mrf.mxu1 }
 0x71d   :  { %v4915_v36 = vpack.c.bf16 %v4883_v63, %v4883_v63  ;;  %4656 = vrot.lane.b32.xlu2 %v4575_v39, %s7860_s19  ;;  %4662 = vrot.lane.b32.xlu0 %v4578_v61, %s7860_s19 }
 0x71e   :  { %5320 = vmatmul.bf16.gmra.mxu1 %v7780_v26  ;;  %v4267_v62 = vadd.f32 %v4266_v7, %v4178_v15  ;;  %v7783_v15 = vld [vmem:[%s11135_s0 + $0x38] sm:$0xff] }
 0x71f   :  { %v4979_v9 = vunpack.c.l.b16 %v4915_v36 }
 0x720   :  { %v4437_v4 = vpop.f32.mrf.mxu3  ;;  %v4356_v39 = vadd.f32 %v4355_v3, %v4267_v62 }
 0x721   :  { %v5008_v18 = vpack.c.b16 %v4979_v9, %v4978_v55  ;;  %v10682_v20 = vadd.f32 %v4437_v4, %v4349_v13  ;;  %v4580_v4 = vld [vmem:[%s11136_s1 + $0xb0] sm:$0xff] }
 0x722   :  { %v10684_v22 = vpop.permute.xlu0 %4794 }
 0x723   :  { %6302 = vst [vmem:[%s11143_s8 + $0x168] sm:$0xff] %v10682_v20  ;;  %7225 = vmatmul.msk.bf16.gmra.mxu0 %vm5022_vm0, %v5008_v18  ;;  %v4180_v60 = vpop.f32.mrf.mxu0  ;;  %v4360_v49 = vpop.f32.mrf.mxu2 }
 0x724   :  { %v4181_v52 = vadd.f32 %v10564_v40, %v4180_v60  ;;  %v4274_v18 = vpop.f32.mrf.mxu1  ;;  %v7534_v60 = vld [vmem:[%s11142_s7 + $0x38] sm:$0xff] }
 0x725   :  { %4658 = vrot.lane.b32.xlu2 %v4576_v44, %s7860_s19  ;;  %v7782_v44 = vld [vmem:[%s11135_s0 + $0x30] sm:$0xff]  ;;  %5560 = vmatpush.bf16.msra.mxu2 %v7534_v60 }
 0x726   :  { %v4270_v36 = vadd.f32 %v4269_v12, %v4181_v52 }
 0x728   :  { %v4439_v47 = vpop.f32.mrf.mxu3  ;;  %v4359_v51 = vadd.f32 %v4358_v32, %v4270_v36  ;;  %v7530_v36 = vld [vmem:[%s11142_s7 + $0x18] sm:$0xff] }
 0x729   :  { %v10700_v42 = vadd.f32 %v4439_v47, %v4351_v11 }
 0x72a   :  { %v4649_v35 = vpop.permute.xlu0 %4648 }
 0x72b   :  { %6304 = vst [vmem:[%s11143_s8 + $0x178] sm:$0xff] %v10700_v42  ;;  %v4731_v1 = vmul.f32 %v7595_v6, %v4649_v35  ;;  %v4182_v14 = vpop.f32.mrf.mxu0  ;;  %v4363_v16 = vpop.f32.mrf.mxu2 }
 0x72c   :  { %v4183_v9 = vadd.f32 %v10564_v40, %v4182_v14  ;;  %v4276_v47 = vpop.f32.mrf.mxu1  ;;  %v7532_v14 = vld [vmem:[%s11142_s7 + $0x28] sm:$0xff] }
 0x72d   :  { %4808 = vrot.lane.b32.xlu1 %v4731_v1, %s7861_s12 }
 0x72e   :  { %5325 = vmatmul.bf16.gmra.mxu1 %v7781_v5  ;;  %v4272_v56 = vadd.f32 %v4271_v10, %v4183_v9  ;;  %v7529_v9 = vld [vmem:[%s11142_s7 + $0x10] sm:$0xff] }
 0x730   :  { %v4442_v43 = vpop.f32.mrf.mxu3  ;;  %v4361_v25 = vadd.f32 %v4360_v49, %v4272_v56 }
 0x731   :  { %v10708_v38 = vadd.f32 %v4442_v43, %v4354_v54  ;;  %v7533_v43 = vld [vmem:[%s11142_s7 + $0x30] sm:$0xff] }
 0x732   :  { %v4651_v0 = vpop.permute.xlu0 %4650  ;;  %5561 = vmatpush.bf16.msra.mxu2 %v7533_v43 }
 0x733   :  { %6306 = vst [vmem:[%s11143_s8 + $0x188] sm:$0xff] %v10708_v38  ;;  %v4732_v17 = vmul.f32 %v7597_v34, %v4651_v0  ;;  %v4185_v13 = vpop.f32.mrf.mxu0  ;;  %v4365_v28 = vpop.f32.mrf.mxu2 }
 0x734   :  { %v4186_v26 = vadd.f32 %v10564_v40, %v4185_v13 }
 0x735   :  { %4810 = vrot.lane.b32.xlu1 %v4732_v17, %s7861_s12  ;;  %v4279_v17 = vpop.f32.mrf.mxu1 }
 0x736   :  { %v4275_v3 = vadd.f32 %v4274_v18, %v4186_v26  ;;  %5562 = vmatpush.bf16.msra.mxu2 %v7532_v14  ;;  %v4884_v26 = vadd.f32 %v10684_v22, %v10356_v58 }
 0x738   :  { %v4444_v61 = vpop.f32.mrf.mxu3  ;;  %v4364_v37 = vadd.f32 %v4363_v16, %v4275_v3  ;;  %v4479_v16 = vmul.f32 0.5, %v10588_v31 }
 0x739   :  { %v10719_v63 = vadd.f32 %v4444_v61, %v4356_v39  ;;  %v7531_v61 = vld [vmem:[%s11142_s7 + $0x20] sm:$0xff] }
 0x73a   :  { %5563 = vmatpush.bf16.msra.mxu2 %v7531_v61 }
 0x73b   :  { %6308 = vst [vmem:[%s11143_s8 + $0x198] sm:$0xff] %v10719_v63  ;;  %v4187_v7 = vpop.f32.mrf.mxu0  ;;  %v4368_v62 = vpop.f32.mrf.mxu2 }
 0x73c   :  { %v4188_v35 = vadd.f32 %v10564_v40, %v4187_v7  ;;  %v7527_v7 = vld [vmem:[%s11142_s7] sm:$0xff] }
 0x73d   :  { %4664 = vrot.lane.b32.xlu1 %v4579_v30, %s7860_s19 }
 0x73e   :  { %5330 = vmatmul.bf16.gmra.mxu1 %v7782_v44  ;;  %v4277_v54 = vadd.f32 %v4276_v47, %v4188_v35  ;;  %5564 = vmatpush.bf16.msra.mxu2 %v7530_v36  ;;  %v4480_v47 = vmul.f32 0.5, %v10605_v33  ;;  %v4477_v35 = vmul.f32 0.5, %v10551_v2 }
 0x740   :  { %v4447_v55 = vpop.f32.mrf.mxu3  ;;  %v4366_v12 = vadd.f32 %v4365_v28, %v4277_v54  ;;  %v4916_v28 = vpack.c.bf16 %v4884_v26, %v4884_v26  ;;  %v4530_v54 = vmul.f32 1.442695, %v4480_v47  ;;  %v4524_v43 = vmul.f32 1.442695, %v4477_v35 }
 0x741   :  { %v10730_v53 = vadd.f32 %v4447_v55, %v4359_v51  ;;  %v4281_v51 = vpop.f32.mrf.mxu1 }
 0x742   :  { %5565 = vmatpush.bf16.msra.mxu2 %v7529_v9  ;;  %v4980_v58 = vunpack.c.l.b16 %v4916_v28  ;;  %v10826_v9 = vld [vmem:[#allocation2 + $0x9] ss:$0 sm:$0xff] }
 0x743   :  { %6310 = vst [vmem:[%s11143_s8 + $0x1a8] sm:$0xff] %v10730_v53  ;;  %v4190_v8 = vpop.f32.mrf.mxu0  ;;  %v4370_v13 = vpop.f32.mrf.mxu2 }
 0x744   :  { %v4191_v32 = vadd.f32 %v10564_v40, %v4190_v8 }
 0x745   :  { %4666 = vrot.lane.b32.xlu1 %v4580_v4, %s7860_s19 }
 0x746   :  { %v4280_v5 = vadd.f32 %v4279_v17, %v4191_v32 }
 0x748   :  { %v4449_v59 = vpop.f32.mrf.mxu3  ;;  %v4369_v52 = vadd.f32 %v4368_v62, %v4280_v5  ;;  %v4478_v5 = vmul.f32 0.5, %v10567_v45 }
 0x749   :  { %v10744_v11 = vadd.f32 %v4449_v59, %v4361_v25  ;;  %v7528_v25 = vld [vmem:[%s11142_s7 + $0x8] sm:$0xff]  ;;  %v4528_v59 = vmul.f32 1.442695, %v4479_v16 }
 0x74a   :  { %5566 = vmatpush.bf16.msra.mxu2 %v7528_v25  ;;  %v4482_v25 = vmul.f32 0.5, %v10641_v48 }
 0x74b   :  { %6312 = vst [vmem:[%s11143_s8 + $0x1b8] sm:$0xff] %v10744_v11  ;;  %v4192_v39 = vpop.f32.mrf.mxu0  ;;  %7598 = vpow2.f32 %v4528_v59 }
 0x74c   :  { %v4193_v10 = vadd.f32 %v10564_v40, %v4192_v39  ;;  %v7784_v40 = vld [vmem:[%s11135_s0 + $0x40] sm:$0xff]  ;;  %7600 = vpow2.f32 %v4530_v54  ;;  %v4534_v26 = vmul.f32 1.442695, %v4482_v25 }
 0x74d   :  { %7602 = vpow2.f32 %v4524_v43 }
 0x74e   :  { %5335 = vmatmul.bf16.gmra.mxu1 %v7783_v15  ;;  %v4282_v55 = vadd.f32 %v4281_v51, %v4193_v10  ;;  %5567 = vmatpush.bf16.msra.mxu2 %v7527_v7  ;;  %v7785_v15 = vld [vmem:[%s11135_s0 + $0x48] sm:$0xff] }
 0x750   :  { %v4452_v6 = vpop.f32.mrf.mxu3  ;;  %v4371_v4 = vadd.f32 %v4370_v13, %v4282_v55 }
 0x751   :  { %v10751_v1 = vadd.f32 %v4452_v6, %v4364_v37 }
 0x753   :  { %6314 = vst [vmem:[%s11143_s8 + $0x1c8] sm:$0xff] %v10751_v1 }
 0x758   :  { %v4454_v34 = vpop.f32.mrf.mxu3 }
 0x759   :  { %v10767_v0 = vadd.f32 %v4454_v34, %v4366_v12  ;;  %v7599_v12 = vpop.eup %7598 }
 0x75a   :  { %v5301_v8 = vpop.f32.mrf.mxu1  ;;  %v7601_v36 = vpop.eup %7600 }
 0x75b   :  { %6316 = vst [vmem:[%s11143_s8 + $0x1d8] sm:$0xff] %v10767_v0 }
 0x75e   :  { %5340 = vmatmul.bf16.gmra.mxu1 %v7784_v40  ;;  %v7603_v40 = vpop.eup %7602 }
 0x760   :  { %v4457_v30 = vpop.f32.mrf.mxu3 }
 0x761   :  { %v10780_v49 = vadd.f32 %v4457_v30, %v4369_v52  ;;  %v4526_v30 = vmul.f32 1.442695, %v4478_v5 }
 0x762   :  { %v5303_v10 = vpop.f32.mrf.mxu1 }
 0x763   :  { %6318 = vst [vmem:[%s11143_s8 + $0x1e8] sm:$0xff] %v10780_v49 }
 0x767   :  { %v4801_v56 = vpop.permute.xlu2 %4800 }
 0x768   :  { %v4459_v18 = vpop.f32.mrf.mxu3  ;;  %v4887_v52 = vadd.f32 %v4801_v56, %v10419_v27 }
 0x769   :  { %v10796_v44 = vadd.f32 %v4459_v18, %v4371_v4 }
 0x76b   :  { %6320 = vst [vmem:[%s11143_s8 + $0x1f8] sm:$0xff] %v10796_v44 }
 0x76e   :  { %5345 = vmatmul.bf16.gmra.mxu1 %v7785_v15 }
 0x76f   :  { %v10810_v3 = vpop.permute.xlu2 %4802 }
 0x770   :  { %v4797_v37 = vpop.permute.xlu1 %4796 }
 0x771   :  { %v4885_v6 = vadd.f32 %v4797_v37, %v10377_v19  ;;  %v4481_v19 = vmul.f32 0.5, %v10625_v23  ;;  %v7786_v37 = vld [vmem:[%s11135_s0 + $0x50] sm:$0xff] }
 0x773   :  { %v4917_v60 = vpack.c.bf16 %v4885_v6, %v4885_v6  ;;  %v4532_v61 = vmul.f32 1.442695, %v4481_v19 }
 0x775   :  { %v4981_v22 = vunpack.c.l.b16 %v4917_v60  ;;  %7604 = vpow2.f32 %v4532_v61  ;;  %v4583_v60 = vld [vmem:[%s11136_s1 + $0xc8] sm:$0xff] }
 0x776   :  { %7606 = vpow2.f32 %v4526_v30 }
 0x777   :  { %v5009_v34 = vpack.c.b16 %v4981_v22, %v4980_v58  ;;  %v4657_v32 = vpop.permute.xlu2 %4656  ;;  %v4805_v17 = vpop.permute.xlu0 %4804  ;;  %7608 = vpow2.f32 %v4534_v26 }
 0x778   :  { %v4735_v62 = vmul.f32 %v7599_v12, %v4657_v32  ;;  %v4799_v14 = vpop.permute.xlu1 %4798 }
 0x779   :  { %7226 = vmatmul.msk.bf16.gmra.mxu0 %vm5022_vm0, %v5009_v34  ;;  %v4886_v39 = vadd.f32 %v4799_v14, %v10399_v29  ;;  %v4919_v29 = vpack.c.bf16 %v4887_v52, %v4887_v52  ;;  %v4889_v34 = vadd.f32 %v4805_v17, %v10463_v50  ;;  %v4888_v14 = vadd.f32 %v10810_v3, %v10438_v46 }
 0x77a   :  { %4816 = vrot.lane.b32.xlu0 %v4735_v62, %s7861_s12 }
 0x77b   :  { %v4918_v51 = vpack.c.bf16 %v4886_v39, %v4886_v39  ;;  %v4983_v7 = vunpack.c.l.b16 %v4919_v29  ;;  %v7605_v47 = vpop.eup %7604  ;;  %v4921_v39 = vpack.c.bf16 %v4889_v34, %v4889_v34 }
 0x77c   :  { %v7607_v54 = vpop.eup %7606 }
 0x77d   :  { %v4982_v27 = vunpack.c.l.b16 %v4918_v51  ;;  %v7609_v5 = vpop.eup %7608  ;;  %v4581_v51 = vld [vmem:[%s11136_s1 + $0xb8] sm:$0xff]  ;;  %v4985_v46 = vunpack.c.l.b16 %v4921_v39 }
 0x77e   :  { %5350 = vmatmul.bf16.gmra.mxu1 %v7786_v37 }
 0x77f   :  { %v4659_v13 = vpop.permute.xlu2 %4658  ;;  %v10824_v55 = vpop.permute.xlu0 %4806  ;;  %v5010_v28 = vpack.c.b16 %v4983_v7, %v4982_v27  ;;  %v4585_v27 = vld [vmem:[%s11136_s1 + $0xd8] sm:$0xff] }
 0x780   :  { %v4736_v4 = vmul.f32 %v7601_v36, %v4659_v13  ;;  %v4653_v18 = vpop.permute.xlu1 %4652  ;;  %v5212_v16 = vpop.f32.mrf.mxu0  ;;  %v4584_v36 = vld [vmem:[%s11136_s1 + $0xd0] sm:$0xff]  ;;  %v4920_v13 = vpack.c.bf16 %v4888_v14, %v4888_v14  ;;  %v4890_v37 = vadd.f32 %v10824_v55, %v10488_v24 }
 0x781   :  { %v4733_v59 = vmul.f32 %v7603_v40, %v4653_v18  ;;  %v5213_v56 = vadd.f32 %v10826_v9, %v5212_v16  ;;  %v7787_v18 = vld [vmem:[%s11135_s0 + $0x58] sm:$0xff] }
 0x782   :  { %4818 = vrot.lane.b32.xlu0 %v4736_v4, %s7861_s12  ;;  %v4984_v4 = vunpack.c.l.b16 %v4920_v13 }
 0x783   :  { %4812 = vrot.lane.b32.xlu2 %v4733_v59, %s7861_s12  ;;  %v5302_v6 = vadd.f32 %v5301_v8, %v5213_v56  ;;  %v5306_v8 = vpop.f32.mrf.mxu1  ;;  %v4582_v59 = vld [vmem:[%s11136_s1 + $0xc0] sm:$0xff] }
 0x784   :  { %v5011_v16 = vpack.c.b16 %v4985_v46, %v4984_v4 }
 0x785   :  { %v5413_v32 = vmul.f32 0.1, %v5302_v6  ;;  %vm5381_vm1 = vcmp.ge.f32.partialorder %v5302_v6, 0.0 }
 0x787   :  { %v4661_v35 = vpop.permute.xlu0 %4660  ;;  %v5445_v61 = vsel %vm5381_vm1, %v5302_v6, %v5413_v32 }
 0x788   :  { %v4655_v58 = vpop.permute.xlu1 %4654  ;;  %v4737_v22 = vmul.f32 %v7605_v47, %v4661_v35  ;;  %v5214_v43 = vpop.f32.mrf.mxu0 }
 0x789   :  { %v4734_v15 = vmul.f32 %v7607_v54, %v4655_v58  ;;  %v5215_v12 = vadd.f32 %v10826_v9, %v5214_v43  ;;  %7227 = vmatmul.msk.bf16.gmra.mxu0 %vm5022_vm0, %v5010_v28  ;;  %v4922_v54 = vpack.c.bf16 %v4890_v37, %v4890_v37 }
 0x78a   :  { %4672 = vrot.lane.b32.xlu0 %v4583_v60, %s7860_s19  ;;  %4820 = vrot.lane.b32.xlu1 %v4737_v22, %s7861_s12 }
 0x78b   :  { %v5304_v62 = vadd.f32 %v5303_v10, %v5215_v12  ;;  %4814 = vrot.lane.b32.xlu2 %v4734_v15, %s7861_s12  ;;  %v5308_v40 = vpop.f32.mrf.mxu1  ;;  %v4586_v15 = vld [vmem:[%s11136_s1 + $0xe0] sm:$0xff]  ;;  %v4483_v12 = vmul.f32 0.5, %v10665_v41  ;;  %v4986_v55 = vunpack.c.l.b16 %v4922_v54 }
 0x78d   :  { %vm5382_vm2 = vcmp.ge.f32.partialorder %v5304_v62, 0.0  ;;  %v5414_v19 = vmul.f32 0.1, %v5304_v62  ;;  %v4536_v32 = vmul.f32 1.442695, %v4483_v12 }
 0x78e   :  { %5355 = vmatmul.bf16.gmra.mxu1 %v7787_v18 }
 0x78f   :  { %v5446_v52 = vsel %vm5382_vm2, %v5304_v62, %v5414_v19  ;;  %v4663_v30 = vpop.permute.xlu0 %4662  ;;  %7610 = vpow2.f32 %v4536_v32 }
 0x790   :  { %v5477_v50 = vpack.c.bf16 %v5446_v52, %v5445_v61  ;;  %v4738_v17 = vmul.f32 %v7609_v5, %v4663_v30  ;;  %v5217_v10 = vpop.f32.mrf.mxu0  ;;  %v4484_v61 = vmul.f32 0.5, %v10682_v20  ;;  %v7789_v20 = vld [vmem:[%s11135_s0 + $0x68] sm:$0xff] }
 0x791   :  { %v5218_v3 = vadd.f32 %v10826_v9, %v5217_v10 }
 0x792   :  { %4674 = vrot.lane.b32.xlu0 %v4584_v36, %s7860_s19  ;;  %5568 = vmatmul.bf16.vlgmr.msra.gmra.mxu2 %v5477_v50  ;;  %v4538_v50 = vmul.f32 1.442695, %v4484_v61  ;;  %v4488_v61 = vmul.f32 0.5, %v10730_v53 }
 0x793   :  { %4668 = vrot.lane.b32.xlu2 %v4581_v51, %s7860_s19  ;;  %4822 = vrot.lane.b32.xlu1 %v4738_v17, %s7861_s12  ;;  %v5307_v25 = vadd.f32 %v5306_v8, %v5218_v3  ;;  %v5311_v28 = vpop.f32.mrf.mxu1 }
 0x794   :  { %7612 = vpow2.f32 %v4538_v50 }
 0x795   :  { %v5415_v26 = vmul.f32 0.1, %v5307_v25  ;;  %vm5383_vm3 = vcmp.ge.f32.partialorder %v5307_v25, 0.0  ;;  %v7611_v10 = vpop.eup %7610 }
 0x797   :  { %v5447_v35 = vsel %vm5383_vm3, %v5307_v25, %v5415_v26  ;;  %v4587_v25 = vld [vmem:[%s11136_s1 + $0xe8] sm:$0xff] }
 0x798   :  { %v5219_v29 = vpop.f32.mrf.mxu0 }
 0x799   :  { %v5220_v56 = vadd.f32 %v10826_v9, %v5219_v29  ;;  %7228 = vmatmul.msk.bf16.gmra.mxu0 %vm5022_vm0, %v5011_v16  ;;  %v7790_v29 = vld [vmem:[%s11135_s0 + $0x70] sm:$0xff] }
 0x79a   :  { %v7613_v4 = vpop.eup %7612 }
 0x79b   :  { %v5309_v7 = vadd.f32 %v5308_v40, %v5220_v56  ;;  %4670 = vrot.lane.b32.xlu2 %v4582_v59, %s7860_s19  ;;  %4676 = vrot.lane.b32.xlu1 %v4585_v27, %s7860_s19  ;;  %v5313_v39 = vpop.f32.mrf.mxu1  ;;  %v4588_v59 = vld [vmem:[%s11136_s1 + $0xf0] sm:$0xff] }
 0x79d   :  { %vm5384_vm4 = vcmp.ge.f32.partialorder %v5309_v7, 0.0  ;;  %v5416_v47 = vmul.f32 0.1, %v5309_v7 }
 0x79f   :  { %v4809_v6 = vpop.permute.xlu1 %4808  ;;  %v5448_v60 = vsel %vm5384_vm4, %v5309_v7, %v5416_v47  ;;  %v4485_v47 = vmul.f32 0.5, %v10700_v42 }
 0x7a0   :  { %v4891_v58 = vadd.f32 %v4809_v6, %v10510_v21  ;;  %v5222_v22 = vpop.f32.mrf.mxu0  ;;  %v5478_v43 = vpack.c.bf16 %v5448_v60, %v5447_v35  ;;  %v7788_v21 = vld [vmem:[%s11135_s0 + $0x60] sm:$0xff]  ;;  %v7791_v35 = vld [vmem:[%s11135_s0 + $0x78] sm:$0xff] }
 0x7a1   :  { %v5223_v24 = vadd.f32 %v10826_v9, %v5222_v22  ;;  %5360 = vmatmul.bf16.gmra.mxu1 %v7788_v21 }
 0x7a2   :  { %v4923_v8 = vpack.c.bf16 %v4891_v58, %v4891_v58  ;;  %5573 = vmatmul.bf16.gmra.mxu2 %v5478_v43  ;;  %v4540_v58 = vmul.f32 1.442695, %v4485_v47 }
 0x7a3   :  { %4678 = vrot.lane.b32.xlu1 %v4586_v15, %s7860_s19  ;;  %v5312_v14 = vadd.f32 %v5311_v28, %v5223_v24  ;;  %v5316_v27 = vpop.f32.mrf.mxu1 }
 0x7a4   :  { %v4987_v34 = vunpack.c.l.b16 %v4923_v8  ;;  %7614 = vpow2.f32 %v4540_v58  ;;  %v4490_v58 = vmul.f32 0.5, %v10751_v1 }
 0x7a5   :  { %v5417_v30 = vmul.f32 0.1, %v5312_v14  ;;  %vm5385_vm5 = vcmp.ge.f32.partialorder %v5312_v14, 0.0 }
 0x7a6   :  { %v5012_v62 = vpack.c.b16 %v4987_v34, %v4986_v55  ;;  %v4487_v34 = vmul.f32 0.5, %v10719_v63 }
 0x7a7   :  { %v4811_v19 = vpop.permute.xlu1 %4810  ;;  %v5449_v13 = vsel %vm5385_vm5, %v5312_v14, %v5417_v30 }
 0x7a8   :  { %v5224_v5 = vpop.f32.mrf.mxu0  ;;  %v4892_v56 = vadd.f32 %v4811_v19, %v10535_v57  ;;  %v4486_v57 = vmul.f32 0.5, %v10708_v38  ;;  %v4544_v19 = vmul.f32 1.442695, %v4487_v34 }
 0x7a9   :  { %v5225_v52 = vadd.f32 %v10826_v9, %v5224_v5  ;;  %7229 = vmatmul.msk.bf16.gmra.mxu0 %vm5022_vm0, %v5012_v62 }
 0x7aa   :  { %v4924_v7 = vpack.c.bf16 %v4892_v56, %v4892_v56  ;;  %v4542_v42 = vmul.f32 1.442695, %v4486_v57  ;;  %v7615_v12 = vpop.eup %7614  ;;  %v4491_v57 = vmul.f32 0.5, %v10767_v0 }
 0x7ab   :  { %v5314_v36 = vadd.f32 %v5313_v39, %v5225_v52  ;;  %v5318_v6 = vpop.f32.mrf.mxu1 }
 0x7ac   :  { %v4988_v60 = vunpack.c.l.b16 %v4924_v7  ;;  %7616 = vpow2.f32 %v4542_v42 }
 0x7ad   :  { %vm5386_vm6 = vcmp.ge.f32.partialorder %v5314_v36, 0.0  ;;  %v5418_v17 = vmul.f32 0.1, %v5314_v36  ;;  %7618 = vpow2.f32 %v4544_v19 }
 0x7af   :  { %v4665_v51 = vpop.permute.xlu1 %4664  ;;  %v5450_v46 = vsel %vm5386_vm6, %v5314_v36, %v5418_v17  ;;  %v4546_v36 = vmul.f32 1.442695, %v4488_v61 }
 0x7b0   :  { %v4739_v3 = vmul.f32 %v7611_v10, %v4665_v51  ;;  %v5479_v40 = vpack.c.bf16 %v5450_v46, %v5449_v13 }
 0x7b1   :  { %5365 = vmatmul.bf16.gmra.mxu1 %v7789_v20  ;;  %7620 = vpow2.f32 %v4546_v36 }
 0x7b2   :  { %5578 = vmatmul.bf16.gmra.mxu2 %v5479_v40  ;;  %4824 = vrot.lane.b32.xlu2 %v4739_v3, %s7861_s12  ;;  %v4589_v40 = vld [vmem:[%s11136_s1 + $0xf8] sm:$0xff] }
 0x7b3   :  { %v5321_v50 = vpop.f32.mrf.mxu1 }
 0x7b7   :  { %v4667_v18 = vpop.permute.xlu1 %4666 }
 0x7b8   :  { %v4740_v16 = vmul.f32 %v7613_v4, %v4667_v18 }
 0x7ba   :  { %4826 = vrot.lane.b32.xlu2 %v4740_v16, %s7861_s12 }
 0x7c1   :  { %5370 = vmatmul.bf16.gmra.mxu1 %v7790_v29 }
 0x7c2   :  { %4680 = vrot.lane.b32.xlu2 %v4587_v25, %s7860_s19 }
 0x7ca   :  { %4682 = vrot.lane.b32.xlu2 %v4588_v59, %s7860_s19 }
 0x7d1   :  { %5375 = vmatmul.bf16.gmra.mxu1 %v7791_v35 }
 0x7dd   :  { %v4813_v26 = vpop.permute.xlu2 %4812 }
 0x7de   :  { %v4893_v37 = vadd.f32 %v4813_v26, %v10551_v2 }
 0x7e0   :  { %v4925_v28 = vpack.c.bf16 %v4893_v37, %v4893_v37 }
 0x7e2   :  { %v4989_v54 = vunpack.c.l.b16 %v4925_v28 }
 0x7e4   :  { %v5013_v22 = vpack.c.b16 %v4989_v54, %v4988_v60  ;;  %v5323_v54 = vpop.f32.mrf.mxu1 }
 0x7e5   :  { %v4815_v43 = vpop.permute.xlu2 %4814 }
 0x7e6   :  { %7230 = vmatmul.msk.bf16.gmra.mxu0 %vm5022_vm0, %v5013_v22  ;;  %v4894_v2 = vadd.f32 %v4815_v43, %v10567_v45  ;;  %v7617_v45 = vpop.eup %7616  ;;  %v4550_v43 = vmul.f32 1.442695, %v4490_v58 }
 0x7e7   :  { %v7619_v17 = vpop.eup %7618 }
 0x7e8   :  { %v4926_v8 = vpack.c.bf16 %v4894_v2, %v4894_v2  ;;  %v7621_v26 = vpop.eup %7620 }
 0x7ea   :  { %v4990_v21 = vunpack.c.l.b16 %v4926_v8 }
 0x7ec   :  { %v4817_v15 = vpop.permute.xlu0 %4816 }
 0x7ed   :  { %v4669_v24 = vpop.permute.xlu2 %4668  ;;  %v4895_v55 = vadd.f32 %v4817_v15, %v10588_v31 }
 0x7ee   :  { %v4741_v32 = vmul.f32 %v7615_v12, %v4669_v24 }
 0x7ef   :  { %v4927_v62 = vpack.c.bf16 %v4895_v55, %v4895_v55 }
 0x7f0   :  { %4828 = vrot.lane.b32.xlu0 %v4741_v32, %s7861_s12 }
 0x7f1   :  { %v4991_v14 = vunpack.c.l.b16 %v4927_v62  ;;  %v4552_v62 = vmul.f32 1.442695, %v4491_v57 }
 0x7f3   :  { %v5014_v38 = vpack.c.b16 %v4991_v14, %v4990_v21 }
 0x7f4   :  { %v4819_v5 = vpop.permute.xlu0 %4818 }
 0x7f5   :  { %v4671_v39 = vpop.permute.xlu2 %4670  ;;  %v4896_v31 = vadd.f32 %v4819_v5, %v10605_v33  ;;  %v4489_v33 = vmul.f32 0.5, %v10744_v11 }
 0x7f6   :  { %v4742_v52 = vmul.f32 %v7617_v45, %v4671_v39  ;;  %v5227_v30 = vpop.f32.mrf.mxu0  ;;  %7231 = vmatmul.msk.bf16.gmra.mxu0 %vm5022_vm0, %v5014_v38  ;;  %v10934_v38 = vld [vmem:[#allocation2 + $0xa] ss:$0 sm:$0xff] }
 0x7f7   :  { %v5228_v63 = vadd.f32 %v10826_v9, %v5227_v30  ;;  %v4928_v13 = vpack.c.bf16 %v4896_v31, %v4896_v31  ;;  %v4548_v59 = vmul.f32 1.442695, %v4489_v33 }
 0x7f8   :  { %4830 = vrot.lane.b32.xlu0 %v4742_v52, %s7861_s12 }
 0x7f9   :  { %v5317_v46 = vadd.f32 %v5316_v27, %v5228_v63  ;;  %v4992_v16 = vunpack.c.l.b16 %v4928_v13  ;;  %7622 = vpow2.f32 %v4548_v59  ;;  %v4492_v63 = vmul.f32 0.5, %v10780_v49 }
 0x7fa   :  { %7624 = vpow2.f32 %v4550_v43 }
 0x7fb   :  { %v5419_v25 = vmul.f32 0.1, %v5317_v46  ;;  %vm5387_vm7 = vcmp.ge.f32.partialorder %v5317_v46, 0.0  ;;  %7626 = vpow2.f32 %v4552_v62  ;;  %v4554_v13 = vmul.f32 1.442695, %v4492_v63 }
 0x7fc   :  { %v4821_v10 = vpop.permute.xlu1 %4820  ;;  %v4673_v51 = vpop.permute.xlu0 %4672 }
 0x7fd   :  { %v4897_v3 = vadd.f32 %v4821_v10, %v10625_v23  ;;  %v4743_v53 = vmul.f32 %v7619_v17, %v4673_v51  ;;  %v5451_v47 = vsel %vm5387_vm7, %v5317_v46, %v5419_v25 }
 0x7fe   :  { %v5229_v20 = vpop.f32.mrf.mxu0 }
 0x7ff   :  { %v4929_v4 = vpack.c.bf16 %v4897_v3, %v4897_v3  ;;  %v5230_v18 = vadd.f32 %v10826_v9, %v5229_v20  ;;  %4832 = vrot.lane.b32.xlu1 %v4743_v53, %s7861_s12  ;;  %v7623_v42 = vpop.eup %7622 }
 0x800   :  { %4684 = vrot.lane.b32.xlu0 %v4589_v40, %s7860_s19  ;;  %v7625_v39 = vpop.eup %7624 }
 0x801   :  { %v4993_v29 = vunpack.c.l.b16 %v4929_v4  ;;  %v5319_v23 = vadd.f32 %v5318_v6, %v5230_v18  ;;  %v7627_v53 = vpop.eup %7626 }
 0x803   :  { %v5015_v27 = vpack.c.b16 %v4993_v29, %v4992_v16  ;;  %vm5388_vm8 = vcmp.ge.f32.partialorder %v5319_v23, 0.0  ;;  %v5420_v56 = vmul.f32 0.1, %v5319_v23 }
 0x804   :  { %v4675_v7 = vpop.permute.xlu0 %4674 }
 0x805   :  { %v4823_v37 = vpop.permute.xlu1 %4822  ;;  %v4744_v11 = vmul.f32 %v7621_v26, %v4675_v7  ;;  %v5452_v28 = vsel %vm5388_vm8, %v5319_v23, %v5420_v56 }
 0x806   :  { %v5232_v35 = vpop.f32.mrf.mxu0  ;;  %7232 = vmatmul.msk.bf16.gmra.mxu0 %vm5022_vm0, %v5015_v27  ;;  %v5480_v60 = vpack.c.bf16 %v5452_v28, %v5451_v47  ;;  %v4898_v6 = vadd.f32 %v4823_v37, %v10641_v48  ;;  %v5326_v48 = vpop.f32.mrf.mxu1 }
 0x807   :  { %4834 = vrot.lane.b32.xlu1 %v4744_v11, %s7861_s12  ;;  %v5233_v22 = vadd.f32 %v10826_v9, %v5232_v35 }
 0x808   :  { %5583 = vmatmul.bf16.gmra.mxu2 %v5480_v60  ;;  %v4930_v15 = vpack.c.bf16 %v4898_v6, %v4898_v6 }
 0x809   :  { %v5322_v12 = vadd.f32 %v5321_v50, %v5233_v22 }
 0x80a   :  { %v4994_v21 = vunpack.c.l.b16 %v4930_v15 }
 0x80b   :  { %v5421_v14 = vmul.f32 0.1, %v5322_v12  ;;  %vm5389_vm9 = vcmp.ge.f32.partialorder %v5322_v12, 0.0 }
 0x80c   :  { %v4825_v2 = vpop.permute.xlu2 %4824 }
 0x80d   :  { %v4899_v8 = vadd.f32 %v4825_v2, %v10665_v41  ;;  %v4677_v24 = vpop.permute.xlu1 %4676  ;;  %v5453_v30 = vsel %vm5389_vm9, %v5322_v12, %v5421_v14 }
 0x80e   :  { %v4745_v55 = vmul.f32 %v7623_v42, %v4677_v24  ;;  %v5234_v34 = vpop.f32.mrf.mxu0  ;;  %v5328_v3 = vpop.f32.mrf.mxu1 }
 0x80f   :  { %v4931_v1 = vpack.c.bf16 %v4899_v8, %v4899_v8  ;;  %v5235_v32 = vadd.f32 %v10826_v9, %v5234_v34 }
 0x810   :  { %4836 = vrot.lane.b32.xlu2 %v4745_v55, %s7861_s12 }
 0x811   :  { %v4995_v0 = vunpack.c.l.b16 %v4931_v1  ;;  %v5324_v19 = vadd.f32 %v5323_v54, %v5235_v32 }
 0x813   :  { %v5016_v5 = vpack.c.b16 %v4995_v0, %v4994_v21  ;;  %vm5390_vm10 = vcmp.ge.f32.partialorder %v5324_v19, 0.0  ;;  %v5422_v41 = vmul.f32 0.1, %v5324_v19 }
 0x814   :  { %v10936_v45 = vpop.permute.xlu2 %4826 }
 0x815   :  { %v4679_v61 = vpop.permute.xlu1 %4678  ;;  %v5569_v52 = vpop.f32.mrf.mxu2  ;;  %v5454_v31 = vsel %vm5390_vm10, %v5324_v19, %v5422_v41 }
 0x816   :  { %v4746_v36 = vmul.f32 %v7625_v39, %v4679_v61  ;;  %v5237_v50 = vpop.f32.mrf.mxu0  ;;  %7233 = vmatmul.msk.bf16.gmra.mxu0 %vm5022_vm0, %v5016_v5  ;;  %v5570_v17 = vadd.f32 %v10934_v38, %v5569_v52  ;;  %v5481_v10 = vpack.c.bf16 %v5454_v31, %v5453_v30  ;;  %v5331_v37 = vpop.f32.mrf.mxu1 }
 0x817   :  { %v5238_v46 = vadd.f32 %v10826_v9, %v5237_v50 }
 0x818   :  { %v7271_v51 = vmul.f32 -1.442695, %v5570_v17  ;;  %5588 = vmatmul.bf16.gmra.mxu2 %v5481_v10  ;;  %4838 = vrot.lane.b32.xlu0 %v4746_v36, %s7861_s12 }
 0x819   :  { %v5327_v33 = vadd.f32 %v5326_v48, %v5238_v46 }
 0x81a   :  { %7628 = vpow2.f32 %v7271_v51 }
 0x81b   :  { %7630 = vpow2.f32 %v4554_v13  ;;  %v5423_v27 = vmul.f32 0.1, %v5327_v33  ;;  %vm5391_vm11 = vcmp.ge.f32.partialorder %v5327_v33, 0.0 }
 0x81c   :  { %v4681_v40 = vpop.permute.xlu2 %4680 }
 0x81d   :  { %v4747_v20 = vmul.f32 %v7627_v53, %v4681_v40  ;;  %v5571_v49 = vpop.f32.mrf.mxu2  ;;  %v5455_v60 = vsel %vm5391_vm11, %v5327_v33, %v5423_v27 }
 0x81e   :  { %v5239_v4 = vpop.f32.mrf.mxu0  ;;  %v5572_v18 = vadd.f32 %v10934_v38, %v5571_v49  ;;  %v5333_v62 = vpop.f32.mrf.mxu1 }
 0x81f   :  { %v5240_v16 = vadd.f32 %v10826_v9, %v5239_v4  ;;  %4840 = vrot.lane.b32.xlu1 %v4747_v20, %s7861_s12 }
 0x820   :  { %v7629_v25 = vpop.eup %7628  ;;  %v7272_v29 = vmul.f32 -1.442695, %v5572_v18 }
 0x821   :  { %v5745_v23 = vadd.f32 1.0, %v7629_v25  ;;  %v5329_v59 = vadd.f32 %v5328_v3, %v5240_v16  ;;  %v7631_v56 = vpop.eup %7630 }
 0x822   :  { %7632 = vpow2.f32 %v7272_v29 }
 0x823   :  { %7634 = vrcp.f32 %v5745_v23  ;;  %vm5392_vm12 = vcmp.ge.f32.partialorder %v5329_v59, 0.0  ;;  %v5424_v26 = vmul.f32 0.1, %v5329_v59  ;;  %v5786_v12 = vand.u32 2147483647, %v5745_v23 }
 0x824   :  { %v4683_v7 = vpop.permute.xlu2 %4682  ;;  %v5788_v8 = vand.u32 2147483648, %v5745_v23  ;;  %vm5782_vm14 = vweird.f32 %v5745_v23 }
 0x825   :  { %v4748_v11 = vmul.f32 %v7631_v56, %v4683_v7  ;;  %v5574_v47 = vpop.f32.mrf.mxu2  ;;  %v5456_v54 = vsel %vm5392_vm12, %v5329_v59, %v5424_v26  ;;  %vm5787_vm15 = vcmp.eq.f32.partialorder %v5786_v12, 8.507059e+37 }
 0x826   :  { %v5242_v28 = vpop.f32.mrf.mxu0  ;;  %v5575_v35 = vadd.f32 %v10934_v38, %v5574_v47  ;;  %v5482_v58 = vpack.c.bf16 %v5456_v54, %v5455_v60  ;;  %v5789_v5 = vor.u32 1.1754944e-38, %v5788_v8 }
 0x827   :  { %4842 = vrot.lane.b32.xlu2 %v4748_v11, %s7861_s12  ;;  %v5243_v2 = vadd.f32 %v10826_v9, %v5242_v28 }
 0x828   :  { %v7633_v6 = vpop.eup %7632  ;;  %v7273_v22 = vmul.f32 -1.442695, %v5575_v35  ;;  %5593 = vmatmul.bf16.gmra.mxu2 %v5482_v58 }
 0x829   :  { %v7635_v43 = vpop.eup %7634  ;;  %v5746_v57 = vadd.f32 1.0, %v7633_v6  ;;  %v5332_v24 = vadd.f32 %v5331_v37, %v5243_v2 }
 0x82a   :  { %v5778_v42 = vmul.f32 %v7635_v43, %v5745_v23  ;;  %7636 = vpow2.f32 %v7273_v22  ;;  %vm5783_vm13 = vweird.f32 %v7635_v43 }
 0x82b   :  { %7638 = vrcp.f32 %v5746_v57  ;;  %vm5784_vm1 = vmor %vm5782_vm14, %vm5783_vm13  ;;  %v5425_v39 = vmul.f32 0.1, %v5332_v24  ;;  %vm5393_vm2 = vcmp.ge.f32.partialorder %v5332_v24, 0.0  ;;  %v5801_v50 = vand.u32 2147483647, %v5746_v57 }
 0x82c   :  { %v5779_v15 = vsub.f32 1.0, %v5778_v42  ;;  %v5803_v17 = vand.u32 2147483648, %v5746_v57  ;;  %vm5797_vm5 = vweird.f32 %v5746_v57 }
 0x82d   :  { %v5576_v55 = vpop.f32.mrf.mxu2  ;;  %v5457_v51 = vsel %vm5393_vm2, %v5332_v24, %v5425_v39  ;;  %vm5802_vm7 = vcmp.eq.f32.partialorder %v5801_v50, 8.507059e+37 }
 0x82e   :  { %v5780_v34 = vmul.f32 %v7635_v43, %v5779_v15  ;;  %v5244_v1 = vpop.f32.mrf.mxu0  ;;  %v5577_v32 = vadd.f32 %v10934_v38, %v5576_v55  ;;  %v5804_v4 = vor.u32 1.1754944e-38, %v5803_v17 }
 0x82f   :  { %v5245_v48 = vadd.f32 %v10826_v9, %v5244_v1 }
 0x830   :  { %v7637_v21 = vpop.eup %7636  ;;  %v5781_v14 = vadd.f32 %v7635_v43, %v5780_v34  ;;  %v7274_v0 = vmul.f32 -1.442695, %v5577_v32 }
 0x831   :  { %v7639_v19 = vpop.eup %7638  ;;  %v5747_v41 = vadd.f32 1.0, %v7637_v21  ;;  %v5334_v61 = vadd.f32 %v5333_v62, %v5245_v48 }
 0x832   :  { %v5785_v52 = vsel %vm5784_vm1, %v7635_v43, %v5781_v14  ;;  %v5793_v30 = vmul.f32 %v7639_v19, %v5746_v57  ;;  %7640 = vpow2.f32 %v7274_v0  ;;  %vm5798_vm4 = vweird.f32 %v7639_v19 }
 0x833   :  { %v5790_v31 = vsel %vm5787_vm15, %v5789_v5, %v5785_v52  ;;  %7642 = vrcp.f32 %v5747_v41  ;;  %vm5394_vm3 = vcmp.ge.f32.partialorder %v5334_v61, 0.0  ;;  %v5426_v36 = vmul.f32 0.1, %v5334_v61  ;;  %vm5799_vm6 = vmor %vm5797_vm5, %vm5798_vm4  ;;  %v5336_v52 = vpop.f32.mrf.mxu1 }
 0x834   :  { %6257 = vst [vmem:[%s11143_s8] sm:$0xff] %v5790_v31  ;;  %v5794_v63 = vsub.f32 1.0, %v5793_v30  ;;  %v5818_v59 = vand.u32 2147483648, %v5747_v41  ;;  %v5816_v26 = vand.u32 2147483647, %v5747_v41  ;;  %vm5812_vm9 = vweird.f32 %v5747_v41 }
 0x835   :  { %v5579_v10 = vpop.f32.mrf.mxu2  ;;  %v5458_v3 = vsel %vm5394_vm3, %v5334_v61, %v5426_v36 }
 0x836   :  { %v5795_v13 = vmul.f32 %v7639_v19, %v5794_v63  ;;  %v5580_v46 = vadd.f32 %v10934_v38, %v5579_v10  ;;  %v5483_v53 = vpack.c.bf16 %v5458_v3, %v5457_v51  ;;  %v5819_v35 = vor.u32 1.1754944e-38, %v5818_v59 }
 0x837   :  { %vm5817_vm11 = vcmp.eq.f32.partialorder %v5816_v26, 8.507059e+37 }
 0x838   :  { %v7641_v40 = vpop.eup %7640  ;;  %v5796_v20 = vadd.f32 %v7639_v19, %v5795_v13  ;;  %v7275_v49 = vmul.f32 -1.442695, %v5580_v46  ;;  %5598 = vmatmul.bf16.gmra.mxu2 %v5483_v53  ;;  %v7792_v13 = vld [vmem:[%s11143_s8 + $0x168] sm:$0xff] }
 0x839   :  { %v7643_v33 = vpop.eup %7642  ;;  %v5748_v18 = vadd.f32 1.0, %v7641_v40  ;;  %v4900_v46 = vadd.f32 %v7792_v13, %v10936_v45  ;;  %v7793_v40 = vld [vmem:[%s11143_s8 + $0x178] sm:$0xff] }
 0x83a   :  { %v5800_v16 = vsel %vm5799_vm6, %v7639_v19, %v5796_v20  ;;  %v5808_v25 = vmul.f32 %v7643_v33, %v5747_v41  ;;  %7644 = vpow2.f32 %v7275_v49  ;;  %vm5813_vm8 = vweird.f32 %v7643_v33 }
 0x83b   :  { %v5805_v29 = vsel %vm5802_vm7, %v5804_v4, %v5800_v16  ;;  %7646 = vrcp.f32 %v5748_v18  ;;  %vm5814_vm10 = vmor %vm5812_vm9, %vm5813_vm8  ;;  %v5833_v43 = vand.u32 2147483648, %v5748_v18  ;;  %v5831_v2 = vand.u32 2147483647, %v5748_v18  ;;  %v5338_v51 = vpop.f32.mrf.mxu1 }
 0x83c   :  { %6259 = vst [vmem:[%s11143_s8 + $0x10] sm:$0xff] %v5805_v29  ;;  %v5809_v23 = vsub.f32 1.0, %v5808_v25  ;;  %vm5827_vm13 = vweird.f32 %v5748_v18  ;;  %v4932_v53 = vpack.c.bf16 %v4900_v46, %v4900_v46 }
 0x83d   :  { %v5581_v27 = vpop.f32.mrf.mxu2  ;;  %v5834_v8 = vor.u32 1.1754944e-38, %v5833_v43  ;;  %vm5832_vm15 = vcmp.eq.f32.partialorder %v5831_v2, 8.507059e+37 }
 0x83e   :  { %v5810_v56 = vmul.f32 %v7643_v33, %v5809_v23  ;;  %v5582_v7 = vadd.f32 %v10934_v38, %v5581_v27  ;;  %v4996_v16 = vunpack.c.l.b16 %v4932_v53 }
 0x840   :  { %v7645_v37 = vpop.eup %7644  ;;  %v5811_v11 = vadd.f32 %v7643_v33, %v5810_v56  ;;  %v7276_v47 = vmul.f32 -1.442695, %v5582_v7 }
 0x841   :  { %v7647_v28 = vpop.eup %7646  ;;  %v5749_v60 = vadd.f32 1.0, %v7645_v37 }
 0x842   :  { %v5815_v54 = vsel %vm5814_vm10, %v7643_v33, %v5811_v11  ;;  %v5823_v58 = vmul.f32 %v7647_v28, %v5748_v18  ;;  %7648 = vpow2.f32 %v7276_v47  ;;  %vm5828_vm12 = vweird.f32 %v7647_v28 }
 0x843   :  { %v5820_v6 = vsel %vm5817_vm11, %v5819_v35, %v5815_v54  ;;  %7650 = vrcp.f32 %v5749_v60  ;;  %vm5829_vm14 = vmor %vm5827_vm13, %vm5828_vm12  ;;  %v5848_v62 = vand.u32 2147483648, %v5749_v60  ;;  %v5846_v21 = vand.u32 2147483647, %v5749_v60  ;;  %v5341_v23 = vpop.f32.mrf.mxu1  ;;  %v7795_v54 = vld [vmem:[%s11143_s8 + $0x198] sm:$0xff] }
 0x844   :  { %6261 = vst [vmem:[%s11143_s8 + $0x20] sm:$0xff] %v5820_v6  ;;  %v5824_v22 = vsub.f32 1.0, %v5823_v58  ;;  %vm5842_vm2 = vweird.f32 %v5749_v60  ;;  %v4493_v33 = vmul.f32 0.5, %v10796_v44  ;;  %v7794_v44 = vld [vmem:[%s11143_s8 + $0x188] sm:$0xff] }
 0x845   :  { %v5849_v19 = vor.u32 1.1754944e-38, %v5848_v62  ;;  %vm5847_vm4 = vcmp.eq.f32.partialorder %v5846_v21, 8.507059e+37 }
 0x846   :  { %v5825_v57 = vmul.f32 %v7647_v28, %v5824_v22  ;;  %v4556_v29 = vmul.f32 1.442695, %v4493_v33 }
 0x848   :  { %v7649_v42 = vpop.eup %7648  ;;  %v5826_v15 = vadd.f32 %v7647_v28, %v5825_v57 }
 0x849   :  { %v7651_v12 = vpop.eup %7650  ;;  %v5750_v24 = vadd.f32 1.0, %v7649_v42 }
 0x84a   :  { %v5830_v55 = vsel %vm5829_vm14, %v7647_v28, %v5826_v15  ;;  %v5838_v34 = vmul.f32 %v7651_v12, %v5749_v60  ;;  %vm5843_vm1 = vweird.f32 %v7651_v12 }
 0x84b   :  { %v5835_v1 = vsel %vm5832_vm15, %v5834_v8, %v5830_v55  ;;  %7652 = vrcp.f32 %v5750_v24  ;;  %vm5844_vm3 = vmor %vm5842_vm2, %vm5843_vm1  ;;  %v5863_v30 = vand.u32 2147483648, %v5750_v24  ;;  %v5861_v63 = vand.u32 2147483647, %v5750_v24  ;;  %v5343_v57 = vpop.f32.mrf.mxu1 }
 0x84c   :  { %6263 = vst [vmem:[%s11143_s8 + $0x30] sm:$0xff] %v5835_v1  ;;  %v5839_v32 = vsub.f32 1.0, %v5838_v34  ;;  %vm5857_vm6 = vweird.f32 %v5750_v24  ;;  %7654 = vpow2.f32 %v4556_v29 }
 0x84d   :  { %v5864_v50 = vor.u32 1.1754944e-38, %v5863_v30  ;;  %vm5862_vm8 = vcmp.eq.f32.partialorder %v5861_v63, 8.507059e+37 }
 0x84e   :  { %v5840_v48 = vmul.f32 %v7651_v12, %v5839_v32 }
 0x850   :  { %v5841_v14 = vadd.f32 %v7651_v12, %v5840_v48 }
 0x851   :  { %v7653_v0 = vpop.eup %7652 }
 0x852   :  { %v5845_v5 = vsel %vm5844_vm3, %v7651_v12, %v5841_v14  ;;  %v5853_v41 = vmul.f32 %v7653_v0, %v5750_v24  ;;  %vm5858_vm5 = vweird.f32 %v7653_v0  ;;  %v7655_v35 = vpop.eup %7654 }
 0x853   :  { %v5850_v39 = vsel %vm5847_vm4, %v5849_v19, %v5845_v5  ;;  %vm5859_vm7 = vmor %vm5857_vm6, %vm5858_vm5  ;;  %v5346_v14 = vpop.f32.mrf.mxu1 }
 0x854   :  { %6265 = vst [vmem:[%s11143_s8 + $0x40] sm:$0xff] %v5850_v39  ;;  %v5854_v61 = vsub.f32 1.0, %v5853_v41  ;;  %v7797_v39 = vld [vmem:[%s11143_s8 + $0x1b8] sm:$0xff] }
 0x856   :  { %v5855_v31 = vmul.f32 %v7653_v0, %v5854_v61 }
 0x858   :  { %v5856_v36 = vadd.f32 %v7653_v0, %v5855_v31 }
 0x85a   :  { %v5860_v17 = vsel %vm5859_vm7, %v7653_v0, %v5856_v36  ;;  %v7796_v0 = vld [vmem:[%s11143_s8 + $0x1a8] sm:$0xff] }
 0x85b   :  { %v5865_v10 = vsel %vm5862_vm8, %v5864_v50, %v5860_v17  ;;  %v5348_v13 = vpop.f32.mrf.mxu1 }
 0x85c   :  { %6267 = vst [vmem:[%s11143_s8 + $0x50] sm:$0xff] %v5865_v10 }
 0x862   :  { %v4829_v3 = vpop.permute.xlu0 %4828 }
 0x863   :  { %v4901_v20 = vadd.f32 %v7793_v40, %v4829_v3  ;;  %v5247_v49 = vpop.f32.mrf.mxu0 }
 0x864   :  { %v5248_v18 = vadd.f32 %v10826_v9, %v5247_v49 }
 0x865   :  { %v4933_v4 = vpack.c.bf16 %v4901_v20, %v4901_v20 }
 0x866   :  { %v5337_v27 = vadd.f32 %v5336_v52, %v5248_v18 }
 0x867   :  { %v4997_v25 = vunpack.c.l.b16 %v4933_v4 }
 0x868   :  { %v5427_v7 = vmul.f32 0.1, %v5337_v27  ;;  %vm5395_vm9 = vcmp.ge.f32.partialorder %v5337_v27, 0.0 }
 0x869   :  { %v5017_v59 = vpack.c.b16 %v4997_v25, %v4996_v16  ;;  %v7798_v16 = vld [vmem:[%s11143_s8 + $0x1c8] sm:$0xff] }
 0x86a   :  { %v4831_v45 = vpop.permute.xlu0 %4830  ;;  %v5459_v22 = vsel %vm5395_vm9, %v5337_v27, %v5427_v7  ;;  %v4837_v48 = vpop.permute.xlu2 %4836 }
 0x86b   :  { %v5249_v56 = vpop.f32.mrf.mxu0  ;;  %7234 = vmatmul.msk.bf16.gmra.mxu0 %vm5022_vm0, %v5017_v59  ;;  %v4902_v37 = vadd.f32 %v7794_v44, %v4831_v45  ;;  %v4905_v61 = vadd.f32 %v7797_v39, %v4837_v48  ;;  %v5351_v27 = vpop.f32.mrf.mxu1 }
 0x86c   :  { %v5250_v26 = vadd.f32 %v10826_v9, %v5249_v56 }
 0x86d   :  { %v4934_v60 = vpack.c.bf16 %v4902_v37, %v4902_v37  ;;  %v4937_v36 = vpack.c.bf16 %v4905_v61, %v4905_v61 }
 0x86e   :  { %v5339_v11 = vadd.f32 %v5338_v51, %v5250_v26 }
 0x86f   :  { %v4998_v8 = vunpack.c.l.b16 %v4934_v60  ;;  %v5001_v46 = vunpack.c.l.b16 %v4937_v36 }
 0x870   :  { %vm5396_vm10 = vcmp.ge.f32.partialorder %v5339_v11, 0.0  ;;  %v5428_v47 = vmul.f32 0.1, %v5339_v11 }
 0x871   :  { %v4833_v28 = vpop.permute.xlu1 %4832 }
 0x872   :  { %v4903_v58 = vadd.f32 %v7795_v54, %v4833_v28  ;;  %v4685_v6 = vpop.permute.xlu0 %4684  ;;  %v5460_v43 = vsel %vm5396_vm10, %v5339_v11, %v5428_v47 }
 0x873   :  { %v4749_v2 = vmul.f32 %v7655_v35, %v4685_v6  ;;  %v5252_v42 = vpop.f32.mrf.mxu0  ;;  %v5484_v15 = vpack.c.bf16 %v5460_v43, %v5459_v22  ;;  %v11009_v43 = vld [vmem:[#allocation2 + $0x9] ss:$0 sm:$0xff] }
 0x874   :  { %v4935_v12 = vpack.c.bf16 %v4903_v58, %v4903_v58  ;;  %v5253_v55 = vadd.f32 %v10826_v9, %v5252_v42  ;;  %v5353_v42 = vpop.f32.mrf.mxu1 }
 0x875   :  { %5603 = vmatmul.bf16.gmra.mxu2 %v5484_v15  ;;  %4844 = vrot.lane.b32.xlu0 %v4749_v2, %s7861_s12 }
 0x876   :  { %v4999_v24 = vunpack.c.l.b16 %v4935_v12  ;;  %v5342_v1 = vadd.f32 %v5341_v23, %v5253_v55 }
 0x878   :  { %v5018_v34 = vpack.c.b16 %v4999_v24, %v4998_v8  ;;  %v5429_v5 = vmul.f32 0.1, %v5342_v1  ;;  %vm5397_vm11 = vcmp.ge.f32.partialorder %v5342_v1, 0.0 }
 0x879   :  { %v4835_v32 = vpop.permute.xlu1 %4834 }
 0x87a   :  { %v4904_v19 = vadd.f32 %v7796_v0, %v4835_v32  ;;  %v5461_v31 = vsel %vm5397_vm11, %v5342_v1, %v5429_v5 }
 0x87b   :  { %v5254_v62 = vpop.f32.mrf.mxu0  ;;  %7235 = vmatmul.msk.bf16.gmra.mxu0 %vm5022_vm0, %v5018_v34 }
 0x87c   :  { %v5255_v21 = vadd.f32 %v10826_v9, %v5254_v62  ;;  %v4936_v30 = vpack.c.bf16 %v4904_v19, %v4904_v19 }
 0x87e   :  { %v5344_v41 = vadd.f32 %v5343_v57, %v5255_v21  ;;  %v5000_v10 = vunpack.c.l.b16 %v4936_v30 }
 0x880   :  { %vm5398_vm12 = vcmp.ge.f32.partialorder %v5344_v41, 0.0  ;;  %v5430_v52 = vmul.f32 0.1, %v5344_v41  ;;  %v5019_v3 = vpack.c.b16 %v5001_v46, %v5000_v10 }
 0x882   :  { %v5462_v63 = vsel %vm5398_vm12, %v5344_v41, %v5430_v52 }
 0x883   :  { %v5257_v50 = vpop.f32.mrf.mxu0  ;;  %v5485_v17 = vpack.c.bf16 %v5462_v63, %v5461_v31 }
 0x884   :  { %v5258_v51 = vadd.f32 %v10826_v9, %v5257_v50 }
 0x885   :  { %5608 = vmatmul.bf16.gmra.mxu2 %v5485_v17 }
 0x886   :  { %v5347_v53 = vadd.f32 %v5346_v14, %v5258_v51 }
 0x888   :  { %v5431_v18 = vmul.f32 0.1, %v5347_v53  ;;  %vm5399_vm13 = vcmp.ge.f32.partialorder %v5347_v53, 0.0 }
 0x88a   :  { %v4839_v40 = vpop.permute.xlu0 %4838  ;;  %v5463_v7 = vsel %vm5399_vm13, %v5347_v53, %v5431_v18 }
 0x88b   :  { %v5259_v20 = vpop.f32.mrf.mxu0  ;;  %7236 = vmatmul.msk.bf16.gmra.mxu0 %vm5022_vm0, %v5019_v3  ;;  %v5584_v49 = vpop.f32.mrf.mxu2  ;;  %v4906_v25 = vadd.f32 %v7798_v16, %v4839_v40 }
 0x88c   :  { %v5260_v33 = vadd.f32 %v10826_v9, %v5259_v20  ;;  %v5585_v4 = vadd.f32 %v10934_v38, %v5584_v49  ;;  %v7799_v9 = vld [vmem:[%s11143_s8 + $0x1d8] sm:$0xff] }
 0x88d   :  { %v4938_v56 = vpack.c.bf16 %v4906_v25, %v4906_v25 }
 0x88e   :  { %v7277_v29 = vmul.f32 -1.442695, %v5585_v4  ;;  %v5349_v23 = vadd.f32 %v5348_v13, %v5260_v33 }
 0x88f   :  { %v5002_v54 = vunpack.c.l.b16 %v4938_v56 }
 0x890   :  { %7656 = vpow2.f32 %v7277_v29  ;;  %vm5400_vm14 = vcmp.ge.f32.partialorder %v5349_v23, 0.0  ;;  %v5432_v59 = vmul.f32 0.1, %v5349_v23 }
 0x891   :  { %v4841_v45 = vpop.permute.xlu1 %4840 }
 0x892   :  { %v4907_v26 = vadd.f32 %v7799_v9, %v4841_v45  ;;  %v5464_v44 = vsel %vm5400_vm14, %v5349_v23, %v5432_v59 }
 0x893   :  { %v5262_v37 = vpop.f32.mrf.mxu0  ;;  %v5586_v11 = vpop.f32.mrf.mxu2  ;;  %v5486_v47 = vpack.c.bf16 %v5464_v44, %v5463_v7 }
 0x894   :  { %v4939_v28 = vpack.c.bf16 %v4907_v26, %v4907_v26  ;;  %v5587_v35 = vadd.f32 %v10934_v38, %v5586_v11  ;;  %v5263_v57 = vadd.f32 %v11009_v43, %v5262_v37 }
 0x895   :  { %5613 = vmatmul.bf16.gmra.mxu2 %v5486_v47 }
 0x896   :  { %v7657_v60 = vpop.eup %7656  ;;  %v5003_v58 = vunpack.c.l.b16 %v4939_v28  ;;  %v7278_v6 = vmul.f32 -1.442695, %v5587_v35  ;;  %v5352_v15 = vadd.f32 %v5351_v27, %v5263_v57 }
 0x897   :  { %v5751_v22 = vadd.f32 1.0, %v7657_v60 }
 0x898   :  { %v5020_v2 = vpack.c.b16 %v5003_v58, %v5002_v54  ;;  %7658 = vpow2.f32 %v7278_v6  ;;  %v5433_v21 = vmul.f32 0.1, %v5352_v15  ;;  %vm5401_vm15 = vcmp.ge.f32.partialorder %v5352_v15, 0.0 }
 0x899   :  { %7660 = vrcp.f32 %v5751_v22  ;;  %v5876_v5 = vand.u32 2147483647, %v5751_v22  ;;  %v5878_v41 = vand.u32 2147483648, %v5751_v22  ;;  %vm5872_vm3 = vweird.f32 %v5751_v22 }
 0x89a   :  { %v5465_v61 = vsel %vm5401_vm15, %v5352_v15, %v5433_v21 }
 0x89b   :  { %v5264_v12 = vpop.f32.mrf.mxu0  ;;  %7237 = vmatmul.msk.bf16.gmra.mxu0 %vm5022_vm0, %v5020_v2  ;;  %v5589_v8 = vpop.f32.mrf.mxu2  ;;  %v5879_v51 = vor.u32 1.1754944e-38, %v5878_v41  ;;  %vm5877_vm5 = vcmp.eq.f32.partialorder %v5876_v5, 8.507059e+37 }
 0x89c   :  { %v5265_v24 = vadd.f32 %v11009_v43, %v5264_v12  ;;  %v5590_v55 = vadd.f32 %v10934_v38, %v5589_v8 }
 0x89e   :  { %v7659_v34 = vpop.eup %7658  ;;  %v7279_v1 = vmul.f32 -1.442695, %v5590_v55  ;;  %v5354_v32 = vadd.f32 %v5353_v42, %v5265_v24 }
 0x89f   :  { %v7661_v62 = vpop.eup %7660  ;;  %v5752_v48 = vadd.f32 1.0, %v7659_v34 }
 0x8a0   :  { %v5868_v14 = vmul.f32 %v7661_v62, %v5751_v22  ;;  %7662 = vpow2.f32 %v7279_v1  ;;  %vm5402_vm1 = vcmp.ge.f32.partialorder %v5354_v32, 0.0  ;;  %v5434_v19 = vmul.f32 0.1, %v5354_v32 }
 0x8a1   :  { %7664 = vrcp.f32 %v5752_v48  ;;  %vm5873_vm2 = vweird.f32 %v7661_v62  ;;  %v5893_v20 = vand.u32 2147483648, %v5752_v48  ;;  %v5891_v33 = vand.u32 2147483647, %v5752_v48 }
 0x8a2   :  { %v5869_v0 = vsub.f32 1.0, %v5868_v14  ;;  %v5466_v31 = vsel %vm5402_vm1, %v5354_v32, %v5434_v19  ;;  %vm5874_vm4 = vmor %vm5872_vm3, %vm5873_vm2  ;;  %vm5887_vm7 = vweird.f32 %v5752_v48 }
 0x8a3   :  { %v5591_v39 = vpop.f32.mrf.mxu2  ;;  %v5487_v63 = vpack.c.bf16 %v5466_v31, %v5465_v61  ;;  %v5894_v23 = vor.u32 1.1754944e-38, %v5893_v20  ;;  %vm5892_vm9 = vcmp.eq.f32.partialorder %v5891_v33, 8.507059e+37 }
 0x8a4   :  { %v5870_v52 = vmul.f32 %v7661_v62, %v5869_v0  ;;  %v5592_v30 = vadd.f32 %v10934_v38, %v5591_v39 }
 0x8a5   :  { %5618 = vmatmul.bf16.gmra.mxu2 %v5487_v63 }
 0x8a6   :  { %v7663_v36 = vpop.eup %7662  ;;  %v5871_v50 = vadd.f32 %v7661_v62, %v5870_v52  ;;  %v7280_v17 = vmul.f32 -1.442695, %v5592_v30 }
 0x8a7   :  { %v7665_v10 = vpop.eup %7664  ;;  %v5753_v13 = vadd.f32 1.0, %v7663_v36 }
 0x8a8   :  { %v5875_v46 = vsel %vm5874_vm4, %v7661_v62, %v5871_v50  ;;  %v5883_v3 = vmul.f32 %v7665_v10, %v5752_v48  ;;  %7666 = vpow2.f32 %v7280_v17  ;;  %vm5888_vm6 = vweird.f32 %v7665_v10 }
 0x8a9   :  { %v5880_v53 = vsel %vm5877_vm5, %v5879_v51, %v5875_v46  ;;  %7668 = vrcp.f32 %v5753_v13  ;;  %vm5889_vm8 = vmor %vm5887_vm7, %vm5888_vm6  ;;  %v5908_v7 = vand.u32 2147483648, %v5753_v13  ;;  %v5906_v37 = vand.u32 2147483647, %v5753_v13 }
 0x8aa   :  { %6269 = vst [vmem:[%s11143_s8 + $0x60] sm:$0xff] %v5880_v53  ;;  %v5884_v40 = vsub.f32 1.0, %v5883_v3  ;;  %vm5902_vm11 = vweird.f32 %v5753_v13 }
 0x8ab   :  { %v5594_v4 = vpop.f32.mrf.mxu2  ;;  %v5909_v60 = vor.u32 1.1754944e-38, %v5908_v7  ;;  %vm5907_vm13 = vcmp.eq.f32.partialorder %v5906_v37, 8.507059e+37 }
 0x8ac   :  { %v5885_v49 = vmul.f32 %v7665_v10, %v5884_v40  ;;  %v5595_v18 = vadd.f32 %v10934_v38, %v5594_v4 }
 0x8ae   :  { %v7667_v16 = vpop.eup %7666  ;;  %v5886_v25 = vadd.f32 %v7665_v10, %v5885_v49  ;;  %v7281_v27 = vmul.f32 -1.442695, %v5595_v18 }
 0x8af   :  { %v7669_v29 = vpop.eup %7668  ;;  %v5754_v59 = vadd.f32 1.0, %v7667_v16 }
 0x8b0   :  { %v5890_v45 = vsel %vm5889_vm8, %v7665_v10, %v5886_v25  ;;  %v5898_v56 = vmul.f32 %v7669_v29, %v5753_v13  ;;  %vm5903_vm10 = vweird.f32 %v7669_v29 }
 0x8b1   :  { %v5895_v9 = vsel %vm5892_vm9, %v5894_v23, %v5890_v45  ;;  %7670 = vrcp.f32 %v5754_v59  ;;  %vm5904_vm12 = vmor %vm5902_vm11, %vm5903_vm10  ;;  %v5923_v15 = vand.u32 2147483648, %v5754_v59  ;;  %v5921_v8 = vand.u32 2147483647, %v5754_v59 }
 0x8b2   :  { %6271 = vst [vmem:[%s11143_s8 + $0x70] sm:$0xff] %v5895_v9  ;;  %v5899_v26 = vsub.f32 1.0, %v5898_v56  ;;  %7672 = vpow2.f32 %v7281_v27  ;;  %vm5917_vm15 = vweird.f32 %v5754_v59 }
 0x8b3   :  { %v5596_v11 = vpop.f32.mrf.mxu2  ;;  %v5924_v32 = vor.u32 1.1754944e-38, %v5923_v15  ;;  %vm5922_vm2 = vcmp.eq.f32.partialorder %v5921_v8, 8.507059e+37  ;;  %v7801_v15 = vld [vmem:[%s11143_s8 + $0x1e8] sm:$0xff] }
 0x8b4   :  { %v5900_v44 = vmul.f32 %v7669_v29, %v5899_v26  ;;  %v5597_v47 = vadd.f32 %v10934_v38, %v5596_v11  ;;  %v5356_v11 = vpop.f32.mrf.mxu1 }
 0x8b6   :  { %v5901_v28 = vadd.f32 %v7669_v29, %v5900_v44  ;;  %v7282_v54 = vmul.f32 -1.442695, %v5597_v47 }
 0x8b7   :  { %v7671_v35 = vpop.eup %7670 }
 0x8b8   :  { %v7673_v58 = vpop.eup %7672  ;;  %v5905_v6 = vsel %vm5904_vm12, %v7669_v29, %v5901_v28  ;;  %v5913_v22 = vmul.f32 %v7671_v35, %v5754_v59  ;;  %7674 = vpow2.f32 %v7282_v54  ;;  %vm5918_vm14 = vweird.f32 %v7671_v35 }
 0x8b9   :  { %v5910_v57 = vsel %vm5907_vm13, %v5909_v60, %v5905_v6  ;;  %v5755_v2 = vadd.f32 1.0, %v7673_v58  ;;  %vm5919_vm1 = vmor %vm5917_vm15, %vm5918_vm14 }
 0x8ba   :  { %6273 = vst [vmem:[%s11143_s8 + $0x80] sm:$0xff] %v5910_v57  ;;  %v5914_v42 = vsub.f32 1.0, %v5913_v22  ;;  %v4843_v22 = vpop.permute.xlu2 %4842 }
 0x8bb   :  { %7676 = vrcp.f32 %v5755_v2  ;;  %v5599_v24 = vpop.f32.mrf.mxu2  ;;  %v5938_v39 = vand.u32 2147483648, %v5755_v2  ;;  %v5936_v30 = vand.u32 2147483647, %v5755_v2  ;;  %vm5932_vm4 = vweird.f32 %v5755_v2 }
 0x8bc   :  { %v5915_v12 = vmul.f32 %v7671_v35, %v5914_v42  ;;  %v5600_v55 = vadd.f32 %v10934_v38, %v5599_v24  ;;  %v5358_v42 = vpop.f32.mrf.mxu1 }
 0x8bd   :  { %v5939_v10 = vor.u32 1.1754944e-38, %v5938_v39  ;;  %vm5937_vm6 = vcmp.eq.f32.partialorder %v5936_v30, 8.507059e+37 }
 0x8be   :  { %v5916_v34 = vadd.f32 %v7671_v35, %v5915_v12  ;;  %v7675_v1 = vpop.eup %7674  ;;  %v7283_v62 = vmul.f32 -1.442695, %v5600_v55  ;;  %v4908_v12 = vadd.f32 %v7801_v15, %v4843_v22  ;;  %v7802_v55 = vld [vmem:[%s11143_s8 + $0x1f8] sm:$0xff] }
 0x8bf   :  { %v5756_v21 = vadd.f32 1.0, %v7675_v1 }
 0x8c0   :  { %v5920_v48 = vsel %vm5919_vm1, %v7671_v35, %v5916_v34  ;;  %7678 = vpow2.f32 %v7283_v62  ;;  %v4940_v24 = vpack.c.bf16 %v4908_v12, %v4908_v12 }
 0x8c1   :  { %v7677_v14 = vpop.eup %7676  ;;  %v5925_v0 = vsel %vm5922_vm2, %v5924_v32, %v5920_v48  ;;  %7680 = vrcp.f32 %v5756_v21  ;;  %v5953_v53 = vand.u32 2147483648, %v5756_v21  ;;  %v5951_v20 = vand.u32 2147483647, %v5756_v21 }
 0x8c2   :  { %6275 = vst [vmem:[%s11143_s8 + $0x90] sm:$0xff] %v5925_v0  ;;  %v5928_v19 = vmul.f32 %v7677_v14, %v5755_v2  ;;  %vm5933_vm3 = vweird.f32 %v7677_v14  ;;  %vm5947_vm8 = vweird.f32 %v5756_v21  ;;  %v5004_v48 = vunpack.c.l.b16 %v4940_v24 }
 0x8c3   :  { %v5601_v41 = vpop.f32.mrf.mxu2  ;;  %vm5934_vm5 = vmor %vm5932_vm4, %vm5933_vm3  ;;  %v5954_v18 = vor.u32 1.1754944e-38, %v5953_v53  ;;  %vm5952_vm10 = vcmp.eq.f32.partialorder %v5951_v20, 8.507059e+37  ;;  %v11056_v20 = vld [vmem:[#allocation2 + $0xa] ss:$0 sm:$0xff] }
 0x8c4   :  { %v5929_v5 = vsub.f32 1.0, %v5928_v19  ;;  %v5602_v61 = vadd.f32 %v10934_v38, %v5601_v41 }
 0x8c6   :  { %v5930_v52 = vmul.f32 %v7677_v14, %v5929_v5  ;;  %v7679_v31 = vpop.eup %7678  ;;  %v7284_v63 = vmul.f32 -1.442695, %v5602_v61 }
 0x8c7   :  { %v7681_v36 = vpop.eup %7680  ;;  %v5757_v17 = vadd.f32 1.0, %v7679_v31 }
 0x8c8   :  { %v5931_v50 = vadd.f32 %v7677_v14, %v5930_v52  ;;  %v5943_v51 = vmul.f32 %v7681_v36, %v5756_v21  ;;  %7682 = vpow2.f32 %v7284_v63  ;;  %vm5948_vm7 = vweird.f32 %v7681_v36 }
 0x8c9   :  { %7684 = vrcp.f32 %v5757_v17  ;;  %vm5949_vm9 = vmor %vm5947_vm8, %vm5948_vm7  ;;  %v5968_v27 = vand.u32 2147483648, %v5757_v17  ;;  %v5966_v56 = vand.u32 2147483647, %v5757_v17  ;;  %vm5962_vm12 = vweird.f32 %v5757_v17 }
 0x8ca   :  { %v5935_v13 = vsel %vm5934_vm5, %v7677_v14, %v5931_v50  ;;  %v5944_v3 = vsub.f32 1.0, %v5943_v51  ;;  %v5361_v14 = vpop.f32.mrf.mxu1 }
 0x8cb   :  { %v5940_v46 = vsel %vm5937_vm6, %v5939_v10, %v5935_v13  ;;  %v5969_v7 = vor.u32 1.1754944e-38, %v5968_v27  ;;  %vm5967_vm14 = vcmp.eq.f32.partialorder %v5966_v56, 8.507059e+37 }
 0x8cc   :  { %6277 = vst [vmem:[%s11143_s8 + $0xa0] sm:$0xff] %v5940_v46  ;;  %v5945_v40 = vmul.f32 %v7681_v36, %v5944_v3 }
 0x8ce   :  { %v7683_v49 = vpop.eup %7682  ;;  %v5946_v33 = vadd.f32 %v7681_v36, %v5945_v40 }
 0x8cf   :  { %v7685_v4 = vpop.eup %7684  ;;  %v5758_v16 = vadd.f32 1.0, %v7683_v49 }
 0x8d0   :  { %v5950_v25 = vsel %vm5949_vm9, %v7681_v36, %v5946_v33  ;;  %v5958_v29 = vmul.f32 %v7685_v4, %v5757_v17  ;;  %vm5963_vm11 = vweird.f32 %v7685_v4 }
 0x8d1   :  { %v5955_v23 = vsel %vm5952_vm10, %v5954_v18, %v5950_v25  ;;  %7686 = vrcp.f32 %v5758_v16  ;;  %vm5964_vm13 = vmor %vm5962_vm12, %vm5963_vm11  ;;  %v5983_v35 = vand.u32 2147483648, %v5758_v16  ;;  %v5981_v54 = vand.u32 2147483647, %v5758_v16 }
 0x8d2   :  { %6279 = vst [vmem:[%s11143_s8 + $0xb0] sm:$0xff] %v5955_v23  ;;  %v5959_v59 = vsub.f32 1.0, %v5958_v29  ;;  %vm5977_vm1 = vweird.f32 %v5758_v16  ;;  %v5363_v63 = vpop.f32.mrf.mxu1 }
 0x8d3   :  { %v5984_v6 = vor.u32 1.1754944e-38, %v5983_v35  ;;  %vm5982_vm3 = vcmp.eq.f32.partialorder %v5981_v54, 8.507059e+37 }
 0x8d4   :  { %v5960_v45 = vmul.f32 %v7685_v4, %v5959_v59 }
 0x8d6   :  { %v5961_v9 = vadd.f32 %v7685_v4, %v5960_v45 }
 0x8d7   :  { %v7687_v26 = vpop.eup %7686 }
 0x8d8   :  { %v5965_v44 = vsel %vm5964_vm13, %v7685_v4, %v5961_v9  ;;  %v5973_v37 = vmul.f32 %v7687_v26, %v5758_v16  ;;  %vm5978_vm15 = vweird.f32 %v7687_v26 }
 0x8d9   :  { %v5970_v47 = vsel %vm5967_vm14, %v5969_v7, %v5965_v44  ;;  %vm5979_vm2 = vmor %vm5977_vm1, %vm5978_vm15 }
 0x8da   :  { %6281 = vst [vmem:[%s11143_s8 + $0xc0] sm:$0xff] %v5970_v47  ;;  %v5974_v28 = vsub.f32 1.0, %v5973_v37  ;;  %v5366_v33 = vpop.f32.mrf.mxu1 }
 0x8dc   :  { %v5975_v60 = vmul.f32 %v7687_v26, %v5974_v28 }
 0x8de   :  { %v5976_v58 = vadd.f32 %v7687_v26, %v5975_v60 }
 0x8e0   :  { %v5980_v57 = vsel %vm5979_vm2, %v7687_v26, %v5976_v58 }
 0x8e1   :  { %v5985_v2 = vsel %vm5982_vm3, %v5984_v6, %v5980_v57 }
 0x8e2   :  { %6283 = vst [vmem:[%s11143_s8 + $0xd0] sm:$0xff] %v5985_v2  ;;  %v5368_v44 = vpop.f32.mrf.mxu1 }
 0x8e7   :  { %v4845_v8 = vpop.permute.xlu0 %4844 }
 0x8e8   :  { %v4909_v34 = vadd.f32 %v7802_v55, %v4845_v8  ;;  %v5267_v1 = vpop.f32.mrf.mxu0 }
 0x8e9   :  { %v5268_v62 = vadd.f32 %v11009_v43, %v5267_v1 }
 0x8ea   :  { %v4941_v32 = vpack.c.bf16 %v4909_v34, %v4909_v34 }
 0x8eb   :  { %v5357_v19 = vadd.f32 %v5356_v11, %v5268_v62 }
 0x8ec   :  { %v5005_v21 = vunpack.c.l.b16 %v4941_v32 }
 0x8ed   :  { %v5435_v39 = vmul.f32 0.1, %v5357_v19  ;;  %vm5403_vm4 = vcmp.ge.f32.partialorder %v5357_v19, 0.0 }
 0x8ee   :  { %v5021_v0 = vpack.c.b16 %v5005_v21, %v5004_v48  ;;  %v5371_v48 = vpop.f32.mrf.mxu1 }
 0x8ef   :  { %v5467_v30 = vsel %vm5403_vm4, %v5357_v19, %v5435_v39 }
 0x8f0   :  { %v5269_v5 = vpop.f32.mrf.mxu0  ;;  %7238 = vmatmul.msk.bf16.gmra.mxu0 %vm5022_vm0, %v5021_v0 }
 0x8f1   :  { %v5270_v41 = vadd.f32 %v11009_v43, %v5269_v5 }
 0x8f3   :  { %v5359_v61 = vadd.f32 %v5358_v42, %v5270_v41 }
 0x8f5   :  { %vm5404_vm5 = vcmp.ge.f32.partialorder %v5359_v61, 0.0  ;;  %v5436_v52 = vmul.f32 0.1, %v5359_v61 }
 0x8f7   :  { %v5468_v31 = vsel %vm5404_vm5, %v5359_v61, %v5436_v52 }
 0x8f8   :  { %v5272_v36 = vpop.f32.mrf.mxu0  ;;  %v5604_v50 = vpop.f32.mrf.mxu2  ;;  %v5488_v17 = vpack.c.bf16 %v5468_v31, %v5467_v30 }
 0x8f9   :  { %v5605_v10 = vadd.f32 %v10934_v38, %v5604_v50  ;;  %v5273_v51 = vadd.f32 %v11009_v43, %v5272_v36 }
 0x8fa   :  { %5623 = vmatmul.bf16.gmra.mxu2 %v5488_v17 }
 0x8fb   :  { %v7285_v13 = vmul.f32 -1.442695, %v5605_v10  ;;  %v5362_v46 = vadd.f32 %v5361_v14, %v5273_v51 }
 0x8fd   :  { %7688 = vpow2.f32 %v7285_v13  ;;  %v5437_v18 = vmul.f32 0.1, %v5362_v46  ;;  %vm5405_vm0 = vcmp.ge.f32.partialorder %v5362_v46, 0.0 }
 0x8ff   :  { %v5469_v23 = vsel %vm5405_vm0, %v5362_v46, %v5437_v18 }
 0x900   :  { %v5274_v3 = vpop.f32.mrf.mxu0  ;;  %v5606_v53 = vpop.f32.mrf.mxu2 }
 0x901   :  { %v5275_v40 = vadd.f32 %v11009_v43, %v5274_v3  ;;  %v5607_v49 = vadd.f32 %v11056_v20, %v5606_v53 }
 0x903   :  { %v7689_v4 = vpop.eup %7688  ;;  %v7286_v16 = vmul.f32 -1.442695, %v5607_v49  ;;  %v5364_v25 = vadd.f32 %v5363_v63, %v5275_v40 }
 0x904   :  { %v5759_v38 = vadd.f32 1.0, %v7689_v4  ;;  %v5373_v4 = vpop.f32.mrf.mxu1 }
 0x905   :  { %7690 = vpow2.f32 %v7286_v16  ;;  %vm5406_vm6 = vcmp.ge.f32.partialorder %v5364_v25, 0.0  ;;  %v5438_v29 = vmul.f32 0.1, %v5364_v25 }
 0x906   :  { %7692 = vrcp.f32 %v5759_v38  ;;  %v5996_v60 = vand.u32 2147483647, %v5759_v38  ;;  %v5998_v54 = vand.u32 2147483648, %v5759_v38  ;;  %vm5992_vm8 = vweird.f32 %v5759_v38 }
 0x907   :  { %v5470_v59 = vsel %vm5406_vm6, %v5364_v25, %v5438_v29 }
 0x908   :  { %v5277_v27 = vpop.f32.mrf.mxu0  ;;  %v5609_v45 = vpop.f32.mrf.mxu2  ;;  %v5489_v56 = vpack.c.bf16 %v5470_v59, %v5469_v23  ;;  %v5999_v34 = vor.u32 1.1754944e-38, %v5998_v54  ;;  %vm5997_vm10 = vcmp.eq.f32.partialorder %v5996_v60, 8.507059e+37 }
 0x909   :  { %v5610_v9 = vadd.f32 %v11056_v20, %v5609_v45  ;;  %v5278_v28 = vadd.f32 %v11009_v43, %v5277_v27 }
 0x90a   :  { %5628 = vmatmul.bf16.gmra.mxu2 %v5489_v56 }
 0x90b   :  { %v7691_v26 = vpop.eup %7690  ;;  %v7287_v7 = vmul.f32 -1.442695, %v5610_v9  ;;  %v5367_v42 = vadd.f32 %v5366_v33, %v5278_v28 }
 0x90c   :  { %v7693_v37 = vpop.eup %7692  ;;  %v5760_v11 = vadd.f32 1.0, %v7691_v26 }
 0x90d   :  { %v5988_v47 = vmul.f32 %v7693_v37, %v5759_v38  ;;  %7694 = vpow2.f32 %v7287_v7  ;;  %vm5993_vm7 = vweird.f32 %v7693_v37  ;;  %v5439_v14 = vmul.f32 0.1, %v5367_v42 }
 0x90e   :  { %7696 = vrcp.f32 %v5760_v11  ;;  %vm5994_vm9 = vmor %vm5992_vm8, %vm5993_vm7  ;;  %vm5407_vm11 = vcmp.ge.f32.partialorder %v5367_v42, 0.0  ;;  %v6013_v5 = vand.u32 2147483648, %v5760_v11  ;;  %v6011_v52 = vand.u32 2147483647, %v5760_v11 }
 0x90f   :  { %v5989_v35 = vsub.f32 1.0, %v5988_v47  ;;  %v5471_v31 = vsel %vm5407_vm11, %v5367_v42, %v5439_v14  ;;  %vm6007_vm14 = vweird.f32 %v5760_v11 }
 0x910   :  { %v5279_v58 = vpop.f32.mrf.mxu0  ;;  %v5611_v6 = vpop.f32.mrf.mxu2  ;;  %v6014_v13 = vor.u32 1.1754944e-38, %v6013_v5  ;;  %vm6012_vm1 = vcmp.eq.f32.partialorder %v6011_v52, 8.507059e+37 }
 0x911   :  { %v5990_v22 = vmul.f32 %v7693_v37, %v5989_v35  ;;  %v5280_v57 = vadd.f32 %v11009_v43, %v5279_v58  ;;  %v5612_v2 = vadd.f32 %v11056_v20, %v5611_v6 }
 0x913   :  { %v7695_v15 = vpop.eup %7694  ;;  %v5991_v12 = vadd.f32 %v7693_v37, %v5990_v22  ;;  %v7288_v8 = vmul.f32 -1.442695, %v5612_v2  ;;  %v5369_v24 = vadd.f32 %v5368_v44, %v5280_v57 }
 0x914   :  { %v7697_v55 = vpop.eup %7696  ;;  %v5761_v1 = vadd.f32 1.0, %v7695_v15 }
 0x915   :  { %v5995_v32 = vsel %vm5994_vm9, %v7693_v37, %v5991_v12  ;;  %v6003_v62 = vmul.f32 %v7697_v55, %v5760_v11  ;;  %7698 = vpow2.f32 %v7288_v8  ;;  %vm5408_vm12 = vcmp.ge.f32.partialorder %v5369_v24, 0.0 }
 0x916   :  { %v6000_v21 = vsel %vm5997_vm10, %v5999_v34, %v5995_v32  ;;  %7700 = vrcp.f32 %v5761_v1  ;;  %v5440_v19 = vmul.f32 0.1, %v5369_v24  ;;  %vm6008_vm13 = vweird.f32 %v7697_v55 }
 0x917   :  { %6285 = vst [vmem:[%s11143_s8 + $0xe0] sm:$0xff] %v6000_v21  ;;  %v6004_v0 = vsub.f32 1.0, %v6003_v62  ;;  %vm6009_vm15 = vmor %vm6007_vm14, %vm6008_vm13  ;;  %v6026_v18 = vand.u32 2147483647, %v5761_v1  ;;  %v6028_v16 = vand.u32 2147483648, %v5761_v1  ;;  %vm6022_vm3 = vweird.f32 %v5761_v1 }
 0x918   :  { %v5282_v41 = vpop.f32.mrf.mxu0  ;;  %v5614_v39 = vpop.f32.mrf.mxu2  ;;  %v5472_v63 = vsel %vm5408_vm12, %v5369_v24, %v5440_v19 }
 0x919   :  { %v6005_v61 = vmul.f32 %v7697_v55, %v6004_v0  ;;  %v5615_v30 = vadd.f32 %v11056_v20, %v5614_v39  ;;  %v5490_v10 = vpack.c.bf16 %v5472_v63, %v5471_v31  ;;  %v5283_v3 = vadd.f32 %v11009_v43, %v5282_v41 }
 0x91a   :  { %vm6027_vm5 = vcmp.eq.f32.partialorder %v6026_v18, 8.507059e+37  ;;  %v6029_v44 = vor.u32 1.1754944e-38, %v6028_v16 }
 0x91b   :  { %v7699_v36 = vpop.eup %7698  ;;  %v6006_v50 = vadd.f32 %v7697_v55, %v6005_v61  ;;  %v7289_v17 = vmul.f32 -1.442695, %v5615_v30  ;;  %5633 = vmatmul.bf16.gmra.mxu2 %v5490_v10  ;;  %v5372_v25 = vadd.f32 %v5371_v48, %v5283_v3 }
 0x91c   :  { %v7701_v51 = vpop.eup %7700  ;;  %v5762_v46 = vadd.f32 1.0, %v7699_v36 }
 0x91d   :  { %v6010_v53 = vsel %vm6009_vm15, %v7697_v55, %v6006_v50  ;;  %v6018_v40 = vmul.f32 %v7701_v51, %v5761_v1  ;;  %7702 = vpow2.f32 %v7289_v17  ;;  %vm6023_vm2 = vweird.f32 %v7701_v51 }
 0x91e   :  { %v6015_v49 = vsel %vm6012_vm1, %v6014_v13, %v6010_v53  ;;  %7704 = vrcp.f32 %v5762_v46  ;;  %vm6024_vm4 = vmor %vm6022_vm3, %vm6023_vm2  ;;  %v5441_v28 = vmul.f32 0.1, %v5372_v25  ;;  %vm5409_vm0 = vcmp.ge.f32.partialorder %v5372_v25, 0.0 }
 0x91f   :  { %6287 = vst [vmem:[%s11143_s8 + $0xf0] sm:$0xff] %v6015_v49  ;;  %v6019_v33 = vsub.f32 1.0, %v6018_v40  ;;  %v6041_v58 = vand.u32 2147483647, %v5762_v46  ;;  %v6043_v6 = vand.u32 2147483648, %v5762_v46  ;;  %vm6037_vm8 = vweird.f32 %v5762_v46 }
 0x920   :  { %v5284_v38 = vpop.f32.mrf.mxu0  ;;  %v5616_v29 = vpop.f32.mrf.mxu2  ;;  %v5473_v57 = vsel %vm5409_vm0, %v5372_v25, %v5441_v28 }
 0x921   :  { %v6020_v23 = vmul.f32 %v7701_v51, %v6019_v33  ;;  %v5285_v59 = vadd.f32 %v11009_v43, %v5284_v38  ;;  %v5617_v27 = vadd.f32 %v11056_v20, %v5616_v29  ;;  %v6044_v34 = vor.u32 1.1754944e-38, %v6043_v6 }
 0x922   :  { %vm6042_vm10 = vcmp.eq.f32.partialorder %v6041_v58, 8.507059e+37  ;;  %v5376_v58 = vpop.f32.mrf.mxu1 }
 0x923   :  { %v7703_v45 = vpop.eup %7702  ;;  %v6021_v56 = vadd.f32 %v7701_v51, %v6020_v23  ;;  %v7290_v9 = vmul.f32 -1.442695, %v5617_v27  ;;  %v5374_v26 = vadd.f32 %v5373_v4, %v5285_v59 }
 0x924   :  { %v7705_v7 = vpop.eup %7704  ;;  %v5763_v37 = vadd.f32 1.0, %v7703_v45 }
 0x925   :  { %v6025_v11 = vsel %vm6024_vm4, %v7701_v51, %v6021_v56  ;;  %v6033_v47 = vmul.f32 %v7705_v7, %v5762_v46  ;;  %7706 = vpow2.f32 %v7290_v9  ;;  %vm5410_vm6 = vcmp.ge.f32.partialorder %v5374_v26, 0.0 }
 0x926   :  { %v6030_v35 = vsel %vm6027_vm5, %v6029_v44, %v6025_v11  ;;  %7708 = vrcp.f32 %v5763_v37  ;;  %v5442_v54 = vmul.f32 0.1, %v5374_v26  ;;  %vm6038_vm7 = vweird.f32 %v7705_v7 }
 0x927   :  { %6289 = vst [vmem:[%s11143_s8 + $0x100] sm:$0xff] %v6030_v35  ;;  %v6034_v60 = vsub.f32 1.0, %v6033_v47  ;;  %vm6039_vm9 = vmor %vm6037_vm8, %vm6038_vm7  ;;  %v6058_v0 = vand.u32 2147483648, %v5763_v37  ;;  %v6056_v5 = vand.u32 2147483647, %v5763_v37  ;;  %vm6052_vm12 = vweird.f32 %v5763_v37 }
 0x928   :  { %v5474_v2 = vsel %vm5410_vm6, %v5374_v26, %v5442_v54  ;;  %v5619_v42 = vpop.f32.mrf.mxu2 }
 0x929   :  { %v6035_v22 = vmul.f32 %v7705_v7, %v6034_v60  ;;  %v5491_v15 = vpack.c.bf16 %v5474_v2, %v5473_v57  ;;  %v5620_v24 = vadd.f32 %v11056_v20, %v5619_v42  ;;  %v6059_v30 = vor.u32 1.1754944e-38, %v6058_v0 }
 0x92a   :  { %vm6057_vm14 = vcmp.eq.f32.partialorder %v6056_v5, 8.507059e+37 }
 0x92b   :  { %v7707_v12 = vpop.eup %7706  ;;  %v6036_v8 = vadd.f32 %v7705_v7, %v6035_v22  ;;  %v7291_v48 = vmul.f32 -1.442695, %v5620_v24  ;;  %5638 = vmatmul.bf16.gmra.mxu2 %v5491_v15  ;;  %v5378_v15 = vpop.f32.mrf.mxu1 }
 0x92c   :  { %v7709_v55 = vpop.eup %7708  ;;  %v5764_v1 = vadd.f32 1.0, %v7707_v12 }
 0x92d   :  { %v6040_v32 = vsel %vm6039_vm9, %v7705_v7, %v6036_v8  ;;  %v6048_v62 = vmul.f32 %v7709_v55, %v5763_v37  ;;  %vm6053_vm11 = vweird.f32 %v7709_v55 }
 0x92e   :  { %v6045_v21 = vsel %vm6042_vm10, %v6044_v34, %v6040_v32  ;;  %7710 = vrcp.f32 %v5764_v1  ;;  %vm6054_vm13 = vmor %vm6052_vm12, %vm6053_vm11  ;;  %v6073_v13 = vand.u32 2147483648, %v5764_v1  ;;  %v6071_v3 = vand.u32 2147483647, %v5764_v1 }
 0x92f   :  { %6291 = vst [vmem:[%s11143_s8 + $0x110] sm:$0xff] %v6045_v21  ;;  %v6049_v14 = vsub.f32 1.0, %v6048_v62  ;;  %7712 = vpow2.f32 %v7291_v48  ;;  %vm6067_vm1 = vweird.f32 %v5764_v1 }
 0x930   :  { %v5621_v41 = vpop.f32.mrf.mxu2  ;;  %v6074_v40 = vor.u32 1.1754944e-38, %v6073_v13  ;;  %vm6072_vm3 = vcmp.eq.f32.partialorder %v6071_v3, 8.507059e+37 }
 0x931   :  { %v6050_v19 = vmul.f32 %v7709_v55, %v6049_v14  ;;  %v5622_v61 = vadd.f32 %v11056_v20, %v5621_v41 }
 0x933   :  { %v6051_v39 = vadd.f32 %v7709_v55, %v6050_v19  ;;  %v7292_v50 = vmul.f32 -1.442695, %v5622_v61 }
 0x934   :  { %v7711_v52 = vpop.eup %7710 }
 0x935   :  { %v7713_v31 = vpop.eup %7712  ;;  %v6055_v63 = vsel %vm6054_vm13, %v7709_v55, %v6051_v39  ;;  %v6063_v36 = vmul.f32 %v7711_v52, %v5764_v1  ;;  %7714 = vpow2.f32 %v7292_v50  ;;  %vm6068_vm15 = vweird.f32 %v7711_v52 }
 0x936   :  { %v6060_v17 = vsel %vm6057_vm14, %v6059_v30, %v6055_v63  ;;  %v5765_v10 = vadd.f32 1.0, %v7713_v31  ;;  %vm6069_vm2 = vmor %vm6067_vm1, %vm6068_vm15 }
 0x937   :  { %6293 = vst [vmem:[%s11143_s8 + $0x120] sm:$0xff] %v6060_v17  ;;  %v6064_v51 = vsub.f32 1.0, %v6063_v36 }
 0x938   :  { %7716 = vrcp.f32 %v5765_v10  ;;  %v6088_v29 = vand.u32 2147483648, %v5765_v10  ;;  %v6086_v59 = vand.u32 2147483647, %v5765_v10  ;;  %vm6082_vm5 = vweird.f32 %v5765_v10 }
 0x939   :  { %v6065_v46 = vmul.f32 %v7711_v52, %v6064_v51 }
 0x93a   :  { %v6089_v56 = vor.u32 1.1754944e-38, %v6088_v29  ;;  %vm6087_vm6 = vcmp.eq.f32.partialorder %v6086_v59, 8.507059e+37 }
 0x93b   :  { %v6066_v53 = vadd.f32 %v7711_v52, %v6065_v46  ;;  %v7715_v49 = vpop.eup %7714 }
 0x93c   :  { %v5766_v16 = vadd.f32 1.0, %v7715_v49 }
 0x93d   :  { %v6070_v33 = vsel %vm6069_vm2, %v7711_v52, %v6066_v53 }
 0x93e   :  { %v7717_v4 = vpop.eup %7716  ;;  %v6075_v18 = vsel %vm6072_vm3, %v6074_v40, %v6070_v33  ;;  %7718 = vrcp.f32 %v5766_v16  ;;  %v6103_v37 = vand.u32 2147483648, %v5766_v16  ;;  %v6101_v47 = vand.u32 2147483647, %v5766_v16 }
 0x93f   :  { %6295 = vst [vmem:[%s11143_s8 + $0x130] sm:$0xff] %v6075_v18  ;;  %v6078_v25 = vmul.f32 %v7717_v4, %v5765_v10  ;;  %vm6083_vm4 = vweird.f32 %v7717_v4  ;;  %vm6097_vm8 = vweird.f32 %v5766_v16 }
 0x940   :  { %vm6084_vm0 = vmor %vm6082_vm5, %vm6083_vm4  ;;  %v6104_v35 = vor.u32 1.1754944e-38, %v6103_v37  ;;  %vm6102_vm10 = vcmp.eq.f32.partialorder %v6101_v47, 8.507059e+37 }
 0x941   :  { %v6079_v38 = vsub.f32 1.0, %v6078_v25 }
 0x943   :  { %v6080_v23 = vmul.f32 %v7717_v4, %v6079_v38 }
 0x944   :  { %v7719_v45 = vpop.eup %7718 }
 0x945   :  { %v6081_v27 = vadd.f32 %v7717_v4, %v6080_v23  ;;  %v6093_v26 = vmul.f32 %v7719_v45, %v5766_v16  ;;  %vm6098_vm7 = vweird.f32 %v7719_v45 }
 0x946   :  { %vm6099_vm9 = vmor %vm6097_vm8, %vm6098_vm7 }
 0x947   :  { %v6085_v9 = vsel %vm6084_vm0, %v7717_v4, %v6081_v27  ;;  %v6094_v44 = vsub.f32 1.0, %v6093_v26 }
 0x948   :  { %v6090_v7 = vsel %vm6087_vm6, %v6089_v56, %v6085_v9 }
 0x949   :  { %6297 = vst [vmem:[%s11143_s8 + $0x140] sm:$0xff] %v6090_v7  ;;  %v6095_v11 = vmul.f32 %v7719_v45, %v6094_v44 }
 0x94b   :  { %v6096_v28 = vadd.f32 %v7719_v45, %v6095_v11 }
 0x94d   :  { %v6100_v60 = vsel %vm6099_vm9, %v7719_v45, %v6096_v28 }
 0x94e   :  { %v6105_v54 = vsel %vm6102_vm10, %v6104_v35, %v6100_v60 }
 0x94f   :  { %6299 = vst [vmem:[%s11143_s8 + $0x150] sm:$0xff] %v6105_v54 }
 0x96d   :  { %v5287_v6 = vpop.f32.mrf.mxu0 }
 0x96e   :  { %v5288_v22 = vadd.f32 %v11009_v43, %v5287_v6 }
 0x970   :  { %v5377_v57 = vadd.f32 %v5376_v58, %v5288_v22 }
 0x972   :  { %v5443_v12 = vmul.f32 0.1, %v5377_v57  ;;  %vm5411_vm11 = vcmp.ge.f32.partialorder %v5377_v57, 0.0 }
 0x974   :  { %v5475_v55 = vsel %vm5411_vm11, %v5377_v57, %v5443_v12 }
 0x975   :  { %v5289_v2 = vpop.f32.mrf.mxu0 }
 0x976   :  { %v5290_v42 = vadd.f32 %v11009_v43, %v5289_v2 }
 0x978   :  { %v5379_v8 = vadd.f32 %v5378_v15, %v5290_v42 }
 0x97a   :  { %vm5412_vm12 = vcmp.ge.f32.partialorder %v5379_v8, 0.0  ;;  %v5444_v24 = vmul.f32 0.1, %v5379_v8 }
 0x97c   :  { %v5476_v34 = vsel %vm5412_vm12, %v5379_v8, %v5444_v24 }
 0x97d   :  { %v5624_v1 = vpop.f32.mrf.mxu2  ;;  %v5492_v32 = vpack.c.bf16 %v5476_v34, %v5475_v55 }
 0x97e   :  { %v5625_v62 = vadd.f32 %v11056_v20, %v5624_v1 }
 0x97f   :  { %5643 = vmatmul.bf16.gmra.mxu2 %v5492_v32 }
 0x980   :  { %v7293_v48 = vmul.f32 -1.442695, %v5625_v62 }
 0x982   :  { %7720 = vpow2.f32 %v7293_v48 }
 0x985   :  { %v5626_v21 = vpop.f32.mrf.mxu2 }
 0x986   :  { %v5627_v14 = vadd.f32 %v11056_v20, %v5626_v21 }
 0x988   :  { %v7721_v0 = vpop.eup %7720  ;;  %v7294_v43 = vmul.f32 -1.442695, %v5627_v14 }
 0x989   :  { %v5767_v19 = vadd.f32 1.0, %v7721_v0 }
 0x98a   :  { %7722 = vpow2.f32 %v7294_v43 }
 0x98b   :  { %7724 = vrcp.f32 %v5767_v19  ;;  %v6118_v36 = vand.u32 2147483648, %v5767_v19  ;;  %v6116_v10 = vand.u32 2147483647, %v5767_v19  ;;  %vm6112_vm14 = vweird.f32 %v5767_v19 }
 0x98d   :  { %v5629_v5 = vpop.f32.mrf.mxu2  ;;  %v6119_v40 = vor.u32 1.1754944e-38, %v6118_v36  ;;  %vm6117_vm1 = vcmp.eq.f32.partialorder %v6116_v10, 8.507059e+37 }
 0x98e   :  { %v5630_v41 = vadd.f32 %v11056_v20, %v5629_v5 }
 0x990   :  { %v7723_v39 = vpop.eup %7722  ;;  %v7295_v61 = vmul.f32 -1.442695, %v5630_v41 }
 0x991   :  { %v7725_v52 = vpop.eup %7724  ;;  %v5768_v30 = vadd.f32 1.0, %v7723_v39 }
 0x992   :  { %v6108_v31 = vmul.f32 %v7725_v52, %v5767_v19  ;;  %7726 = vpow2.f32 %v7295_v61  ;;  %vm6113_vm13 = vweird.f32 %v7725_v52 }
 0x993   :  { %7728 = vrcp.f32 %v5768_v30  ;;  %vm6114_vm15 = vmor %vm6112_vm14, %vm6113_vm13  ;;  %v6133_v25 = vand.u32 2147483648, %v5768_v30  ;;  %v6131_v29 = vand.u32 2147483647, %v5768_v30  ;;  %vm6127_vm3 = vweird.f32 %v5768_v30 }
 0x994   :  { %v6109_v63 = vsub.f32 1.0, %v6108_v31 }
 0x995   :  { %v5631_v50 = vpop.f32.mrf.mxu2  ;;  %v6134_v56 = vor.u32 1.1754944e-38, %v6133_v25  ;;  %vm6132_vm5 = vcmp.eq.f32.partialorder %v6131_v29, 8.507059e+37 }
 0x996   :  { %v6110_v17 = vmul.f32 %v7725_v52, %v6109_v63  ;;  %v5632_v51 = vadd.f32 %v11056_v20, %v5631_v50 }
 0x998   :  { %v7727_v13 = vpop.eup %7726  ;;  %v6111_v46 = vadd.f32 %v7725_v52, %v6110_v17  ;;  %v7296_v3 = vmul.f32 -1.442695, %v5632_v51 }
 0x999   :  { %v7729_v53 = vpop.eup %7728  ;;  %v5769_v49 = vadd.f32 1.0, %v7727_v13 }
 0x99a   :  { %v6115_v33 = vsel %vm6114_vm15, %v7725_v52, %v6111_v46  ;;  %v6123_v4 = vmul.f32 %v7729_v53, %v5768_v30  ;;  %7730 = vpow2.f32 %v7296_v3  ;;  %vm6128_vm2 = vweird.f32 %v7729_v53 }
 0x99b   :  { %v6120_v18 = vsel %vm6117_vm1, %v6119_v40, %v6115_v33  ;;  %7732 = vrcp.f32 %v5769_v49  ;;  %vm6129_vm4 = vmor %vm6127_vm3, %vm6128_vm2  ;;  %v6148_v28 = vand.u32 2147483648, %v5769_v49  ;;  %v6146_v60 = vand.u32 2147483647, %v5769_v49 }
 0x99c   :  { %6301 = vst [vmem:[%s11143_s8 + $0x160] sm:$0xff] %v6120_v18  ;;  %v6124_v16 = vsub.f32 1.0, %v6123_v4  ;;  %vm6142_vm6 = vweird.f32 %v5769_v49 }
 0x99d   :  { %v6149_v22 = vor.u32 1.1754944e-38, %v6148_v28  ;;  %vm6147_vm8 = vcmp.eq.f32.partialorder %v6146_v60, 8.507059e+37 }
 0x99e   :  { %v6125_v38 = vmul.f32 %v7729_v53, %v6124_v16  ;;  %v5634_v27 = vpop.f32.mrf.mxu2 }
 0x99f   :  { %v5635_v26 = vadd.f32 %v11056_v20, %v5634_v27 }
 0x9a0   :  { %v7731_v23 = vpop.eup %7730  ;;  %v6126_v59 = vadd.f32 %v7729_v53, %v6125_v38 }
 0x9a1   :  { %v7733_v45 = vpop.eup %7732  ;;  %v5770_v9 = vadd.f32 1.0, %v7731_v23  ;;  %v7297_v47 = vmul.f32 -1.442695, %v5635_v26 }
 0x9a2   :  { %v6130_v7 = vsel %vm6129_vm4, %v7729_v53, %v6126_v59  ;;  %v6138_v44 = vmul.f32 %v7733_v45, %v5769_v49  ;;  %vm6143_vm0 = vweird.f32 %v7733_v45 }
 0x9a3   :  { %v6135_v37 = vsel %vm6132_vm5, %v6134_v56, %v6130_v7  ;;  %7734 = vrcp.f32 %v5770_v9  ;;  %vm6144_vm7 = vmor %vm6142_vm6, %vm6143_vm0  ;;  %v6163_v55 = vand.u32 2147483648, %v5770_v9  ;;  %v6161_v32 = vand.u32 2147483647, %v5770_v9 }
 0x9a4   :  { %6303 = vst [vmem:[%s11143_s8 + $0x170] sm:$0xff] %v6135_v37  ;;  %v6139_v11 = vsub.f32 1.0, %v6138_v44  ;;  %7736 = vpow2.f32 %v7297_v47  ;;  %vm6157_vm10 = vweird.f32 %v5770_v9 }
 0x9a5   :  { %v6164_v21 = vor.u32 1.1754944e-38, %v6163_v55  ;;  %vm6162_vm12 = vcmp.eq.f32.partialorder %v6161_v32, 8.507059e+37 }
 0x9a6   :  { %v6140_v35 = vmul.f32 %v7733_v45, %v6139_v11  ;;  %v5636_v58 = vpop.f32.mrf.mxu2 }
 0x9a7   :  { %v5637_v57 = vadd.f32 %v11056_v20, %v5636_v58 }
 0x9a8   :  { %v6141_v54 = vadd.f32 %v7733_v45, %v6140_v35 }
 0x9a9   :  { %v7735_v6 = vpop.eup %7734  ;;  %v7298_v12 = vmul.f32 -1.442695, %v5637_v57 }
 0x9aa   :  { %v6145_v2 = vsel %vm6144_vm7, %v7733_v45, %v6141_v54  ;;  %v6153_v42 = vmul.f32 %v7735_v6, %v5770_v9  ;;  %v7737_v8 = vpop.eup %7736  ;;  %vm6158_vm9 = vweird.f32 %v7735_v6 }
 0x9ab   :  { %v6150_v15 = vsel %vm6147_vm8, %v6149_v22, %v6145_v2  ;;  %v5771_v34 = vadd.f32 1.0, %v7737_v8  ;;  %7738 = vpow2.f32 %v7298_v12  ;;  %vm6159_vm11 = vmor %vm6157_vm10, %vm6158_vm9 }
 0x9ac   :  { %6305 = vst [vmem:[%s11143_s8 + $0x180] sm:$0xff] %v6150_v15  ;;  %v6154_v24 = vsub.f32 1.0, %v6153_v42 }
 0x9ad   :  { %7740 = vrcp.f32 %v5771_v34  ;;  %v6178_v31 = vand.u32 2147483648, %v5771_v34  ;;  %v6176_v50 = vand.u32 2147483647, %v5771_v34  ;;  %vm6172_vm14 = vweird.f32 %v5771_v34 }
 0x9ae   :  { %v6155_v1 = vmul.f32 %v7735_v6, %v6154_v24  ;;  %v5639_v48 = vpop.f32.mrf.mxu2 }
 0x9af   :  { %v5640_v14 = vadd.f32 %v11056_v20, %v5639_v48  ;;  %v6179_v3 = vor.u32 1.1754944e-38, %v6178_v31  ;;  %vm6177_vm1 = vcmp.eq.f32.partialorder %v6176_v50, 8.507059e+37 }
 0x9b0   :  { %v6156_v62 = vadd.f32 %v7735_v6, %v6155_v1 }
 0x9b1   :  { %v7739_v43 = vpop.eup %7738  ;;  %v7299_v5 = vmul.f32 -1.442695, %v5640_v14 }
 0x9b2   :  { %v6160_v0 = vsel %vm6159_vm11, %v7735_v6, %v6156_v62  ;;  %v5772_v41 = vadd.f32 1.0, %v7739_v43 }
 0x9b3   :  { %v6165_v19 = vsel %vm6162_vm12, %v6164_v21, %v6160_v0  ;;  %v7741_v39 = vpop.eup %7740  ;;  %7742 = vpow2.f32 %v7299_v5 }
 0x9b4   :  { %6307 = vst [vmem:[%s11143_s8 + $0x190] sm:$0xff] %v6165_v19  ;;  %v6168_v61 = vmul.f32 %v7741_v39, %v5771_v34  ;;  %7744 = vrcp.f32 %v5772_v41  ;;  %vm6173_vm13 = vweird.f32 %v7741_v39  ;;  %v6193_v4 = vand.u32 2147483648, %v5772_v41 }
 0x9b5   :  { %vm6174_vm15 = vmor %vm6172_vm14, %vm6173_vm13  ;;  %v6191_v16 = vand.u32 2147483647, %v5772_v41  ;;  %vm6187_vm3 = vweird.f32 %v5772_v41 }
 0x9b6   :  { %v6169_v52 = vsub.f32 1.0, %v6168_v61  ;;  %v5641_v30 = vpop.f32.mrf.mxu2  ;;  %v6194_v23 = vor.u32 1.1754944e-38, %v6193_v4 }
 0x9b7   :  { %v5642_v63 = vadd.f32 %v11056_v20, %v5641_v30  ;;  %vm6192_vm5 = vcmp.eq.f32.partialorder %v6191_v16, 8.507059e+37 }
 0x9b8   :  { %v6170_v36 = vmul.f32 %v7741_v39, %v6169_v52 }
 0x9b9   :  { %v7743_v17 = vpop.eup %7742  ;;  %v7300_v10 = vmul.f32 -1.442695, %v5642_v63 }
 0x9ba   :  { %v7745_v51 = vpop.eup %7744  ;;  %v6171_v13 = vadd.f32 %v7741_v39, %v6170_v36  ;;  %v5773_v46 = vadd.f32 1.0, %v7743_v17 }
 0x9bb   :  { %v6183_v53 = vmul.f32 %v7745_v51, %v5772_v41  ;;  %7746 = vpow2.f32 %v7300_v10  ;;  %vm6188_vm2 = vweird.f32 %v7745_v51 }
 0x9bc   :  { %v6175_v40 = vsel %vm6174_vm15, %v7741_v39, %v6171_v13  ;;  %7748 = vrcp.f32 %v5773_v46  ;;  %vm6189_vm4 = vmor %vm6187_vm3, %vm6188_vm2  ;;  %v6208_v26 = vand.u32 2147483648, %v5773_v46  ;;  %v6206_v44 = vand.u32 2147483647, %v5773_v46 }
 0x9bd   :  { %v6180_v49 = vsel %vm6177_vm1, %v6179_v3, %v6175_v40  ;;  %v6184_v33 = vsub.f32 1.0, %v6183_v53  ;;  %vm6202_vm6 = vweird.f32 %v5773_v46 }
 0x9be   :  { %6309 = vst [vmem:[%s11143_s8 + $0x1a0] sm:$0xff] %v6180_v49  ;;  %v6209_v47 = vor.u32 1.1754944e-38, %v6208_v26  ;;  %vm6207_vm8 = vcmp.eq.f32.partialorder %v6206_v44, 8.507059e+37 }
 0x9bf   :  { %v6185_v18 = vmul.f32 %v7745_v51, %v6184_v33 }
 0x9c1   :  { %v7747_v25 = vpop.eup %7746  ;;  %v6186_v38 = vadd.f32 %v7745_v51, %v6185_v18 }
 0x9c2   :  { %v7749_v29 = vpop.eup %7748  ;;  %v5774_v59 = vadd.f32 1.0, %v7747_v25 }
 0x9c3   :  { %v6190_v27 = vsel %vm6189_vm4, %v7745_v51, %v6186_v38  ;;  %v6198_v45 = vmul.f32 %v7749_v29, %v5773_v46  ;;  %vm6203_vm0 = vweird.f32 %v7749_v29 }
 0x9c4   :  { %v6195_v56 = vsel %vm6192_vm5, %v6194_v23, %v6190_v27  ;;  %7750 = vrcp.f32 %v5774_v59  ;;  %vm6204_vm7 = vmor %vm6202_vm6, %vm6203_vm0  ;;  %v6223_v58 = vand.u32 2147483648, %v5774_v59  ;;  %v6221_v22 = vand.u32 2147483647, %v5774_v59 }
 0x9c5   :  { %6311 = vst [vmem:[%s11143_s8 + $0x1b0] sm:$0xff] %v6195_v56  ;;  %v6199_v9 = vsub.f32 1.0, %v6198_v45  ;;  %vm6217_vm10 = vweird.f32 %v5774_v59 }
 0x9c6   :  { %v6224_v2 = vor.u32 1.1754944e-38, %v6223_v58  ;;  %vm6222_vm12 = vcmp.eq.f32.partialorder %v6221_v22, 8.507059e+37 }
 0x9c7   :  { %v6200_v7 = vmul.f32 %v7749_v29, %v6199_v9 }
 0x9c9   :  { %v6201_v37 = vadd.f32 %v7749_v29, %v6200_v7 }
 0x9ca   :  { %v7751_v11 = vpop.eup %7750 }
 0x9cb   :  { %v6205_v28 = vsel %vm6204_vm7, %v7749_v29, %v6201_v37  ;;  %v6213_v35 = vmul.f32 %v7751_v11, %v5774_v59  ;;  %vm6218_vm9 = vweird.f32 %v7751_v11 }
 0x9cc   :  { %v6210_v60 = vsel %vm6207_vm8, %v6209_v47, %v6205_v28  ;;  %vm6219_vm11 = vmor %vm6217_vm10, %vm6218_vm9 }
 0x9cd   :  { %6313 = vst [vmem:[%s11143_s8 + $0x1c0] sm:$0xff] %v6210_v60  ;;  %v6214_v54 = vsub.f32 1.0, %v6213_v35 }
 0x9cf   :  { %v6215_v6 = vmul.f32 %v7751_v11, %v6214_v54 }
 0x9d1   :  { %v6216_v57 = vadd.f32 %v7751_v11, %v6215_v6 }
 0x9d3   :  { %v6220_v42 = vsel %vm6219_vm11, %v7751_v11, %v6216_v57 }
 0x9d4   :  { %v6225_v15 = vsel %vm6222_vm12, %v6224_v2, %v6220_v42 }
 0x9d5   :  { %6315 = vst [vmem:[%s11143_s8 + $0x1d0] sm:$0xff] %v6225_v15 }
 0xa02   :  { %v5644_v12 = vpop.f32.mrf.mxu2 }
 0xa03   :  { %v5645_v8 = vadd.f32 %v11056_v20, %v5644_v12 }
 0xa05   :  { %v7301_v24 = vmul.f32 -1.442695, %v5645_v8 }
 0xa07   :  { %7752 = vpow2.f32 %v7301_v24 }
 0xa0a   :  { %v5646_v55 = vpop.f32.mrf.mxu2 }
 0xa0b   :  { %v5647_v34 = vadd.f32 %v11056_v20, %v5646_v55 }
 0xa0d   :  { %v7753_v1 = vpop.eup %7752  ;;  %v7302_v32 = vmul.f32 -1.442695, %v5647_v34 }
 0xa0e   :  { %v5775_v62 = vadd.f32 1.0, %v7753_v1 }
 0xa0f   :  { %7754 = vpow2.f32 %v7302_v32 }
 0xa10   :  { %7756 = vrcp.f32 %v5775_v62  ;;  %v6238_v19 = vand.u32 2147483648, %v5775_v62  ;;  %v6236_v41 = vand.u32 2147483647, %v5775_v62  ;;  %vm6232_vm14 = vweird.f32 %v5775_v62 }
 0xa12   :  { %v6239_v20 = vor.u32 1.1754944e-38, %v6238_v19  ;;  %vm6237_vm1 = vcmp.eq.f32.partialorder %v6236_v41, 8.507059e+37 }
 0xa15   :  { %v7755_v48 = vpop.eup %7754 }
 0xa16   :  { %v7757_v21 = vpop.eup %7756  ;;  %v5776_v14 = vadd.f32 1.0, %v7755_v48 }
 0xa17   :  { %v6228_v0 = vmul.f32 %v7757_v21, %v5775_v62  ;;  %vm6233_vm13 = vweird.f32 %v7757_v21 }
 0xa18   :  { %7758 = vrcp.f32 %v5776_v14  ;;  %vm6234_vm15 = vmor %vm6232_vm14, %vm6233_vm13  ;;  %v6253_v36 = vand.u32 2147483648, %v5776_v14  ;;  %v6251_v17 = vand.u32 2147483647, %v5776_v14  ;;  %vm6247_vm3 = vweird.f32 %v5776_v14 }
 0xa19   :  { %v6229_v43 = vsub.f32 1.0, %v6228_v0 }
 0xa1a   :  { %v6254_v51 = vor.u32 1.1754944e-38, %v6253_v36  ;;  %vm6252_vm5 = vcmp.eq.f32.partialorder %v6251_v17, 8.507059e+37 }
 0xa1b   :  { %v6230_v5 = vmul.f32 %v7757_v21, %v6229_v43 }
 0xa1d   :  { %v6231_v39 = vadd.f32 %v7757_v21, %v6230_v5 }
 0xa1e   :  { %v7759_v61 = vpop.eup %7758 }
 0xa1f   :  { %v6235_v52 = vsel %vm6234_vm15, %v7757_v21, %v6231_v39  ;;  %v6243_v30 = vmul.f32 %v7759_v61, %v5776_v14  ;;  %vm6248_vm2 = vweird.f32 %v7759_v61 }
 0xa20   :  { %v6240_v31 = vsel %vm6237_vm1, %v6239_v20, %v6235_v52  ;;  %vm6249_vm4 = vmor %vm6247_vm3, %vm6248_vm2 }
 0xa21   :  { %6317 = vst [vmem:[%s11143_s8 + $0x1e0] sm:$0xff] %v6240_v31  ;;  %v6244_v63 = vsub.f32 1.0, %v6243_v30 }
 0xa23   :  { %v6245_v50 = vmul.f32 %v7759_v61, %v6244_v63 }
 0xa25   :  { %v6246_v10 = vadd.f32 %v7759_v61, %v6245_v50 }
 0xa27   :  { %v6250_v13 = vsel %vm6249_vm4, %v7759_v61, %v6246_v10 }
 0xa28   :  { %v6255_v46 = vsel %vm6252_vm5, %v6254_v51, %v6250_v13 }
 0xa29   :  { %6319 = vst [vmem:[%s11143_s8 + $0x1f0] sm:$0xff] %v6255_v46 }
 0xa2a   :  { %6325 = vsyncpa [#allocation3], 1 }
 0xa2b   :  { %6326 = vsyncpa [#allocation5], 1 }

</bundles_post_ra>
